<compile_context>
chip_gen: v5e
topology: v5e:2x2
jax: 0.10.0
libtpu: 0.0.40
codegen_flags: <defaults>
</compile_context>

<pallas_src>
import functools
import math

import jax
import jax.numpy as jnp
from jax.experimental import pallas as pl
from jax.experimental.pallas import tpu as pltpu


OUT_PAD = 128  # final-fc output padded to a full 128-lane width inside the kernel


# ----------------------------- in-kernel helpers -----------------------------

def _layer_norm(x, g, b, eps=1e-5):
    mu = jnp.mean(x, axis=-1, keepdims=True)
    var = jnp.mean(jnp.square(x - mu), axis=-1, keepdims=True)
    return (x - mu) * jax.lax.rsqrt(var + eps) * g + b


def _softmax_last(x):
    m = jnp.max(x, axis=-1, keepdims=True)
    p = jnp.exp(x - m)
    return p / jnp.sum(p, axis=-1, keepdims=True)   # exact (review note)


def _mm(a16, b16):
    """bf16 x bf16 matmul with f32 accumulation on the MXU (operands pre-cast)."""
    return jnp.dot(a16, b16, preferred_element_type=jnp.float32)


def _qkt(q16, k16):
    """scores = q @ k.T via dot_general contraction (no explicit transpose)."""
    return jax.lax.dot_general(q16, k16, (((1,), (1,)), ((), ())),
                               preferred_element_type=jnp.float32)


def _dequant16(wq):
    """int8 -> bf16 weight dequant (two-step via f32: portable Mosaic path)."""
    return wq.astype(jnp.float32).astype(jnp.bfloat16)


def _unpack_vec(vec, d):
    """vec rows: [bqkv(3d)] [bo|b2|s2] [g1|be1] [g2|be2]."""
    bqkv = vec[0:1, :]
    bo, b2, s2 = vec[1:2, :d], vec[1:2, d:2 * d], vec[1:2, 2 * d:3 * d]
    g1, be1 = vec[2:3, :d], vec[2:3, d:2 * d]
    g2, be2 = vec[3:4, :d], vec[3:4, d:2 * d]
    return bqkv, bo, b2, s2, g1, be1, g2, be2


def _attn_ffn_tail(x, ctx16, wo16, w1q, w2q, b1, s1, bo, b2, s2, g1, be1, g2, be2):
    """Shared post-attention path: out-proj, add&norm, quantized FFN, add&norm."""
    attn = _mm(ctx16, wo16) + bo
    h = _layer_norm(x + attn, g1, be1)
    f = _mm(h.astype(jnp.bfloat16), _dequant16(w1q)) * s1 + b1
    f = jnp.maximum(f, 0.0)
    f = _mm(f.astype(jnp.bfloat16), _dequant16(w2q)) * s2 + b2
    return _layer_norm(h + f, g2, be2)


def _self_encoder(x, wqkv16, wo16, w1q, w2q, vec, b1, s1, *, nb, seq, scale):
    """nn.TransformerEncoderLayer (nhead=1, post-LN, relu, eval-mode dropout)."""
    d = x.shape[-1]
    bqkv, bo, b2, s2, g1, be1, g2, be2 = _unpack_vec(vec, d)
    x16 = x.astype(jnp.bfloat16)
    qkv = _mm(x16, wqkv16) + bqkv                       # (nb*seq, 3d) fused QKV
    qkv16 = qkv.astype(jnp.bfloat16)
    q = qkv16[:, :d].reshape(nb, seq, d)
    k = qkv16[:, d:2 * d].reshape(nb, seq, d)
    v = qkv16[:, 2 * d:].reshape(nb, seq, d)
    s = jnp.einsum('bqd,bkd->bqk', q, k,
                   preferred_element_type=jnp.float32) * scale
    p = _softmax_last(s)
    ctx = jnp.einsum('bqk,bkd->bqd', p.astype(jnp.bfloat16), v,
                     preferred_element_type=jnp.float32)
    ctx16 = ctx.reshape(nb * seq, d).astype(jnp.bfloat16)
    return _attn_ffn_tail(x, ctx16, wo16, w1q, w2q, b1, s1,
                          bo, b2, s2, g1, be1, g2, be2)


def _cross_encoder(x, x2, wqkv16, wo16, w1q, w2q, vec, b1, s1, *, scale, n_valid):
    """TE co-encoder: Q from x, K/V from x2 (zero-padded keys masked out)."""
    d = x.shape[-1]
    bqkv, bo, b2, s2, g1, be1, g2, be2 = _unpack_vec(vec, d)
    x16 = x.astype(jnp.bfloat16)
    x2_16 = x2.astype(jnp.bfloat16)
    q16 = (_mm(x16, wqkv16[:, :d]) + bqkv[:, :d]).astype(jnp.bfloat16)
    kv = _mm(x2_16, wqkv16[:, d:]) + bqkv[:, d:]
    kv16 = kv.astype(jnp.bfloat16)
    k16, v16 = kv16[:, :d], kv16[:, d:]
    s = _qkt(q16, k16) * scale
    col = jax.lax.broadcasted_iota(jnp.int32, s.shape, 1)
    s = jnp.where(col < n_valid, s, -1e30)              # mask padded key rows
    p = _softmax_last(s)
    ctx16 = _mm(p.astype(jnp.bfloat16), v16).astype(jnp.bfloat16)
    return _attn_ffn_tail(x, ctx16, wo16, w1q, w2q, b1, s1,
                          bo, b2, s2, g1, be1, g2, be2)


# --------------------------------- kernel ------------------------------------

def _hmcan_kernel(xs_ref, xc_ref, wattn_ref, w1q_ref, w2q_ref, wfc_ref,
                  vec_ref, b1s_ref, o_ref, *,
                  nb, seq, d, f_enc, f_te, n_valid_kv, scale):
    i = pl.program_id(0)
    f_sum = f_enc + f_te
    x = xs_ref[0].reshape(nb * seq, d)                   # flattened tokens, f32

    # --- static views into the packed weight slabs ---------------------------
    wattn = wattn_ref[0]                                 # (d, 8d) bf16
    e_wqkv, e_wo = wattn[:, 0:3 * d], wattn[:, 3 * d:4 * d]
    t_wqkv, t_wo = wattn[:, 4 * d:7 * d], wattn[:, 7 * d:8 * d]
    e_w1q = w1q_ref[0, :, 0:f_enc]                       # (d, f_enc) int8
    t_w1q = w1q_ref[0, :, f_enc:f_sum]                   # (d, f_te)  int8
    e_w2q = w2q_ref[0, 0:f_enc, :]                       # (f_enc, d) int8
    t_w2q = w2q_ref[0, f_enc:f_sum, :]                   # (f_te, d)  int8
    e_vec = vec_ref[0, 0:4, :]
    t_vec = vec_ref[0, 4:8, :]
    e_b1, t_b1 = b1s_ref[0, 0:1, 0:f_enc], b1s_ref[0, 0:1, f_enc:f_sum]
    e_s1, t_s1 = b1s_ref[0, 1:2, 0:f_enc], b1s_ref[0, 1:2, f_enc:f_sum]

    # 1) self-attention transformer encoder layer
    enc = _self_encoder(x, e_wqkv, e_wo, e_w1q, e_w2q, e_vec, e_b1, e_s1,
                        nb=nb, seq=seq, scale=scale)

    # 2) contextual (cross) encoder over the other modality's tokens
    n_valid = jnp.where(i == 0, n_valid_kv[0], n_valid_kv[1])
    co = _cross_encoder(enc, xc_ref[0], t_wqkv, t_wo, t_w1q, t_w2q,
                        t_vec, t_b1, t_s1, scale=scale, n_valid=n_valid)

    # 3) this pass's contribution to the final fc.  AvgPool1d(2,2) is already
    #    folded into wfc (= pool @ fc-slice), so this is a direct sum of small
    #    bf16 dots — padded batch columns hit zero weight rows.
    enc16 = enc.astype(jnp.bfloat16)
    co16 = co.astype(jnp.bfloat16)
    wfc = wfc_ref[0]                                     # (2*nb*d, OUT_PAD) bf16
    acc = None
    for b in range(nb):                                  # nb tiny, static unroll
        pe = jnp.dot(enc16[b * seq:(b + 1) * seq, :], wfc[b * d:(b + 1) * d, :],
                     preferred_element_type=jnp.float32)
        pc = jnp.dot(co16[b * seq:(b + 1) * seq, :],
                     wfc[(nb + b) * d:(nb + b + 1) * d, :],
                     preferred_element_type=jnp.float32)
        acc = (pe + pc) if acc is None else (acc + pe + pc)
    o_ref[0] = acc


# -------------------------------- parameters ---------------------------------

def _quant_cols(w):
    """Symmetric int8 quantization with per-output-channel scale."""
    amax = jnp.max(jnp.abs(w), axis=0, keepdims=True)
    scale = jnp.maximum(amax, 1e-8) / 127.0
    q = jnp.clip(jnp.round(w / scale), -127, 127).astype(jnp.int8)
    return q, scale.astype(jnp.float32)


def _init_block(key, d_model, d_ff):
    ks = jax.random.split(key, 6)

    def w(k, shape):
        return 0.05 * jax.random.normal(k, shape, dtype=jnp.float32)

    wq, wk, wv, wo = (w(ks[i], (d_model, d_model)) for i in range(4))
    w1q, s1 = _quant_cols(w(ks[4], (d_model, d_ff)))
    w2q, s2 = _quant_cols(w(ks[5], (d_ff, d_model)))
    # packed small vectors: [bqkv] [bo|b2|s2] [g1|be1] [g2|be2]  (LN gains = 1)
    vec = jnp.zeros((4, 3 * d_model), jnp.float32)
    vec = vec.at[1, 2 * d_model:].set(s2[0])   # w2 output scale
    vec = vec.at[2, :d_model].set(1.0)         # g1
    vec = vec.at[3, :d_model].set(1.0)         # g2
    return dict(
        wqkv=jnp.concatenate([wq, wk, wv], axis=1).astype(jnp.bfloat16),
        wo=wo.astype(jnp.bfloat16),
        w1q=w1q, w2q=w2q, s1=s1,
        b1=jnp.zeros((1, d_ff), jnp.float32),
        vec=vec,
    )


def init_hmcan_params(key, feature_size=256, d_ff=512, output_size=6, k=2):
    keys = jax.random.split(key, 5)
    enc_ff = 2048  # nn.TransformerEncoderLayer default dim_feedforward
    passes = []
    for p in range(2):
        enc = _init_block(keys[2 * p], feature_size, enc_ff)
        te = _init_block(keys[2 * p + 1], feature_size, d_ff)
        w_attn = jnp.concatenate([enc['wqkv'], enc['wo'], te['wqkv'], te['wo']],
                                 axis=1)                                 # (D, 8D) bf16
        w1q = jnp.concatenate([enc['w1q'], te['w1q']], axis=1)           # (D, Fsum) i8
        w2q = jnp.concatenate([enc['w2q'], te['w2q']], axis=0)           # (Fsum, D) i8
        vec = jnp.concatenate([enc['vec'], te['vec']], axis=0)           # (8, 3D)
        b1s = jnp.stack([jnp.concatenate([enc['b1'][0], te['b1'][0]]),
                         jnp.concatenate([enc['s1'][0], te['s1'][0]])])  # (2, Fsum)
        passes.append((w_attn, w1q, w2q, vec, b1s))
    names = ('w_attn', 'w1q', 'w2q', 'vec', 'b1s')
    params = {n: jnp.stack([passes[0][j], passes[1][j]], axis=0)
              for j, n in enumerate(names)}
    params['fc_w'] = (0.05 * jax.random.normal(
        keys[4], ((1 + k) * feature_size, output_size))).astype(jnp.float32)
    params['fc_b'] = jnp.zeros((1, output_size), jnp.float32)
    return params


# ---------------------------------- forward ----------------------------------

def _dim_semantics():
    """CORE_PARALLEL on multi-TensorCore chips (v7x), 'arbitrary' otherwise."""
    try:
        kind = jax.devices()[0].device_kind.lower()
    except Exception:
        kind = ""
    if "v7" in kind or "7x" in kind:
        return (pltpu.CORE_PARALLEL,)
    return ("arbitrary",)


def hmcan_forward(S, C, params, *, enc_ff=2048, te_ff=512):
    assert S.ndim <= 4 and C.ndim <= 4
    if S.ndim == 4:
        S = jnp.mean(S, axis=-2)
    if C.ndim == 4:
        C = jnp.mean(C, axis=-2)
    L, Bs, D = S.shape
    Lc, Bc, Dc = C.shape
    assert Lc == L and Dc == D
    fc_w, fc_b = params['fc_w'], params['fc_b']
    out_size = fc_w.shape[1]
    assert fc_w.shape[0] == (Bs + Bc) * D, "fc expects Bs + Bc == 1 + k"
    assert params['w1q'].shape == (2, D, enc_ff + te_ff)

    nb = max(Bs, Bc)          # padded batch columns per pass
    T = nb * L                # padded cross key/value token count

    def stack_self(X, B):     # (L, B, D) -> (nb, L, D), zero-padded columns
        return jnp.pad(jnp.transpose(X, (1, 0, 2)), ((0, nb - B), (0, 0), (0, 0)))

    def stack_cross(X, B):    # (L, B, D) -> (T, D), zero-padded rows
        return jnp.pad(X.reshape(L * B, D), ((0, T - L * B), (0, 0)))

    xs = jnp.stack([stack_self(S, Bs), stack_self(C, Bc)], axis=0)    # (2,nb,L,D)
    xc = jnp.stack([stack_cross(C, Bc), stack_cross(S, Bs)], axis=0)  # (2,T,D)

    # AvgPool1d(2,2) folded into the final fc weights: wfc row-block b holds
    # pool @ fc[rows of (enc|co) features of batch b], zero for padded batches.
    pool = 0.5 * jnp.repeat(jnp.eye(D // 2, dtype=jnp.float32), 2, axis=0)  # (D,D/2)
    zero_half = jnp.zeros((D // 2, out_size), jnp.float32)

    def fold_pass(p_off, B_p):
        enc_w, co_w = [], []
        for b in range(nb):
            if b < B_p:
                top = fc_w[p_off + b * D: p_off + b * D + D // 2]
                bot = fc_w[p_off + b * D + D // 2: p_off + (b + 1) * D]
            else:
                top = bot = zero_half
            enc_w.append(pool @ top)
            co_w.append(pool @ bot)
        w = jnp.concatenate(enc_w + co_w, axis=0)               # (2*nb*D, out)
        w = jnp.pad(w, ((0, 0), (0, OUT_PAD - out_size)))
        return w.astype(jnp.bfloat16)

    wfc = jnp.stack([fold_pass(0, Bs), fold_pass(Bs * D, Bc)], axis=0)

    args = (xs, xc, params['w_attn'], params['w1q'], params['w2q'], wfc,
            params['vec'], params['b1s'])

    def lead_spec(a):
        nd = a.ndim
        return pl.BlockSpec((1,) + a.shape[1:],
                            lambda i, _nd=nd: (i,) + (0,) * (_nd - 1))

    in_specs = [lead_spec(a) for a in args]

    # Double-buffered per-pass blocks (~2.6 MiB/step) + bf16 dequant temps fit
    # comfortably; 32 MiB keeps headroom on v5e/v6e and stays <48 MiB for v7x.
    arg_bytes = sum(int(a.size) * a.dtype.itemsize for a in args)
    vmem_limit = int(min(48 << 20, max(32 << 20, 2 * arg_bytes + (8 << 20))))

    kern = functools.partial(
        _hmcan_kernel, nb=nb, seq=L, d=D, f_enc=enc_ff, f_te=te_ff,
        n_valid_kv=(Bc * L, Bs * L), scale=1.0 / math.sqrt(D))

    partials = pl.pallas_call(
        kern,
        grid=(2,),
        in_specs=in_specs,
        out_specs=pl.BlockSpec((1, L, OUT_PAD), lambda i: (i, 0, 0)),
        out_shape=jax.ShapeDtypeStruct((2, L, OUT_PAD), jnp.float32),
        compiler_params=pltpu.CompilerParams(
            dimension_semantics=_dim_semantics(),
            vmem_limit_bytes=vmem_limit,
        ),
    )(*args)

    out = partials[0] + partials[1]                   # combine the two passes
    return out[:, :out_size] + fc_b                   # final fc bias (tiny, XLA)


# ------------------------------------ main ------------------------------------

if __name__ == "__main__":
    key = jax.random.PRNGKey(0)
    k_param, k_s, k_c = jax.random.split(key, 3)

    feature_size = 256          # d_model of both contextual transformers
    L, Bs, Bc = 8, 2, 1         # Bs + Bc == 1 + k == 3 so fc (3*D -> 6) matches

    S = jax.random.normal(k_s, (L, Bs, feature_size), dtype=jnp.float32)
    C = jax.random.normal(k_c, (L, Bc, feature_size), dtype=jnp.float32)

    params = init_hmcan_params(k_param, feature_size=feature_size,
                               d_ff=512, output_size=6, k=2)

    fwd = jax.jit(hmcan_forward)
    out = jax.block_until_ready(fwd(S, C, params))
    assert out.shape == (L, 6), out.shape
    assert bool(jnp.all(jnp.isfinite(out)))
    print("KERNEL_OK")
</pallas_src>

<mosaic_0001>
module attributes {stable_mosaic.version = 11 : i64} {
  func.func @_hmcan_kernel(%arg0: i32, %arg1: memref<1x2x8x256xf32, #tpu.memory_space<vmem>>, %arg2: memref<1x16x256xf32, #tpu.memory_space<vmem>>, %arg3: memref<1x256x2048xbf16, #tpu.memory_space<vmem>>, %arg4: memref<1x256x2560xi8, #tpu.memory_space<vmem>>, %arg5: memref<1x2560x256xi8, #tpu.memory_space<vmem>>, %arg6: memref<1x1024x128xbf16, #tpu.memory_space<vmem>>, %arg7: memref<1x8x768xf32, #tpu.memory_space<vmem>>, %arg8: memref<1x2x2560xf32, #tpu.memory_space<vmem>>, %arg9: memref<1x8x128xf32, #tpu.memory_space<vmem>>) attributes {dimension_semantics = [#tpu.dimension_semantics<arbitrary>], iteration_bounds = array<i64: 2>, scalar_prefetch = 0 : i64, scratch_operands = 0 : i64, tpu.core_type = #tpu.core_type<tc>, window_params = [{transform_indices = @transform_0, window_bounds = array<i64: 1, 2, 8, 256>}, {transform_indices = @transform_1, window_bounds = array<i64: 1, 16, 256>}, {transform_indices = @transform_2, window_bounds = array<i64: 1, 256, 2048>}, {transform_indices = @transform_3, window_bounds = array<i64: 1, 256, 2560>}, {transform_indices = @transform_4, window_bounds = array<i64: 1, 2560, 256>}, {transform_indices = @transform_5, window_bounds = array<i64: 1, 1024, 128>}, {transform_indices = @transform_6, window_bounds = array<i64: 1, 8, 768>}, {transform_indices = @transform_7, window_bounds = array<i64: 1, 2, 2560>}, {transform_indices = @transform_8, window_bounds = array<i64: 1, 8, 128>}]} {
    %c0 = arith.constant 0 : index
    %c0_0 = arith.constant 0 : index
    %c0_1 = arith.constant 0 : index
    %c0_2 = arith.constant 0 : index
    %0 = vector.load %arg1[%c0, %c0_0, %c0_1, %c0_2] : memref<1x2x8x256xf32, #tpu.memory_space<vmem>>, vector<1x2x8x256xf32>
    %1 = vector.shape_cast %0 : vector<1x2x8x256xf32> to vector<2x8x256xf32>
    %2 = vector.shape_cast %1 : vector<2x8x256xf32> to vector<16x256xf32>
    %c0_3 = arith.constant 0 : index
    %c0_4 = arith.constant 0 : index
    %c0_5 = arith.constant 0 : index
    %3 = vector.load %arg3[%c0_3, %c0_4, %c0_5] : memref<1x256x2048xbf16, #tpu.memory_space<vmem>>, vector<1x256x2048xbf16>
    %4 = vector.shape_cast %3 : vector<1x256x2048xbf16> to vector<256x2048xbf16>
    %5 = vector.extract_strided_slice %4 {offsets = [0, 0], sizes = [256, 768], strides = [1, 1]} : vector<256x2048xbf16> to vector<256x768xbf16>
    %6 = vector.extract_strided_slice %4 {offsets = [0, 768], sizes = [256, 256], strides = [1, 1]} : vector<256x2048xbf16> to vector<256x256xbf16>
    %7 = vector.extract_strided_slice %4 {offsets = [0, 1024], sizes = [256, 768], strides = [1, 1]} : vector<256x2048xbf16> to vector<256x768xbf16>
    %8 = vector.extract_strided_slice %4 {offsets = [0, 1792], sizes = [256, 256], strides = [1, 1]} : vector<256x2048xbf16> to vector<256x256xbf16>
    %c0_6 = arith.constant 0 : index
    %c0_7 = arith.constant 0 : index
    %c0_8 = arith.constant 0 : index
    %9 = vector.load %arg4[%c0_6, %c0_7, %c0_8] : memref<1x256x2560xi8, #tpu.memory_space<vmem>>, vector<1x256x2048xi8>
    %10 = vector.shape_cast %9 : vector<1x256x2048xi8> to vector<256x2048xi8>
    %c0_9 = arith.constant 0 : index
    %c0_10 = arith.constant 0 : index
    %c2048 = arith.constant 2048 : index
    %11 = vector.load %arg4[%c0_9, %c0_10, %c2048] : memref<1x256x2560xi8, #tpu.memory_space<vmem>>, vector<1x256x512xi8>
    %12 = vector.shape_cast %11 : vector<1x256x512xi8> to vector<256x512xi8>
    %c0_11 = arith.constant 0 : index
    %c0_12 = arith.constant 0 : index
    %c0_13 = arith.constant 0 : index
    %13 = vector.load %arg5[%c0_11, %c0_12, %c0_13] : memref<1x2560x256xi8, #tpu.memory_space<vmem>>, vector<1x2048x256xi8>
    %14 = vector.shape_cast %13 : vector<1x2048x256xi8> to vector<2048x256xi8>
    %c0_14 = arith.constant 0 : index
    %c2048_15 = arith.constant 2048 : index
    %c0_16 = arith.constant 0 : index
    %15 = vector.load %arg5[%c0_14, %c2048_15, %c0_16] : memref<1x2560x256xi8, #tpu.memory_space<vmem>>, vector<1x512x256xi8>
    %16 = vector.shape_cast %15 : vector<1x512x256xi8> to vector<512x256xi8>
    %c0_17 = arith.constant 0 : index
    %c0_18 = arith.constant 0 : index
    %c0_19 = arith.constant 0 : index
    %17 = vector.load %arg7[%c0_17, %c0_18, %c0_19] : memref<1x8x768xf32, #tpu.memory_space<vmem>>, vector<1x4x768xf32>
    %18 = vector.shape_cast %17 : vector<1x4x768xf32> to vector<4x768xf32>
    %c0_20 = arith.constant 0 : index
    %c4 = arith.constant 4 : index
    %c0_21 = arith.constant 0 : index
    %19 = vector.load %arg7[%c0_20, %c4, %c0_21] : memref<1x8x768xf32, #tpu.memory_space<vmem>>, vector<1x4x768xf32>
    %20 = vector.shape_cast %19 : vector<1x4x768xf32> to vector<4x768xf32>
    %c0_22 = arith.constant 0 : index
    %c0_23 = arith.constant 0 : index
    %c0_24 = arith.constant 0 : index
    %21 = vector.load %arg8[%c0_22, %c0_23, %c0_24] : memref<1x2x2560xf32, #tpu.memory_space<vmem>>, vector<1x1x2048xf32>
    %22 = vector.shape_cast %21 : vector<1x1x2048xf32> to vector<1x2048xf32>
    %c0_25 = arith.constant 0 : index
    %c0_26 = arith.constant 0 : index
    %c2048_27 = arith.constant 2048 : index
    %23 = vector.load %arg8[%c0_25, %c0_26, %c2048_27] : memref<1x2x2560xf32, #tpu.memory_space<vmem>>, vector<1x1x512xf32>
    %24 = vector.shape_cast %23 : vector<1x1x512xf32> to vector<1x512xf32>
    %c0_28 = arith.constant 0 : index
    %c1 = arith.constant 1 : index
    %c0_29 = arith.constant 0 : index
    %25 = vector.load %arg8[%c0_28, %c1, %c0_29] : memref<1x2x2560xf32, #tpu.memory_space<vmem>>, vector<1x1x2048xf32>
    %26 = vector.shape_cast %25 : vector<1x1x2048xf32> to vector<1x2048xf32>
    %c0_30 = arith.constant 0 : index
    %c1_31 = arith.constant 1 : index
    %c2048_32 = arith.constant 2048 : index
    %27 = vector.load %arg8[%c0_30, %c1_31, %c2048_32] : memref<1x2x2560xf32, #tpu.memory_space<vmem>>, vector<1x1x512xf32>
    %28 = vector.shape_cast %27 : vector<1x1x512xf32> to vector<1x512xf32>
    %29 = vector.extract_strided_slice %18 {offsets = [0, 0], sizes = [1, 768], strides = [1, 1]} : vector<4x768xf32> to vector<1x768xf32>
    %30 = vector.extract_strided_slice %18 {offsets = [1, 0], sizes = [1, 256], strides = [1, 1]} : vector<4x768xf32> to vector<1x256xf32>
    %31 = vector.extract_strided_slice %18 {offsets = [1, 256], sizes = [1, 256], strides = [1, 1]} : vector<4x768xf32> to vector<1x256xf32>
    %32 = vector.extract_strided_slice %18 {offsets = [1, 512], sizes = [1, 256], strides = [1, 1]} : vector<4x768xf32> to vector<1x256xf32>
    %33 = vector.extract_strided_slice %18 {offsets = [2, 0], sizes = [1, 256], strides = [1, 1]} : vector<4x768xf32> to vector<1x256xf32>
    %34 = vector.extract_strided_slice %18 {offsets = [2, 256], sizes = [1, 256], strides = [1, 1]} : vector<4x768xf32> to vector<1x256xf32>
    %35 = vector.extract_strided_slice %18 {offsets = [3, 0], sizes = [1, 256], strides = [1, 1]} : vector<4x768xf32> to vector<1x256xf32>
    %36 = vector.extract_strided_slice %18 {offsets = [3, 256], sizes = [1, 256], strides = [1, 1]} : vector<4x768xf32> to vector<1x256xf32>
    %37 = arith.truncf %2 : vector<16x256xf32> to vector<16x256xbf16>
    %cst = arith.constant dense<0.000000e+00> : vector<16x768xf32>
    %38 = tpu.matmul %37, %5, %cst {dimension_numbers = #tpu.dot_dimension_numbers<[1], [0], [0], [1], [0, 0, 1, 1], [], []>} : vector<16x256xbf16>, vector<256x768xbf16>, vector<16x768xf32> -> vector<16x768xf32>
    %39 = vector.broadcast %29 : vector<1x768xf32> to vector<16x768xf32>
    %40 = arith.addf %38, %39 : vector<16x768xf32>
    %41 = arith.truncf %40 : vector<16x768xf32> to vector<16x768xbf16>
    %42 = vector.extract_strided_slice %41 {offsets = [0, 0], sizes = [16, 256], strides = [1, 1]} : vector<16x768xbf16> to vector<16x256xbf16>
    %43 = vector.shape_cast %42 : vector<16x256xbf16> to vector<2x8x256xbf16>
    %44 = vector.extract_strided_slice %41 {offsets = [0, 256], sizes = [16, 256], strides = [1, 1]} : vector<16x768xbf16> to vector<16x256xbf16>
    %45 = vector.shape_cast %44 : vector<16x256xbf16> to vector<2x8x256xbf16>
    %46 = vector.extract_strided_slice %41 {offsets = [0, 512], sizes = [16, 256], strides = [1, 1]} : vector<16x768xbf16> to vector<16x256xbf16>
    %47 = vector.shape_cast %46 : vector<16x256xbf16> to vector<2x8x256xbf16>
    "tpu.trace_start"() <{level = 10 : i32, message = "bqd,bkd->bqk"}> : () -> ()
    %cst_33 = arith.constant dense<0.000000e+00> : vector<2x8x8xf32>
    %48 = tpu.matmul %43, %45, %cst_33 {dimension_numbers = #tpu.dot_dimension_numbers<[2], [2], [1], [1], [0, 0, 0, 1, 1, 1], [0], [0]>} : vector<2x8x256xbf16>, vector<2x8x256xbf16>, vector<2x8x8xf32> -> vector<2x8x8xf32>
    "tpu.trace_stop"() : () -> ()
    %cst_34 = arith.constant 6.250000e-02 : f32
    %49 = vector.broadcast %cst_34 : f32 to vector<2x8x8xf32>
    %50 = arith.mulf %48, %49 : vector<2x8x8xf32>
    %cst_35 = arith.constant dense<0xFF800000> : vector<2x8xf32>
    %51 = vector.multi_reduction <maximumf>, %50, %cst_35 [2] : vector<2x8x8xf32> to vector<2x8xf32>
    %52 = vector.shape_cast %51 : vector<2x8xf32> to vector<2x8x1xf32>
    %53 = vector.broadcast %52 : vector<2x8x1xf32> to vector<2x8x8xf32>
    %54 = arith.subf %50, %53 : vector<2x8x8xf32>
    %55 = math.exp %54 : vector<2x8x8xf32>
    %cst_36 = arith.constant dense<0.000000e+00> : vector<2x8xf32>
    %56 = vector.multi_reduction <add>, %55, %cst_36 [2] : vector<2x8x8xf32> to vector<2x8xf32>
    %57 = vector.shape_cast %56 : vector<2x8xf32> to vector<2x8x1xf32>
    %58 = vector.broadcast %57 : vector<2x8x1xf32> to vector<2x8x8xf32>
    %59 = arith.divf %55, %58 : vector<2x8x8xf32>
    %60 = arith.truncf %59 : vector<2x8x8xf32> to vector<2x8x8xbf16>
    "tpu.trace_start"() <{level = 10 : i32, message = "bqk,bkd->bqd"}> : () -> ()
    %cst_37 = arith.constant dense<0.000000e+00> : vector<2x8x256xf32>
    %61 = tpu.matmul %60, %47, %cst_37 {dimension_numbers = #tpu.dot_dimension_numbers<[2], [1], [1], [2], [0, 0, 0, 1, 1, 2], [0], [0]>} : vector<2x8x8xbf16>, vector<2x8x256xbf16>, vector<2x8x256xf32> -> vector<2x8x256xf32>
    "tpu.trace_stop"() : () -> ()
    %62 = vector.shape_cast %61 : vector<2x8x256xf32> to vector<16x256xf32>
    %63 = arith.truncf %62 : vector<16x256xf32> to vector<16x256xbf16>
    %cst_38 = arith.constant dense<0.000000e+00> : vector<16x256xf32>
    %64 = tpu.matmul %63, %6, %cst_38 {dimension_numbers = #tpu.dot_dimension_numbers<[1], [0], [0], [1], [0, 0, 1, 1], [], []>} : vector<16x256xbf16>, vector<256x256xbf16>, vector<16x256xf32> -> vector<16x256xf32>
    %65 = vector.broadcast %30 : vector<1x256xf32> to vector<16x256xf32>
    %66 = arith.addf %64, %65 : vector<16x256xf32>
    %67 = arith.addf %2, %66 : vector<16x256xf32>
    %cst_39 = arith.constant dense<0.000000e+00> : vector<16xf32>
    %68 = vector.multi_reduction <add>, %67, %cst_39 [1] : vector<16x256xf32> to vector<16xf32>
    %69 = vector.shape_cast %68 : vector<16xf32> to vector<16x1xf32>
    %cst_40 = arith.constant 2.560000e+02 : f32
    %70 = vector.broadcast %cst_40 : f32 to vector<16x1xf32>
    %71 = arith.divf %69, %70 : vector<16x1xf32>
    %72 = vector.broadcast %71 : vector<16x1xf32> to vector<16x256xf32>
    %73 = arith.subf %67, %72 : vector<16x256xf32>
    %74 = arith.mulf %73, %73 : vector<16x256xf32>
    %cst_41 = arith.constant dense<0.000000e+00> : vector<16xf32>
    %75 = vector.multi_reduction <add>, %74, %cst_41 [1] : vector<16x256xf32> to vector<16xf32>
    %76 = vector.shape_cast %75 : vector<16xf32> to vector<16x1xf32>
    %cst_42 = arith.constant 2.560000e+02 : f32
    %77 = vector.broadcast %cst_42 : f32 to vector<16x1xf32>
    %78 = arith.divf %76, %77 : vector<16x1xf32>
    %79 = vector.broadcast %71 : vector<16x1xf32> to vector<16x256xf32>
    %80 = arith.subf %67, %79 : vector<16x256xf32>
    %cst_43 = arith.constant 9.99999974E-6 : f32
    %81 = vector.broadcast %cst_43 : f32 to vector<16x1xf32>
    %82 = arith.addf %78, %81 : vector<16x1xf32>
    %83 = math.rsqrt %82 : vector<16x1xf32>
    %84 = vector.broadcast %83 : vector<16x1xf32> to vector<16x256xf32>
    %85 = arith.mulf %80, %84 : vector<16x256xf32>
    %86 = vector.broadcast %33 : vector<1x256xf32> to vector<16x256xf32>
    %87 = arith.mulf %85, %86 : vector<16x256xf32>
    %88 = vector.broadcast %34 : vector<1x256xf32> to vector<16x256xf32>
    %89 = arith.addf %87, %88 : vector<16x256xf32>
    %90 = arith.truncf %89 : vector<16x256xf32> to vector<16x256xbf16>
    %91 = arith.sitofp %10 : vector<256x2048xi8> to vector<256x2048xf32>
    %92 = arith.truncf %91 : vector<256x2048xf32> to vector<256x2048xbf16>
    %cst_44 = arith.constant dense<0.000000e+00> : vector<16x2048xf32>
    %93 = tpu.matmul %90, %92, %cst_44 {dimension_numbers = #tpu.dot_dimension_numbers<[1], [0], [0], [1], [0, 0, 1, 1], [], []>} : vector<16x256xbf16>, vector<256x2048xbf16>, vector<16x2048xf32> -> vector<16x2048xf32>
    %94 = vector.broadcast %26 : vector<1x2048xf32> to vector<16x2048xf32>
    %95 = arith.mulf %93, %94 : vector<16x2048xf32>
    %96 = vector.broadcast %22 : vector<1x2048xf32> to vector<16x2048xf32>
    %97 = arith.addf %95, %96 : vector<16x2048xf32>
    %cst_45 = arith.constant 0.000000e+00 : f32
    %98 = vector.broadcast %cst_45 : f32 to vector<16x2048xf32>
    %99 = arith.maximumf %97, %98 : vector<16x2048xf32>
    %100 = arith.truncf %99 : vector<16x2048xf32> to vector<16x2048xbf16>
    %101 = arith.sitofp %14 : vector<2048x256xi8> to vector<2048x256xf32>
    %102 = arith.truncf %101 : vector<2048x256xf32> to vector<2048x256xbf16>
    %cst_46 = arith.constant dense<0.000000e+00> : vector<16x256xf32>
    %103 = tpu.matmul %100, %102, %cst_46 {dimension_numbers = #tpu.dot_dimension_numbers<[1], [0], [0], [1], [0, 0, 1, 1], [], []>} : vector<16x2048xbf16>, vector<2048x256xbf16>, vector<16x256xf32> -> vector<16x256xf32>
    %104 = vector.broadcast %32 : vector<1x256xf32> to vector<16x256xf32>
    %105 = arith.mulf %103, %104 : vector<16x256xf32>
    %106 = vector.broadcast %31 : vector<1x256xf32> to vector<16x256xf32>
    %107 = arith.addf %105, %106 : vector<16x256xf32>
    %108 = arith.addf %89, %107 : vector<16x256xf32>
    %cst_47 = arith.constant dense<0.000000e+00> : vector<16xf32>
    %109 = vector.multi_reduction <add>, %108, %cst_47 [1] : vector<16x256xf32> to vector<16xf32>
    %110 = vector.shape_cast %109 : vector<16xf32> to vector<16x1xf32>
    %cst_48 = arith.constant 2.560000e+02 : f32
    %111 = vector.broadcast %cst_48 : f32 to vector<16x1xf32>
    %112 = arith.divf %110, %111 : vector<16x1xf32>
    %113 = vector.broadcast %112 : vector<16x1xf32> to vector<16x256xf32>
    %114 = arith.subf %108, %113 : vector<16x256xf32>
    %115 = arith.mulf %114, %114 : vector<16x256xf32>
    %cst_49 = arith.constant dense<0.000000e+00> : vector<16xf32>
    %116 = vector.multi_reduction <add>, %115, %cst_49 [1] : vector<16x256xf32> to vector<16xf32>
    %117 = vector.shape_cast %116 : vector<16xf32> to vector<16x1xf32>
    %cst_50 = arith.constant 2.560000e+02 : f32
    %118 = vector.broadcast %cst_50 : f32 to vector<16x1xf32>
    %119 = arith.divf %117, %118 : vector<16x1xf32>
    %120 = vector.broadcast %112 : vector<16x1xf32> to vector<16x256xf32>
    %121 = arith.subf %108, %120 : vector<16x256xf32>
    %cst_51 = arith.constant 9.99999974E-6 : f32
    %122 = vector.broadcast %cst_51 : f32 to vector<16x1xf32>
    %123 = arith.addf %119, %122 : vector<16x1xf32>
    %124 = math.rsqrt %123 : vector<16x1xf32>
    %125 = vector.broadcast %124 : vector<16x1xf32> to vector<16x256xf32>
    %126 = arith.mulf %121, %125 : vector<16x256xf32>
    %127 = vector.broadcast %35 : vector<1x256xf32> to vector<16x256xf32>
    %128 = arith.mulf %126, %127 : vector<16x256xf32>
    %129 = vector.broadcast %36 : vector<1x256xf32> to vector<16x256xf32>
    %130 = arith.addf %128, %129 : vector<16x256xf32>
    %c0_i32 = arith.constant 0 : i32
    %131 = arith.cmpi eq, %arg0, %c0_i32 : i32
    %c8_i32 = arith.constant 8 : i32
    %c16_i32 = arith.constant 16 : i32
    %132 = arith.select %131, %c8_i32, %c16_i32 : i32
    %c0_52 = arith.constant 0 : index
    %c0_53 = arith.constant 0 : index
    %c0_54 = arith.constant 0 : index
    %133 = vector.load %arg2[%c0_52, %c0_53, %c0_54] : memref<1x16x256xf32, #tpu.memory_space<vmem>>, vector<1x16x256xf32>
    %134 = vector.shape_cast %133 : vector<1x16x256xf32> to vector<16x256xf32>
    %135 = vector.extract_strided_slice %20 {offsets = [0, 0], sizes = [1, 768], strides = [1, 1]} : vector<4x768xf32> to vector<1x768xf32>
    %136 = vector.extract_strided_slice %20 {offsets = [1, 0], sizes = [1, 256], strides = [1, 1]} : vector<4x768xf32> to vector<1x256xf32>
    %137 = vector.extract_strided_slice %20 {offsets = [1, 256], sizes = [1, 256], strides = [1, 1]} : vector<4x768xf32> to vector<1x256xf32>
    %138 = vector.extract_strided_slice %20 {offsets = [1, 512], sizes = [1, 256], strides = [1, 1]} : vector<4x768xf32> to vector<1x256xf32>
    %139 = vector.extract_strided_slice %20 {offsets = [2, 0], sizes = [1, 256], strides = [1, 1]} : vector<4x768xf32> to vector<1x256xf32>
    %140 = vector.extract_strided_slice %20 {offsets = [2, 256], sizes = [1, 256], strides = [1, 1]} : vector<4x768xf32> to vector<1x256xf32>
    %141 = vector.extract_strided_slice %20 {offsets = [3, 0], sizes = [1, 256], strides = [1, 1]} : vector<4x768xf32> to vector<1x256xf32>
    %142 = vector.extract_strided_slice %20 {offsets = [3, 256], sizes = [1, 256], strides = [1, 1]} : vector<4x768xf32> to vector<1x256xf32>
    %143 = arith.truncf %130 : vector<16x256xf32> to vector<16x256xbf16>
    %144 = arith.truncf %134 : vector<16x256xf32> to vector<16x256xbf16>
    %145 = vector.extract_strided_slice %7 {offsets = [0, 0], sizes = [256, 256], strides = [1, 1]} : vector<256x768xbf16> to vector<256x256xbf16>
    %cst_55 = arith.constant dense<0.000000e+00> : vector<16x256xf32>
    %146 = tpu.matmul %143, %145, %cst_55 {dimension_numbers = #tpu.dot_dimension_numbers<[1], [0], [0], [1], [0, 0, 1, 1], [], []>} : vector<16x256xbf16>, vector<256x256xbf16>, vector<16x256xf32> -> vector<16x256xf32>
    %147 = vector.extract_strided_slice %135 {offsets = [0, 0], sizes = [1, 256], strides = [1, 1]} : vector<1x768xf32> to vector<1x256xf32>
    %148 = vector.broadcast %147 : vector<1x256xf32> to vector<16x256xf32>
    %149 = arith.addf %146, %148 : vector<16x256xf32>
    %150 = arith.truncf %149 : vector<16x256xf32> to vector<16x256xbf16>
    %151 = vector.extract_strided_slice %7 {offsets = [0, 256], sizes = [256, 512], strides = [1, 1]} : vector<256x768xbf16> to vector<256x512xbf16>
    %cst_56 = arith.constant dense<0.000000e+00> : vector<16x512xf32>
    %152 = tpu.matmul %144, %151, %cst_56 {dimension_numbers = #tpu.dot_dimension_numbers<[1], [0], [0], [1], [0, 0, 1, 1], [], []>} : vector<16x256xbf16>, vector<256x512xbf16>, vector<16x512xf32> -> vector<16x512xf32>
    %153 = vector.extract_strided_slice %135 {offsets = [0, 256], sizes = [1, 512], strides = [1, 1]} : vector<1x768xf32> to vector<1x512xf32>
    %154 = vector.broadcast %153 : vector<1x512xf32> to vector<16x512xf32>
    %155 = arith.addf %152, %154 : vector<16x512xf32>
    %156 = arith.truncf %155 : vector<16x512xf32> to vector<16x512xbf16>
    %157 = vector.extract_strided_slice %156 {offsets = [0, 0], sizes = [16, 256], strides = [1, 1]} : vector<16x512xbf16> to vector<16x256xbf16>
    %158 = vector.extract_strided_slice %156 {offsets = [0, 256], sizes = [16, 256], strides = [1, 1]} : vector<16x512xbf16> to vector<16x256xbf16>
    %cst_57 = arith.constant dense<0.000000e+00> : vector<16x16xf32>
    %159 = tpu.matmul %150, %157, %cst_57 {dimension_numbers = #tpu.dot_dimension_numbers<[1], [1], [0], [0], [0, 0, 1, 0], [], []>} : vector<16x256xbf16>, vector<16x256xbf16>, vector<16x16xf32> -> vector<16x16xf32>
    %cst_58 = arith.constant 6.250000e-02 : f32
    %160 = vector.broadcast %cst_58 : f32 to vector<16x16xf32>
    %161 = arith.mulf %159, %160 : vector<16x16xf32>
    %162 = tpu.iota {dimensions = array<i32: 1>} : vector<16x16xi32>
    %163 = vector.broadcast %132 : i32 to vector<16x16xi32>
    %164 = arith.cmpi slt, %162, %163 : vector<16x16xi32>
    %cst_59 = arith.constant -1.000000e+30 : f32
    %165 = vector.broadcast %cst_59 : f32 to vector<16x16xf32>
    %166 = arith.select %164, %161, %165 : vector<16x16xi1>, vector<16x16xf32>
    %cst_60 = arith.constant dense<0xFF800000> : vector<16xf32>
    %167 = vector.multi_reduction <maximumf>, %166, %cst_60 [1] : vector<16x16xf32> to vector<16xf32>
    %168 = vector.shape_cast %167 : vector<16xf32> to vector<16x1xf32>
    %169 = vector.broadcast %168 : vector<16x1xf32> to vector<16x16xf32>
    %170 = arith.subf %166, %169 : vector<16x16xf32>
    %171 = math.exp %170 : vector<16x16xf32>
    %cst_61 = arith.constant dense<0.000000e+00> : vector<16xf32>
    %172 = vector.multi_reduction <add>, %171, %cst_61 [1] : vector<16x16xf32> to vector<16xf32>
    %173 = vector.shape_cast %172 : vector<16xf32> to vector<16x1xf32>
    %174 = vector.broadcast %173 : vector<16x1xf32> to vector<16x16xf32>
    %175 = arith.divf %171, %174 : vector<16x16xf32>
    %176 = arith.truncf %175 : vector<16x16xf32> to vector<16x16xbf16>
    %cst_62 = arith.constant dense<0.000000e+00> : vector<16x256xf32>
    %177 = tpu.matmul %176, %158, %cst_62 {dimension_numbers = #tpu.dot_dimension_numbers<[1], [0], [0], [1], [0, 0, 1, 1], [], []>} : vector<16x16xbf16>, vector<16x256xbf16>, vector<16x256xf32> -> vector<16x256xf32>
    %178 = arith.truncf %177 : vector<16x256xf32> to vector<16x256xbf16>
    %cst_63 = arith.constant dense<0.000000e+00> : vector<16x256xf32>
    %179 = tpu.matmul %178, %8, %cst_63 {dimension_numbers = #tpu.dot_dimension_numbers<[1], [0], [0], [1], [0, 0, 1, 1], [], []>} : vector<16x256xbf16>, vector<256x256xbf16>, vector<16x256xf32> -> vector<16x256xf32>
    %180 = vector.broadcast %136 : vector<1x256xf32> to vector<16x256xf32>
    %181 = arith.addf %179, %180 : vector<16x256xf32>
    %182 = arith.addf %130, %181 : vector<16x256xf32>
    %cst_64 = arith.constant dense<0.000000e+00> : vector<16xf32>
    %183 = vector.multi_reduction <add>, %182, %cst_64 [1] : vector<16x256xf32> to vector<16xf32>
    %184 = vector.shape_cast %183 : vector<16xf32> to vector<16x1xf32>
    %cst_65 = arith.constant 2.560000e+02 : f32
    %185 = vector.broadcast %cst_65 : f32 to vector<16x1xf32>
    %186 = arith.divf %184, %185 : vector<16x1xf32>
    %187 = vector.broadcast %186 : vector<16x1xf32> to vector<16x256xf32>
    %188 = arith.subf %182, %187 : vector<16x256xf32>
    %189 = arith.mulf %188, %188 : vector<16x256xf32>
    %cst_66 = arith.constant dense<0.000000e+00> : vector<16xf32>
    %190 = vector.multi_reduction <add>, %189, %cst_66 [1] : vector<16x256xf32> to vector<16xf32>
    %191 = vector.shape_cast %190 : vector<16xf32> to vector<16x1xf32>
    %cst_67 = arith.constant 2.560000e+02 : f32
    %192 = vector.broadcast %cst_67 : f32 to vector<16x1xf32>
    %193 = arith.divf %191, %192 : vector<16x1xf32>
    %194 = vector.broadcast %186 : vector<16x1xf32> to vector<16x256xf32>
    %195 = arith.subf %182, %194 : vector<16x256xf32>
    %cst_68 = arith.constant 9.99999974E-6 : f32
    %196 = vector.broadcast %cst_68 : f32 to vector<16x1xf32>
    %197 = arith.addf %193, %196 : vector<16x1xf32>
    %198 = math.rsqrt %197 : vector<16x1xf32>
    %199 = vector.broadcast %198 : vector<16x1xf32> to vector<16x256xf32>
    %200 = arith.mulf %195, %199 : vector<16x256xf32>
    %201 = vector.broadcast %139 : vector<1x256xf32> to vector<16x256xf32>
    %202 = arith.mulf %200, %201 : vector<16x256xf32>
    %203 = vector.broadcast %140 : vector<1x256xf32> to vector<16x256xf32>
    %204 = arith.addf %202, %203 : vector<16x256xf32>
    %205 = arith.truncf %204 : vector<16x256xf32> to vector<16x256xbf16>
    %206 = arith.sitofp %12 : vector<256x512xi8> to vector<256x512xf32>
    %207 = arith.truncf %206 : vector<256x512xf32> to vector<256x512xbf16>
    %cst_69 = arith.constant dense<0.000000e+00> : vector<16x512xf32>
    %208 = tpu.matmul %205, %207, %cst_69 {dimension_numbers = #tpu.dot_dimension_numbers<[1], [0], [0], [1], [0, 0, 1, 1], [], []>} : vector<16x256xbf16>, vector<256x512xbf16>, vector<16x512xf32> -> vector<16x512xf32>
    %209 = vector.broadcast %28 : vector<1x512xf32> to vector<16x512xf32>
    %210 = arith.mulf %208, %209 : vector<16x512xf32>
    %211 = vector.broadcast %24 : vector<1x512xf32> to vector<16x512xf32>
    %212 = arith.addf %210, %211 : vector<16x512xf32>
    %cst_70 = arith.constant 0.000000e+00 : f32
    %213 = vector.broadcast %cst_70 : f32 to vector<16x512xf32>
    %214 = arith.maximumf %212, %213 : vector<16x512xf32>
    %215 = arith.truncf %214 : vector<16x512xf32> to vector<16x512xbf16>
    %216 = arith.sitofp %16 : vector<512x256xi8> to vector<512x256xf32>
    %217 = arith.truncf %216 : vector<512x256xf32> to vector<512x256xbf16>
    %cst_71 = arith.constant dense<0.000000e+00> : vector<16x256xf32>
    %218 = tpu.matmul %215, %217, %cst_71 {dimension_numbers = #tpu.dot_dimension_numbers<[1], [0], [0], [1], [0, 0, 1, 1], [], []>} : vector<16x512xbf16>, vector<512x256xbf16>, vector<16x256xf32> -> vector<16x256xf32>
    %219 = vector.broadcast %138 : vector<1x256xf32> to vector<16x256xf32>
    %220 = arith.mulf %218, %219 : vector<16x256xf32>
    %221 = vector.broadcast %137 : vector<1x256xf32> to vector<16x256xf32>
    %222 = arith.addf %220, %221 : vector<16x256xf32>
    %223 = arith.addf %204, %222 : vector<16x256xf32>
    %cst_72 = arith.constant dense<0.000000e+00> : vector<16xf32>
    %224 = vector.multi_reduction <add>, %223, %cst_72 [1] : vector<16x256xf32> to vector<16xf32>
    %225 = vector.shape_cast %224 : vector<16xf32> to vector<16x1xf32>
    %cst_73 = arith.constant 2.560000e+02 : f32
    %226 = vector.broadcast %cst_73 : f32 to vector<16x1xf32>
    %227 = arith.divf %225, %226 : vector<16x1xf32>
    %228 = vector.broadcast %227 : vector<16x1xf32> to vector<16x256xf32>
    %229 = arith.subf %223, %228 : vector<16x256xf32>
    %230 = arith.mulf %229, %229 : vector<16x256xf32>
    %cst_74 = arith.constant dense<0.000000e+00> : vector<16xf32>
    %231 = vector.multi_reduction <add>, %230, %cst_74 [1] : vector<16x256xf32> to vector<16xf32>
    %232 = vector.shape_cast %231 : vector<16xf32> to vector<16x1xf32>
    %cst_75 = arith.constant 2.560000e+02 : f32
    %233 = vector.broadcast %cst_75 : f32 to vector<16x1xf32>
    %234 = arith.divf %232, %233 : vector<16x1xf32>
    %235 = vector.broadcast %227 : vector<16x1xf32> to vector<16x256xf32>
    %236 = arith.subf %223, %235 : vector<16x256xf32>
    %cst_76 = arith.constant 9.99999974E-6 : f32
    %237 = vector.broadcast %cst_76 : f32 to vector<16x1xf32>
    %238 = arith.addf %234, %237 : vector<16x1xf32>
    %239 = math.rsqrt %238 : vector<16x1xf32>
    %240 = vector.broadcast %239 : vector<16x1xf32> to vector<16x256xf32>
    %241 = arith.mulf %236, %240 : vector<16x256xf32>
    %242 = vector.broadcast %141 : vector<1x256xf32> to vector<16x256xf32>
    %243 = arith.mulf %241, %242 : vector<16x256xf32>
    %244 = vector.broadcast %142 : vector<1x256xf32> to vector<16x256xf32>
    %245 = arith.addf %243, %244 : vector<16x256xf32>
    %246 = arith.truncf %130 : vector<16x256xf32> to vector<16x256xbf16>
    %247 = arith.truncf %245 : vector<16x256xf32> to vector<16x256xbf16>
    %c0_77 = arith.constant 0 : index
    %c0_78 = arith.constant 0 : index
    %c0_79 = arith.constant 0 : index
    %248 = vector.load %arg6[%c0_77, %c0_78, %c0_79] : memref<1x1024x128xbf16, #tpu.memory_space<vmem>>, vector<1x1024x128xbf16>
    %249 = vector.shape_cast %248 : vector<1x1024x128xbf16> to vector<1024x128xbf16>
    %250 = vector.extract_strided_slice %246 {offsets = [0, 0], sizes = [8, 256], strides = [1, 1]} : vector<16x256xbf16> to vector<8x256xbf16>
    %251 = vector.extract_strided_slice %249 {offsets = [0, 0], sizes = [256, 128], strides = [1, 1]} : vector<1024x128xbf16> to vector<256x128xbf16>
    %cst_80 = arith.constant dense<0.000000e+00> : vector<8x128xf32>
    %252 = tpu.matmul %250, %251, %cst_80 {dimension_numbers = #tpu.dot_dimension_numbers<[1], [0], [0], [1], [0, 0, 1, 1], [], []>} : vector<8x256xbf16>, vector<256x128xbf16>, vector<8x128xf32> -> vector<8x128xf32>
    %253 = vector.extract_strided_slice %247 {offsets = [0, 0], sizes = [8, 256], strides = [1, 1]} : vector<16x256xbf16> to vector<8x256xbf16>
    %254 = vector.extract_strided_slice %249 {offsets = [512, 0], sizes = [256, 128], strides = [1, 1]} : vector<1024x128xbf16> to vector<256x128xbf16>
    %cst_81 = arith.constant dense<0.000000e+00> : vector<8x128xf32>
    %255 = tpu.matmul %253, %254, %cst_81 {dimension_numbers = #tpu.dot_dimension_numbers<[1], [0], [0], [1], [0, 0, 1, 1], [], []>} : vector<8x256xbf16>, vector<256x128xbf16>, vector<8x128xf32> -> vector<8x128xf32>
    %256 = arith.addf %252, %255 : vector<8x128xf32>
    %257 = vector.extract_strided_slice %246 {offsets = [8, 0], sizes = [8, 256], strides = [1, 1]} : vector<16x256xbf16> to vector<8x256xbf16>
    %258 = vector.extract_strided_slice %249 {offsets = [256, 0], sizes = [256, 128], strides = [1, 1]} : vector<1024x128xbf16> to vector<256x128xbf16>
    %cst_82 = arith.constant dense<0.000000e+00> : vector<8x128xf32>
    %259 = tpu.matmul %257, %258, %cst_82 {dimension_numbers = #tpu.dot_dimension_numbers<[1], [0], [0], [1], [0, 0, 1, 1], [], []>} : vector<8x256xbf16>, vector<256x128xbf16>, vector<8x128xf32> -> vector<8x128xf32>
    %260 = vector.extract_strided_slice %247 {offsets = [8, 0], sizes = [8, 256], strides = [1, 1]} : vector<16x256xbf16> to vector<8x256xbf16>
    %261 = vector.extract_strided_slice %249 {offsets = [768, 0], sizes = [256, 128], strides = [1, 1]} : vector<1024x128xbf16> to vector<256x128xbf16>
    %cst_83 = arith.constant dense<0.000000e+00> : vector<8x128xf32>
    %262 = tpu.matmul %260, %261, %cst_83 {dimension_numbers = #tpu.dot_dimension_numbers<[1], [0], [0], [1], [0, 0, 1, 1], [], []>} : vector<8x256xbf16>, vector<256x128xbf16>, vector<8x128xf32> -> vector<8x128xf32>
    %263 = arith.addf %256, %259 : vector<8x128xf32>
    %264 = arith.addf %263, %262 : vector<8x128xf32>
    %c0_84 = arith.constant 0 : index
    %c0_85 = arith.constant 0 : index
    %c0_86 = arith.constant 0 : index
    %265 = vector.load %arg9[%c0_84, %c0_85, %c0_86] : memref<1x8x128xf32, #tpu.memory_space<vmem>>, vector<1x8x128xf32>
    %266 = vector.shape_cast %265 : vector<1x8x128xf32> to vector<8x128xf32>
    %267 = vector.shape_cast %264 : vector<8x128xf32> to vector<1x8x128xf32>
    tpu.vector_store %arg9[%c0_84, %c0_85, %c0_86], %267 {strides = array<i32>} : memref<1x8x128xf32, #tpu.memory_space<vmem>>, vector<1x8x128xf32>,
    return
  }
  func.func @transform_0(%arg0: i32) -> (i32, i32, i32, i32) {
    %c0_i32 = arith.constant 0 : i32
    %c0_i32_0 = arith.constant 0 : i32
    %c0_i32_1 = arith.constant 0 : i32
    %c0_i32_2 = arith.constant 0 : i32
    return %arg0, %c0_i32, %c0_i32_0, %c0_i32_1 : i32, i32, i32, i32
  }
  func.func @transform_1(%arg0: i32) -> (i32, i32, i32) {
    %c0_i32 = arith.constant 0 : i32
    %c0_i32_0 = arith.constant 0 : i32
    %c0_i32_1 = arith.constant 0 : i32
    return %arg0, %c0_i32, %c0_i32_0 : i32, i32, i32
  }
  func.func @transform_2(%arg0: i32) -> (i32, i32, i32) {
    %c0_i32 = arith.constant 0 : i32
    %c0_i32_0 = arith.constant 0 : i32
    %c0_i32_1 = arith.constant 0 : i32
    return %arg0, %c0_i32, %c0_i32_0 : i32, i32, i32
  }
  func.func @transform_3(%arg0: i32) -> (i32, i32, i32) {
    %c0_i32 = arith.constant 0 : i32
    %c0_i32_0 = arith.constant 0 : i32
    %c0_i32_1 = arith.constant 0 : i32
    return %arg0, %c0_i32, %c0_i32_0 : i32, i32, i32
  }
  func.func @transform_4(%arg0: i32) -> (i32, i32, i32) {
    %c0_i32 = arith.constant 0 : i32
    %c0_i32_0 = arith.constant 0 : i32
    %c0_i32_1 = arith.constant 0 : i32
    return %arg0, %c0_i32, %c0_i32_0 : i32, i32, i32
  }
  func.func @transform_5(%arg0: i32) -> (i32, i32, i32) {
    %c0_i32 = arith.constant 0 : i32
    %c0_i32_0 = arith.constant 0 : i32
    %c0_i32_1 = arith.constant 0 : i32
    return %arg0, %c0_i32, %c0_i32_0 : i32, i32, i32
  }
  func.func @transform_6(%arg0: i32) -> (i32, i32, i32) {
    %c0_i32 = arith.constant 0 : i32
    %c0_i32_0 = arith.constant 0 : i32
    %c0_i32_1 = arith.constant 0 : i32
    return %arg0, %c0_i32, %c0_i32_0 : i32, i32, i32
  }
  func.func @transform_7(%arg0: i32) -> (i32, i32, i32) {
    %c0_i32 = arith.constant 0 : i32
    %c0_i32_0 = arith.constant 0 : i32
    %c0_i32_1 = arith.constant 0 : i32
    return %arg0, %c0_i32, %c0_i32_0 : i32, i32, i32
  }
  func.func @transform_8(%arg0: i32) -> (i32, i32, i32) {
    %c0_i32 = arith.constant 0 : i32
    %c0_i32_0 = arith.constant 0 : i32
    %c0_i32_1 = arith.constant 0 : i32
    return %arg0, %c0_i32, %c0_i32_0 : i32, i32, i32
  }
}

</mosaic_0001>

<bundles_post_ra>
// kernel: hmcan_forward.1
= control target key start
LH: loop header
LB: loop body
LE: loop exit
PB: predicated region body
PF: predicated region fallthrough
CT: control target
= control target key end

     0   :  { %13 = vsyncpa [#allocation3], 0  ;;  %s12976_s0 = inlined_call_operand.vmem [shape: f32[2,2,8,256], index: 0, kind: input, shape index: {}]   ;;  %s12977_s1 = inlined_call_operand.vmem [shape: f32[2,16,256], index: 1, kind: input, shape index: {}]   ;;  %s12978_s2 = inlined_call_operand.vmem [shape: bf16[2,256,2048], index: 2, kind: input, shape index: {}]   ;;  %s12979_s3 = inlined_call_operand.vmem [shape: s8[2,256,2560], index: 3, kind: input, shape index: {}]   ;;  %s12980_s4 = inlined_call_operand.hbm [shape: s8[2,2560,256], index: 4, kind: input, shape index: {}]   ;;  %s12981_s5 = inlined_call_operand.vmem [shape: bf16[2,1024,128], index: 5, kind: input, shape index: {}]   ;;  %s12982_s6 = inlined_call_operand.vmem [shape: f32[2,8,768], index: 6, kind: input, shape index: {}]   ;;  %s12983_s7 = inlined_call_operand.vmem [shape: f32[2,2,2560], index: 7, kind: input, shape index: {}]   ;;  %s12984_s8 = inlined_call_operand.vmem [shape: f32[2,8,128], index: 8, kind: output, shape index: {}]  }
   0x1   :  { %15 = vsyncpa [#allocation3 + $0x1], 0  ;;  %s10692_s27 = smov 0   ;;  %s10694_s28 = smov 0  }
   0x2   :  { %s10696_s29 = smov 0   ;;  %s10698_s30 = smov 0  }
   0x3 LB: > { %s10711_s9 = sadd.s32 4294967295, %s10642_s30   ;;  %s10714_s10 = sadd.s32 1, %s10642_s30   ;;  %s10642_s30 = sphi %s10698_s30, %s12990_s30   ;;  %s10638_s29 = sphi %s10696_s29, %s12989_s29   ;;  %s10634_s28 = sphi %s10694_s28, %s12988_s28   ;;  %s10630_s27 = sphi %s10692_s27, %s12987_s27  }
   0x4   : > { %s129_s11 = ssub.s32 %s10642_s30, %s10714_s10  ;;  %s132_s12 = sadd.s32 1, %s10638_s29 }
   0x5   : > { %p130_p0 = scmp.eq.s32.totalorder %s129_s11, 0  ;;  %p139_p1 = scmp.ne.s32.totalorder %s10638_s29, %s10634_s28 }
   0x6   : > { %p140_p2 = scmp.eq.s32.totalorder %s10642_s30, 0  ;;  %p145_p3 = scmp.ne.s32.totalorder %s10634_s28, %s10630_s27 }
   0x7   : > { %s10724_s13 = scalar_select %p130_p0, %s10638_s29, %s132_s12  }
   0x8   : > { %p141_p4 = por %p140_p2, %p139_p1  ;;  %p146_p5 = scmp.eq.s32.totalorder %s10711_s9, 0 }
   0x9   : > { %p10486_p6 = scmp.lt.s32.totalorder %s10642_s30, 2  ;;  %s305_s15 = sand.u32 1, %s10638_s29  }
   0xa   : > { %p10730_p7 = por %p146_p5, %p145_p3  ;;  %s10474_s16 = smul.u32 1280, %s305_s15 }
   0xb   : > { %s10475_s17 = smul.u32 1280, %s10642_s30  ;;  %p10736_p8 = pnand %p10486_p6, %p141_p4 }
   0xc   : > { %s309_s22 = scalar_lea.vmem [#allocation2], %s10474_s16  ;;  %p8844_p9 = scmp.ge.s32.totalorder %s10642_s30, 1 }
   0xd   : > { %s314_s21 = scalar_lea.hbm %s12980_s4, %s10475_s17  ;;  %s317_s23 = sshll.u32 %s309_s22, 4  ;;  %s318_s23 = int_to_ptr.vmem [resolvable:$true] %s317_s23 }
   0xe   : > { %s315_s24 = sshll.u32 %s314_s21, 4  ;;  %s306_s25 = scalar_lea.sflag [#allocation3], %s305_s15  ;;  %s316_s24 = int_to_ptr.hbm [resolvable:$true] %s315_s24 }
   0xf   : > { %s10578_s26 = sshra.s32 %s316_s24, 4  ;;  %p10582_p11 = pneg %p10736_p8  ;;  %s10579_s26 = int_to_ptr.hbm [resolvable:$true] %s10578_s26 }
  0x10   : > { %s10580_s27 = scalar_lea.hbm %s10579_s26, 1280  ;;  %s10585_s19 = scalar_lea.hbm %s12980_s4, 2560 }
  0x11   : > { %p10581_p10 = scmp.ne.s32.totalorder %s10579_s26, %s10580_s27  ;;  %p10586_p0 = scmp.lt.s32.totalorder %s10579_s26, %s12980_s4 }
  0x12   : > { %p10587_p1 = scmp.lt.s32.totalorder %s10585_s19, %s10580_s27 }
  0x13   : > { %p10583_p12 = pnand %p10582_p11, %p10581_p10 }
  0x14   : > { %p10588_p2 = por %p10587_p1, %p10586_p0 }
  0x15   : > { %p10584_p13 = pneg %p10583_p12 }
  0x17   : > { %p10589_p3 = pnand %p10588_p2, %p10584_p13 }
  0x19   : > { %10592 = shalt.err (!%p10589_p3)
}
  0x1a   : > { %s10644_s15 = smov 256   ;;  %s10645_s20 = smov 16  }
  0x1b   : > { %10485 = dma.hbm_to_vmem [thread:$0]  (!%p10736_p8), %s316_s24, 20480, %s318_s23, %s306_s25, %s10644_s15, %s10644_s15, %s10645_s20  }
  0x1c   : > { %p349_p4 = scmp.lt.s32.totalorder %s10642_s30, 3 }
  0x1e   : > { %p350_p6 = pnand %p8844_p9, %p349_p4 }
  0x1f   : > { %s355_s21 = sand.u32 (!%p350_p6), 1, %s10634_s28  }
  0x20   : > { %353 = sbr.rel (%p350_p6) target bundleno = 4135 (0x1027), region = 52  ;;  %s356_s26 = scalar_lea.sflag (!%p350_p6), [#allocation3], %s355_s21 }
  0x21   : > { %s10476_s22 = smul.u32 (!%p350_p6), 1280, %s355_s21 }
  0x23   : > { %s10758_s27 = scalar_lea.vmem (!%p350_p6), [#allocation2], %s10476_s22 }
  0x25   : > { %10625 = dma.done.wait (%p10730_p7), %s356_s26, 20480  }
  0x26   : > { %10627 = vsyncadd (%p10730_p7), %s356_s26, 4294946816  ;;  %p427_p10 = scmp.lt.s32.totalorder %s10711_s9, 1  ;;  %vm1873_vm0 = vcmask 1043456   ;;  %vm1814_vm1 = vcmask 64512  }
  0x28   : > { %s10766_s18 = scalar_select %p427_p10, %s10711_s9, 1 }
  0x2a   : > { %s10152_s30 = sshll.u32 %s10766_s18, 11  ;;  %s10150_s14 = sshll.u32 %s10766_s18, 5 }
  0x2b   : > { %s10772_s25 = scalar_lea.vmem %s12978_s2, %s10152_s30  ;;  %s10845_s19 = scalar_lea.vmem %s12976_s0, %s10150_s14 }
  0x2c   : > { %v9032_v0 = vld [vmem:[%s10772_s25 + $0x380] sm:$0xf]  ;;  %v10266_v5 = vld [vmem:[%s10772_s25 + $0x384] sm:$0xf]  ;;  %s10478_s17 = smul.u32 48, %s10766_s18  ;;  %s436_s16 = scalar_lea.vmem %s12977_s1, %s10150_s14 }
  0x2d   : > { %v10274_v1 = vld [vmem:[%s10772_s25 + $0x3bc] sm:$0xf0]  ;;  %v9034_v6 = vld [vmem:[%s10772_s25 + $0x3c0] sm:$0xf0]  ;;  %s10477_s21 = smul.u32 1280, %s10766_s18  ;;  %s10153_s9 = sshll.u32 %s10766_s18, 9 }
  0x2e   : > { %v9224_v2 = vld [vmem:[%s10772_s25 + $0x780] sm:$0xf]  ;;  %v9033_v3 = vor.u32 %v10274_v1, %v9032_v0  ;;  %v9037_v8 = vor.u32 %v10266_v5, %v9034_v6  ;;  %v10394_v9 = vld [vmem:[%s10772_s25 + $0x784] sm:$0xf]  ;;  %s10998_s20 = scalar_lea.vmem %s12982_s6, %s10478_s17  ;;  %s10479_s23 = smul.u32 40, %s10766_s18 }
  0x2f   : > { %v10402_v4 = vld [vmem:[%s10772_s25 + $0x7bc] sm:$0xf0]  ;;  %v9226_v10 = vld [vmem:[%s10772_s25 + $0x7c0] sm:$0xf0]  ;;  %s11133_s30 = scalar_lea.vmem %s12979_s3, %s10477_s21  ;;  %s12836_s15 = scalar_lea.vmem %s12981_s5, %s10153_s9 }
  0x30   : > { %v9225_v7 = vor.u32 %v10402_v4, %v9224_v2  ;;  %v9008_v11 = vld [vmem:[%s10772_s25 + $0x300] sm:$0xf]  ;;  %1558 = vmatpush.bf16.msra.mxu0 %v9033_v3  ;;  %v9229_v12 = vor.u32 %v10394_v9, %v9226_v10  ;;  %1586 = vmatpush.bf16.msra.mxu2 %v9037_v8  ;;  %v10250_v18 = vld [vmem:[%s10772_s25 + $0x304] sm:$0xf]  ;;  %s11429_s12 = scalar_lea.vmem %s12983_s7, %s10479_s23 }
  0x31   : > { %v10258_v13 = vld [vmem:[%s10772_s25 + $0x33c] sm:$0xf0]  ;;  %v9010_v19 = vld [vmem:[%s10772_s25 + $0x340] sm:$0xf0]  ;;  %s5956_s14 = scalar_select %p146_p5, 8, 16 }
  0x32   : > { %v9200_v14 = vld [vmem:[%s10772_s25 + $0x700] sm:$0xf]  ;;  %1572 = vmatpush.bf16.msra.mxu1 %v9225_v7  ;;  %v9009_v16 = vor.u32 %v10258_v13, %v9008_v11  ;;  %v10378_v20 = vld [vmem:[%s10772_s25 + $0x704] sm:$0xf]  ;;  %1600 = vmatpush.bf16.msra.mxu3 %v9229_v12  ;;  %v9013_v21 = vor.u32 %v10250_v18, %v9010_v19 }
  0x33   : > { %v10386_v15 = vld [vmem:[%s10772_s25 + $0x73c] sm:$0xf0]  ;;  %v9202_v22 = vld [vmem:[%s10772_s25 + $0x740] sm:$0xf0] }
  0x34   : > { %v9201_v17 = vor.u32 %v10386_v15, %v9200_v14  ;;  %v8984_v23 = vld [vmem:[%s10772_s25 + $0x280] sm:$0xf]  ;;  %v9205_v25 = vor.u32 %v10378_v20, %v9202_v22  ;;  %v10234_v28 = vld [vmem:[%s10772_s25 + $0x284] sm:$0xf]  ;;  %1559 = vmatpush.bf16.msra.mxu0 %v9009_v16  ;;  %1587 = vmatpush.bf16.msra.mxu2 %v9013_v21 }
  0x35   : > { %v10242_v24 = vld [vmem:[%s10772_s25 + $0x2bc] sm:$0xf0]  ;;  %v8986_v30 = vld [vmem:[%s10772_s25 + $0x2c0] sm:$0xf0] }
  0x36   : > { %v9176_v26 = vld [vmem:[%s10772_s25 + $0x680] sm:$0xf]  ;;  %v8985_v29 = vor.u32 %v10242_v24, %v8984_v23  ;;  %v10362_v31 = vld [vmem:[%s10772_s25 + $0x684] sm:$0xf]  ;;  %1573 = vmatpush.bf16.msra.mxu1 %v9201_v17  ;;  %v8989_v34 = vor.u32 %v10234_v28, %v8986_v30  ;;  %1601 = vmatpush.bf16.msra.mxu3 %v9205_v25  ;;  %v9040_v28 = vld [vmem:[%s10772_s25 + $0x388] sm:$0xf] }
  0x37   : > { %v10370_v27 = vld [vmem:[%s10772_s25 + $0x6bc] sm:$0xf0]  ;;  %v9178_v32 = vld [vmem:[%s10772_s25 + $0x6c0] sm:$0xf0]  ;;  %v9232_v30 = vld [vmem:[%s10772_s25 + $0x788] sm:$0xf] }
  0x38   : > { %v9177_v33 = vor.u32 %v10370_v27, %v9176_v26  ;;  %v8960_v35 = vld [vmem:[%s10772_s25 + $0x200] sm:$0xf]  ;;  %v9181_v38 = vor.u32 %v10362_v31, %v9178_v32  ;;  %v10218_v40 = vld [vmem:[%s10772_s25 + $0x204] sm:$0xf]  ;;  %1560 = vmatpush.bf16.msra.mxu0 %v8985_v29  ;;  %1588 = vmatpush.bf16.msra.mxu2 %v8989_v34  ;;  %v10275_v29 = vld [vmem:[%s10772_s25 + $0x3c4] sm:$0xf0] }
  0x39   : > { %v10226_v36 = vld [vmem:[%s10772_s25 + $0x23c] sm:$0xf0]  ;;  %v8962_v41 = vld [vmem:[%s10772_s25 + $0x240] sm:$0xf0]  ;;  %v10403_v31 = vld [vmem:[%s10772_s25 + $0x7c4] sm:$0xf0] }
  0x3a   : > { %v9152_v37 = vld [vmem:[%s10772_s25 + $0x600] sm:$0xf]  ;;  %v10346_v42 = vld [vmem:[%s10772_s25 + $0x604] sm:$0xf]  ;;  %v8961_v44 = vor.u32 %v10226_v36, %v8960_v35  ;;  %1574 = vmatpush.bf16.msra.mxu1 %v9177_v33  ;;  %v8965_v46 = vor.u32 %v10218_v40, %v8962_v41  ;;  %1602 = vmatpush.bf16.msra.mxu3 %v9181_v38  ;;  %v10267_v33 = vld [vmem:[%s10772_s25 + $0x38c] sm:$0xf] }
  0x3b   : > { %v10354_v39 = vld [vmem:[%s10772_s25 + $0x63c] sm:$0xf0]  ;;  %v9154_v43 = vld [vmem:[%s10772_s25 + $0x640] sm:$0xf0]  ;;  %v9042_v34 = vld [vmem:[%s10772_s25 + $0x3c8] sm:$0xf0] }
  0x3c   : > { %v9153_v45 = vor.u32 %v10354_v39, %v9152_v37  ;;  %v8936_v47 = vld [vmem:[%s10772_s25 + $0x180] sm:$0xf]  ;;  %v9157_v50 = vor.u32 %v10346_v42, %v9154_v43  ;;  %v10202_v52 = vld [vmem:[%s10772_s25 + $0x184] sm:$0xf]  ;;  %1561 = vmatpush.bf16.msra.mxu0 %v8961_v44  ;;  %1589 = vmatpush.bf16.msra.mxu2 %v8965_v46  ;;  %v10395_v35 = vld [vmem:[%s10772_s25 + $0x78c] sm:$0xf]  ;;  %v9041_v42 = vor.u32 %v10275_v29, %v9040_v28 }
  0x3d   : > { %v10210_v48 = vld [vmem:[%s10772_s25 + $0x1bc] sm:$0xf0]  ;;  %v8938_v53 = vld [vmem:[%s10772_s25 + $0x1c0] sm:$0xf0]  ;;  %v9234_v38 = vld [vmem:[%s10772_s25 + $0x7c8] sm:$0xf0]  ;;  %v9045_v46 = vor.u32 %v10267_v33, %v9042_v34 }
  0x3e   : > { %v9128_v49 = vld [vmem:[%s10772_s25 + $0x580] sm:$0xf]  ;;  %v10330_v54 = vld [vmem:[%s10772_s25 + $0x584] sm:$0xf]  ;;  %v8937_v56 = vor.u32 %v10210_v48, %v8936_v47  ;;  %1575 = vmatpush.bf16.msra.mxu1 %v9153_v45  ;;  %v8941_v58 = vor.u32 %v10202_v52, %v8938_v53  ;;  %1603 = vmatpush.bf16.msra.mxu3 %v9157_v50  ;;  %v469_v40 = vld [vmem:[%s10845_s19 + $0x10] sm:$0xff]  ;;  %v9233_v45 = vor.u32 %v10403_v31, %v9232_v30 }
  0x3f   : > { %v10338_v51 = vld [vmem:[%s10772_s25 + $0x5bc] sm:$0xf0]  ;;  %v9130_v55 = vld [vmem:[%s10772_s25 + $0x5c0] sm:$0xf0]  ;;  %v9016_v43 = vld [vmem:[%s10772_s25 + $0x308] sm:$0xf]  ;;  %v9237_v50 = vor.u32 %v10395_v35, %v9234_v38 }
  0x40   : > { %v9129_v57 = vor.u32 %v10338_v51, %v9128_v49  ;;  %v8912_v59 = vld [vmem:[%s10772_s25 + $0x100] sm:$0xf]  ;;  %v9133_v62 = vor.u32 %v10330_v54, %v9130_v55  ;;  %v10186_v0 = vld [vmem:[%s10772_s25 + $0x104] sm:$0xf]  ;;  %1562 = vmatpush.bf16.msra.mxu0 %v8937_v56  ;;  %1590 = vmatpush.bf16.msra.mxu2 %v8941_v58  ;;  %v10259_v44 = vld [vmem:[%s10772_s25 + $0x344] sm:$0xf0] }
  0x41   : > { %v10194_v60 = vld [vmem:[%s10772_s25 + $0x13c] sm:$0xf0]  ;;  %v8914_v1 = vld [vmem:[%s10772_s25 + $0x140] sm:$0xf0]  ;;  %v9208_v47 = vld [vmem:[%s10772_s25 + $0x708] sm:$0xf]  ;;  %v9017_v58 = vor.u32 %v10259_v44, %v9016_v43 }
  0x42   : > { %v9104_v61 = vld [vmem:[%s10772_s25 + $0x500] sm:$0xf]  ;;  %v10314_v2 = vld [vmem:[%s10772_s25 + $0x504] sm:$0xf]  ;;  %v8913_v4 = vor.u32 %v10194_v60, %v8912_v59  ;;  %1576 = vmatpush.bf16.msra.mxu1 %v9129_v57  ;;  %v8917_v6 = vor.u32 %v10186_v0, %v8914_v1  ;;  %1604 = vmatpush.bf16.msra.mxu3 %v9133_v62  ;;  %v468_v48 = vld [vmem:[%s10845_s19 + $0x8] sm:$0xff] }
  0x43   : > { %v10322_v63 = vld [vmem:[%s10772_s25 + $0x53c] sm:$0xf0]  ;;  %v9106_v3 = vld [vmem:[%s10772_s25 + $0x540] sm:$0xf0]  ;;  %v470_v49 = vld [vmem:[%s10845_s19 + $0x18] sm:$0xff] }
  0x44   : > { %v9105_v5 = vor.u32 %v10322_v63, %v9104_v61  ;;  %v8888_v7 = vld [vmem:[%s10772_s25 + $0x80] sm:$0xf]  ;;  %v9109_v10 = vor.u32 %v10314_v2, %v9106_v3  ;;  %v10170_v12 = vld [vmem:[%s10772_s25 + $0x84] sm:$0xf]  ;;  %1563 = vmatpush.bf16.msra.mxu0 %v8913_v4  ;;  %1591 = vmatpush.bf16.msra.mxu2 %v8917_v6  ;;  %v10387_v51 = vld [vmem:[%s10772_s25 + $0x744] sm:$0xf0]  ;;  %v10868_v57 = vpack.c.bf16 %v470_v49, %v468_v48 }
  0x45   : > { %v10178_v8 = vld [vmem:[%s10772_s25 + $0xbc] sm:$0xf0]  ;;  %v8890_v13 = vld [vmem:[%s10772_s25 + $0xc0] sm:$0xf0]  ;;  %v10251_v52 = vld [vmem:[%s10772_s25 + $0x30c] sm:$0xf]  ;;  %v9209_v59 = vor.u32 %v10387_v51, %v9208_v47 }
  0x46   : > { %v9080_v9 = vld [vmem:[%s10772_s25 + $0x480] sm:$0xf]  ;;  %v10298_v14 = vld [vmem:[%s10772_s25 + $0x484] sm:$0xf]  ;;  %v8889_v16 = vor.u32 %v10178_v8, %v8888_v7  ;;  %1577 = vmatpush.bf16.msra.mxu1 %v9105_v5  ;;  %v8893_v21 = vor.u32 %v10170_v12, %v8890_v13  ;;  %1605 = vmatpush.bf16.msra.mxu3 %v9109_v10  ;;  %v9018_v53 = vld [vmem:[%s10772_s25 + $0x348] sm:$0xf0] }
  0x47   : > { %v10306_v11 = vld [vmem:[%s10772_s25 + $0x4bc] sm:$0xf0]  ;;  %v9082_v15 = vld [vmem:[%s10772_s25 + $0x4c0] sm:$0xf0]  ;;  %v10379_v55 = vld [vmem:[%s10772_s25 + $0x70c] sm:$0xf]  ;;  %v9021_v60 = vor.u32 %v10251_v52, %v9018_v53 }
  0x48   : > { %v8864_v17 = vld [vmem:[%s10772_s25] sm:$0xf]  ;;  %v9081_v20 = vor.u32 %v10306_v11, %v9080_v9  ;;  %v10154_v23 = vld [vmem:[%s10772_s25 + $0x4] sm:$0xf]  ;;  %v9085_v25 = vor.u32 %v10298_v14, %v9082_v15  ;;  %1564 = vmatpush.bf16.msra.mxu0 %v8889_v16  ;;  %1592 = vmatpush.bf16.msra.mxu2 %v8893_v21  ;;  %v9210_v56 = vld [vmem:[%s10772_s25 + $0x748] sm:$0xf0] }
  0x49   : > { %v10162_v18 = vld [vmem:[%s10772_s25 + $0x3c] sm:$0xf0]  ;;  %v8866_v24 = vld [vmem:[%s10772_s25 + $0x40] sm:$0xf0]  ;;  %v8992_v61 = vld [vmem:[%s10772_s25 + $0x288] sm:$0xf]  ;;  %v9213_v0 = vor.u32 %v10379_v55, %v9210_v56 }
  0x4a   : > { %v9056_v19 = vld [vmem:[%s10772_s25 + $0x400] sm:$0xf]  ;;  %v10282_v26 = vld [vmem:[%s10772_s25 + $0x404] sm:$0xf]  ;;  %v8865_v32 = vor.u32 %v10162_v18, %v8864_v17  ;;  %1578 = vmatpush.bf16.msra.mxu1 %v9081_v20  ;;  %v8869_v37 = vor.u32 %v10154_v23, %v8866_v24  ;;  %1606 = vmatpush.bf16.msra.mxu3 %v9085_v25  ;;  %v10243_v62 = vld [vmem:[%s10772_s25 + $0x2c4] sm:$0xf0] }
  0x4b   : > { %v10290_v22 = vld [vmem:[%s10772_s25 + $0x43c] sm:$0xf0]  ;;  %v9058_v27 = vld [vmem:[%s10772_s25 + $0x440] sm:$0xf0]  ;;  %v9184_v63 = vld [vmem:[%s10772_s25 + $0x688] sm:$0xf]  ;;  %v8993_v6 = vor.u32 %v10243_v62, %v8992_v61 }
  0x4c   : > { %v9057_v36 = vor.u32 %v10290_v22, %v9056_v19  ;;  %v467_v39 = vld [vmem:[%s10845_s19] sm:$0xff]  ;;  %v9061_v41 = vor.u32 %v10282_v26, %v9058_v27  ;;  %1565 = vmatpush.bf16.msra.mxu0 %v8865_v32  ;;  %1593 = vmatpush.bf16.msra.mxu2 %v8869_v37  ;;  %v10371_v1 = vld [vmem:[%s10772_s25 + $0x6c4] sm:$0xf0]  ;;  %v10235_v2 = vld [vmem:[%s10772_s25 + $0x28c] sm:$0xf] }
  0x4d   : > { %v10864_v54 = vpack.c.bf16 %v469_v40, %v467_v39  ;;  %v8994_v3 = vld [vmem:[%s10772_s25 + $0x2c8] sm:$0xf0]  ;;  %v9185_v7 = vor.u32 %v10371_v1, %v9184_v63  ;;  %v8968_v9 = vld [vmem:[%s10772_s25 + $0x208] sm:$0xf] }
  0x4e   : > { %1579 = vmatpush.bf16.msra.mxu1 %v9057_v36  ;;  %1607 = vmatpush.bf16.msra.mxu3 %v9061_v41  ;;  %v10363_v4 = vld [vmem:[%s10772_s25 + $0x68c] sm:$0xf]  ;;  %v8997_v8 = vor.u32 %v10235_v2, %v8994_v3  ;;  %v10227_v10 = vld [vmem:[%s10772_s25 + $0x244] sm:$0xf0] }
  0x4f   : > { %1594 = vmatmul.bf16.vlgmr.msra.gmra.mxu2 %v10864_v54  ;;  %v9186_v5 = vld [vmem:[%s10772_s25 + $0x6c8] sm:$0xf0]  ;;  %1566 = vmatmul.bf16.vlgmr.msra.gmra.mxu0 %v10864_v54  ;;  %v9160_v11 = vld [vmem:[%s10772_s25 + $0x608] sm:$0xf]  ;;  %v8969_v18 = vor.u32 %v10227_v10, %v8968_v9 }
  0x50   : > { %1614 = vmatpush.bf16.msrb.mxu0 %v9041_v42  ;;  %1642 = vmatpush.bf16.msrb.mxu2 %v9045_v46  ;;  %v9189_v12 = vor.u32 %v10363_v4, %v9186_v5  ;;  %v10355_v13 = vld [vmem:[%s10772_s25 + $0x644] sm:$0xf0]  ;;  %v10219_v14 = vld [vmem:[%s10772_s25 + $0x20c] sm:$0xf]  ;;  %v10268_v4 = vld [vmem:[%s10772_s25 + $0x394] sm:$0xf] }
  0x51   : > { %1608 = vmatmul.bf16.vlgmr.msra.gmra.mxu3 %v10868_v57  ;;  %1580 = vmatmul.bf16.vlgmr.msra.gmra.mxu1 %v10868_v57  ;;  %v8970_v15 = vld [vmem:[%s10772_s25 + $0x248] sm:$0xf0]  ;;  %v9161_v19 = vor.u32 %v10355_v13, %v9160_v11  ;;  %v8944_v21 = vld [vmem:[%s10772_s25 + $0x188] sm:$0xf]  ;;  %v9050_v5 = vld [vmem:[%s10772_s25 + $0x3d0] sm:$0xf0] }
  0x52   : > { %1628 = vmatpush.bf16.msrb.mxu1 %v9233_v45  ;;  %1656 = vmatpush.bf16.msrb.mxu3 %v9237_v50  ;;  %v10347_v16 = vld [vmem:[%s10772_s25 + $0x60c] sm:$0xf]  ;;  %v8973_v20 = vor.u32 %v10219_v14, %v8970_v15  ;;  %v10211_v22 = vld [vmem:[%s10772_s25 + $0x1c4] sm:$0xf0]  ;;  %v9048_v13 = vld [vmem:[%s10772_s25 + $0x390] sm:$0xf] }
  0x53   : > { %v9162_v17 = vld [vmem:[%s10772_s25 + $0x648] sm:$0xf0]  ;;  %v9136_v23 = vld [vmem:[%s10772_s25 + $0x588] sm:$0xf]  ;;  %v8945_v30 = vor.u32 %v10211_v22, %v8944_v21  ;;  %v10276_v14 = vld [vmem:[%s10772_s25 + $0x3cc] sm:$0xf0] }
  0x54   : > { %1615 = vmatpush.bf16.msrb.mxu0 %v9017_v58  ;;  %1643 = vmatpush.bf16.msrb.mxu2 %v9021_v60  ;;  %v9165_v24 = vor.u32 %v10347_v16, %v9162_v17  ;;  %v10339_v25 = vld [vmem:[%s10772_s25 + $0x5c4] sm:$0xf0]  ;;  %v10203_v26 = vld [vmem:[%s10772_s25 + $0x18c] sm:$0xf]  ;;  %v10396_v15 = vld [vmem:[%s10772_s25 + $0x794] sm:$0xf]  ;;  %v9049_v22 = vor.u32 %v10276_v14, %v9048_v13 }
  0x55   : > { %v8946_v27 = vld [vmem:[%s10772_s25 + $0x1c8] sm:$0xf0]  ;;  %v9137_v31 = vor.u32 %v10339_v25, %v9136_v23  ;;  %v8920_v33 = vld [vmem:[%s10772_s25 + $0x108] sm:$0xf]  ;;  %v9242_v17 = vld [vmem:[%s10772_s25 + $0x7d0] sm:$0xf0] }
  0x56   : > { %1629 = vmatpush.bf16.msrb.mxu1 %v9209_v59  ;;  %1657 = vmatpush.bf16.msrb.mxu3 %v9213_v0  ;;  %v10331_v28 = vld [vmem:[%s10772_s25 + $0x58c] sm:$0xf]  ;;  %v8949_v32 = vor.u32 %v10203_v26, %v8946_v27  ;;  %v10195_v34 = vld [vmem:[%s10772_s25 + $0x144] sm:$0xf0]  ;;  %v10388_v21 = vld [vmem:[%s10772_s25 + $0x74c] sm:$0xf0]  ;;  %v9245_v23 = vor.u32 %v10396_v15, %v9242_v17 }
  0x57   : > { %v9138_v29 = vld [vmem:[%s10772_s25 + $0x5c8] sm:$0xf0]  ;;  %v9112_v35 = vld [vmem:[%s10772_s25 + $0x508] sm:$0xf]  ;;  %v8921_v42 = vor.u32 %v10195_v34, %v8920_v33  ;;  %v9024_v25 = vld [vmem:[%s10772_s25 + $0x310] sm:$0xf] }
  0x58   : > { %1616 = vmatpush.bf16.msrb.mxu0 %v8993_v6  ;;  %1644 = vmatpush.bf16.msrb.mxu2 %v8997_v8  ;;  %v9141_v36 = vor.u32 %v10331_v28, %v9138_v29  ;;  %v10323_v37 = vld [vmem:[%s10772_s25 + $0x544] sm:$0xf0]  ;;  %v10187_v38 = vld [vmem:[%s10772_s25 + $0x10c] sm:$0xf]  ;;  %v10404_v8 = vld [vmem:[%s10772_s25 + $0x7cc] sm:$0xf0] }
  0x59   : > { %v8922_v39 = vld [vmem:[%s10772_s25 + $0x148] sm:$0xf0]  ;;  %v9113_v43 = vor.u32 %v10323_v37, %v9112_v35  ;;  %v8896_v45 = vld [vmem:[%s10772_s25 + $0x88] sm:$0xf]  ;;  %v10260_v26 = vld [vmem:[%s10772_s25 + $0x34c] sm:$0xf0] }
  0x5a   : > { %1630 = vmatpush.bf16.msrb.mxu1 %v9185_v7  ;;  %1658 = vmatpush.bf16.msrb.mxu3 %v9189_v12  ;;  %v10315_v40 = vld [vmem:[%s10772_s25 + $0x50c] sm:$0xf]  ;;  %v8925_v44 = vor.u32 %v10187_v38, %v8922_v39  ;;  %v10179_v46 = vld [vmem:[%s10772_s25 + $0xc4] sm:$0xf0]  ;;  %v9240_v7 = vld [vmem:[%s10772_s25 + $0x790] sm:$0xf]  ;;  %v9053_v12 = vor.u32 %v10268_v4, %v9050_v5 }
  0x5b   : > { %v9114_v41 = vld [vmem:[%s10772_s25 + $0x548] sm:$0xf0]  ;;  %v9088_v47 = vld [vmem:[%s10772_s25 + $0x488] sm:$0xf]  ;;  %v8897_v55 = vor.u32 %v10179_v46, %v8896_v45  ;;  %v9241_v16 = vor.u32 %v10404_v8, %v9240_v7  ;;  %v10380_v28 = vld [vmem:[%s10772_s25 + $0x714] sm:$0xf] }
  0x5c   : > { %1617 = vmatpush.bf16.msrb.mxu0 %v8969_v18  ;;  %1645 = vmatpush.bf16.msrb.mxu2 %v8973_v20  ;;  %v9117_v48 = vor.u32 %v10315_v40, %v9114_v41  ;;  %v10307_v49 = vld [vmem:[%s10772_s25 + $0x4c4] sm:$0xf0]  ;;  %v10171_v50 = vld [vmem:[%s10772_s25 + $0x8c] sm:$0xf]  ;;  %v10252_v18 = vld [vmem:[%s10772_s25 + $0x314] sm:$0xf] }
  0x5d   : > { %v8898_v51 = vld [vmem:[%s10772_s25 + $0xc8] sm:$0xf0]  ;;  %v8872_v56 = vld [vmem:[%s10772_s25 + $0x8] sm:$0xf]  ;;  %v9089_v58 = vor.u32 %v10307_v49, %v9088_v47  ;;  %v9216_v20 = vld [vmem:[%s10772_s25 + $0x710] sm:$0xf] }
  0x5e   : > { %1631 = vmatpush.bf16.msrb.mxu1 %v9161_v19  ;;  %1659 = vmatpush.bf16.msrb.mxu3 %v9165_v24  ;;  %v10299_v52 = vld [vmem:[%s10772_s25 + $0x48c] sm:$0xf]  ;;  %v8901_v59 = vor.u32 %v10171_v50, %v8898_v51  ;;  %v10163_v60 = vld [vmem:[%s10772_s25 + $0x44] sm:$0xf0]  ;;  %v9026_v19 = vld [vmem:[%s10772_s25 + $0x350] sm:$0xf0]  ;;  %v9217_v27 = vor.u32 %v10388_v21, %v9216_v20 }
  0x5f   : > { %v9090_v53 = vld [vmem:[%s10772_s25 + $0x4c8] sm:$0xf0]  ;;  %v9064_v61 = vld [vmem:[%s10772_s25 + $0x408] sm:$0xf]  ;;  %v8873_v6 = vor.u32 %v10163_v60, %v8872_v56  ;;  %v9029_v24 = vor.u32 %v10252_v18, %v9026_v19  ;;  %v9218_v29 = vld [vmem:[%s10772_s25 + $0x750] sm:$0xf0] }
  0x60   : > { %1618 = vmatpush.bf16.msrb.mxu0 %v8945_v30  ;;  %1646 = vmatpush.bf16.msrb.mxu2 %v8949_v32  ;;  %v10291_v62 = vld [vmem:[%s10772_s25 + $0x444] sm:$0xf0]  ;;  %v9093_v63 = vor.u32 %v10299_v52, %v9090_v53  ;;  %v10155_v0 = vld [vmem:[%s10772_s25 + $0xc] sm:$0xf]  ;;  %v9025_v30 = vor.u32 %v10260_v26, %v9024_v25  ;;  %v10236_v32 = vld [vmem:[%s10772_s25 + $0x294] sm:$0xf] }
  0x61   : > { %v8874_v1 = vld [vmem:[%s10772_s25 + $0x48] sm:$0xf0]  ;;  %v9065_v9 = vor.u32 %v10291_v62, %v9064_v61  ;;  %v9002_v33 = vld [vmem:[%s10772_s25 + $0x2d0] sm:$0xf0]  ;;  %v9000_v35 = vld [vmem:[%s10772_s25 + $0x290] sm:$0xf] }
  0x62   : > { %1632 = vmatpush.bf16.msrb.mxu1 %v9137_v31  ;;  %1660 = vmatpush.bf16.msrb.mxu3 %v9141_v36  ;;  %v10283_v2 = vld [vmem:[%s10772_s25 + $0x40c] sm:$0xf]  ;;  %v8877_v10 = vor.u32 %v10155_v0, %v8874_v1  ;;  %v9221_v31 = vor.u32 %v10380_v28, %v9218_v29  ;;  %v9005_v34 = vor.u32 %v10236_v32, %v9002_v33  ;;  %v10244_v36 = vld [vmem:[%s10772_s25 + $0x2cc] sm:$0xf0]  ;;  %v10364_v40 = vld [vmem:[%s10772_s25 + $0x694] sm:$0xf] }
  0x63   : > { %v9066_v3 = vld [vmem:[%s10772_s25 + $0x448] sm:$0xf0]  ;;  %v9192_v37 = vld [vmem:[%s10772_s25 + $0x690] sm:$0xf]  ;;  %v9001_v38 = vor.u32 %v10244_v36, %v9000_v35  ;;  %v9194_v41 = vld [vmem:[%s10772_s25 + $0x6d0] sm:$0xf0] }
  0x64   : > { %1619 = vmatpush.bf16.msrb.mxu0 %v8921_v42  ;;  %1647 = vmatpush.bf16.msrb.mxu2 %v8925_v44  ;;  %v9069_v11 = vor.u32 %v10283_v2, %v9066_v3  ;;  %v10372_v39 = vld [vmem:[%s10772_s25 + $0x6cc] sm:$0xf0]  ;;  %v10220_v44 = vld [vmem:[%s10772_s25 + $0x214] sm:$0xf] }
  0x65   : > { %v9193_v42 = vor.u32 %v10372_v39, %v9192_v37  ;;  %v8978_v45 = vld [vmem:[%s10772_s25 + $0x250] sm:$0xf0]  ;;  %v8976_v46 = vld [vmem:[%s10772_s25 + $0x210] sm:$0xf] }
  0x66   : > { %1633 = vmatpush.bf16.msrb.mxu1 %v9113_v43  ;;  %1661 = vmatpush.bf16.msrb.mxu3 %v9117_v48  ;;  %v9197_v43 = vor.u32 %v10364_v40, %v9194_v41  ;;  %v8981_v47 = vor.u32 %v10220_v44, %v8978_v45  ;;  %v10228_v48 = vld [vmem:[%s10772_s25 + $0x24c] sm:$0xf0]  ;;  %v10348_v53 = vld [vmem:[%s10772_s25 + $0x614] sm:$0xf] }
  0x67   : > { %v9168_v49 = vld [vmem:[%s10772_s25 + $0x610] sm:$0xf]  ;;  %v8977_v51 = vor.u32 %v10228_v48, %v8976_v46  ;;  %v10204_v56 = vld [vmem:[%s10772_s25 + $0x194] sm:$0xf] }
  0x68   : > { %1620 = vmatpush.bf16.msrb.mxu0 %v8897_v55  ;;  %1648 = vmatpush.bf16.msrb.mxu2 %v8901_v59  ;;  %v10356_v50 = vld [vmem:[%s10772_s25 + $0x64c] sm:$0xf0]  ;;  %v9170_v55 = vld [vmem:[%s10772_s25 + $0x650] sm:$0xf0] }
  0x69   : > { %v9169_v52 = vor.u32 %v10356_v50, %v9168_v49  ;;  %v8954_v59 = vld [vmem:[%s10772_s25 + $0x1d0] sm:$0xf0]  ;;  %v8952_v61 = vld [vmem:[%s10772_s25 + $0x190] sm:$0xf]  ;;  %v11007_v49 = vld [vmem:[%s10998_s20 + $0x8] sm:$0xf] }
  0x6a   : > { %1634 = vmatpush.bf16.msrb.mxu1 %v9089_v58  ;;  %1662 = vmatpush.bf16.msrb.mxu3 %v9093_v63  ;;  %v9173_v58 = vor.u32 %v10348_v53, %v9170_v55  ;;  %v8957_v60 = vor.u32 %v10204_v56, %v8954_v59  ;;  %v10212_v62 = vld [vmem:[%s10772_s25 + $0x1cc] sm:$0xf0]  ;;  %v10332_v2 = vld [vmem:[%s10772_s25 + $0x594] sm:$0xf]  ;;  %v1050_v53 = vld [vmem:[%s10998_s20 + $0x18] sm:$0xf] }
  0x6b   : > { %v9144_v63 = vld [vmem:[%s10772_s25 + $0x590] sm:$0xf]  ;;  %v8953_v0 = vor.u32 %v10212_v62, %v8952_v61  ;;  %v9146_v3 = vld [vmem:[%s10772_s25 + $0x5d0] sm:$0xf0]  ;;  %v1073_v56 = vperm.slane %v11007_v49, 0  ;;  %v1075_v59 = vperm.slane %v1050_v53, 0 }
  0x6c   : > { %1621 = vmatpush.bf16.msrb.mxu0 %v8873_v6  ;;  %1649 = vmatpush.bf16.msrb.mxu2 %v8877_v10  ;;  %v10340_v1 = vld [vmem:[%s10772_s25 + $0x5cc] sm:$0xf0]  ;;  %v9149_v5 = vor.u32 %v10332_v2, %v9146_v3  ;;  %v10188_v6 = vld [vmem:[%s10772_s25 + $0x114] sm:$0xf] }
  0x6d   : > { %v9145_v4 = vor.u32 %v10340_v1, %v9144_v63  ;;  %v8930_v7 = vld [vmem:[%s10772_s25 + $0x150] sm:$0xf0]  ;;  %v8928_v8 = vld [vmem:[%s10772_s25 + $0x110] sm:$0xf] }
  0x6e   : > { %1635 = vmatpush.bf16.msrb.mxu1 %v9065_v9  ;;  %1663 = vmatpush.bf16.msrb.mxu3 %v9069_v11  ;;  %v8933_v9 = vor.u32 %v10188_v6, %v8930_v7  ;;  %v10196_v10 = vld [vmem:[%s10772_s25 + $0x14c] sm:$0xf0]  ;;  %v10316_v15 = vld [vmem:[%s10772_s25 + $0x514] sm:$0xf] }
  0x6f   : > { %1622 = vmatmul.bf16.vlgmr.msrb.gmra.mxu0 %v10864_v54  ;;  %1650 = vmatmul.bf16.vlgmr.msrb.gmra.mxu2 %v10864_v54  ;;  %v9120_v11 = vld [vmem:[%s10772_s25 + $0x510] sm:$0xf]  ;;  %v8929_v13 = vor.u32 %v10196_v10, %v8928_v8  ;;  %v10172_v17 = vld [vmem:[%s10772_s25 + $0x94] sm:$0xf] }
  0x70   : > { %1698 = vmatpush.bf16.msra.mxu2 %v9053_v12  ;;  %1670 = vmatpush.bf16.msra.mxu0 %v9049_v22  ;;  %v10324_v12 = vld [vmem:[%s10772_s25 + $0x54c] sm:$0xf0]  ;;  %v8906_v19 = vld [vmem:[%s10772_s25 + $0xd0] sm:$0xf0] }
  0x71   : > { %1636 = vmatmul.bf16.vlgmr.msrb.gmra.mxu1 %v10868_v57  ;;  %1664 = vmatmul.bf16.vlgmr.msrb.gmra.mxu3 %v10868_v57  ;;  %v9121_v14 = vor.u32 %v10324_v12, %v9120_v11  ;;  %v8909_v20 = vor.u32 %v10172_v17, %v8906_v19  ;;  %v8904_v21 = vld [vmem:[%s10772_s25 + $0x90] sm:$0xf]  ;;  %v10300_v26 = vld [vmem:[%s10772_s25 + $0x494] sm:$0xf] }
  0x72   : > { %1684 = vmatpush.bf16.msra.mxu1 %v9241_v16  ;;  %1712 = vmatpush.bf16.msra.mxu3 %v9245_v23  ;;  %v9122_v16 = vld [vmem:[%s10772_s25 + $0x550] sm:$0xf0]  ;;  %v10180_v22 = vld [vmem:[%s10772_s25 + $0xcc] sm:$0xf0] }
  0x73   : > { %v9125_v18 = vor.u32 %v10316_v15, %v9122_v16  ;;  %v9096_v23 = vld [vmem:[%s10772_s25 + $0x490] sm:$0xf]  ;;  %v9098_v28 = vld [vmem:[%s10772_s25 + $0x4d0] sm:$0xf0] }
  0x74   : > { %1699 = vmatpush.bf16.msra.mxu2 %v9029_v24  ;;  %1671 = vmatpush.bf16.msra.mxu0 %v9025_v30  ;;  %v8905_v24 = vor.u32 %v10180_v22, %v8904_v21  ;;  %v10308_v25 = vld [vmem:[%s10772_s25 + $0x4cc] sm:$0xf0]  ;;  %v10156_v29 = vld [vmem:[%s10772_s25 + $0x14] sm:$0xf] }
  0x75   : > { %v8882_v30 = vld [vmem:[%s10772_s25 + $0x50] sm:$0xf0]  ;;  %v8880_v33 = vld [vmem:[%s10772_s25 + $0x10] sm:$0xf] }
  0x76   : > { %1685 = vmatpush.bf16.msra.mxu1 %v9217_v27  ;;  %1713 = vmatpush.bf16.msra.mxu3 %v9221_v31  ;;  %v9097_v27 = vor.u32 %v10308_v25, %v9096_v23  ;;  %v9101_v31 = vor.u32 %v10300_v26, %v9098_v28  ;;  %v8885_v32 = vor.u32 %v10156_v29, %v8882_v30  ;;  %v9072_v35 = vld [vmem:[%s10772_s25 + $0x410] sm:$0xf]  ;;  %v9074_v39 = vld [vmem:[%s10772_s25 + $0x450] sm:$0xf0] }
  0x77   : > { %v10292_v37 = vld [vmem:[%s10772_s25 + $0x44c] sm:$0xf0] }
  0x78   : > { %1700 = vmatpush.bf16.msra.mxu2 %v9005_v34  ;;  %1672 = vmatpush.bf16.msra.mxu0 %v9001_v38  ;;  %v10164_v34 = vld [vmem:[%s10772_s25 + $0x4c] sm:$0xf0]  ;;  %v10284_v38 = vld [vmem:[%s10772_s25 + $0x414] sm:$0xf]  ;;  %v9073_v40 = vor.u32 %v10292_v37, %v9072_v35 }
  0x79   : > { %v8881_v36 = vor.u32 %v10164_v34, %v8880_v33  ;;  %v9077_v41 = vor.u32 %v10284_v38, %v9074_v39  ;;  %v1051_v38 = vld [vmem:[%s10998_s20 + $0x20] sm:$0xf]  ;;  %v1052_v39 = vld [vmem:[%s10998_s20 + $0x28] sm:$0xf] }
  0x7a   : > { %1686 = vmatpush.bf16.msra.mxu1 %v9193_v42  ;;  %1714 = vmatpush.bf16.msra.mxu3 %v9197_v43 }
  0x7c   : > { %1701 = vmatpush.bf16.msra.mxu2 %v8981_v47  ;;  %1673 = vmatpush.bf16.msra.mxu0 %v8977_v51  ;;  %v11001_v47 = vld [vmem:[%s10998_s20 + $0x10] sm:$0xf] }
  0x7d   : > { %v1074_v51 = vperm.slane %v11001_v47, 0 }
  0x7e   : > { %1687 = vmatpush.bf16.msra.mxu1 %v9169_v52  ;;  %1715 = vmatpush.bf16.msra.mxu3 %v9173_v58 }
  0x80   : > { %1702 = vmatpush.bf16.msra.mxu2 %v8957_v60  ;;  %1674 = vmatpush.bf16.msra.mxu0 %v8953_v0 }
  0x82   : > { %1688 = vmatpush.bf16.msra.mxu1 %v9145_v4  ;;  %1716 = vmatpush.bf16.msra.mxu3 %v9149_v5 }
  0x84   : > { %1703 = vmatpush.bf16.msra.mxu2 %v8933_v9  ;;  %1675 = vmatpush.bf16.msra.mxu0 %v8929_v13 }
  0x86   : > { %1689 = vmatpush.bf16.msra.mxu1 %v9121_v14  ;;  %1717 = vmatpush.bf16.msra.mxu3 %v9125_v18 }
  0x88   : > { %1704 = vmatpush.bf16.msra.mxu2 %v8909_v20  ;;  %1676 = vmatpush.bf16.msra.mxu0 %v8905_v24 }
  0x8a   : > { %1690 = vmatpush.bf16.msra.mxu1 %v9097_v27  ;;  %1718 = vmatpush.bf16.msra.mxu3 %v9101_v31 }
  0x8c   : > { %1705 = vmatpush.bf16.msra.mxu2 %v8885_v32  ;;  %1677 = vmatpush.bf16.msra.mxu0 %v8881_v36 }
  0x8e   : > { %1691 = vmatpush.bf16.msra.mxu1 %v9073_v40  ;;  %1719 = vmatpush.bf16.msra.mxu3 %v9077_v41  ;;  %v1076_v40 = vperm.slane %v1051_v38, 0 }
  0x8f   : > { %1706 = vmatmul.bf16.vlgmr.msra.gmra.mxu2 %v10864_v54  ;;  %1678 = vmatmul.bf16.vlgmr.msra.gmra.mxu0 %v10864_v54 }
  0x91   : > { %1692 = vmatmul.bf16.vlgmr.msra.gmra.mxu1 %v10868_v57  ;;  %1720 = vmatmul.bf16.vlgmr.msra.gmra.mxu3 %v10868_v57  ;;  %v11004_v57 = vld [vmem:[%s10998_s20] sm:$0xf] }
  0x92   : > { %v1072_v55 = vperm.slane %v11004_v57, 0 }
  0xcc   : > { %v1567_v42 = vpop.f32.mrf.mxu0 }
  0xcd   : > { %v1568_v60 = vadd.f32 %v1567_v42, %v1072_v55  ;;  %v1077_v42 = vperm.slane %v1052_v39, 0  ;;  %v10405_v39 = vld [vmem:[%s10772_s25 + $0x7d4] sm:$0xf0] }
  0xce   : > { %v1581_v43 = vpop.f32.mrf.mxu1 }
  0xcf   : > { %v1582_v4 = vadd.f32 %v1581_v43, %v1568_v60 }
  0xd2   : > { %v1595_v44 = vpop.f32.mrf.mxu2 }
  0xd3   : > { %v1596_v61 = vadd.f32 %v1595_v44, %v1073_v56 }
  0xd4   : > { %v1609_v45 = vpop.f32.mrf.mxu3  ;;  %v1569_v46 = vpop.f32.mrf.mxu0 }
  0xd5   : > { %v1610_v5 = vadd.f32 %v1609_v45, %v1596_v61  ;;  %v1570_v12 = vadd.f32 %v1569_v46, %v1072_v55 }
  0xd6   : > { %v1583_v54 = vpop.f32.mrf.mxu1 }
  0xd7   : > { %v1726_v11 = vpack.c.bf16 %v1610_v5, %v1582_v4  ;;  %v1584_v24 = vadd.f32 %v1583_v54, %v1570_v12 }
  0xd9   : > { %v1733_v22 = vunpack.c.l.b16 %v1726_v11  ;;  %v1734_v23 = vunpack.c.h.b16 %v1726_v11 }
  0xda   : > { %v1597_v48 = vpop.f32.mrf.mxu2 }
  0xdb   : > { %v1598_v13 = vadd.f32 %v1597_v48, %v1073_v56  ;;  %v1735_v29 = vpack.c.b16 %v1733_v22, %v1733_v22  ;;  %v1736_v30 = vpack.c.b16 %v1734_v23, %v1734_v23 }
  0xdc   : > { %v1611_v50 = vpop.f32.mrf.mxu3 }
  0xdd   : > { %v1612_v25 = vadd.f32 %v1611_v50, %v1598_v13 }
  0xdf   : > { %v1729_v31 = vpack.c.bf16 %v1612_v25, %v1584_v24 }
  0xe1   : > { %v1773_v34 = vunpack.c.l.b16 %v1729_v31  ;;  %v1774_v35 = vunpack.c.h.b16 %v1729_v31 }
  0xe3   : > { %v1775_v36 = vpack.c.b16 %v1773_v34, %v1773_v34  ;;  %v1776_v37 = vpack.c.b16 %v1774_v35, %v1774_v35  ;;  %v9308_v35 = vld [vmem:[%s10772_s25 + $0x398] sm:$0xf] }
  0xec   : > { %v1623_v52 = vpop.f32.mrf.mxu0 }
  0xed   : > { %v1624_v58 = vadd.f32 %v1623_v52, %v1074_v51 }
  0xee   : > { %v1637_v62 = vpop.f32.mrf.mxu1 }
  0xef   : > { %v1638_v0 = vadd.f32 %v1637_v62, %v1624_v58 }
  0xf2   : > { %v1651_v63 = vpop.f32.mrf.mxu2 }
  0xf3   : > { %v1652_v1 = vadd.f32 %v1651_v63, %v1075_v59 }
  0xf4   : > { %v1665_v2 = vpop.f32.mrf.mxu3  ;;  %v1625_v6 = vpop.f32.mrf.mxu0 }
  0xf5   : > { %v1666_v3 = vadd.f32 %v1665_v2, %v1652_v1  ;;  %v1626_v10 = vadd.f32 %v1625_v6, %v1074_v51 }
  0xf6   : > { %v1639_v18 = vpop.f32.mrf.mxu1 }
  0xf7   : > { %v1727_v7 = vpack.c.bf16 %v1666_v3, %v1638_v0  ;;  %v1640_v20 = vadd.f32 %v1639_v18, %v1626_v10 }
  0xf9   : > { %v1740_v8 = vunpack.c.l.b16 %v1727_v7  ;;  %v1741_v9 = vunpack.c.h.b16 %v1727_v7 }
  0xfa   : > { %v1653_v14 = vpop.f32.mrf.mxu2 }
  0xfb   : > { %v1742_v15 = vpack.c.b16 %v1740_v8, %v1740_v8  ;;  %v1743_v16 = vpack.c.b16 %v1741_v9, %v1741_v9  ;;  %v1654_v17 = vadd.f32 %v1653_v14, %v1075_v59 }
  0xfc   : > { %v1667_v19 = vpop.f32.mrf.mxu3 }
  0xfd   : > { %v1668_v21 = vadd.f32 %v1667_v19, %v1654_v17  ;;  %1753 = vmatpush.bf16.xpose.msrb.mxu0 %v1742_v15  ;;  %1766 = vmatpush.bf16.xpose.msrb.mxu1 %v1743_v16 }
  0xff   : > { %v1730_v26 = vpack.c.bf16 %v1668_v21, %v1640_v20 }
 0x101   : > { %v1780_v27 = vunpack.c.l.b16 %v1730_v26  ;;  %v1781_v28 = vunpack.c.h.b16 %v1730_v26 }
 0x103   : > { %v1782_v32 = vpack.c.b16 %v1780_v27, %v1780_v27  ;;  %v1783_v33 = vpack.c.b16 %v1781_v28, %v1781_v28 }
 0x104   : > { %1754 = vmatmul.bf16.vlgmr.msrb.gmra.mxu0 %v1735_v29  ;;  %1767 = vmatmul.bf16.vlgmr.msrb.gmra.mxu1 %v1736_v30 }
 0x105   : > { %1793 = vmatpush.bf16.xpose.msrb.mxu2 %v1782_v32  ;;  %1806 = vmatpush.bf16.xpose.msrb.mxu3 %v1783_v33 }
 0x10c   : > { %1794 = vmatmul.bf16.vlgmr.msrb.gmra.mxu2 %v1775_v36  ;;  %1807 = vmatmul.bf16.vlgmr.msrb.gmra.mxu3 %v1776_v37  ;;  %v1679_v41 = vpop.f32.mrf.mxu0  ;;  %v10277_v36 = vld [vmem:[%s10772_s25 + $0x3d4] sm:$0xf0] }
 0x10d   : > { %v1680_v43 = vadd.f32 %v1679_v41, %v1076_v40  ;;  %v9372_v37 = vld [vmem:[%s10772_s25 + $0x798] sm:$0xf]  ;;  %v9309_v38 = vor.u32 %v10277_v36, %v9308_v35  ;;  %v9310_v41 = vld [vmem:[%s10772_s25 + $0x3d8] sm:$0xf0] }
 0x10e   : > { %v1693_v44 = vpop.f32.mrf.mxu1  ;;  %v10341_v35 = vld [vmem:[%s10772_s25 + $0x5d4] sm:$0xf0]  ;;  %v10205_v36 = vld [vmem:[%s10772_s25 + $0x19c] sm:$0xf] }
 0x10f   : > { %v1694_v54 = vadd.f32 %v1693_v44, %v1680_v43  ;;  %v9373_v43 = vor.u32 %v10405_v39, %v9372_v37  ;;  %v9278_v37 = vld [vmem:[%s10772_s25 + $0x1d8] sm:$0xf0] }
 0x110   : > { %v10333_v39 = vld [vmem:[%s10772_s25 + $0x59c] sm:$0xf] }
 0x112   : > { %v1707_v45 = vpop.f32.mrf.mxu2 }
 0x113   : > { %v1708_v46 = vadd.f32 %v1707_v45, %v1077_v42  ;;  %v10397_v45 = vld [vmem:[%s10772_s25 + $0x79c] sm:$0xf] }
 0x114   : > { %v1721_v48 = vpop.f32.mrf.mxu3  ;;  %v1681_v51 = vpop.f32.mrf.mxu0 }
 0x115   : > { %v1722_v50 = vadd.f32 %v1721_v48, %v1708_v46  ;;  %v1682_v53 = vadd.f32 %v1681_v51, %v1076_v40  ;;  %v10269_v40 = vld [vmem:[%s10772_s25 + $0x39c] sm:$0xf]  ;;  %v10261_v48 = vld [vmem:[%s10772_s25 + $0x354] sm:$0xf0] }
 0x116   : > { %v1695_v58 = vpop.f32.mrf.mxu1  ;;  %v9313_v44 = vor.u32 %v10269_v40, %v9310_v41  ;;  %v9374_v46 = vld [vmem:[%s10772_s25 + $0x7d8] sm:$0xf0] }
 0x117   : > { %v1728_v52 = vpack.c.bf16 %v1722_v50, %v1694_v54  ;;  %v1696_v61 = vadd.f32 %v1695_v58, %v1682_v53  ;;  %v9300_v54 = vld [vmem:[%s10772_s25 + $0x318] sm:$0xf]  ;;  %v9377_v50 = vor.u32 %v10397_v45, %v9374_v46  ;;  %v9302_v58 = vld [vmem:[%s10772_s25 + $0x358] sm:$0xf0] }
 0x118   : > { %v9301_v51 = vor.u32 %v10261_v48, %v9300_v54  ;;  %v10389_v53 = vld [vmem:[%s10772_s25 + $0x754] sm:$0xf0]  ;;  %v9342_v40 = vld [vmem:[%s10772_s25 + $0x5d8] sm:$0xf0] }
 0x119   : > { %v1866_v59 = vunpack.c.l.b16 %v1728_v52  ;;  %v1867_v60 = vunpack.c.h.b16 %v1728_v52  ;;  %v9364_v52 = vld [vmem:[%s10772_s25 + $0x718] sm:$0xf] }
 0x11a   : > { %v1709_v55 = vpop.f32.mrf.mxu2  ;;  %v9268_v45 = vld [vmem:[%s10772_s25 + $0x118] sm:$0xf] }
 0x11b   : > { %v1710_v56 = vadd.f32 %v1709_v55, %v1077_v42  ;;  %v1868_v0 = vpack.c.b16 %v1866_v59, %v1866_v59  ;;  %v1869_v1 = vpack.c.b16 %v1867_v60, %v1867_v60  ;;  %v10253_v55 = vld [vmem:[%s10772_s25 + $0x31c] sm:$0xf]  ;;  %v10197_v46 = vld [vmem:[%s10772_s25 + $0x154] sm:$0xf0] }
 0x11c   : > { %v1723_v62 = vpop.f32.mrf.mxu3  ;;  %v10381_v59 = vld [vmem:[%s10772_s25 + $0x71c] sm:$0xf]  ;;  %v9305_v60 = vor.u32 %v10253_v55, %v9302_v58 }
 0x11d   : > { %v1724_v63 = vadd.f32 %v1723_v62, %v1710_v56  ;;  %v1875_v5 = vsel %vm1873_vm0, %v1868_v0, 0  ;;  %v1878_v6 = vsel %vm1873_vm0, %v1869_v1, 0  ;;  %v9365_v56 = vor.u32 %v10389_v53, %v9364_v52  ;;  %v9292_v62 = vld [vmem:[%s10772_s25 + $0x298] sm:$0xf]  ;;  %v10189_v55 = vld [vmem:[%s10772_s25 + $0x11c] sm:$0xf] }
 0x11e   : > { %1887 = vmatpush.bf16.msra.mxu0 %v1875_v5  ;;  %1900 = vmatpush.bf16.msra.mxu1 %v1878_v6  ;;  %v9294_v6 = vld [vmem:[%s10772_s25 + $0x2d8] sm:$0xf0]  ;;  %v9345_v52 = vor.u32 %v10333_v39, %v9342_v40  ;;  %v10325_v53 = vld [vmem:[%s10772_s25 + $0x554] sm:$0xf0] }
 0x11f   : > { %v1731_v2 = vpack.c.bf16 %v1724_v63, %v1696_v61  ;;  %v9366_v61 = vld [vmem:[%s10772_s25 + $0x758] sm:$0xf0]  ;;  %v10245_v63 = vld [vmem:[%s10772_s25 + $0x2d4] sm:$0xf0] }
 0x120   : > { %v9369_v0 = vor.u32 %v10381_v59, %v9366_v61  ;;  %v9293_v1 = vor.u32 %v10245_v63, %v9292_v62  ;;  %v9269_v59 = vor.u32 %v10197_v46, %v9268_v45  ;;  %v9334_v61 = vld [vmem:[%s10772_s25 + $0x558] sm:$0xf0] }
 0x121   : > { %v1907_v3 = vunpack.c.l.b16 %v1731_v2  ;;  %v1908_v4 = vunpack.c.h.b16 %v1731_v2  ;;  %v9356_v2 = vld [vmem:[%s10772_s25 + $0x698] sm:$0xf] }
 0x122   : > { %2110 = vmatpush.bf16.msrb.mxu0 %v9309_v38  ;;  %2124 = vmatpush.bf16.msrb.mxu1 %v9373_v43 }
 0x123   : > { %v1909_v7 = vpack.c.b16 %v1907_v3, %v1907_v3  ;;  %v1910_v8 = vpack.c.b16 %v1908_v4, %v1908_v4  ;;  %v10373_v3 = vld [vmem:[%s10772_s25 + $0x6d4] sm:$0xf0]  ;;  %v10237_v4 = vld [vmem:[%s10772_s25 + $0x29c] sm:$0xf] }
 0x124   : > { %v9357_v5 = vor.u32 %v10373_v3, %v9356_v2 }
 0x125   : > { %v1915_v9 = vsel %vm1873_vm0, %v1909_v7, 0  ;;  %v1918_v10 = vsel %vm1873_vm0, %v1910_v8, 0  ;;  %v10365_v7 = vld [vmem:[%s10772_s25 + $0x69c] sm:$0xf] }
 0x126   : > { %1927 = vmatpush.bf16.msra.mxu2 %v1915_v9  ;;  %1940 = vmatpush.bf16.msra.mxu3 %v1918_v10  ;;  %v9358_v8 = vld [vmem:[%s10772_s25 + $0x6d8] sm:$0xf0]  ;;  %v9297_v10 = vor.u32 %v10237_v4, %v9294_v6  ;;  %v9324_v6 = vld [vmem:[%s10772_s25 + $0x498] sm:$0xf] }
 0x127   : > { %2111 = vmatpush.bf16.msrb.mxu0 %v9301_v51  ;;  %2125 = vmatpush.bf16.msrb.mxu1 %v9365_v56  ;;  %v9270_v56 = vld [vmem:[%s10772_s25 + $0x158] sm:$0xf0] }
 0x12a   : > { %2138 = vmatpush.bf16.msrb.mxu2 %v9313_v44  ;;  %2152 = vmatpush.bf16.msrb.mxu3 %v9377_v50  ;;  %v9281_v44 = vor.u32 %v10205_v36, %v9278_v37  ;;  %v9332_v50 = vld [vmem:[%s10772_s25 + $0x518] sm:$0xf] }
 0x12b   : > { %2112 = vmatpush.bf16.msrb.mxu0 %v9293_v1  ;;  %2126 = vmatpush.bf16.msrb.mxu1 %v9357_v5  ;;  %v10181_v1 = vld [vmem:[%s10772_s25 + $0xd4] sm:$0xf0]  ;;  %v9333_v4 = vor.u32 %v10325_v53, %v9332_v50  ;;  %v9273_v5 = vor.u32 %v10189_v55, %v9270_v56 }
 0x12e   : > { %2139 = vmatpush.bf16.msrb.mxu2 %v9305_v60  ;;  %2153 = vmatpush.bf16.msrb.mxu3 %v9369_v0  ;;  %v10317_v60 = vld [vmem:[%s10772_s25 + $0x51c] sm:$0xf]  ;;  %v9260_v0 = vld [vmem:[%s10772_s25 + $0x98] sm:$0xf] }
 0x132   : > { %2140 = vmatpush.bf16.msrb.mxu2 %v9297_v10  ;;  %v10173_v10 = vld [vmem:[%s10772_s25 + $0x9c] sm:$0xf] }
 0x181   : > { %v1755_v11 = vpop.f32.mrf.mxu0  ;;  %v1768_v12 = vpop.f32.mrf.mxu1 }
 0x182   : > { %v1769_v19 = vadd.f32 %v1768_v12, %v1755_v11  ;;  %v9284_v11 = vld [vmem:[%s10772_s25 + $0x218] sm:$0xf] }
 0x183   : > { %v10229_v12 = vld [vmem:[%s10772_s25 + $0x254] sm:$0xf0] }
 0x184   : > { %v1812_v23 = vmul.f32 0.0625, %v1769_v19  ;;  %v9286_v19 = vld [vmem:[%s10772_s25 + $0x258] sm:$0xf0] }
 0x186   : > { %v1815_v24 = vsel %vm1814_vm1, %v1812_v23, -inf }
 0x189   : > { %v1757_v13 = vpop.f32.mrf.mxu0  ;;  %v1770_v14 = vpop.f32.mrf.mxu1 }
 0x18a   : > { %v9348_v13 = vld [vmem:[%s10772_s25 + $0x618] sm:$0xf] }
 0x18f   : > { %v1795_v15 = vpop.f32.mrf.mxu2  ;;  %v1808_v16 = vpop.f32.mrf.mxu3 }
 0x190   : > { %v1809_v17 = vadd.f32 %v1808_v16, %v1795_v15  ;;  %v9361_v16 = vor.u32 %v10365_v7, %v9358_v8  ;;  %v9337_v8 = vor.u32 %v10317_v60, %v9334_v61 }
 0x192   : > { %v1813_v18 = vmul.f32 0.0625, %v1809_v17  ;;  %v10357_v17 = vld [vmem:[%s10772_s25 + $0x654] sm:$0xf0]  ;;  %2154 = vmatpush.bf16.msrb.mxu3 %v9361_v16 }
 0x194   : > { %v1818_v20 = vsel %vm1814_vm1, %v1813_v18, -inf }
 0x195   : > { %1819 = vmax.xlane.f32.xlu0 %v1818_v20 }
 0x197   : > { %v1797_v21 = vpop.f32.mrf.mxu2  ;;  %v1810_v22 = vpop.f32.mrf.mxu3 }
 0x198   : > { %v9285_v21 = vor.u32 %v10229_v12, %v9284_v11  ;;  %v10349_v22 = vld [vmem:[%s10772_s25 + $0x61c] sm:$0xf]  ;;  %v9261_v12 = vor.u32 %v10181_v1, %v9260_v0  ;;  %v10557_v0 = vld [vmem:[%s10845_s19 + $0x8] sm:$0xff] }
 0x199   : > { %v9262_v11 = vld [vmem:[%s10772_s25 + $0xd8] sm:$0xf0] }
 0x19a   : > { %2113 = vmatpush.bf16.msrb.mxu0 %v9285_v21 }
 0x19d   : > { %1816 = vmax.xlane.f32.xlu0 %v1815_v24  ;;  %v9349_v24 = vor.u32 %v10357_v17, %v9348_v13  ;;  %v10301_v13 = vld [vmem:[%s10772_s25 + $0x49c] sm:$0xf] }
 0x19f   : > { %2127 = vmatpush.bf16.msrb.mxu1 %v9349_v24  ;;  %v9252_v24 = vld [vmem:[%s10772_s25 + $0x18] sm:$0xf] }
 0x208   : > { %v1820_v25 = vpop.xlane.xlu0 %1819 }
 0x209   : > { %v1822_v26 = vsub.f32 %v1813_v18, %v1820_v25  ;;  %v10221_v18 = vld [vmem:[%s10772_s25 + $0x21c] sm:$0xf] }
 0x20a   : > { %v9289_v25 = vor.u32 %v10221_v18, %v9286_v19  ;;  %v9265_v19 = vor.u32 %v10173_v10, %v9262_v11  ;;  %v10559_v10 = vld [vmem:[%s10845_s19 + $0x18] sm:$0xff] }
 0x20b   : > { %v1825_v27 = vmul.f32 1.442695, %v1822_v26  ;;  %v9350_v26 = vld [vmem:[%s10772_s25 + $0x658] sm:$0xf0] }
 0x20c   : > { %2141 = vmatpush.bf16.msrb.mxu2 %v9289_v25  ;;  %v10165_v25 = vld [vmem:[%s10772_s25 + $0x54] sm:$0xf0] }
 0x20d   : > { %10522 = vpow2.f32 %v1825_v27  ;;  %v9276_v27 = vld [vmem:[%s10772_s25 + $0x198] sm:$0xf] }
 0x210   : > { %v1817_v28 = vpop.xlane.xlu0 %1816  ;;  %2142 = vmatpush.bf16.msrb.mxu2 %v9281_v44 }
 0x211   : > { %v1821_v29 = vsub.f32 %v1812_v23, %v1817_v28 }
 0x213   : > { %v11017_v30 = vpop.eup %10522  ;;  %v1823_v31 = vmul.f32 1.442695, %v1821_v29  ;;  %v10213_v29 = vld [vmem:[%s10772_s25 + $0x1d4] sm:$0xf0] }
 0x214   : > { %v1830_v32 = vsel %vm1814_vm1, %v11017_v30, 0.0  ;;  %v9277_v38 = vor.u32 %v10213_v29, %v9276_v27  ;;  %2143 = vmatpush.bf16.msrb.mxu2 %v9273_v5  ;;  %v9253_v27 = vor.u32 %v10165_v25, %v9252_v24  ;;  %v10157_v29 = vld [vmem:[%s10772_s25 + $0x1c] sm:$0xf] }
 0x215   : > { %10524 = vpow2.f32 %v1823_v31  ;;  %1831 = vadd.xlane.f32.xlu1 %v1830_v32  ;;  %v9340_v31 = vld [vmem:[%s10772_s25 + $0x598] sm:$0xf] }
 0x216   : > { %v9341_v43 = vor.u32 %v10341_v35, %v9340_v31  ;;  %2114 = vmatpush.bf16.msrb.mxu0 %v9277_v38  ;;  %v9254_v31 = vld [vmem:[%s10772_s25 + $0x58] sm:$0xf0] }
 0x217   : > { %v9318_v35 = vld [vmem:[%s10772_s25 + $0x458] sm:$0xf0] }
 0x218   : > { %2128 = vmatpush.bf16.msrb.mxu1 %v9341_v43  ;;  %2144 = vmatpush.bf16.msrb.mxu2 %v9265_v19 }
 0x21a   : > { %2115 = vmatpush.bf16.msrb.mxu0 %v9269_v59 }
 0x21b   : > { %v11021_v33 = vpop.eup %10524 }
 0x21c   : > { %v1827_v34 = vsel %vm1814_vm1, %v11021_v33, 0.0  ;;  %2129 = vmatpush.bf16.msrb.mxu1 %v9333_v4 }
 0x21d   : > { %1828 = vadd.xlane.f32.xlu1 %v1827_v34  ;;  %v9353_v34 = vor.u32 %v10349_v22, %v9350_v26  ;;  %v9316_v26 = vld [vmem:[%s10772_s25 + $0x418] sm:$0xf] }
 0x21e   : > { %2116 = vmatpush.bf16.msrb.mxu0 %v9261_v12 }
 0x21f   : > { %2155 = vmatpush.bf16.msrb.mxu3 %v9353_v34  ;;  %v9257_v34 = vor.u32 %v10157_v29, %v9254_v31 }
 0x221   : > { %2145 = vmatpush.bf16.msrb.mxu2 %v9257_v34 }
 0x222   : > { %2117 = vmatpush.bf16.msrb.mxu0 %v9253_v27  ;;  %v840_v27 = vld [vmem:[%s11133_s30 + $0x468] sm:$0xff] }
 0x223   : > { %2156 = vmatpush.bf16.msrb.mxu3 %v9345_v52  ;;  %v2722_v31 = vunpack.c.2.s8 %v840_v27 }
 0x227   : > { %2157 = vmatpush.bf16.msrb.mxu3 %v9337_v8  ;;  %v10558_v8 = vld [vmem:[%s10845_s19 + $0x10] sm:$0xff] }
 0x288   : > { %v11031_v42 = vpop.xlane.xlu1 %1831 }
 0x289   : > { %10526 = vrcp.f32 %v11031_v42  ;;  %v1857_v20 = vand.u32 2147483647, %v11031_v42  ;;  %v1859_v28 = vand.u32 2147483648, %v11031_v42  ;;  %vm1853_vm3 = vweird.f32 %v11031_v42 }
 0x28b   : > { %vm1858_vm5 = vcmp.eq.f32.partialorder %v1857_v20, 8.507059e+37  ;;  %v1860_v48 = vor.u32 1.1754944e-38, %v1859_v28  ;;  %v10293_v28 = vld [vmem:[%s10772_s25 + $0x454] sm:$0xf0] }
 0x28f   : > { %v10527_v9 = vpop.eup %10526 }
 0x290   : > { %v1849_v14 = vmul.f32 %v10527_v9, %v11031_v42  ;;  %v11056_v15 = vpop.xlane.xlu1 %1828  ;;  %vm1854_vm2 = vweird.f32 %v10527_v9 }
 0x291   : > { %10528 = vrcp.f32 %v11056_v15  ;;  %vm1855_vm4 = vmor %vm1853_vm3, %vm1854_vm2  ;;  %v1842_v2 = vand.u32 2147483647, %v11056_v15  ;;  %v1844_v3 = vand.u32 2147483648, %v11056_v15  ;;  %vm1838_vm7 = vweird.f32 %v11056_v15 }
 0x292   : > { %v1850_v23 = vsub.f32 1.0, %v1849_v14  ;;  %v9326_v14 = vld [vmem:[%s10772_s25 + $0x4d8] sm:$0xf0] }
 0x293   : > { %v1845_v17 = vor.u32 1.1754944e-38, %v1844_v3  ;;  %vm1843_vm9 = vcmp.eq.f32.partialorder %v1842_v2, 8.507059e+37 }
 0x294   : > { %v1851_v32 = vmul.f32 %v10527_v9, %v1850_v23 }
 0x296   : > { %v1852_v41 = vadd.f32 %v10527_v9, %v1851_v32  ;;  %v9317_v32 = vor.u32 %v10293_v28, %v9316_v26 }
 0x297   : > { %v10529_v54 = vpop.eup %10528 }
 0x298   : > { %v1856_v51 = vsel %vm1855_vm4, %v10527_v9, %v1852_v41  ;;  %v1834_v42 = vmul.f32 %v10529_v54, %v11056_v15  ;;  %vm1839_vm6 = vweird.f32 %v10529_v54  ;;  %v10309_v9 = vld [vmem:[%s10772_s25 + $0x4d4] sm:$0xf0]  ;;  %v9329_v15 = vor.u32 %v10301_v13, %v9326_v14 }
 0x299   : > { %v1861_v58 = vsel %vm1858_vm5, %v1860_v48, %v1856_v51  ;;  %vm1840_vm8 = vmor %vm1838_vm7, %vm1839_vm6  ;;  %v9325_v18 = vor.u32 %v10309_v9, %v9324_v6  ;;  %v1948_v48 = vperm.slane %v11004_v57, 1  ;;  %v10646_v13 = vmov 256.0  }
 0x29a   : > { %v1862_v62 = vmul.f32 %v11017_v30, %v1861_v58  ;;  %v1835_v63 = vsub.f32 1.0, %v1834_v42  ;;  %2158 = vmatpush.bf16.msrb.mxu3 %v9329_v15  ;;  %v1949_v42 = vperm.slane %v11007_v49, 1  ;;  %10530 = vrcp.f32 %v10646_v13  ;;  %v775_v15 = vld [vmem:[%s11133_s30 + $0x1e0] sm:$0xff] }
 0x29b   : > { %2130 = vmatpush.bf16.msrb.mxu1 %v9325_v18  ;;  %v2481_v24 = vunpack.c.3.s8 %v775_v15 }
 0x29c   : > { %v1836_v7 = vmul.f32 %v10529_v54, %v1835_v63  ;;  %v1864_v30 = vpack.c.bf16 %v1862_v62, %v1862_v62  ;;  %v10556_v62 = vld [vmem:[%s10845_s19] sm:$0xff] }
 0x29e   : > { %v1837_v16 = vadd.f32 %v10529_v54, %v1836_v7  ;;  %9248 = vmatmul.msk.bf16.vlgmr.msra.gmra.mxu2 %vm1814_vm1, %v1864_v30  ;;  %9249 = vmatmul.msk.bf16.vlgmr.msra.gmra.mxu3 %vm1814_vm1, %v1864_v30 }
 0x29f   : > { %2131 = vmatpush.bf16.msrb.mxu1 %v9317_v32  ;;  %v2738_v32 = vunpack.c.3.s8 %v840_v27 }
 0x2a0   : > { %v1841_v20 = vsel %vm1840_vm8, %v10529_v54, %v1837_v16  ;;  %v10531_v14 = vpop.eup %10530  ;;  %vm6681_vm8 = vcmask 130048  }
 0x2a1   : > { %v1846_v21 = vsel %vm1843_vm9, %v1845_v17, %v1841_v20  ;;  %v2177_v16 = vmul.f32 256.0, %v10531_v14  ;;  %vm2181_vm10 = vweird.f32 %v10531_v14 }
 0x2a2   : > { %v1847_v22 = vmul.f32 %v11021_v33, %v1846_v21  ;;  %v10285_v33 = vld [vmem:[%s10772_s25 + $0x41c] sm:$0xf]  ;;  %v839_v21 = vld [vmem:[%s11133_s30 + $0x460] sm:$0xff] }
 0x2a3   : > { %v9321_v36 = vor.u32 %v10285_v33, %v9318_v35  ;;  %v2178_v17 = vsub.f32 1.0, %v2177_v16  ;;  %v2721_v25 = vunpack.c.2.s8 %v839_v21  ;;  %v2737_v26 = vunpack.c.3.s8 %v839_v21 }
 0x2a4   : > { %v1863_v23 = vpack.c.bf16 %v1847_v22, %v1847_v22  ;;  %v776_v22 = vld [vmem:[%s11133_s30 + $0x1e8] sm:$0xff]  ;;  %v2993_v33 = vcvt.s32.f32 %v2481_v24 }
 0x2a5   : > { %2159 = vmatpush.bf16.msrb.mxu3 %v9321_v36  ;;  %v2179_v18 = vmul.f32 %v10531_v14, %v2178_v17  ;;  %v2466_v28 = vunpack.c.2.s8 %v776_v22  ;;  %v2482_v29 = vunpack.c.3.s8 %v776_v22  ;;  %v3233_v35 = vcvt.s32.f32 %v2721_v25 }
 0x2a6   : > { %9246 = vmatmul.msk.bf16.vlgmr.msra.gmra.mxu0 %vm1814_vm1, %v1863_v23  ;;  %9247 = vmatmul.msk.bf16.vlgmr.msra.gmra.mxu1 %vm1814_vm1, %v1863_v23  ;;  %v2465_v23 = vunpack.c.2.s8 %v775_v15  ;;  %v3249_v36 = vcvt.s32.f32 %v2737_v26 }
 0x2a7   : > { %v2180_v19 = vadd.f32 %v10531_v14, %v2179_v18 }
 0x2a8   : > { %v2977_v34 = vcvt.s32.f32 %v2465_v23 }
 0x2a9   : > { %v11135_v20 = vsel %vm2181_vm10, %v10531_v14, %v2180_v19 }
 0x321   : > { %v1929_v37 = vpop.f32.mrf.mxu2  ;;  %v1942_v38 = vpop.f32.mrf.mxu3 }
 0x323   : > { %v1889_v39 = vpop.f32.mrf.mxu0  ;;  %v1902_v40 = vpop.f32.mrf.mxu1 }
 0x324   : > { %v1946_v41 = vpack.c.bf16 %v1929_v37, %v1889_v39  ;;  %v1947_v43 = vpack.c.bf16 %v1942_v38, %v1902_v40  ;;  %v2978_v37 = vcvt.s32.f32 %v2466_v28  ;;  %v2994_v38 = vcvt.s32.f32 %v2482_v29 }
 0x325   : > { %v3234_v39 = vcvt.s32.f32 %v2722_v31  ;;  %v3250_v40 = vcvt.s32.f32 %v2738_v32 }
 0x326   : > { %2118 = vmatmul.bf16.vlgmr.msrb.gmra.mxu0 %v1946_v41  ;;  %2132 = vmatmul.bf16.vlgmr.msrb.gmra.mxu1 %v1947_v43 }
 0x327   : > { %2146 = vmatmul.bf16.vlgmr.msrb.gmra.mxu2 %v1946_v41  ;;  %2160 = vmatmul.bf16.vlgmr.msrb.gmra.mxu3 %v1947_v43  ;;  %v3377_v41 = vpack.c.bf16 %v2993_v33, %v2977_v34  ;;  %v3505_v43 = vpack.c.bf16 %v3249_v36, %v3233_v35 }
 0x329   : > { %v1931_v44 = vpop.f32.mrf.mxu2  ;;  %v1944_v45 = vpop.f32.mrf.mxu3  ;;  %3521 = vmatpush.bf16.msra.mxu0 %v3377_v41  ;;  %3535 = vmatpush.bf16.msra.mxu1 %v3505_v43 }
 0x32a   : > { %v2433_v44 = vunpack.c.0.s8 %v775_v15  ;;  %v2449_v45 = vunpack.c.1.s8 %v775_v15 }
 0x32b   : > { %v1891_v46 = vpop.f32.mrf.mxu0  ;;  %v1904_v54 = vpop.f32.mrf.mxu1 }
 0x32c   : > { %v3378_v46 = vpack.c.bf16 %v2994_v38, %v2978_v37  ;;  %v3506_v54 = vpack.c.bf16 %v3250_v40, %v3234_v39 }
 0x32e   : > { %3549 = vmatpush.bf16.msra.mxu2 %v3378_v46  ;;  %3563 = vmatpush.bf16.msra.mxu3 %v3506_v54  ;;  %v11153_v54 = vld [vmem:[%s11133_s30 + $0xa0] sm:$0xff] }
 0x3a3   : > { %v2119_v50 = vpop.f32.mrf.mxu0  ;;  %v2133_v52 = vpop.f32.mrf.mxu1 }
 0x3a4   : > { %v2120_v51 = vadd.f32 %v2119_v50, %v1948_v48  ;;  %v2705_v50 = vunpack.c.1.s8 %v839_v21 }
 0x3a6   : > { %v2134_v56 = vadd.f32 %v2133_v52, %v2120_v51  ;;  %v759_v51 = vld [vmem:[%s11133_s30 + $0x140] sm:$0xff]  ;;  %v2961_v52 = vcvt.s32.f32 %v2449_v45 }
 0x3a7   : > { %v2385_v34 = vunpack.c.1.s8 %v759_v51 }
 0x3a8   : > { %v11114_v63 = vadd.f32 %v10556_v62, %v2134_v56 }
 0x3a9   : > { %v2897_v39 = vcvt.s32.f32 %v2385_v34  ;;  %v2233_v34 = vperm.slane %v11001_v47, 2 }
 0x3aa   : > { %v2147_v53 = vpop.f32.mrf.mxu2  ;;  %v2161_v55 = vpop.f32.mrf.mxu3 }
 0x3ab   : > { %v2148_v58 = vadd.f32 %v2147_v53, %v1949_v42  ;;  %v2121_v59 = vpop.f32.mrf.mxu0  ;;  %v2135_v3 = vpop.f32.mrf.mxu1  ;;  %v2434_v53 = vunpack.c.0.s8 %v776_v22 }
 0x3ac   : > { %v2122_v61 = vadd.f32 %v2121_v59, %v1948_v48  ;;  %v2689_v48 = vunpack.c.0.s8 %v839_v21  ;;  %v2690_v59 = vunpack.c.0.s8 %v840_v27 }
 0x3ad   : > { %v2162_v60 = vadd.f32 %v2161_v55, %v2148_v58  ;;  %v2450_v55 = vunpack.c.1.s8 %v776_v22  ;;  %v3217_v58 = vcvt.s32.f32 %v2705_v50 }
 0x3ae   : > { %v2136_v5 = vadd.f32 %v2135_v3, %v2122_v61  ;;  %v3201_v56 = vcvt.s32.f32 %v2689_v48  ;;  %v823_v61 = vld [vmem:[%s11133_s30 + $0x3c0] sm:$0xff]  ;;  %v2401_v3 = vunpack.c.2.s8 %v759_v51 }
 0x3af   : > { %v11117_v1 = vadd.f32 %v10557_v0, %v2162_v60  ;;  %v2706_v60 = vunpack.c.1.s8 %v840_v27  ;;  %v2946_v0 = vcvt.s32.f32 %v2434_v53  ;;  %v2657_v13 = vunpack.c.2.s8 %v823_v61 }
 0x3b0   : > { %v11122_v9 = vadd.f32 %v10558_v8, %v2136_v5  ;;  %v3489_v5 = vpack.c.bf16 %v3217_v58, %v3201_v56  ;;  %v824_v8 = vld [vmem:[%s11133_s30 + $0x3c8] sm:$0xff]  ;;  %v2673_v14 = vunpack.c.3.s8 %v823_v61  ;;  %v2369_v27 = vunpack.c.0.s8 %v759_v51 }
 0x3b1   : > { %v2170_v2 = vadd.f32 %v11117_v1, %v11114_v63  ;;  %v3169_v15 = vcvt.s32.f32 %v2657_v13  ;;  %v2658_v22 = vunpack.c.2.s8 %v824_v8  ;;  %v2674_v23 = vunpack.c.3.s8 %v824_v8  ;;  %v744_v56 = vld [vmem:[%s11133_s30 + $0xa8] sm:$0xff] }
 0x3b2   : > { %v2149_v4 = vpop.f32.mrf.mxu2  ;;  %v2163_v7 = vpop.f32.mrf.mxu3  ;;  %3536 = vmatpush.bf16.msra.mxu1 %v3489_v5  ;;  %v3185_v21 = vcvt.s32.f32 %v2673_v14  ;;  %v2881_v36 = vcvt.s32.f32 %v2369_v27  ;;  %v2625_v37 = vunpack.c.0.s8 %v823_v61  ;;  %v2641_v40 = vunpack.c.1.s8 %v823_v61 }
 0x3b3   : > { %v2150_v6 = vadd.f32 %v2149_v4, %v1949_v42  ;;  %2171 = vadd.xlane.f32.xlu2 %v2170_v2  ;;  %v2945_v42 = vcvt.s32.f32 %v2433_v44  ;;  %v2962_v2 = vcvt.s32.f32 %v2450_v55  ;;  %v760_v4 = vld [vmem:[%s11133_s30 + $0x148] sm:$0xff]  ;;  %v3170_v31 = vcvt.s32.f32 %v2658_v22 }
 0x3b4   : > { %v2402_v18 = vunpack.c.2.s8 %v760_v4  ;;  %v2418_v19 = vunpack.c.3.s8 %v760_v4  ;;  %v3473_v29 = vpack.c.bf16 %v3185_v21, %v3169_v15  ;;  %v3186_v32 = vcvt.s32.f32 %v2674_v23 }
 0x3b5   : > { %v2164_v30 = vadd.f32 %v2163_v7, %v2150_v6  ;;  %v3361_v62 = vpack.c.bf16 %v2961_v52, %v2945_v42  ;;  %v3202_v6 = vcvt.s32.f32 %v2690_v59  ;;  %v3218_v7 = vcvt.s32.f32 %v2706_v60  ;;  %v11156_v52 = vld [vmem:[%s11133_s30 + $0x320] sm:$0xff] }
 0x3b6   : > { %v2914_v25 = vcvt.s32.f32 %v2402_v18  ;;  %v2930_v26 = vcvt.s32.f32 %v2418_v19  ;;  %3537 = vmatpush.bf16.msra.mxu1 %v3473_v29  ;;  %v3474_v38 = vpack.c.bf16 %v3186_v32, %v3170_v31  ;;  %v2370_v41 = vunpack.c.0.s8 %v760_v4 }
 0x3b7   : > { %v11125_v11 = vadd.f32 %v10559_v10, %v2164_v30  ;;  %v2417_v30 = vunpack.c.3.s8 %v759_v51  ;;  %3522 = vmatpush.bf16.msra.mxu0 %v3361_v62  ;;  %v3362_v10 = vpack.c.bf16 %v2962_v2, %v2946_v0  ;;  %v3490_v16 = vpack.c.bf16 %v3218_v7, %v3202_v6 }
 0x3b8   : > { %v3346_v35 = vpack.c.bf16 %v2930_v26, %v2914_v25  ;;  %v3137_v45 = vcvt.s32.f32 %v2625_v37  ;;  %v2386_v46 = vunpack.c.1.s8 %v760_v4  ;;  %v3329_v48 = vpack.c.bf16 %v2897_v39, %v2881_v36  ;;  %v808_v4 = vld [vmem:[%s11133_s30 + $0x328] sm:$0xff] }
 0x3b9   : > { %v2173_v12 = vadd.f32 %v11125_v11, %v11122_v9  ;;  %v2929_v17 = vcvt.s32.f32 %v2417_v30  ;;  %3550 = vmatpush.bf16.msra.mxu2 %v3362_v10  ;;  %3564 = vmatpush.bf16.msra.mxu3 %v3490_v16  ;;  %v3153_v50 = vcvt.s32.f32 %v2641_v40  ;;  %v2882_v51 = vcvt.s32.f32 %v2370_v41 }
 0x3ba   : > { %v2626_v42 = vunpack.c.0.s8 %v824_v8  ;;  %v2898_v53 = vcvt.s32.f32 %v2386_v46  ;;  %v2642_v55 = vunpack.c.1.s8 %v824_v8  ;;  %v2337_v60 = vunpack.c.2.s8 %v11153_v54 }
 0x3bb   : > { %2174 = vadd.xlane.f32.xlu2 %v2173_v12  ;;  %v2913_v12 = vcvt.s32.f32 %v2401_v3  ;;  %v3457_v58 = vpack.c.bf16 %v3153_v50, %v3137_v45  ;;  %v2353_v61 = vunpack.c.3.s8 %v11153_v54  ;;  %v2593_v3 = vunpack.c.2.s8 %v11156_v52 }
 0x3bc   : > { %v3138_v59 = vcvt.s32.f32 %v2626_v42  ;;  %v3330_v0 = vpack.c.bf16 %v2898_v53, %v2882_v51  ;;  %v3154_v2 = vcvt.s32.f32 %v2642_v55  ;;  %v2849_v6 = vcvt.s32.f32 %v2337_v60  ;;  %v791_v53 = vld [vmem:[%s11133_s30 + $0x280] sm:$0xff]  ;;  %v728_v55 = vld [vmem:[%s11133_s30 + $0x8] sm:$0xff] }
 0x3bd   : > { %v3345_v24 = vpack.c.bf16 %v2929_v17, %v2913_v12  ;;  %3551 = vmatpush.bf16.msra.mxu2 %v3346_v35  ;;  %3565 = vmatpush.bf16.msra.mxu3 %v3474_v38  ;;  %v2865_v7 = vcvt.s32.f32 %v2353_v61  ;;  %v2609_v30 = vunpack.c.3.s8 %v11156_v52  ;;  %v2338_v8 = vunpack.c.2.s8 %v744_v56  ;;  %v792_v61 = vld [vmem:[%s11133_s30 + $0x288] sm:$0xff] }
 0x3be   : > { %3538 = vmatpush.bf16.msra.mxu1 %v3457_v58  ;;  %v3458_v12 = vpack.c.bf16 %v3154_v2, %v3138_v59  ;;  %v3105_v13 = vcvt.s32.f32 %v2593_v3  ;;  %v2354_v14 = vunpack.c.3.s8 %v744_v56  ;;  %v2594_v19 = vunpack.c.2.s8 %v808_v4 }
 0x3bf   : > { %3523 = vmatpush.bf16.msra.mxu0 %v3345_v24  ;;  %v3313_v16 = vpack.c.bf16 %v2865_v7, %v2849_v6  ;;  %v3121_v17 = vcvt.s32.f32 %v2609_v30  ;;  %v2850_v18 = vcvt.s32.f32 %v2338_v8  ;;  %v2610_v23 = vunpack.c.3.s8 %v808_v4 }
 0x3c0   : > { %v2866_v22 = vcvt.s32.f32 %v2354_v14  ;;  %v3106_v25 = vcvt.s32.f32 %v2594_v19  ;;  %v2228_v32 = vperm.slane %v11007_v49, 2  ;;  %v2321_v35 = vunpack.c.1.s8 %v11153_v54 }
 0x3c1   : > { %3552 = vmatpush.bf16.msra.mxu2 %v3330_v0  ;;  %3566 = vmatpush.bf16.msra.mxu3 %v3458_v12  ;;  %v3441_v24 = vpack.c.bf16 %v3121_v17, %v3105_v13  ;;  %v3122_v29 = vcvt.s32.f32 %v2610_v23  ;;  %v2561_v36 = vunpack.c.0.s8 %v11156_v52  ;;  %v2577_v37 = vunpack.c.1.s8 %v11156_v52 }
 0x3c2   : > { %v2306_v38 = vunpack.c.0.s8 %v744_v56  ;;  %v2322_v39 = vunpack.c.1.s8 %v744_v56  ;;  %v2562_v40 = vunpack.c.0.s8 %v808_v4  ;;  %v2578_v41 = vunpack.c.1.s8 %v808_v4 }
 0x3c3   : > { %3524 = vmatpush.bf16.msra.mxu0 %v3329_v48  ;;  %3539 = vmatpush.bf16.msra.mxu1 %v3441_v24  ;;  %v3442_v31 = vpack.c.bf16 %v3122_v29, %v3106_v25  ;;  %v2833_v46 = vcvt.s32.f32 %v2321_v35  ;;  %v3073_v48 = vcvt.s32.f32 %v2561_v36  ;;  %v3089_v50 = vcvt.s32.f32 %v2577_v37 }
 0x3c4   : > { %v2818_v51 = vcvt.s32.f32 %v2306_v38  ;;  %v2834_v42 = vcvt.s32.f32 %v2322_v39  ;;  %v2529_v0 = vunpack.c.2.s8 %v791_v53  ;;  %v2545_v2 = vunpack.c.3.s8 %v791_v53  ;;  %v841_v38 = vld [vmem:[%s11133_s30 + $0x470] sm:$0xff] }
 0x3c5   : > { %3567 = vmatpush.bf16.msra.mxu3 %v3442_v31  ;;  %v3425_v59 = vpack.c.bf16 %v3089_v50, %v3073_v48  ;;  %v2290_v6 = vunpack.c.3.s8 %v728_v55  ;;  %v2530_v8 = vunpack.c.2.s8 %v792_v61  ;;  %v2497_v25 = vunpack.c.0.s8 %v791_v53 }
 0x3c6   : > { %v3298_v56 = vpack.c.bf16 %v2834_v42, %v2818_v51  ;;  %v3041_v7 = vcvt.s32.f32 %v2529_v0  ;;  %v3057_v30 = vcvt.s32.f32 %v2545_v2  ;;  %v2258_v31 = vunpack.c.1.s8 %v728_v55 }
 0x3c7   : > { %3525 = vmatpush.bf16.msra.mxu0 %v3313_v16  ;;  %3540 = vmatpush.bf16.msra.mxu1 %v3425_v59  ;;  %v2802_v14 = vcvt.s32.f32 %v2290_v6  ;;  %v2498_v36 = vunpack.c.0.s8 %v792_v61  ;;  %v2514_v37 = vunpack.c.1.s8 %v792_v61 }
 0x3c8   : > { %v3409_v17 = vpack.c.bf16 %v3057_v30, %v3041_v7 }
 0x3c9   : > { %v3010_v50 = vcvt.s32.f32 %v2498_v36  ;;  %v3026_v51 = vcvt.s32.f32 %v2514_v37 }
 0x3cb   : > { %3541 = vmatpush.bf16.msra.mxu1 %v3409_v17 }
 0x426   : > { %v2172_v28 = vpop.xlane.xlu2 %2171 }
 0x427   : > { %v2183_v33 = vmul.f32 %v11135_v20, %v2172_v28  ;;  %v3314_v28 = vpack.c.bf16 %v2866_v22, %v2850_v18  ;;  %v3042_v18 = vcvt.s32.f32 %v2530_v8 }
 0x429   : > { %v11147_v43 = vsub.f32 %v11114_v63, %v2183_v33  ;;  %v11150_v44 = vsub.f32 %v11117_v1, %v2183_v33  ;;  %3553 = vmatpush.bf16.msra.mxu2 %v3314_v28  ;;  %v2305_v33 = vunpack.c.0.s8 %v11153_v54  ;;  %v727_v54 = vld [vmem:[%s11133_s30] sm:$0xff] }
 0x42a   : > { %v2273_v60 = vunpack.c.2.s8 %v727_v54  ;;  %v2289_v52 = vunpack.c.3.s8 %v727_v54  ;;  %v2241_v16 = vunpack.c.0.s8 %v727_v54  ;;  %v2257_v22 = vunpack.c.1.s8 %v727_v54 }
 0x42b   : > { %v2189_v63 = vmul.f32 %v11147_v43, %v11147_v43  ;;  %v2190_v1 = vmul.f32 %v11150_v44, %v11150_v44  ;;  %v2817_v45 = vcvt.s32.f32 %v2305_v33  ;;  %v3009_v33 = vcvt.s32.f32 %v2497_v25 }
 0x42c   : > { %v2785_v3 = vcvt.s32.f32 %v2273_v60  ;;  %v2801_v4 = vcvt.s32.f32 %v2289_v52  ;;  %v2753_v24 = vcvt.s32.f32 %v2241_v16  ;;  %v2769_v29 = vcvt.s32.f32 %v2257_v22  ;;  %v761_v16 = vld [vmem:[%s11133_s30 + $0x150] sm:$0xff] }
 0x42d   : > { %v2193_v62 = vadd.f32 %v2190_v1, %v2189_v63  ;;  %v3074_v63 = vcvt.s32.f32 %v2562_v40  ;;  %v3090_v1 = vcvt.s32.f32 %v2578_v41  ;;  %v3297_v58 = vpack.c.bf16 %v2833_v46, %v2817_v45  ;;  %3554 = vmatpush.bf16.msra.mxu2 %v3298_v56  ;;  %v778_v46 = vld [vmem:[%s11133_s30 + $0x1f8] sm:$0xff] }
 0x42e   : > { %v2175_v5 = vpop.xlane.xlu2 %2174  ;;  %v3281_v12 = vpack.c.bf16 %v2801_v4, %v2785_v3  ;;  %v3265_v39 = vpack.c.bf16 %v2769_v29, %v2753_v24  ;;  %v2770_v41 = vcvt.s32.f32 %v2258_v31  ;;  %v2468_v60 = vunpack.c.2.s8 %v778_v46 }
 0x42f   : > { %v2184_v10 = vmul.f32 %v11135_v20, %v2175_v5  ;;  %2194 = vadd.xlane.f32.xlu0 %v2193_v62  ;;  %v3426_v62 = vpack.c.bf16 %v3090_v1, %v3074_v63  ;;  %3526 = vmatpush.bf16.msra.mxu0 %v3297_v58  ;;  %v2274_v5 = vunpack.c.2.s8 %v728_v55  ;;  %v842_v63 = vld [vmem:[%s11133_s30 + $0x478] sm:$0xff]  ;;  %v3394_v58 = vpack.c.bf16 %v3026_v51, %v3010_v50 }
 0x430   : > { %v2484_v52 = vunpack.c.3.s8 %v778_v46  ;;  %v2740_v0 = vunpack.c.3.s8 %v842_v63  ;;  %v2980_v3 = vcvt.s32.f32 %v2468_v60  ;;  %v2452_v22 = vunpack.c.1.s8 %v778_v46 }
 0x431   : > { %v11170_v15 = vsub.f32 %v11122_v9, %v2184_v10  ;;  %v11173_v21 = vsub.f32 %v11125_v11, %v2184_v10  ;;  %v2227_v11 = vperm.slane %v11004_v57, 2  ;;  %3568 = vmatpush.bf16.msra.mxu3 %v3426_v62  ;;  %v2546_v10 = vunpack.c.3.s8 %v792_v61 }
 0x432   : > { %v2786_v13 = vcvt.s32.f32 %v2274_v5  ;;  %v2724_v62 = vunpack.c.2.s8 %v842_v63  ;;  %v2996_v4 = vcvt.s32.f32 %v2484_v52  ;;  %v3252_v30 = vcvt.s32.f32 %v2740_v0 }
 0x433   : > { %v2191_v26 = vmul.f32 %v11170_v15, %v11170_v15  ;;  %v2192_v27 = vmul.f32 %v11173_v21, %v11173_v21  ;;  %v3058_v19 = vcvt.s32.f32 %v2546_v10  ;;  %3527 = vmatpush.bf16.msra.mxu0 %v3281_v12  ;;  %v2692_v25 = vunpack.c.0.s8 %v842_v63 }
 0x434   : > { %v3282_v23 = vpack.c.bf16 %v2802_v14, %v2786_v13  ;;  %v3236_v7 = vcvt.s32.f32 %v2724_v62  ;;  %v3380_v10 = vpack.c.bf16 %v2996_v4, %v2980_v3  ;;  %v2691_v13 = vunpack.c.0.s8 %v841_v38 }
 0x435   : > { %v2196_v9 = vadd.f32 %v2192_v27, %v2191_v26  ;;  %v2513_v26 = vunpack.c.1.s8 %v791_v53  ;;  %v777_v27 = vld [vmem:[%s11133_s30 + $0x1f0] sm:$0xff]  ;;  %v3410_v28 = vpack.c.bf16 %v3058_v19, %v3042_v18  ;;  %v2723_v53 = vunpack.c.2.s8 %v841_v38 }
 0x436   : > { %3555 = vmatpush.bf16.msra.mxu2 %v3282_v23  ;;  %v2467_v45 = vunpack.c.2.s8 %v777_v27  ;;  %v2483_v42 = vunpack.c.3.s8 %v777_v27  ;;  %v2435_v5 = vunpack.c.0.s8 %v777_v27  ;;  %v2451_v8 = vunpack.c.1.s8 %v777_v27  ;;  %v825_v27 = vld [vmem:[%s11133_s30 + $0x3d0] sm:$0xff] }
 0x437   : > { %2197 = vadd.xlane.f32.xlu1 %v2196_v9  ;;  %v2242_v9 = vunpack.c.0.s8 %v728_v55  ;;  %v3025_v35 = vcvt.s32.f32 %v2513_v26  ;;  %3569 = vmatpush.bf16.msra.mxu3 %v3410_v28  ;;  %v2739_v55 = vunpack.c.3.s8 %v841_v38  ;;  %v3235_v61 = vcvt.s32.f32 %v2723_v53 }
 0x438   : > { %3528 = vmatpush.bf16.msra.mxu0 %v3265_v39  ;;  %v2979_v54 = vcvt.s32.f32 %v2467_v45  ;;  %v2995_v59 = vcvt.s32.f32 %v2483_v42  ;;  %v2947_v12 = vcvt.s32.f32 %v2435_v5  ;;  %v2707_v14 = vunpack.c.1.s8 %v841_v38  ;;  %v826_v39 = vld [vmem:[%s11133_s30 + $0x3d8] sm:$0xff]  ;;  %v11199_v5 = vld [vmem:[%s11133_s30 + $0xb0] sm:$0xff] }
 0x439   : > { %v2754_v40 = vcvt.s32.f32 %v2242_v9  ;;  %v3393_v48 = vpack.c.bf16 %v3025_v35, %v3009_v33  ;;  %v3251_v56 = vcvt.s32.f32 %v2739_v55  ;;  %v3508_v17 = vpack.c.bf16 %v3252_v30, %v3236_v7  ;;  %v762_v33 = vld [vmem:[%s11133_s30 + $0x158] sm:$0xff] }
 0x43a   : > { %v3379_v2 = vpack.c.bf16 %v2995_v59, %v2979_v54  ;;  %v2963_v18 = vcvt.s32.f32 %v2451_v8  ;;  %v2436_v19 = vunpack.c.0.s8 %v778_v46  ;;  %v3203_v23 = vcvt.s32.f32 %v2691_v13 }
 0x43b   : > { %v3266_v1 = vpack.c.bf16 %v2770_v41, %v2754_v40  ;;  %3542 = vmatpush.bf16.msra.mxu1 %v3393_v48  ;;  %3570 = vmatpush.bf16.msra.mxu3 %v3394_v58  ;;  %v3507_v6 = vpack.c.bf16 %v3251_v56, %v3235_v61  ;;  %v3219_v24 = vcvt.s32.f32 %v2707_v14  ;;  %v2708_v26 = vunpack.c.1.s8 %v842_v63 }
 0x43c   : > { %3577 = vmatpush.bf16.msrb.mxu0 %v3379_v2  ;;  %v3363_v28 = vpack.c.bf16 %v2963_v18, %v2947_v12  ;;  %v2948_v29 = vcvt.s32.f32 %v2436_v19  ;;  %v2964_v9 = vcvt.s32.f32 %v2452_v22  ;;  %v2403_v31 = vunpack.c.2.s8 %v761_v16 }
 0x43d   : > { %3556 = vmatpush.bf16.msra.mxu2 %v3266_v1  ;;  %v3491_v35 = vpack.c.bf16 %v3219_v24, %v3203_v23  ;;  %v3204_v36 = vcvt.s32.f32 %v2692_v25  ;;  %v3220_v37 = vcvt.s32.f32 %v2708_v26  ;;  %v2419_v38 = vunpack.c.3.s8 %v761_v16  ;;  %v746_v23 = vld [vmem:[%s11133_s30 + $0xb8] sm:$0xff] }
 0x43e   : > { %v3364_v40 = vpack.c.bf16 %v2964_v9, %v2948_v29  ;;  %v2915_v41 = vcvt.s32.f32 %v2403_v31  ;;  %v2659_v45 = vunpack.c.2.s8 %v825_v27  ;;  %v2675_v46 = vunpack.c.3.s8 %v825_v27 }
 0x43f   : > { %3591 = vmatpush.bf16.msrb.mxu1 %v3507_v6  ;;  %3619 = vmatpush.bf16.msrb.mxu3 %v3508_v17  ;;  %v3492_v48 = vpack.c.bf16 %v3220_v37, %v3204_v36  ;;  %v2931_v50 = vcvt.s32.f32 %v2419_v38  ;;  %v2404_v51 = vunpack.c.2.s8 %v762_v33  ;;  %v2420_v42 = vunpack.c.3.s8 %v762_v33 }
 0x440   : > { %3578 = vmatpush.bf16.msrb.mxu0 %v3363_v28  ;;  %v3171_v63 = vcvt.s32.f32 %v2659_v45  ;;  %v3187_v1 = vcvt.s32.f32 %v2675_v46  ;;  %v2660_v54 = vunpack.c.2.s8 %v826_v39  ;;  %v2676_v53 = vunpack.c.3.s8 %v826_v39  ;;  %v810_v28 = vld [vmem:[%s11133_s30 + $0x338] sm:$0xff] }
 0x441   : > { %3605 = vmatpush.bf16.msrb.mxu2 %v3380_v10  ;;  %v3347_v55 = vpack.c.bf16 %v2931_v50, %v2915_v41  ;;  %v2916_v58 = vcvt.s32.f32 %v2404_v51  ;;  %v2932_v59 = vcvt.s32.f32 %v2420_v42  ;;  %v2371_v60 = vunpack.c.0.s8 %v761_v16 }
 0x442   : > { %v3475_v52 = vpack.c.bf16 %v3187_v1, %v3171_v63  ;;  %v3172_v61 = vcvt.s32.f32 %v2660_v54  ;;  %v3188_v56 = vcvt.s32.f32 %v2676_v53  ;;  %v2387_v62 = vunpack.c.1.s8 %v761_v16  ;;  %v809_v16 = vld [vmem:[%s11133_s30 + $0x330] sm:$0xff] }
 0x443   : > { %3592 = vmatpush.bf16.msrb.mxu1 %v3491_v35  ;;  %3620 = vmatpush.bf16.msrb.mxu3 %v3492_v48  ;;  %v3348_v0 = vpack.c.bf16 %v2932_v59, %v2916_v58  ;;  %v2883_v2 = vcvt.s32.f32 %v2371_v60  ;;  %v2627_v3 = vunpack.c.0.s8 %v825_v27  ;;  %v2643_v4 = vunpack.c.1.s8 %v825_v27 }
 0x444   : > { %3579 = vmatpush.bf16.msrb.mxu0 %v3347_v55  ;;  %v3476_v6 = vpack.c.bf16 %v3188_v56, %v3172_v61  ;;  %v2899_v7 = vcvt.s32.f32 %v2387_v62  ;;  %v2372_v30 = vunpack.c.0.s8 %v762_v33  ;;  %v2388_v8 = vunpack.c.1.s8 %v762_v33 }
 0x445   : > { %3606 = vmatpush.bf16.msrb.mxu2 %v3364_v40  ;;  %v3139_v10 = vcvt.s32.f32 %v2627_v3  ;;  %v3155_v12 = vcvt.s32.f32 %v2643_v4  ;;  %v2628_v13 = vunpack.c.0.s8 %v826_v39  ;;  %v2644_v14 = vunpack.c.1.s8 %v826_v39 }
 0x446   : > { %v3331_v17 = vpack.c.bf16 %v2899_v7, %v2883_v2  ;;  %v2884_v18 = vcvt.s32.f32 %v2372_v30  ;;  %v2900_v19 = vcvt.s32.f32 %v2388_v8  ;;  %v2339_v22 = vunpack.c.2.s8 %v11199_v5  ;;  %v11215_v2 = vld [vmem:[%s10998_s20 + $0x18] sm:$0xf]  ;;  %v11220_v7 = vld [vmem:[%s11133_s30 + $0x290] sm:$0xff] }
 0x447   : > { %3593 = vmatpush.bf16.msrb.mxu1 %v3475_v52  ;;  %3621 = vmatpush.bf16.msrb.mxu3 %v3476_v6  ;;  %v3459_v24 = vpack.c.bf16 %v3155_v12, %v3139_v10  ;;  %v3140_v25 = vcvt.s32.f32 %v2628_v13  ;;  %v3156_v26 = vcvt.s32.f32 %v2644_v14  ;;  %v2355_v27 = vunpack.c.3.s8 %v11199_v5 }
 0x448   : > { %3580 = vmatpush.bf16.msrb.mxu0 %v3331_v17  ;;  %v3332_v29 = vpack.c.bf16 %v2900_v19, %v2884_v18  ;;  %v2851_v9 = vcvt.s32.f32 %v2339_v22  ;;  %v2595_v31 = vunpack.c.2.s8 %v809_v16  ;;  %v2611_v33 = vunpack.c.3.s8 %v809_v16  ;;  %v730_v17 = vld [vmem:[%s11133_s30 + $0x18] sm:$0xff] }
 0x449   : > { %3607 = vmatpush.bf16.msrb.mxu2 %v3348_v0  ;;  %v3460_v35 = vpack.c.bf16 %v3156_v26, %v3140_v25  ;;  %v2867_v36 = vcvt.s32.f32 %v2355_v27  ;;  %v2340_v37 = vunpack.c.2.s8 %v746_v23  ;;  %v2356_v38 = vunpack.c.3.s8 %v746_v23  ;;  %v11212_v0 = vld [vmem:[%s11133_s30 + $0x10] sm:$0xff] }
 0x44a   : > { %v3107_v40 = vcvt.s32.f32 %v2595_v31  ;;  %v3123_v41 = vcvt.s32.f32 %v2611_v33  ;;  %v2596_v45 = vunpack.c.2.s8 %v810_v28  ;;  %v2612_v46 = vunpack.c.3.s8 %v810_v28 }
 0x44b   : > { %3594 = vmatpush.bf16.msrb.mxu1 %v3459_v24  ;;  %3622 = vmatpush.bf16.msrb.mxu3 %v3460_v35  ;;  %v3315_v50 = vpack.c.bf16 %v2867_v36, %v2851_v9  ;;  %v2852_v51 = vcvt.s32.f32 %v2340_v37  ;;  %v2868_v42 = vcvt.s32.f32 %v2356_v38  ;;  %v2307_v53 = vunpack.c.0.s8 %v11199_v5  ;;  %v794_v35 = vld [vmem:[%s11133_s30 + $0x298] sm:$0xff] }
 0x44c   : > { %v3443_v63 = vpack.c.bf16 %v3123_v41, %v3107_v40  ;;  %v3108_v1 = vcvt.s32.f32 %v2596_v45  ;;  %v3124_v54 = vcvt.s32.f32 %v2612_v46  ;;  %v2323_v59 = vunpack.c.1.s8 %v11199_v5 }
 0x44d   : > { %3608 = vmatpush.bf16.msrb.mxu2 %v3332_v29  ;;  %3581 = vmatpush.bf16.msrb.mxu0 %v3315_v50  ;;  %v3316_v58 = vpack.c.bf16 %v2868_v42, %v2852_v51  ;;  %v2563_v60 = vunpack.c.0.s8 %v809_v16  ;;  %v2819_v61 = vcvt.s32.f32 %v2307_v53  ;;  %v2579_v56 = vunpack.c.1.s8 %v809_v16 }
 0x44e   : > { %v3444_v52 = vpack.c.bf16 %v3124_v54, %v3108_v1  ;;  %v2308_v62 = vunpack.c.0.s8 %v746_v23  ;;  %v2234_v3 = vperm.slane %v11215_v2, 2  ;;  %v2835_v4 = vcvt.s32.f32 %v2323_v59 }
 0x44f   : > { %3595 = vmatpush.bf16.msrb.mxu1 %v3443_v63  ;;  %v3075_v6 = vcvt.s32.f32 %v2563_v60  ;;  %v3091_v5 = vcvt.s32.f32 %v2579_v56  ;;  %v2324_v30 = vunpack.c.1.s8 %v746_v23  ;;  %v2564_v10 = vunpack.c.0.s8 %v810_v28 }
 0x450   : > { %3623 = vmatpush.bf16.msrb.mxu3 %v3444_v52  ;;  %v2820_v8 = vcvt.s32.f32 %v2308_v62  ;;  %v3299_v12 = vpack.c.bf16 %v2835_v4, %v2819_v61  ;;  %v2580_v13 = vunpack.c.1.s8 %v810_v28  ;;  %v2275_v14 = vunpack.c.2.s8 %v11212_v0 }
 0x451   : > { %3609 = vmatpush.bf16.msrb.mxu2 %v3316_v58  ;;  %v2291_v16 = vunpack.c.3.s8 %v11212_v0  ;;  %v3427_v19 = vpack.c.bf16 %v3091_v5, %v3075_v6  ;;  %v2836_v22 = vcvt.s32.f32 %v2324_v30  ;;  %v3076_v24 = vcvt.s32.f32 %v2564_v10 }
 0x452   : > { %v2531_v25 = vunpack.c.2.s8 %v11220_v7  ;;  %3582 = vmatpush.bf16.msrb.mxu0 %v3299_v12  ;;  %v3092_v23 = vcvt.s32.f32 %v2580_v13  ;;  %v2787_v27 = vcvt.s32.f32 %v2275_v14  ;;  %v2547_v9 = vunpack.c.3.s8 %v11220_v7 }
 0x453   : > { %v2803_v29 = vcvt.s32.f32 %v2291_v16  ;;  %3596 = vmatpush.bf16.msrb.mxu1 %v3427_v19  ;;  %v3300_v28 = vpack.c.bf16 %v2836_v22, %v2820_v8  ;;  %v2276_v33 = vunpack.c.2.s8 %v730_v17  ;;  %v2292_v40 = vunpack.c.3.s8 %v730_v17  ;;  %v843_v22 = vld [vmem:[%s11133_s30 + $0x480] sm:$0xff] }
 0x454   : > { %v3043_v31 = vcvt.s32.f32 %v2531_v25  ;;  %v3428_v38 = vpack.c.bf16 %v3092_v23, %v3076_v24  ;;  %v3059_v45 = vcvt.s32.f32 %v2547_v9  ;;  %v2532_v50 = vunpack.c.2.s8 %v794_v35 }
 0x455   : > { %3610 = vmatpush.bf16.msrb.mxu2 %v3300_v28  ;;  %v2788_v46 = vcvt.s32.f32 %v2276_v33  ;;  %v2548_v63 = vunpack.c.3.s8 %v794_v35  ;;  %v2243_v1 = vunpack.c.0.s8 %v11212_v0  ;;  %v2259_v58 = vunpack.c.1.s8 %v11212_v0  ;;  %v11239_v0 = vld [vmem:[%s11133_s30 + $0x200] sm:$0xff]  ;;  %v780_v33 = vld [vmem:[%s11133_s30 + $0x208] sm:$0xff] }
 0x456   : > { %3624 = vmatpush.bf16.msrb.mxu3 %v3428_v38  ;;  %v3411_v42 = vpack.c.bf16 %v3059_v45, %v3043_v31  ;;  %v3044_v53 = vcvt.s32.f32 %v2532_v50  ;;  %v2499_v59 = vunpack.c.0.s8 %v11220_v7  ;;  %v2515_v56 = vunpack.c.1.s8 %v11220_v7 }
 0x457   : > { %v3060_v52 = vcvt.s32.f32 %v2548_v63  ;;  %v2755_v61 = vcvt.s32.f32 %v2243_v1  ;;  %v2771_v62 = vcvt.s32.f32 %v2259_v58  ;;  %v2244_v6 = vunpack.c.0.s8 %v730_v17 }
 0x458   : > { %3597 = vmatpush.bf16.msrb.mxu1 %v3411_v42  ;;  %v3011_v4 = vcvt.s32.f32 %v2499_v59  ;;  %v2260_v5 = vunpack.c.1.s8 %v730_v17  ;;  %v3027_v10 = vcvt.s32.f32 %v2515_v56  ;;  %v2500_v12 = vunpack.c.0.s8 %v794_v35 }
 0x459   : > { %v3412_v8 = vpack.c.bf16 %v3060_v52, %v3044_v53  ;;  %v3267_v14 = vpack.c.bf16 %v2771_v62, %v2755_v61  ;;  %v2756_v16 = vcvt.s32.f32 %v2244_v6  ;;  %v2516_v19 = vunpack.c.1.s8 %v794_v35 }
 0x45a   : > { %v3395_v17 = vpack.c.bf16 %v3027_v10, %v3011_v4  ;;  %v2485_v9 = vunpack.c.3.s8 %v11239_v0  ;;  %v2725_v31 = vunpack.c.2.s8 %v843_v22  ;;  %v2437_v4 = vunpack.c.0.s8 %v11239_v0 }
 0x45b   : > { %3625 = vmatpush.bf16.msrb.mxu3 %v3412_v8  ;;  %v3028_v23 = vcvt.s32.f32 %v2516_v19  ;;  %v2453_v6 = vunpack.c.1.s8 %v11239_v0  ;;  %v2709_v10 = vunpack.c.1.s8 %v843_v22 }
 0x45c   : > { %3598 = vmatpush.bf16.msrb.mxu1 %v3395_v17  ;;  %v11255_v45 = vcvt.s32.f32 %v2485_v9 }
 0x4a2   : > { %v2195_v39 = vpop.xlane.xlu0 %2194 }
 0x4a3   : > { %v2199_v48 = vmul.f32 %v2195_v39, %v11135_v20  ;;  %v3283_v39 = vpack.c.bf16 %v2803_v29, %v2787_v27  ;;  %v2469_v27 = vunpack.c.2.s8 %v11239_v0  ;;  %v2454_v0 = vunpack.c.1.s8 %v780_v33 }
 0x4a5   : > { %v11208_v55 = vadd.f32 1e-05, %v2199_v48  ;;  %3583 = vmatpush.bf16.msrb.mxu0 %v3283_v39  ;;  %v2804_v48 = vcvt.s32.f32 %v2292_v40  ;;  %v11252_v39 = vcvt.s32.f32 %v2469_v27  ;;  %v844_v40 = vld [vmem:[%s11133_s30 + $0x488] sm:$0xff] }
 0x4a6   : > { %v2726_v1 = vunpack.c.2.s8 %v844_v40  ;;  %v2742_v61 = vunpack.c.3.s8 %v844_v40  ;;  %v2694_v27 = vunpack.c.0.s8 %v844_v40 }
 0x4a7   : > { %10532 = vrsqrt.f32 %v11208_v55  ;;  %vm2209_vm11 = vweird.f32 %v11208_v55  ;;  %v3284_v54 = vpack.c.bf16 %v2804_v48, %v2788_v46  ;;  %v2741_v46 = vunpack.c.3.s8 %v843_v22 }
 0x4a8   : > { %v3381_v42 = vpack.c.bf16 %v11255_v45, %v11252_v39  ;;  %v11281_v56 = vcvt.s32.f32 %v2726_v1  ;;  %v3254_v8 = vcvt.s32.f32 %v2742_v61  ;;  %v811_v39 = vld [vmem:[%s11133_s30 + $0x340] sm:$0xff] }
 0x4a9   : > { %3611 = vmatpush.bf16.msrb.mxu2 %v3284_v54  ;;  %3584 = vmatpush.bf16.msrb.mxu0 %v3267_v14  ;;  %v11265_v63 = vcvt.s32.f32 %v2741_v46 }
 0x4aa   : > { %v2198_v18 = vpop.xlane.xlu1 %2197  ;;  %v3510_v19 = vpack.c.bf16 %v3254_v8, %v11281_v56 }
 0x4ab   : > { %v2200_v26 = vmul.f32 %v2198_v18, %v11135_v20  ;;  %v2772_v18 = vcvt.s32.f32 %v2260_v5  ;;  %v2693_v5 = vunpack.c.0.s8 %v843_v22 }
 0x4ad   : > { %v10533_v36 = vpop.eup %10532  ;;  %v11229_v37 = vadd.f32 1e-05, %v2200_v26  ;;  %v3268_v25 = vpack.c.bf16 %v2772_v18, %v2756_v16  ;;  %v3012_v26 = vcvt.s32.f32 %v2500_v12  ;;  %v2438_v12 = vunpack.c.0.s8 %v780_v33 }
 0x4ae   : > { %v2204_v41 = vmul.f32 %v10533_v36, %v11208_v55  ;;  %vm2210_vm12 = vweird.f32 %v10533_v36  ;;  %v11294_v18 = vcvt.s32.f32 %v2453_v6 }
 0x4af   : > { %10534 = vrsqrt.f32 %v11229_v37  ;;  %vm2219_vm13 = vweird.f32 %v11229_v37  ;;  %vm2211_vm15 = vmor %vm2209_vm11, %vm2210_vm12  ;;  %3612 = vmatpush.bf16.msrb.mxu2 %v3268_v25  ;;  %v3396_v55 = vpack.c.bf16 %v3028_v23, %v3012_v26  ;;  %v11308_v17 = vcvt.s32.f32 %v2438_v12  ;;  %v827_v25 = vld [vmem:[%s11133_s30 + $0x3e0] sm:$0xff] }
 0x4b0   : > { %v2205_v51 = vmul.f32 %v10533_v36, %v2204_v41  ;;  %v2966_v23 = vcvt.s32.f32 %v2454_v0  ;;  %v2629_v61 = vunpack.c.0.s8 %v827_v25 }
 0x4b1   : > { %3626 = vmatpush.bf16.msrb.mxu3 %v3396_v55 }
 0x4b2   : > { %v2206_v60 = vmul.f32 0.5, %v2205_v51  ;;  %v3366_v9 = vpack.c.bf16 %v2966_v23, %v11308_v17  ;;  %v3141_v12 = vcvt.s32.f32 %v2629_v61 }
 0x4b4   : > { %v2207_v30 = vsub.f32 1.5, %v2206_v60 }
 0x4b5   : > { %v10535_v13 = vpop.eup %10534 }
 0x4b6   : > { %v2208_v24 = vmul.f32 %v10533_v36, %v2207_v30  ;;  %v2214_v7 = vmul.f32 %v10535_v13, %v11229_v37  ;;  %vm2220_vm14 = vweird.f32 %v10535_v13  ;;  %v11292_v37 = vcvt.s32.f32 %v2437_v4 }
 0x4b7   : > { %vm2221_vm0 = vmor %vm2219_vm13, %vm2220_vm14 }
 0x4b8   : > { %v2212_v29 = vsel %vm2211_vm15, %v10533_v36, %v2208_v24  ;;  %v2215_v28 = vmul.f32 %v10535_v13, %v2214_v7  ;;  %v11257_v36 = vcvt.s32.f32 %v2725_v31  ;;  %v11297_v24 = vcvt.s32.f32 %v2693_v5 }
 0x4b9   : > { %v2223_v35 = vmul.f32 %v2212_v29, %v11147_v43  ;;  %v2224_v38 = vmul.f32 %v2212_v29, %v11150_v44  ;;  %v2470_v43 = vunpack.c.2.s8 %v780_v33  ;;  %v2486_v44 = vunpack.c.3.s8 %v780_v33 }
 0x4ba   : > { %v2216_v41 = vmul.f32 0.5, %v2215_v28  ;;  %v3509_v52 = vpack.c.bf16 %v11265_v63, %v11257_v36  ;;  %v11299_v7 = vcvt.s32.f32 %v2709_v10  ;;  %v2710_v29 = vunpack.c.1.s8 %v844_v40  ;;  %v764_v28 = vld [vmem:[%s11133_s30 + $0x168] sm:$0xff] }
 0x4bb   : > { %v2229_v48 = vmul.f32 %v2227_v11, %v2223_v35  ;;  %v2230_v50 = vmul.f32 %v2228_v32, %v2224_v38  ;;  %v11275_v58 = vcvt.s32.f32 %v2470_v43  ;;  %v11277_v59 = vcvt.s32.f32 %v2486_v44  ;;  %v828_v38 = vld [vmem:[%s11133_s30 + $0x3e8] sm:$0xff] }
 0x4bc   : > { %v2217_v51 = vsub.f32 1.5, %v2216_v41  ;;  %v3493_v26 = vpack.c.bf16 %v11299_v7, %v11297_v24  ;;  %v3206_v31 = vcvt.s32.f32 %v2694_v27  ;;  %v3222_v33 = vcvt.s32.f32 %v2710_v29  ;;  %v748_v24 = vld [vmem:[%s11133_s30 + $0xc8] sm:$0xff] }
 0x4bd   : > { %v11269_v54 = vadd.f32 %v2233_v34, %v2229_v48  ;;  %v11273_v53 = vadd.f32 %v2234_v3, %v2230_v50  ;;  %v3382_v62 = vpack.c.bf16 %v11277_v59, %v11275_v58  ;;  %v2661_v35 = vunpack.c.2.s8 %v827_v25 }
 0x4be   : > { %v2218_v60 = vmul.f32 %v10535_v13, %v2217_v51  ;;  %v2677_v40 = vunpack.c.3.s8 %v827_v25  ;;  %v2406_v46 = vunpack.c.2.s8 %v764_v28  ;;  %v2422_v48 = vunpack.c.3.s8 %v764_v28 }
 0x4bf   : > { %v3173_v41 = vcvt.s32.f32 %v2661_v35  ;;  %v2662_v50 = vunpack.c.2.s8 %v828_v38  ;;  %v2678_v43 = vunpack.c.3.s8 %v828_v38  ;;  %v2645_v5 = vunpack.c.1.s8 %v827_v25 }
 0x4c0   : > { %v2222_v30 = vsel %vm2221_vm0, %v10535_v13, %v2218_v60  ;;  %v763_v13 = vld [vmem:[%s11133_s30 + $0x160] sm:$0xff]  ;;  %v3189_v44 = vcvt.s32.f32 %v2677_v40  ;;  %v2918_v51 = vcvt.s32.f32 %v2406_v46  ;;  %v2934_v58 = vcvt.s32.f32 %v2422_v48 }
 0x4c1   : > { %v2225_v14 = vmul.f32 %v2222_v30, %v11170_v15  ;;  %v2226_v16 = vmul.f32 %v2222_v30, %v11173_v21  ;;  %v3365_v21 = vpack.c.bf16 %v11294_v18, %v11292_v37  ;;  %v2373_v63 = vunpack.c.0.s8 %v763_v13  ;;  %v747_v30 = vld [vmem:[%s11133_s30 + $0xc0] sm:$0xff] }
 0x4c2   : > { %v2389_v1 = vunpack.c.1.s8 %v763_v13  ;;  %v3174_v59 = vcvt.s32.f32 %v2662_v50  ;;  %v3190_v60 = vcvt.s32.f32 %v2678_v43  ;;  %v3477_v56 = vpack.c.bf16 %v3189_v44, %v3173_v41  ;;  %v731_v43 = vld [vmem:[%s11133_s30 + $0x20] sm:$0xff] }
 0x4c3   : > { %v2231_v22 = vmul.f32 %v2227_v11, %v2225_v14  ;;  %v2232_v15 = vmul.f32 %v2228_v32, %v2226_v16  ;;  %v2405_v11 = vunpack.c.2.s8 %v763_v13  ;;  %v2421_v32 = vunpack.c.3.s8 %v763_v13 }
 0x4c4   : > { %v2885_v4 = vcvt.s32.f32 %v2373_v63  ;;  %v2901_v6 = vcvt.s32.f32 %v2389_v1  ;;  %v3350_v8 = vpack.c.bf16 %v2934_v58, %v2918_v51  ;;  %v3478_v10 = vpack.c.bf16 %v3190_v60, %v3174_v59 }
 0x4c5   : > { %v11315_v57 = vadd.f32 %v2233_v34, %v2231_v22  ;;  %v11319_v49 = vadd.f32 %v2234_v3, %v2232_v15  ;;  %v2917_v34 = vcvt.s32.f32 %v2405_v11  ;;  %v2933_v2 = vcvt.s32.f32 %v2421_v32  ;;  %v812_v15 = vld [vmem:[%s11133_s30 + $0x348] sm:$0xff] }
 0x4c6   : > { %v3494_v3 = vpack.c.bf16 %v3222_v33, %v3206_v31  ;;  %v2374_v14 = vunpack.c.0.s8 %v764_v28  ;;  %v3333_v45 = vpack.c.bf16 %v2901_v6, %v2885_v4  ;;  %v2630_v16 = vunpack.c.0.s8 %v828_v38 }
 0x4c7   : > { %v11326_v55 = vpack.c.bf16 %v11315_v57, %v11269_v54  ;;  %v11330_v47 = vpack.c.bf16 %v11319_v49, %v11273_v53  ;;  %v3349_v36 = vpack.c.bf16 %v2933_v2, %v2917_v34  ;;  %v2646_v37 = vunpack.c.1.s8 %v828_v38 }
 0x4c8   : > { %v2341_v18 = vunpack.c.2.s8 %v747_v30  ;;  %v3142_v13 = vcvt.s32.f32 %v2630_v16  ;;  %v2597_v22 = vunpack.c.2.s8 %v811_v39  ;;  %v2613_v27 = vunpack.c.3.s8 %v811_v39 }
 0x4c9   : > { %3529 = vmatmul.bf16.vlgmr.msra.gmra.mxu0 %v11326_v55  ;;  %3543 = vmatmul.bf16.vlgmr.msra.gmra.mxu1 %v11330_v47  ;;  %v3158_v17 = vcvt.s32.f32 %v2646_v37  ;;  %v2614_v38 = vunpack.c.3.s8 %v812_v15  ;;  %v2309_v34 = vunpack.c.0.s8 %v747_v30  ;;  %v2325_v40 = vunpack.c.1.s8 %v747_v30 }
 0x4ca   : > { %3557 = vmatmul.bf16.vlgmr.msra.gmra.mxu2 %v11326_v55  ;;  %3571 = vmatmul.bf16.vlgmr.msra.gmra.mxu3 %v11330_v47  ;;  %v2853_v25 = vcvt.s32.f32 %v2341_v18  ;;  %v3109_v11 = vcvt.s32.f32 %v2597_v22  ;;  %v3125_v31 = vcvt.s32.f32 %v2613_v27  ;;  %v2565_v41 = vunpack.c.0.s8 %v811_v39 }
 0x4cb   : > { %3633 = vmatpush.bf16.msra.mxu0 %v3381_v42  ;;  %3647 = vmatpush.bf16.msra.mxu1 %v3509_v52  ;;  %v3157_v42 = vcvt.s32.f32 %v2645_v5  ;;  %v2390_v52 = vunpack.c.1.s8 %v764_v28  ;;  %v3462_v32 = vpack.c.bf16 %v3158_v17, %v3142_v13  ;;  %v3126_v48 = vcvt.s32.f32 %v2614_v38 }
 0x4cc   : > { %3661 = vmatpush.bf16.msra.mxu2 %v3382_v62  ;;  %3675 = vmatpush.bf16.msra.mxu3 %v3510_v19  ;;  %v2886_v62 = vcvt.s32.f32 %v2374_v14  ;;  %v2357_v19 = vunpack.c.3.s8 %v747_v30  ;;  %v3445_v2 = vpack.c.bf16 %v3125_v31, %v3109_v11  ;;  %v2581_v50 = vunpack.c.1.s8 %v811_v39 }
 0x4cd   : > { %v3461_v7 = vpack.c.bf16 %v3157_v42, %v3141_v12  ;;  %v2902_v0 = vcvt.s32.f32 %v2390_v52  ;;  %v2837_v44 = vcvt.s32.f32 %v2325_v40  ;;  %v3077_v51 = vcvt.s32.f32 %v2565_v41 }
 0x4ce   : > { %v2869_v23 = vcvt.s32.f32 %v2357_v19  ;;  %v2310_v63 = vunpack.c.0.s8 %v748_v24  ;;  %v2326_v1 = vunpack.c.1.s8 %v748_v24  ;;  %v3093_v59 = vcvt.s32.f32 %v2581_v50 }
 0x4cf   : > { %3634 = vmatpush.bf16.msra.mxu0 %v3365_v21  ;;  %3648 = vmatpush.bf16.msra.mxu1 %v3493_v26  ;;  %v3334_v29 = vpack.c.bf16 %v2902_v0, %v2886_v62  ;;  %v2342_v21 = vunpack.c.2.s8 %v748_v24  ;;  %v2358_v26 = vunpack.c.3.s8 %v748_v24  ;;  %v2566_v60 = vunpack.c.0.s8 %v812_v15 }
 0x4d0   : > { %3662 = vmatpush.bf16.msra.mxu2 %v3366_v9  ;;  %3676 = vmatpush.bf16.msra.mxu3 %v3494_v3  ;;  %v3317_v28 = vpack.c.bf16 %v2869_v23, %v2853_v25  ;;  %v2598_v9 = vunpack.c.2.s8 %v812_v15  ;;  %v2582_v61 = vunpack.c.1.s8 %v812_v15  ;;  %v2822_v6 = vcvt.s32.f32 %v2310_v63 }
 0x4d1   : > { %v2854_v33 = vcvt.s32.f32 %v2342_v21  ;;  %v2870_v35 = vcvt.s32.f32 %v2358_v26  ;;  %v2838_v5 = vcvt.s32.f32 %v2326_v1  ;;  %v2277_v30 = vunpack.c.2.s8 %v731_v43 }
 0x4d2   : > { %v3110_v3 = vcvt.s32.f32 %v2598_v9  ;;  %v3078_v12 = vcvt.s32.f32 %v2566_v60  ;;  %v3094_v14 = vcvt.s32.f32 %v2582_v61  ;;  %v2293_v39 = vunpack.c.3.s8 %v731_v43  ;;  %v781_v9 = vld [vmem:[%s11133_s30 + $0x210] sm:$0xff] }
 0x4d3   : > { %3635 = vmatpush.bf16.msra.mxu0 %v3349_v36  ;;  %3649 = vmatpush.bf16.msra.mxu1 %v3477_v56  ;;  %v3318_v46 = vpack.c.bf16 %v2870_v35, %v2854_v33  ;;  %v2821_v36 = vcvt.s32.f32 %v2309_v34  ;;  %v795_v56 = vld [vmem:[%s11133_s30 + $0x2a0] sm:$0xff]  ;;  %v3302_v42 = vpack.c.bf16 %v2838_v5, %v2822_v6  ;;  %v2789_v52 = vcvt.s32.f32 %v2277_v30 }
 0x4d4   : > { %3663 = vmatpush.bf16.msra.mxu2 %v3350_v8  ;;  %3677 = vmatpush.bf16.msra.mxu3 %v3478_v10  ;;  %v3446_v58 = vpack.c.bf16 %v3126_v48, %v3110_v3  ;;  %v732_v8 = vld [vmem:[%s11133_s30 + $0x28] sm:$0xff]  ;;  %v3429_v10 = vpack.c.bf16 %v3093_v59, %v3077_v51  ;;  %v2533_v16 = vunpack.c.2.s8 %v795_v56  ;;  %v2549_v62 = vunpack.c.3.s8 %v795_v56  ;;  %v846_v59 = vld [vmem:[%s11133_s30 + $0x498] sm:$0xff] }
 0x4d5   : > { %v3301_v4 = vpack.c.bf16 %v2837_v44, %v2821_v36  ;;  %v3430_v37 = vpack.c.bf16 %v3094_v14, %v3078_v12  ;;  %v2805_v18 = vcvt.s32.f32 %v2293_v39  ;;  %v2278_v19 = vunpack.c.2.s8 %v732_v8  ;;  %v782_v44 = vld [vmem:[%s11133_s30 + $0x218] sm:$0xff] }
 0x4d6   : > { %v2294_v24 = vunpack.c.3.s8 %v732_v8  ;;  %v3061_v0 = vcvt.s32.f32 %v2549_v62  ;;  %v2245_v23 = vunpack.c.0.s8 %v731_v43  ;;  %v2261_v21 = vunpack.c.1.s8 %v731_v43 }
 0x4d7   : > { %3636 = vmatpush.bf16.msra.mxu0 %v3333_v45  ;;  %3650 = vmatpush.bf16.msra.mxu1 %v3461_v7  ;;  %v796_v45 = vld [vmem:[%s11133_s30 + $0x2a8] sm:$0xff]  ;;  %v3045_v7 = vcvt.s32.f32 %v2533_v16  ;;  %v3285_v15 = vpack.c.bf16 %v2805_v18, %v2789_v52  ;;  %v2790_v17 = vcvt.s32.f32 %v2278_v19  ;;  %v2517_v31 = vunpack.c.1.s8 %v795_v56 }
 0x4d8   : > { %3664 = vmatpush.bf16.msra.mxu2 %v3334_v29  ;;  %3678 = vmatpush.bf16.msra.mxu3 %v3462_v32  ;;  %v2534_v13 = vunpack.c.2.s8 %v796_v45  ;;  %v2550_v22 = vunpack.c.3.s8 %v796_v45  ;;  %v2806_v25 = vcvt.s32.f32 %v2294_v24  ;;  %v2757_v32 = vcvt.s32.f32 %v2245_v23 }
 0x4d9   : > { %3585 = vmatmul.bf16.vlgmr.msrb.gmra.mxu0 %v11326_v55  ;;  %3599 = vmatmul.bf16.vlgmr.msrb.gmra.mxu1 %v11330_v47  ;;  %v3413_v27 = vpack.c.bf16 %v3061_v0, %v3045_v7  ;;  %v2773_v35 = vcvt.s32.f32 %v2261_v21  ;;  %v2246_v38 = vunpack.c.0.s8 %v732_v8  ;;  %v2262_v34 = vunpack.c.1.s8 %v732_v8 }
 0x4da   : > { %3613 = vmatmul.bf16.vlgmr.msrb.gmra.mxu2 %v11326_v55  ;;  %3627 = vmatmul.bf16.vlgmr.msrb.gmra.mxu3 %v11330_v47  ;;  %v3046_v29 = vcvt.s32.f32 %v2534_v13  ;;  %v3062_v11 = vcvt.s32.f32 %v2550_v22  ;;  %v3286_v26 = vpack.c.bf16 %v2806_v25, %v2790_v17  ;;  %v3029_v3 = vcvt.s32.f32 %v2517_v31  ;;  %v765_v22 = vld [vmem:[%s11133_s30 + $0x170] sm:$0xff] }
 0x4db   : > { %3637 = vmatpush.bf16.msra.mxu0 %v3317_v28  ;;  %3651 = vmatpush.bf16.msra.mxu1 %v3445_v2  ;;  %v2501_v28 = vunpack.c.0.s8 %v795_v56  ;;  %v2502_v40 = vunpack.c.0.s8 %v796_v45  ;;  %v2518_v41 = vunpack.c.1.s8 %v796_v45  ;;  %v3269_v48 = vpack.c.bf16 %v2773_v35, %v2757_v32 }
 0x4dc   : > { %3665 = vmatpush.bf16.msra.mxu2 %v3318_v46  ;;  %3679 = vmatpush.bf16.msra.mxu3 %v3446_v58  ;;  %v3414_v33 = vpack.c.bf16 %v3062_v11, %v3046_v29  ;;  %v845_v46 = vld [vmem:[%s11133_s30 + $0x490] sm:$0xff]  ;;  %v2758_v36 = vcvt.s32.f32 %v2246_v38  ;;  %v2774_v50 = vcvt.s32.f32 %v2262_v34  ;;  %v2471_v43 = vunpack.c.2.s8 %v781_v9 }
 0x4dd   : > { %v3013_v2 = vcvt.s32.f32 %v2501_v28  ;;  %v3014_v63 = vcvt.s32.f32 %v2502_v40  ;;  %v3030_v1 = vcvt.s32.f32 %v2518_v41  ;;  %v2487_v58 = vunpack.c.3.s8 %v781_v9 }
 0x4de   : > { %v3270_v60 = vpack.c.bf16 %v2774_v50, %v2758_v36  ;;  %v2983_v61 = vcvt.s32.f32 %v2471_v43  ;;  %v2727_v56 = vunpack.c.2.s8 %v845_v46  ;;  %v2472_v30 = vunpack.c.2.s8 %v782_v44 }
 0x4df   : > { %3638 = vmatpush.bf16.msra.mxu0 %v3301_v4  ;;  %3652 = vmatpush.bf16.msra.mxu1 %v3429_v10  ;;  %v3397_v51 = vpack.c.bf16 %v3029_v3, %v3013_v2  ;;  %v2743_v4 = vunpack.c.3.s8 %v845_v46  ;;  %v3398_v6 = vpack.c.bf16 %v3030_v1, %v3014_v63  ;;  %v2999_v5 = vcvt.s32.f32 %v2487_v58  ;;  %v830_v3 = vld [vmem:[%s11133_s30 + $0x3f8] sm:$0xff] }
 0x4e0   : > { %3666 = vmatpush.bf16.msra.mxu2 %v3302_v42  ;;  %3680 = vmatpush.bf16.msra.mxu3 %v3430_v37  ;;  %v2488_v8 = vunpack.c.3.s8 %v782_v44  ;;  %v3239_v10 = vcvt.s32.f32 %v2727_v56  ;;  %v2728_v14 = vunpack.c.2.s8 %v846_v59  ;;  %v2744_v39 = vunpack.c.3.s8 %v846_v59 }
 0x4e1   : > { %v3255_v12 = vcvt.s32.f32 %v2743_v4  ;;  %v3383_v45 = vpack.c.bf16 %v2999_v5, %v2983_v61  ;;  %v2984_v42 = vcvt.s32.f32 %v2472_v30  ;;  %v2439_v16 = vunpack.c.0.s8 %v781_v9 }
 0x4e2   : > { %v3000_v52 = vcvt.s32.f32 %v2488_v8  ;;  %v3240_v37 = vcvt.s32.f32 %v2728_v14  ;;  %v3256_v18 = vcvt.s32.f32 %v2744_v39  ;;  %v2455_v19 = vunpack.c.1.s8 %v781_v9  ;;  %v749_v39 = vld [vmem:[%s11133_s30 + $0xd0] sm:$0xff] }
 0x4e3   : > { %3639 = vmatpush.bf16.msra.mxu0 %v3285_v15  ;;  %3653 = vmatpush.bf16.msra.mxu1 %v3413_v27  ;;  %v3511_v62 = vpack.c.bf16 %v3255_v12, %v3239_v10  ;;  %v2951_v7 = vcvt.s32.f32 %v2439_v16  ;;  %v2695_v0 = vunpack.c.0.s8 %v845_v46  ;;  %v2711_v13 = vunpack.c.1.s8 %v845_v46 }
 0x4e4   : > { %3667 = vmatpush.bf16.msra.mxu2 %v3286_v26  ;;  %3681 = vmatpush.bf16.msra.mxu3 %v3414_v33  ;;  %v3384_v24 = vpack.c.bf16 %v3000_v52, %v2984_v42  ;;  %v3512_v15 = vpack.c.bf16 %v3256_v18, %v3240_v37  ;;  %v2967_v17 = vcvt.s32.f32 %v2455_v19  ;;  %v2440_v25 = vunpack.c.0.s8 %v782_v44  ;;  %v829_v26 = vld [vmem:[%s11133_s30 + $0x3f0] sm:$0xff]  ;;  %v766_v33 = vld [vmem:[%s11133_s30 + $0x178] sm:$0xff] }
 0x4e5   : > { %v2456_v23 = vunpack.c.1.s8 %v782_v44  ;;  %v3207_v27 = vcvt.s32.f32 %v2695_v0  ;;  %v3223_v29 = vcvt.s32.f32 %v2711_v13  ;;  %v2696_v11 = vunpack.c.0.s8 %v846_v59 }
 0x4e6   : > { %v2712_v21 = vunpack.c.1.s8 %v846_v59  ;;  %v3367_v32 = vpack.c.bf16 %v2967_v17, %v2951_v7  ;;  %v2952_v28 = vcvt.s32.f32 %v2440_v25  ;;  %v2407_v9 = vunpack.c.2.s8 %v765_v22 }
 0x4e7   : > { %3640 = vmatpush.bf16.msra.mxu0 %v3269_v48  ;;  %3654 = vmatpush.bf16.msra.mxu1 %v3397_v51  ;;  %v2968_v31 = vcvt.s32.f32 %v2456_v23  ;;  %v3495_v35 = vpack.c.bf16 %v3223_v29, %v3207_v27  ;;  %v3208_v38 = vcvt.s32.f32 %v2696_v11  ;;  %v2423_v2 = vunpack.c.3.s8 %v765_v22  ;;  %v814_v29 = vld [vmem:[%s11133_s30 + $0x358] sm:$0xff] }
 0x4e8   : > { %3668 = vmatpush.bf16.msra.mxu2 %v3270_v60  ;;  %3682 = vmatpush.bf16.msra.mxu3 %v3398_v6  ;;  %v3224_v34 = vcvt.s32.f32 %v2712_v21  ;;  %v2919_v41 = vcvt.s32.f32 %v2407_v9  ;;  %v2663_v46 = vunpack.c.2.s8 %v829_v26  ;;  %v2679_v48 = vunpack.c.3.s8 %v829_v26 }
 0x4e9   : > { %v3368_v40 = vpack.c.bf16 %v2968_v31, %v2952_v28  ;;  %v2935_v50 = vcvt.s32.f32 %v2423_v2  ;;  %v2408_v43 = vunpack.c.2.s8 %v766_v33  ;;  %v2424_v44 = vunpack.c.3.s8 %v766_v33 }
 0x4ea   : > { %3655 = vmatmul.bf16.vlgmr.msra.gmra.mxu1 %v11330_v47  ;;  %3641 = vmatmul.bf16.vlgmr.msra.gmra.mxu0 %v11326_v55  ;;  %v3496_v36 = vpack.c.bf16 %v3224_v34, %v3208_v38  ;;  %v3175_v51 = vcvt.s32.f32 %v2663_v46  ;;  %v3191_v63 = vcvt.s32.f32 %v2679_v48  ;;  %v2664_v1 = vunpack.c.2.s8 %v830_v3 }
 0x4eb   : > { %3689 = vmatpush.bf16.msrb.mxu0 %v3383_v45  ;;  %3703 = vmatpush.bf16.msrb.mxu1 %v3511_v62  ;;  %v2680_v58 = vunpack.c.3.s8 %v830_v3  ;;  %v3351_v59 = vpack.c.bf16 %v2935_v50, %v2919_v41  ;;  %v2920_v60 = vcvt.s32.f32 %v2408_v43  ;;  %v2936_v61 = vcvt.s32.f32 %v2424_v44 }
 0x4ec   : > { %3717 = vmatpush.bf16.msrb.mxu2 %v3384_v24  ;;  %3683 = vmatmul.bf16.vlgmr.msra.gmra.mxu3 %v11330_v47  ;;  %v2375_v56 = vunpack.c.0.s8 %v765_v22  ;;  %v3479_v4 = vpack.c.bf16 %v3191_v63, %v3175_v51  ;;  %v3176_v6 = vcvt.s32.f32 %v2664_v1  ;;  %v2391_v30 = vunpack.c.1.s8 %v765_v22  ;;  %v813_v24 = vld [vmem:[%s11133_s30 + $0x350] sm:$0xff] }
 0x4ed   : > { %3731 = vmatpush.bf16.msrb.mxu3 %v3512_v15  ;;  %3669 = vmatmul.bf16.vlgmr.msra.gmra.mxu2 %v11326_v55  ;;  %v3192_v5 = vcvt.s32.f32 %v2680_v58  ;;  %v3352_v8 = vpack.c.bf16 %v2936_v61, %v2920_v60  ;;  %v2631_v12 = vunpack.c.0.s8 %v829_v26  ;;  %v2647_v14 = vunpack.c.1.s8 %v829_v26  ;;  %v750_v15 = vld [vmem:[%s11133_s30 + $0xd8] sm:$0xff]  ;;  %v733_v58 = vld [vmem:[%s11133_s30 + $0x30] sm:$0xff] }
 0x4ee   : > { %v2887_v10 = vcvt.s32.f32 %v2375_v56  ;;  %v2903_v42 = vcvt.s32.f32 %v2391_v30  ;;  %v2376_v52 = vunpack.c.0.s8 %v766_v33  ;;  %v2392_v16 = vunpack.c.1.s8 %v766_v33 }
 0x4ef   : > { %3690 = vmatpush.bf16.msrb.mxu0 %v3367_v32  ;;  %3704 = vmatpush.bf16.msrb.mxu1 %v3495_v35  ;;  %v3480_v45 = vpack.c.bf16 %v3192_v5, %v3176_v6  ;;  %v3143_v62 = vcvt.s32.f32 %v2631_v12  ;;  %v3159_v37 = vcvt.s32.f32 %v2647_v14  ;;  %v2632_v18 = vunpack.c.0.s8 %v830_v3 }
 0x4f0   : > { %3718 = vmatpush.bf16.msrb.mxu2 %v3368_v40  ;;  %v2648_v19 = vunpack.c.1.s8 %v830_v3  ;;  %v3335_v7 = vpack.c.bf16 %v2903_v42, %v2887_v10  ;;  %v2888_v0 = vcvt.s32.f32 %v2376_v52  ;;  %v2904_v13 = vcvt.s32.f32 %v2392_v16 }
 0x4f1   : > { %3732 = vmatpush.bf16.msrb.mxu3 %v3496_v36  ;;  %v2343_v22 = vunpack.c.2.s8 %v749_v39  ;;  %v3463_v17 = vpack.c.bf16 %v3159_v37, %v3143_v62  ;;  %v3144_v25 = vcvt.s32.f32 %v2632_v18  ;;  %v2359_v27 = vunpack.c.3.s8 %v749_v39  ;;  %v798_v37 = vld [vmem:[%s11133_s30 + $0x2b8] sm:$0xff] }
 0x4f2   : > { %v3160_v23 = vcvt.s32.f32 %v2648_v19  ;;  %v3336_v11 = vpack.c.bf16 %v2904_v13, %v2888_v0  ;;  %v2599_v26 = vunpack.c.2.s8 %v813_v24  ;;  %v2615_v32 = vunpack.c.3.s8 %v813_v24 }
 0x4f3   : > { %3691 = vmatpush.bf16.msrb.mxu0 %v3351_v59  ;;  %3705 = vmatpush.bf16.msrb.mxu1 %v3479_v4  ;;  %v2855_v21 = vcvt.s32.f32 %v2343_v22  ;;  %v2871_v31 = vcvt.s32.f32 %v2359_v27  ;;  %v2344_v9 = vunpack.c.2.s8 %v750_v15  ;;  %v2360_v33 = vunpack.c.3.s8 %v750_v15 }
 0x4f4   : > { %3719 = vmatpush.bf16.msrb.mxu2 %v3352_v8  ;;  %v3464_v28 = vpack.c.bf16 %v3160_v23, %v3144_v25  ;;  %v3111_v35 = vcvt.s32.f32 %v2599_v26  ;;  %v3127_v38 = vcvt.s32.f32 %v2615_v32  ;;  %v2600_v34 = vunpack.c.2.s8 %v814_v29  ;;  %v797_v8 = vld [vmem:[%s11133_s30 + $0x2b0] sm:$0xff] }
 0x4f5   : > { %3733 = vmatpush.bf16.msrb.mxu3 %v3480_v45  ;;  %v2616_v2 = vunpack.c.3.s8 %v814_v29  ;;  %v3319_v3 = vpack.c.bf16 %v2871_v31, %v2855_v21  ;;  %v2856_v40 = vcvt.s32.f32 %v2344_v9  ;;  %v2872_v41 = vcvt.s32.f32 %v2360_v33  ;;  %v734_v45 = vld [vmem:[%s11133_s30 + $0x38] sm:$0xff] }
 0x4f6   : > { %v2311_v46 = vunpack.c.0.s8 %v749_v39  ;;  %v3447_v48 = vpack.c.bf16 %v3127_v38, %v3111_v35  ;;  %v3112_v36 = vcvt.s32.f32 %v2600_v34  ;;  %v2327_v43 = vunpack.c.1.s8 %v749_v39 }
 0x4f7   : > { %3692 = vmatpush.bf16.msrb.mxu0 %v3335_v7  ;;  %3706 = vmatpush.bf16.msrb.mxu1 %v3463_v17  ;;  %v3128_v50 = vcvt.s32.f32 %v2616_v2  ;;  %v3320_v44 = vpack.c.bf16 %v2872_v41, %v2856_v40  ;;  %v2567_v63 = vunpack.c.0.s8 %v813_v24  ;;  %v2583_v1 = vunpack.c.1.s8 %v813_v24  ;;  %v783_v2 = vld [vmem:[%s11133_s30 + $0x220] sm:$0xff] }
 0x4f8   : > { %3720 = vmatpush.bf16.msrb.mxu2 %v3336_v11  ;;  %v2823_v51 = vcvt.s32.f32 %v2311_v46  ;;  %v2839_v60 = vcvt.s32.f32 %v2327_v43  ;;  %v2312_v61 = vunpack.c.0.s8 %v750_v15  ;;  %v2328_v56 = vunpack.c.1.s8 %v750_v15 }
 0x4f9   : > { %3734 = vmatpush.bf16.msrb.mxu3 %v3464_v28  ;;  %v3448_v59 = vpack.c.bf16 %v3128_v50, %v3112_v36  ;;  %v3079_v4 = vcvt.s32.f32 %v2567_v63  ;;  %v3095_v6 = vcvt.s32.f32 %v2583_v1  ;;  %v2568_v5 = vunpack.c.0.s8 %v814_v29 }
 0x4fa   : > { %v2584_v30 = vunpack.c.1.s8 %v814_v29  ;;  %v3303_v10 = vpack.c.bf16 %v2839_v60, %v2823_v51  ;;  %v2824_v12 = vcvt.s32.f32 %v2312_v61  ;;  %v2840_v14 = vcvt.s32.f32 %v2328_v56 }
 0x4fb   : > { %3693 = vmatpush.bf16.msrb.mxu0 %v3319_v3  ;;  %3707 = vmatpush.bf16.msrb.mxu1 %v3447_v48  ;;  %v2279_v39 = vunpack.c.2.s8 %v733_v58  ;;  %v3431_v42 = vpack.c.bf16 %v3095_v6, %v3079_v4  ;;  %v3080_v52 = vcvt.s32.f32 %v2568_v5  ;;  %v2295_v62 = vunpack.c.3.s8 %v733_v58  ;;  %v848_v6 = vld [vmem:[%s11133_s30 + $0x4a8] sm:$0xff] }
 0x4fc   : > { %3721 = vmatpush.bf16.msrb.mxu2 %v3320_v44  ;;  %v3096_v16 = vcvt.s32.f32 %v2584_v30  ;;  %v3304_v18 = vpack.c.bf16 %v2840_v14, %v2824_v12  ;;  %v2535_v24 = vunpack.c.2.s8 %v797_v8  ;;  %v2551_v7 = vunpack.c.3.s8 %v797_v8  ;;  %v847_v44 = vld [vmem:[%s11133_s30 + $0x4a0] sm:$0xff] }
 0x4fd   : > { %3735 = vmatpush.bf16.msrb.mxu3 %v3448_v59  ;;  %v2791_v19 = vcvt.s32.f32 %v2279_v39  ;;  %v2807_v13 = vcvt.s32.f32 %v2295_v62  ;;  %v2280_v22 = vunpack.c.2.s8 %v734_v45  ;;  %v2296_v15 = vunpack.c.3.s8 %v734_v45  ;;  %v784_v59 = vld [vmem:[%s11133_s30 + $0x228] sm:$0xff] }
 0x4fe   : > { %v3432_v0 = vpack.c.bf16 %v3096_v16, %v3080_v52  ;;  %v3047_v17 = vcvt.s32.f32 %v2535_v24  ;;  %v3063_v25 = vcvt.s32.f32 %v2551_v7  ;;  %v2536_v23 = vunpack.c.2.s8 %v798_v37 }
 0x4ff   : > { %3694 = vmatpush.bf16.msrb.mxu0 %v3303_v10  ;;  %3708 = vmatpush.bf16.msrb.mxu1 %v3431_v42  ;;  %v2552_v27 = vunpack.c.3.s8 %v798_v37  ;;  %v3287_v29 = vpack.c.bf16 %v2807_v13, %v2791_v19  ;;  %v2792_v11 = vcvt.s32.f32 %v2280_v22  ;;  %v2808_v21 = vcvt.s32.f32 %v2296_v15 }
 0x500   : > { %3722 = vmatpush.bf16.msrb.mxu2 %v3304_v18  ;;  %v2247_v26 = vunpack.c.0.s8 %v733_v58  ;;  %v3415_v32 = vpack.c.bf16 %v3063_v25, %v3047_v17  ;;  %v3048_v28 = vcvt.s32.f32 %v2536_v23  ;;  %v2263_v9 = vunpack.c.1.s8 %v733_v58 }
 0x501   : > { %3736 = vmatpush.bf16.msrb.mxu3 %v3432_v0  ;;  %v3064_v31 = vcvt.s32.f32 %v2552_v27  ;;  %v3288_v33 = vpack.c.bf16 %v2808_v21, %v2792_v11  ;;  %v2503_v38 = vunpack.c.0.s8 %v797_v8  ;;  %v2519_v34 = vunpack.c.1.s8 %v797_v8  ;;  %v767_v27 = vld [vmem:[%s11133_s30 + $0x180] sm:$0xff] }
 0x502   : > { %v2759_v35 = vcvt.s32.f32 %v2247_v26  ;;  %v2775_v40 = vcvt.s32.f32 %v2263_v9  ;;  %v2248_v41 = vunpack.c.0.s8 %v734_v45  ;;  %v2264_v46 = vunpack.c.1.s8 %v734_v45 }
 0x503   : > { %3695 = vmatpush.bf16.msrb.mxu0 %v3287_v29  ;;  %3709 = vmatpush.bf16.msrb.mxu1 %v3415_v32  ;;  %v3416_v3 = vpack.c.bf16 %v3064_v31, %v3048_v28  ;;  %v3015_v48 = vcvt.s32.f32 %v2503_v38  ;;  %v3031_v36 = vcvt.s32.f32 %v2519_v34  ;;  %v2504_v50 = vunpack.c.0.s8 %v798_v37 }
 0x504   : > { %3723 = vmatpush.bf16.msrb.mxu2 %v3288_v33  ;;  %v2520_v43 = vunpack.c.1.s8 %v798_v37  ;;  %v3271_v51 = vpack.c.bf16 %v2775_v40, %v2759_v35  ;;  %v2760_v63 = vcvt.s32.f32 %v2248_v41  ;;  %v2776_v1 = vcvt.s32.f32 %v2264_v46  ;;  %v831_v33 = vld [vmem:[%s11133_s30 + $0x400] sm:$0xff] }
 0x505   : > { %3737 = vmatpush.bf16.msrb.mxu3 %v3416_v3  ;;  %v2473_v58 = vunpack.c.2.s8 %v783_v2  ;;  %v3399_v60 = vpack.c.bf16 %v3031_v36, %v3015_v48  ;;  %v3016_v61 = vcvt.s32.f32 %v2504_v50  ;;  %v2489_v4 = vunpack.c.3.s8 %v783_v2  ;;  %v768_v3 = vld [vmem:[%s11133_s30 + $0x188] sm:$0xff] }
 0x506   : > { %v3032_v56 = vcvt.s32.f32 %v2520_v43  ;;  %v3272_v5 = vpack.c.bf16 %v2776_v1, %v2760_v63  ;;  %v2729_v8 = vunpack.c.2.s8 %v847_v44  ;;  %v2745_v10 = vunpack.c.3.s8 %v847_v44  ;;  %v832_v36 = vld [vmem:[%s11133_s30 + $0x408] sm:$0xff] }
 0x507   : > { %3696 = vmatpush.bf16.msrb.mxu0 %v3271_v51  ;;  %v2985_v30 = vcvt.s32.f32 %v2473_v58  ;;  %3710 = vmatpush.bf16.msrb.mxu1 %v3399_v60  ;;  %v3001_v14 = vcvt.s32.f32 %v2489_v4  ;;  %v2474_v39 = vunpack.c.2.s8 %v784_v59  ;;  %v2490_v45 = vunpack.c.3.s8 %v784_v59 }
 0x508   : > { %v3400_v12 = vpack.c.bf16 %v3032_v56, %v3016_v61  ;;  %3724 = vmatpush.bf16.msrb.mxu2 %v3272_v5  ;;  %v3241_v42 = vcvt.s32.f32 %v2729_v8  ;;  %v3257_v52 = vcvt.s32.f32 %v2745_v10  ;;  %v2730_v16 = vunpack.c.2.s8 %v848_v6 }
 0x509   : > { %v2746_v62 = vunpack.c.3.s8 %v848_v6  ;;  %v3385_v37 = vpack.c.bf16 %v3001_v14, %v2985_v30  ;;  %v2986_v18 = vcvt.s32.f32 %v2474_v39  ;;  %v3002_v19 = vcvt.s32.f32 %v2490_v45 }
 0x50a   : > { %3738 = vmatpush.bf16.msrb.mxu3 %v3400_v12  ;;  %3697 = vmatmul.bf16.vlgmr.msrb.gmra.mxu0 %v11326_v55  ;;  %v2441_v24 = vunpack.c.0.s8 %v783_v2  ;;  %v3513_v7 = vpack.c.bf16 %v3257_v52, %v3241_v42  ;;  %v3242_v0 = vcvt.s32.f32 %v2730_v16  ;;  %v2457_v22 = vunpack.c.1.s8 %v783_v2 }
 0x50b   : > { %v3258_v13 = vcvt.s32.f32 %v2746_v62  ;;  %3711 = vmatmul.bf16.vlgmr.msrb.gmra.mxu1 %v11330_v47  ;;  %3745 = vmatpush.bf16.msra.mxu0 %v3385_v37  ;;  %v3386_v15 = vpack.c.bf16 %v3002_v19, %v2986_v18  ;;  %v2697_v25 = vunpack.c.0.s8 %v847_v44  ;;  %v2713_v23 = vunpack.c.1.s8 %v847_v44  ;;  %v751_v62 = vld [vmem:[%s11133_s30 + $0xe0] sm:$0xff] }
 0x50c   : > { %3725 = vmatmul.bf16.vlgmr.msrb.gmra.mxu2 %v11326_v55  ;;  %v2953_v17 = vcvt.s32.f32 %v2441_v24  ;;  %3759 = vmatpush.bf16.msra.mxu1 %v3513_v7  ;;  %v2969_v11 = vcvt.s32.f32 %v2457_v22  ;;  %v2442_v21 = vunpack.c.0.s8 %v784_v59  ;;  %v2458_v26 = vunpack.c.1.s8 %v784_v59 }
 0x50d   : > { %v3514_v29 = vpack.c.bf16 %v3258_v13, %v3242_v0  ;;  %3739 = vmatmul.bf16.vlgmr.msrb.gmra.mxu3 %v11330_v47  ;;  %3773 = vmatpush.bf16.msra.mxu2 %v3386_v15  ;;  %v3209_v32 = vcvt.s32.f32 %v2697_v25  ;;  %v3225_v28 = vcvt.s32.f32 %v2713_v23  ;;  %v2698_v31 = vunpack.c.0.s8 %v848_v6  ;;  %v815_v15 = vld [vmem:[%s11133_s30 + $0x360] sm:$0xff] }
 0x50e   : > { %v2714_v9 = vunpack.c.1.s8 %v848_v6  ;;  %v3369_v35 = vpack.c.bf16 %v2969_v11, %v2953_v17  ;;  %v2954_v38 = vcvt.s32.f32 %v2442_v21  ;;  %v2970_v34 = vcvt.s32.f32 %v2458_v26 }
 0x50f   : > { %3787 = vmatpush.bf16.msra.mxu3 %v3514_v29  ;;  %v2409_v2 = vunpack.c.2.s8 %v767_v27  ;;  %v3497_v40 = vpack.c.bf16 %v3225_v28, %v3209_v32  ;;  %v3210_v41 = vcvt.s32.f32 %v2698_v31  ;;  %v2425_v48 = vunpack.c.3.s8 %v767_v27  ;;  %v752_v29 = vld [vmem:[%s11133_s30 + $0xe8] sm:$0xff] }
 0x510   : > { %v3226_v46 = vcvt.s32.f32 %v2714_v9  ;;  %3746 = vmatpush.bf16.msra.mxu0 %v3369_v35  ;;  %v3370_v50 = vpack.c.bf16 %v2970_v34, %v2954_v38  ;;  %v2665_v44 = vunpack.c.2.s8 %v831_v33  ;;  %v2681_v51 = vunpack.c.3.s8 %v831_v33  ;;  %v816_v28 = vld [vmem:[%s11133_s30 + $0x368] sm:$0xff] }
 0x511   : > { %v2921_v43 = vcvt.s32.f32 %v2409_v2  ;;  %3760 = vmatpush.bf16.msra.mxu1 %v3497_v40  ;;  %v2937_v1 = vcvt.s32.f32 %v2425_v48  ;;  %v2410_v58 = vunpack.c.2.s8 %v768_v3  ;;  %v2426_v59 = vunpack.c.3.s8 %v768_v3 }
 0x512   : > { %v3498_v63 = vpack.c.bf16 %v3226_v46, %v3210_v41  ;;  %3774 = vmatpush.bf16.msra.mxu2 %v3370_v50  ;;  %v3177_v60 = vcvt.s32.f32 %v2665_v44  ;;  %v3193_v61 = vcvt.s32.f32 %v2681_v51  ;;  %v2666_v56 = vunpack.c.2.s8 %v832_v36 }
 0x513   : > { %v2682_v4 = vunpack.c.3.s8 %v832_v36  ;;  %v3353_v6 = vpack.c.bf16 %v2937_v1, %v2921_v43  ;;  %v2922_v5 = vcvt.s32.f32 %v2410_v58  ;;  %v2938_v30 = vcvt.s32.f32 %v2426_v59 }
 0x514   : > { %3788 = vmatpush.bf16.msra.mxu3 %v3498_v63  ;;  %v2377_v8 = vunpack.c.0.s8 %v767_v27  ;;  %v3481_v10 = vpack.c.bf16 %v3193_v61, %v3177_v60  ;;  %v3178_v12 = vcvt.s32.f32 %v2666_v56  ;;  %v2393_v39 = vunpack.c.1.s8 %v767_v27 }
 0x515   : > { %v3194_v14 = vcvt.s32.f32 %v2682_v4  ;;  %3747 = vmatpush.bf16.msra.mxu0 %v3353_v6  ;;  %v3354_v45 = vpack.c.bf16 %v2938_v30, %v2922_v5  ;;  %v2633_v52 = vunpack.c.0.s8 %v831_v33  ;;  %v2649_v16 = vunpack.c.1.s8 %v831_v33  ;;  %v735_v4 = vld [vmem:[%s11133_s30 + $0x40] sm:$0xff] }
 0x516   : > { %v2889_v42 = vcvt.s32.f32 %v2377_v8  ;;  %3761 = vmatpush.bf16.msra.mxu1 %v3481_v10  ;;  %v2905_v18 = vcvt.s32.f32 %v2393_v39  ;;  %v2378_v19 = vunpack.c.0.s8 %v768_v3  ;;  %v2394_v24 = vunpack.c.1.s8 %v768_v3 }
 0x517   : > { %v3482_v37 = vpack.c.bf16 %v3194_v14, %v3178_v12  ;;  %3775 = vmatpush.bf16.msra.mxu2 %v3354_v45  ;;  %v3145_v7 = vcvt.s32.f32 %v2633_v52  ;;  %v3161_v0 = vcvt.s32.f32 %v2649_v16  ;;  %v2634_v13 = vunpack.c.0.s8 %v832_v36  ;;  %v799_v45 = vld [vmem:[%s11133_s30 + $0x2c0] sm:$0xff] }
 0x518   : > { %v2650_v22 = vunpack.c.1.s8 %v832_v36  ;;  %v3337_v17 = vpack.c.bf16 %v2905_v18, %v2889_v42  ;;  %v2890_v25 = vcvt.s32.f32 %v2378_v19  ;;  %v2906_v23 = vcvt.s32.f32 %v2394_v24 }
 0x519   : > { %3789 = vmatpush.bf16.msra.mxu3 %v3482_v37  ;;  %v2345_v27 = vunpack.c.2.s8 %v751_v62  ;;  %v3465_v11 = vpack.c.bf16 %v3161_v0, %v3145_v7  ;;  %v3146_v21 = vcvt.s32.f32 %v2634_v13  ;;  %v2361_v32 = vunpack.c.3.s8 %v751_v62  ;;  %v736_v37 = vld [vmem:[%s11133_s30 + $0x48] sm:$0xff] }
 0x51a   : > { %v3162_v26 = vcvt.s32.f32 %v2650_v22  ;;  %3748 = vmatpush.bf16.msra.mxu0 %v3337_v17  ;;  %v3338_v31 = vpack.c.bf16 %v2906_v23, %v2890_v25  ;;  %v2601_v33 = vunpack.c.2.s8 %v815_v15  ;;  %v2617_v35 = vunpack.c.3.s8 %v815_v15  ;;  %v800_v0 = vld [vmem:[%s11133_s30 + $0x2c8] sm:$0xff] }
 0x51b   : > { %v2857_v9 = vcvt.s32.f32 %v2345_v27  ;;  %3762 = vmatpush.bf16.msra.mxu1 %v3465_v11  ;;  %v2873_v34 = vcvt.s32.f32 %v2361_v32  ;;  %v2346_v2 = vunpack.c.2.s8 %v752_v29  ;;  %v2362_v3 = vunpack.c.3.s8 %v752_v29 }
 0x51c   : > { %v3466_v38 = vpack.c.bf16 %v3162_v26, %v3146_v21  ;;  %3776 = vmatpush.bf16.msra.mxu2 %v3338_v31  ;;  %v3113_v40 = vcvt.s32.f32 %v2601_v33  ;;  %v3129_v41 = vcvt.s32.f32 %v2617_v35  ;;  %v2602_v46 = vunpack.c.2.s8 %v816_v28 }
 0x51d   : > { %v2618_v48 = vunpack.c.3.s8 %v816_v28  ;;  %v3321_v36 = vpack.c.bf16 %v2873_v34, %v2857_v9  ;;  %v2858_v50 = vcvt.s32.f32 %v2346_v2  ;;  %v2874_v43 = vcvt.s32.f32 %v2362_v3 }
 0x51e   : > { %3790 = vmatpush.bf16.msra.mxu3 %v3466_v38  ;;  %v2313_v44 = vunpack.c.0.s8 %v751_v62  ;;  %v3449_v51 = vpack.c.bf16 %v3129_v41, %v3113_v40  ;;  %v3114_v63 = vcvt.s32.f32 %v2602_v46  ;;  %v2329_v58 = vunpack.c.1.s8 %v751_v62 }
 0x51f   : > { %v3130_v1 = vcvt.s32.f32 %v2618_v48  ;;  %3749 = vmatpush.bf16.msra.mxu0 %v3321_v36  ;;  %v3322_v59 = vpack.c.bf16 %v2874_v43, %v2858_v50  ;;  %v2569_v61 = vunpack.c.0.s8 %v815_v15  ;;  %v2585_v56 = vunpack.c.1.s8 %v815_v15  ;;  %v785_v48 = vld [vmem:[%s11133_s30 + $0x230] sm:$0xff] }
 0x520   : > { %v2825_v60 = vcvt.s32.f32 %v2313_v44  ;;  %3763 = vmatpush.bf16.msra.mxu1 %v3449_v51  ;;  %v2841_v5 = vcvt.s32.f32 %v2329_v58  ;;  %v2314_v30 = vunpack.c.0.s8 %v752_v29  ;;  %v2330_v8 = vunpack.c.1.s8 %v752_v29 }
 0x521   : > { %v3450_v6 = vpack.c.bf16 %v3130_v1, %v3114_v63  ;;  %3777 = vmatpush.bf16.msra.mxu2 %v3322_v59  ;;  %v3081_v10 = vcvt.s32.f32 %v2569_v61  ;;  %v3097_v12 = vcvt.s32.f32 %v2585_v56  ;;  %v2570_v14 = vunpack.c.0.s8 %v816_v28  ;;  %v849_v59 = vld [vmem:[%s11133_s30 + $0x4b0] sm:$0xff] }
 0x522   : > { %v2586_v39 = vunpack.c.1.s8 %v816_v28  ;;  %v3305_v42 = vpack.c.bf16 %v2841_v5, %v2825_v60  ;;  %v2826_v52 = vcvt.s32.f32 %v2314_v30  ;;  %v2842_v16 = vcvt.s32.f32 %v2330_v8 }
 0x523   : > { %3791 = vmatpush.bf16.msra.mxu3 %v3450_v6  ;;  %v2281_v62 = vunpack.c.2.s8 %v735_v4  ;;  %v3433_v18 = vpack.c.bf16 %v3097_v12, %v3081_v10  ;;  %v3082_v19 = vcvt.s32.f32 %v2570_v14  ;;  %v2297_v7 = vunpack.c.3.s8 %v735_v4  ;;  %v786_v6 = vld [vmem:[%s11133_s30 + $0x238] sm:$0xff] }
 0x524   : > { %v3098_v24 = vcvt.s32.f32 %v2586_v39  ;;  %3750 = vmatpush.bf16.msra.mxu0 %v3305_v42  ;;  %v3306_v13 = vpack.c.bf16 %v2842_v16, %v2826_v52  ;;  %v2537_v15 = vunpack.c.2.s8 %v799_v45  ;;  %v2553_v17 = vunpack.c.3.s8 %v799_v45  ;;  %v850_v12 = vld [vmem:[%s11133_s30 + $0x4b8] sm:$0xff] }
 0x525   : > { %v2793_v22 = vcvt.s32.f32 %v2281_v62  ;;  %3764 = vmatpush.bf16.msra.mxu1 %v3433_v18  ;;  %v2809_v23 = vcvt.s32.f32 %v2297_v7  ;;  %v2282_v27 = vunpack.c.2.s8 %v736_v37  ;;  %v2298_v29 = vunpack.c.3.s8 %v736_v37 }
 0x526   : > { %v3434_v25 = vpack.c.bf16 %v3098_v24, %v3082_v19  ;;  %3778 = vmatpush.bf16.msra.mxu2 %v3306_v13  ;;  %v3049_v11 = vcvt.s32.f32 %v2537_v15  ;;  %v3065_v21 = vcvt.s32.f32 %v2553_v17  ;;  %v2538_v26 = vunpack.c.2.s8 %v800_v0 }
 0x527   : > { %v2554_v32 = vunpack.c.3.s8 %v800_v0  ;;  %v3289_v28 = vpack.c.bf16 %v2809_v23, %v2793_v22  ;;  %v2794_v31 = vcvt.s32.f32 %v2282_v27  ;;  %v2810_v9 = vcvt.s32.f32 %v2298_v29 }
 0x528   : > { %3792 = vmatpush.bf16.msra.mxu3 %v3434_v25  ;;  %v2249_v33 = vunpack.c.0.s8 %v735_v4  ;;  %v3417_v35 = vpack.c.bf16 %v3065_v21, %v3049_v11  ;;  %v3050_v38 = vcvt.s32.f32 %v2538_v26  ;;  %v2265_v2 = vunpack.c.1.s8 %v735_v4 }
 0x529   : > { %v3066_v34 = vcvt.s32.f32 %v2554_v32  ;;  %3751 = vmatpush.bf16.msra.mxu0 %v3289_v28  ;;  %v3290_v3 = vpack.c.bf16 %v2810_v9, %v2794_v31  ;;  %v2505_v41 = vunpack.c.0.s8 %v799_v45  ;;  %v2521_v46 = vunpack.c.1.s8 %v799_v45  ;;  %v769_v32 = vld [vmem:[%s11133_s30 + $0x190] sm:$0xff] }
 0x52a   : > { %v2761_v40 = vcvt.s32.f32 %v2249_v33  ;;  %3765 = vmatpush.bf16.msra.mxu1 %v3417_v35  ;;  %v2777_v50 = vcvt.s32.f32 %v2265_v2  ;;  %v2250_v43 = vunpack.c.0.s8 %v736_v37  ;;  %v2266_v44 = vunpack.c.1.s8 %v736_v37 }
 0x52b   : > { %v3418_v36 = vpack.c.bf16 %v3066_v34, %v3050_v38  ;;  %3779 = vmatpush.bf16.msra.mxu2 %v3290_v3  ;;  %v3017_v51 = vcvt.s32.f32 %v2505_v41  ;;  %v3033_v63 = vcvt.s32.f32 %v2521_v46  ;;  %v2506_v1 = vunpack.c.0.s8 %v800_v0  ;;  %v833_v3 = vld [vmem:[%s11133_s30 + $0x410] sm:$0xff] }
 0x52c   : > { %v2522_v58 = vunpack.c.1.s8 %v800_v0  ;;  %v3273_v60 = vpack.c.bf16 %v2777_v50, %v2761_v40  ;;  %v2762_v61 = vcvt.s32.f32 %v2250_v43  ;;  %v2778_v56 = vcvt.s32.f32 %v2266_v44 }
 0x52d   : > { %3793 = vmatpush.bf16.msra.mxu3 %v3418_v36  ;;  %v2475_v4 = vunpack.c.2.s8 %v785_v48  ;;  %v3401_v5 = vpack.c.bf16 %v3033_v63, %v3017_v51  ;;  %v3018_v30 = vcvt.s32.f32 %v2506_v1  ;;  %v2491_v10 = vunpack.c.3.s8 %v785_v48  ;;  %v770_v36 = vld [vmem:[%s11133_s30 + $0x198] sm:$0xff] }
 0x52e   : > { %v3034_v8 = vcvt.s32.f32 %v2522_v58  ;;  %3752 = vmatpush.bf16.msra.mxu0 %v3273_v60  ;;  %v3274_v14 = vpack.c.bf16 %v2778_v56, %v2762_v61  ;;  %v2731_v45 = vunpack.c.2.s8 %v849_v59  ;;  %v2747_v42 = vunpack.c.3.s8 %v849_v59  ;;  %v834_v63 = vld [vmem:[%s11133_s30 + $0x418] sm:$0xff] }
 0x52f   : > { %v2987_v39 = vcvt.s32.f32 %v2475_v4  ;;  %3766 = vmatpush.bf16.msra.mxu1 %v3401_v5  ;;  %v3003_v16 = vcvt.s32.f32 %v2491_v10  ;;  %v2476_v62 = vunpack.c.2.s8 %v786_v6  ;;  %v2492_v37 = vunpack.c.3.s8 %v786_v6 }
 0x530   : > { %v3402_v52 = vpack.c.bf16 %v3034_v8, %v3018_v30  ;;  %3780 = vmatpush.bf16.msra.mxu2 %v3274_v14  ;;  %v3243_v18 = vcvt.s32.f32 %v2731_v45  ;;  %v3259_v19 = vcvt.s32.f32 %v2747_v42  ;;  %v2732_v24 = vunpack.c.2.s8 %v850_v12 }
 0x531   : > { %v2748_v7 = vunpack.c.3.s8 %v850_v12  ;;  %v3387_v0 = vpack.c.bf16 %v3003_v16, %v2987_v39  ;;  %v2988_v13 = vcvt.s32.f32 %v2476_v62  ;;  %v3004_v22 = vcvt.s32.f32 %v2492_v37  ;;  %3753 = vmatmul.bf16.vlgmr.msra.gmra.mxu0 %v11326_v55 }
 0x532   : > { %3794 = vmatpush.bf16.msra.mxu3 %v3402_v52  ;;  %v2443_v15 = vunpack.c.0.s8 %v785_v48  ;;  %v3515_v17 = vpack.c.bf16 %v3259_v19, %v3243_v18  ;;  %v3244_v25 = vcvt.s32.f32 %v2732_v24  ;;  %3767 = vmatmul.bf16.vlgmr.msra.gmra.mxu1 %v11330_v47  ;;  %v2459_v27 = vunpack.c.1.s8 %v785_v48 }
 0x533   : > { %v3260_v23 = vcvt.s32.f32 %v2748_v7  ;;  %3801 = vmatpush.bf16.msrb.mxu0 %v3387_v0  ;;  %v3388_v29 = vpack.c.bf16 %v3004_v22, %v2988_v13  ;;  %3781 = vmatmul.bf16.vlgmr.msra.gmra.mxu2 %v11326_v55  ;;  %v2699_v21 = vunpack.c.0.s8 %v849_v59  ;;  %v2715_v26 = vunpack.c.1.s8 %v849_v59  ;;  %v753_v7 = vld [vmem:[%s11133_s30 + $0xf0] sm:$0xff] }
 0x534   : > { %v2955_v11 = vcvt.s32.f32 %v2443_v15  ;;  %3815 = vmatpush.bf16.msrb.mxu1 %v3515_v17  ;;  %v2971_v31 = vcvt.s32.f32 %v2459_v27  ;;  %v2444_v9 = vunpack.c.0.s8 %v786_v6  ;;  %v2460_v33 = vunpack.c.1.s8 %v786_v6 }
 0x535   : > { %v3516_v28 = vpack.c.bf16 %v3260_v23, %v3244_v25  ;;  %3795 = vmatmul.bf16.vlgmr.msra.gmra.mxu3 %v11330_v47  ;;  %3829 = vmatpush.bf16.msrb.mxu2 %v3388_v29  ;;  %v3211_v35 = vcvt.s32.f32 %v2699_v21  ;;  %v3227_v38 = vcvt.s32.f32 %v2715_v26  ;;  %v2700_v34 = vunpack.c.0.s8 %v850_v12  ;;  %v817_v29 = vld [vmem:[%s11133_s30 + $0x370] sm:$0xff] }
 0x536   : > { %v2716_v2 = vunpack.c.1.s8 %v850_v12  ;;  %v3371_v40 = vpack.c.bf16 %v2971_v31, %v2955_v11  ;;  %v2956_v41 = vcvt.s32.f32 %v2444_v9  ;;  %v2972_v46 = vcvt.s32.f32 %v2460_v33 }
 0x537   : > { %3843 = vmatpush.bf16.msrb.mxu3 %v3516_v28  ;;  %v2411_v48 = vunpack.c.2.s8 %v769_v32  ;;  %v3499_v50 = vpack.c.bf16 %v3227_v38, %v3211_v35  ;;  %v3212_v43 = vcvt.s32.f32 %v2700_v34  ;;  %v2427_v51 = vunpack.c.3.s8 %v769_v32  ;;  %v754_v28 = vld [vmem:[%s11133_s30 + $0xf8] sm:$0xff] }
 0x538   : > { %v3228_v44 = vcvt.s32.f32 %v2716_v2  ;;  %3802 = vmatpush.bf16.msrb.mxu0 %v3371_v40  ;;  %v3372_v1 = vpack.c.bf16 %v2972_v46, %v2956_v41  ;;  %v2667_v59 = vunpack.c.2.s8 %v833_v3  ;;  %v2683_v60 = vunpack.c.3.s8 %v833_v3  ;;  %v818_v38 = vld [vmem:[%s11133_s30 + $0x378] sm:$0xff] }
 0x539   : > { %v2923_v58 = vcvt.s32.f32 %v2411_v48  ;;  %3816 = vmatpush.bf16.msrb.mxu1 %v3499_v50  ;;  %v2939_v56 = vcvt.s32.f32 %v2427_v51  ;;  %v2412_v4 = vunpack.c.2.s8 %v770_v36  ;;  %v2428_v6 = vunpack.c.3.s8 %v770_v36 }
 0x53a   : > { %v3500_v61 = vpack.c.bf16 %v3228_v44, %v3212_v43  ;;  %3830 = vmatpush.bf16.msrb.mxu2 %v3372_v1  ;;  %v3179_v5 = vcvt.s32.f32 %v2667_v59  ;;  %v3195_v30 = vcvt.s32.f32 %v2683_v60  ;;  %v2668_v8 = vunpack.c.2.s8 %v834_v63 }
 0x53b   : > { %v2684_v10 = vunpack.c.3.s8 %v834_v63  ;;  %v3355_v12 = vpack.c.bf16 %v2939_v56, %v2923_v58  ;;  %v2924_v14 = vcvt.s32.f32 %v2412_v4  ;;  %v2940_v39 = vcvt.s32.f32 %v2428_v6 }
 0x53c   : > { %3844 = vmatpush.bf16.msrb.mxu3 %v3500_v61  ;;  %v2379_v45 = vunpack.c.0.s8 %v769_v32  ;;  %v3483_v42 = vpack.c.bf16 %v3195_v30, %v3179_v5  ;;  %v3180_v52 = vcvt.s32.f32 %v2668_v8  ;;  %v2395_v62 = vunpack.c.1.s8 %v769_v32 }
 0x53d   : > { %v3196_v16 = vcvt.s32.f32 %v2684_v10  ;;  %3803 = vmatpush.bf16.msrb.mxu0 %v3355_v12  ;;  %v3356_v37 = vpack.c.bf16 %v2940_v39, %v2924_v14  ;;  %v2635_v19 = vunpack.c.0.s8 %v833_v3  ;;  %v2651_v24 = vunpack.c.1.s8 %v833_v3  ;;  %v737_v10 = vld [vmem:[%s11133_s30 + $0x50] sm:$0xff] }
 0x53e   : > { %v2891_v18 = vcvt.s32.f32 %v2379_v45  ;;  %3817 = vmatpush.bf16.msrb.mxu1 %v3483_v42  ;;  %v2907_v13 = vcvt.s32.f32 %v2395_v62  ;;  %v2380_v22 = vunpack.c.0.s8 %v770_v36  ;;  %v2396_v15 = vunpack.c.1.s8 %v770_v36 }
 0x53f   : > { %v3484_v0 = vpack.c.bf16 %v3196_v16, %v3180_v52  ;;  %3831 = vmatpush.bf16.msrb.mxu2 %v3356_v37  ;;  %v3147_v17 = vcvt.s32.f32 %v2635_v19  ;;  %v3163_v25 = vcvt.s32.f32 %v2651_v24  ;;  %v2636_v23 = vunpack.c.0.s8 %v834_v63  ;;  %v801_v37 = vld [vmem:[%s11133_s30 + $0x2d0] sm:$0xff] }
 0x540   : > { %v2652_v27 = vunpack.c.1.s8 %v834_v63  ;;  %v3339_v11 = vpack.c.bf16 %v2907_v13, %v2891_v18  ;;  %v2892_v21 = vcvt.s32.f32 %v2380_v22  ;;  %v2908_v26 = vcvt.s32.f32 %v2396_v15 }
 0x541   : > { %3845 = vmatpush.bf16.msrb.mxu3 %v3484_v0  ;;  %v2347_v32 = vunpack.c.2.s8 %v753_v7  ;;  %v3467_v31 = vpack.c.bf16 %v3163_v25, %v3147_v17  ;;  %v3148_v9 = vcvt.s32.f32 %v2636_v23  ;;  %v2363_v35 = vunpack.c.3.s8 %v753_v7  ;;  %v738_v0 = vld [vmem:[%s11133_s30 + $0x58] sm:$0xff] }
 0x542   : > { %v3164_v33 = vcvt.s32.f32 %v2652_v27  ;;  %3804 = vmatpush.bf16.msrb.mxu0 %v3339_v11  ;;  %v3340_v34 = vpack.c.bf16 %v2908_v26, %v2892_v21  ;;  %v2603_v3 = vunpack.c.2.s8 %v817_v29  ;;  %v2619_v40 = vunpack.c.3.s8 %v817_v29  ;;  %v802_v25 = vld [vmem:[%s11133_s30 + $0x2d8] sm:$0xff] }
 0x543   : > { %v2859_v2 = vcvt.s32.f32 %v2347_v32  ;;  %3818 = vmatpush.bf16.msrb.mxu1 %v3467_v31  ;;  %v2875_v46 = vcvt.s32.f32 %v2363_v35  ;;  %v2348_v48 = vunpack.c.2.s8 %v754_v28  ;;  %v2364_v36 = vunpack.c.3.s8 %v754_v28 }
 0x544   : > { %v3468_v41 = vpack.c.bf16 %v3164_v33, %v3148_v9  ;;  %3832 = vmatpush.bf16.msrb.mxu2 %v3340_v34  ;;  %v3115_v50 = vcvt.s32.f32 %v2603_v3  ;;  %v3131_v43 = vcvt.s32.f32 %v2619_v40  ;;  %v2604_v44 = vunpack.c.2.s8 %v818_v38 }
 0x545   : > { %v2620_v51 = vunpack.c.3.s8 %v818_v38  ;;  %v3323_v63 = vpack.c.bf16 %v2875_v46, %v2859_v2  ;;  %v2860_v1 = vcvt.s32.f32 %v2348_v48  ;;  %v2876_v58 = vcvt.s32.f32 %v2364_v36 }
 0x546   : > { %3846 = vmatpush.bf16.msrb.mxu3 %v3468_v41  ;;  %v2315_v59 = vunpack.c.0.s8 %v753_v7  ;;  %v3451_v60 = vpack.c.bf16 %v3131_v43, %v3115_v50  ;;  %v3116_v61 = vcvt.s32.f32 %v2604_v44  ;;  %v2331_v4 = vunpack.c.1.s8 %v753_v7 }
 0x547   : > { %v3132_v56 = vcvt.s32.f32 %v2620_v51  ;;  %3805 = vmatpush.bf16.msrb.mxu0 %v3323_v63  ;;  %v3324_v6 = vpack.c.bf16 %v2876_v58, %v2860_v1  ;;  %v2571_v30 = vunpack.c.0.s8 %v817_v29  ;;  %v2587_v8 = vunpack.c.1.s8 %v817_v29  ;;  %v787_v51 = vld [vmem:[%s11133_s30 + $0x240] sm:$0xff] }
 0x548   : > { %v2827_v5 = vcvt.s32.f32 %v2315_v59  ;;  %3819 = vmatpush.bf16.msrb.mxu1 %v3451_v60  ;;  %v2843_v14 = vcvt.s32.f32 %v2331_v4  ;;  %v2316_v39 = vunpack.c.0.s8 %v754_v28  ;;  %v2332_v45 = vunpack.c.1.s8 %v754_v28 }
 0x549   : > { %v3452_v12 = vpack.c.bf16 %v3132_v56, %v3116_v61  ;;  %3833 = vmatpush.bf16.msrb.mxu2 %v3324_v6  ;;  %v3083_v42 = vcvt.s32.f32 %v2571_v30  ;;  %v3099_v52 = vcvt.s32.f32 %v2587_v8  ;;  %v2572_v16 = vunpack.c.0.s8 %v818_v38  ;;  %v851_v6 = vld [vmem:[%s11133_s30 + $0x4c0] sm:$0xff] }
 0x54a   : > { %v2588_v62 = vunpack.c.1.s8 %v818_v38  ;;  %v3307_v18 = vpack.c.bf16 %v2843_v14, %v2827_v5  ;;  %v2828_v19 = vcvt.s32.f32 %v2316_v39  ;;  %v2844_v24 = vcvt.s32.f32 %v2332_v45 }
 0x54b   : > { %3847 = vmatpush.bf16.msrb.mxu3 %v3452_v12  ;;  %v2283_v7 = vunpack.c.2.s8 %v737_v10  ;;  %v3435_v13 = vpack.c.bf16 %v3099_v52, %v3083_v42  ;;  %v3084_v22 = vcvt.s32.f32 %v2572_v16  ;;  %v2299_v17 = vunpack.c.3.s8 %v737_v10  ;;  %v788_v12 = vld [vmem:[%s11133_s30 + $0x248] sm:$0xff] }
 0x54c   : > { %v3100_v15 = vcvt.s32.f32 %v2588_v62  ;;  %3806 = vmatpush.bf16.msrb.mxu0 %v3307_v18  ;;  %v3308_v23 = vpack.c.bf16 %v2844_v24, %v2828_v19  ;;  %v2539_v29 = vunpack.c.2.s8 %v801_v37  ;;  %v2555_v11 = vunpack.c.3.s8 %v801_v37  ;;  %v852_v52 = vld [vmem:[%s11133_s30 + $0x4c8] sm:$0xff] }
 0x54d   : > { %v2795_v27 = vcvt.s32.f32 %v2283_v7  ;;  %3820 = vmatpush.bf16.msrb.mxu1 %v3435_v13  ;;  %v2811_v26 = vcvt.s32.f32 %v2299_v17  ;;  %v2284_v32 = vunpack.c.2.s8 %v738_v0  ;;  %v2300_v28 = vunpack.c.3.s8 %v738_v0 }
 0x54e   : > { %v3436_v21 = vpack.c.bf16 %v3100_v15, %v3084_v22  ;;  %3834 = vmatpush.bf16.msrb.mxu2 %v3308_v23  ;;  %v3051_v31 = vcvt.s32.f32 %v2539_v29  ;;  %v3067_v9 = vcvt.s32.f32 %v2555_v11  ;;  %v2540_v33 = vunpack.c.2.s8 %v802_v25 }
 0x54f   : > { %v2556_v35 = vunpack.c.3.s8 %v802_v25  ;;  %v3291_v38 = vpack.c.bf16 %v2811_v26, %v2795_v27  ;;  %v2796_v34 = vcvt.s32.f32 %v2284_v32  ;;  %v2812_v2 = vcvt.s32.f32 %v2300_v28 }
 0x550   : > { %3848 = vmatpush.bf16.msrb.mxu3 %v3436_v21  ;;  %v2251_v3 = vunpack.c.0.s8 %v737_v10  ;;  %v3419_v40 = vpack.c.bf16 %v3067_v9, %v3051_v31  ;;  %v3052_v41 = vcvt.s32.f32 %v2540_v33  ;;  %v2267_v48 = vunpack.c.1.s8 %v737_v10 }
 0x551   : > { %v3068_v46 = vcvt.s32.f32 %v2556_v35  ;;  %3807 = vmatpush.bf16.msrb.mxu0 %v3291_v38  ;;  %v3292_v36 = vpack.c.bf16 %v2812_v2, %v2796_v34  ;;  %v2507_v43 = vunpack.c.0.s8 %v801_v37  ;;  %v2523_v44 = vunpack.c.1.s8 %v801_v37  ;;  %v11420_v35 = vld [vmem:[%s11133_s30 + $0x1a0] sm:$0xff] }
 0x552   : > { %v2763_v50 = vcvt.s32.f32 %v2251_v3  ;;  %3821 = vmatpush.bf16.msrb.mxu1 %v3419_v40  ;;  %v2779_v1 = vcvt.s32.f32 %v2267_v48  ;;  %v2252_v58 = vunpack.c.0.s8 %v738_v0  ;;  %v2268_v59 = vunpack.c.1.s8 %v738_v0 }
 0x553   : > { %v3420_v63 = vpack.c.bf16 %v3068_v46, %v3052_v41  ;;  %3835 = vmatpush.bf16.msrb.mxu2 %v3292_v36  ;;  %v3019_v60 = vcvt.s32.f32 %v2507_v43  ;;  %v3035_v61 = vcvt.s32.f32 %v2523_v44  ;;  %v2508_v56 = vunpack.c.0.s8 %v802_v25  ;;  %v835_v36 = vld [vmem:[%s11133_s30 + $0x420] sm:$0xff] }
 0x554   : > { %v2524_v4 = vunpack.c.1.s8 %v802_v25  ;;  %v3275_v5 = vpack.c.bf16 %v2779_v1, %v2763_v50  ;;  %v2764_v30 = vcvt.s32.f32 %v2252_v58  ;;  %v2780_v8 = vcvt.s32.f32 %v2268_v59 }
 0x555   : > { %3849 = vmatpush.bf16.msrb.mxu3 %v3420_v63  ;;  %v2477_v10 = vunpack.c.2.s8 %v787_v51  ;;  %v3403_v14 = vpack.c.bf16 %v3035_v61, %v3019_v60  ;;  %v3020_v39 = vcvt.s32.f32 %v2508_v56  ;;  %v2493_v42 = vunpack.c.3.s8 %v787_v51  ;;  %v772_v63 = vld [vmem:[%s11133_s30 + $0x1a8] sm:$0xff] }
 0x556   : > { %v3036_v45 = vcvt.s32.f32 %v2524_v4  ;;  %3808 = vmatpush.bf16.msrb.mxu0 %v3275_v5  ;;  %v3276_v16 = vpack.c.bf16 %v2780_v8, %v2764_v30  ;;  %v2733_v37 = vunpack.c.2.s8 %v851_v6  ;;  %v2749_v18 = vunpack.c.3.s8 %v851_v6  ;;  %v11433_v61 = vld [vmem:[%s11133_s30 + $0x428] sm:$0xff]  ;;  %v3530_v30 = vpop.f32.mrf.mxu0  ;;  %v3544_v8 = vpop.f32.mrf.mxu1 }
 0x557   : > { %v2989_v62 = vcvt.s32.f32 %v2477_v10  ;;  %3822 = vmatpush.bf16.msrb.mxu1 %v3403_v14  ;;  %v3005_v24 = vcvt.s32.f32 %v2493_v42  ;;  %v2478_v7 = vunpack.c.2.s8 %v788_v12  ;;  %v2494_v0 = vunpack.c.3.s8 %v788_v12 }
 0x558   : > { %v3404_v19 = vpack.c.bf16 %v3036_v45, %v3020_v39  ;;  %3836 = vmatpush.bf16.msrb.mxu2 %v3276_v16  ;;  %v3245_v13 = vcvt.s32.f32 %v2733_v37  ;;  %v3261_v22 = vcvt.s32.f32 %v2749_v18  ;;  %v2734_v15 = vunpack.c.2.s8 %v852_v52  ;;  %v11436_v45 = vld [vmem:[%s11429_s12 + $0x1] ss:$2 sm:$0xff]  ;;  %v11441_v37 = vld [vmem:[%s11429_s12] ss:$2 sm:$0xff] }
 0x559   : > { %v2750_v17 = vunpack.c.3.s8 %v852_v52  ;;  %v3389_v25 = vpack.c.bf16 %v3005_v24, %v2989_v62  ;;  %v2990_v23 = vcvt.s32.f32 %v2478_v7  ;;  %v3006_v27 = vcvt.s32.f32 %v2494_v0  ;;  %3809 = vmatmul.bf16.vlgmr.msrb.gmra.mxu0 %v11326_v55 }
 0x55a   : > { %3850 = vmatpush.bf16.msrb.mxu3 %v3404_v19  ;;  %v2445_v29 = vunpack.c.0.s8 %v787_v51  ;;  %v3517_v11 = vpack.c.bf16 %v3261_v22, %v3245_v13  ;;  %v3246_v21 = vcvt.s32.f32 %v2734_v15  ;;  %3823 = vmatmul.bf16.vlgmr.msrb.gmra.mxu1 %v11330_v47  ;;  %v2461_v32 = vunpack.c.1.s8 %v787_v51 }
 0x55b   : > { %v3262_v26 = vcvt.s32.f32 %v2750_v17  ;;  %3857 = vmatpush.bf16.msra.mxu0 %v3389_v25  ;;  %v3390_v28 = vpack.c.bf16 %v3006_v27, %v2990_v23  ;;  %3837 = vmatmul.bf16.vlgmr.msrb.gmra.mxu2 %v11326_v55  ;;  %v2701_v9 = vunpack.c.0.s8 %v851_v6  ;;  %v2717_v33 = vunpack.c.1.s8 %v851_v6 }
 0x55c   : > { %v2957_v31 = vcvt.s32.f32 %v2445_v29  ;;  %3871 = vmatpush.bf16.msra.mxu1 %v3517_v11  ;;  %v2973_v34 = vcvt.s32.f32 %v2461_v32  ;;  %v2446_v2 = vunpack.c.0.s8 %v788_v12  ;;  %v2462_v3 = vunpack.c.1.s8 %v788_v12 }
 0x55d   : > { %v3518_v38 = vpack.c.bf16 %v3262_v26, %v3246_v21  ;;  %3851 = vmatmul.bf16.vlgmr.msrb.gmra.mxu3 %v11330_v47  ;;  %3885 = vmatpush.bf16.msra.mxu2 %v3390_v28  ;;  %v3213_v40 = vcvt.s32.f32 %v2701_v9  ;;  %v3229_v41 = vcvt.s32.f32 %v2717_v33  ;;  %v2702_v46 = vunpack.c.0.s8 %v852_v52  ;;  %v3558_v33 = vpop.f32.mrf.mxu2 }
 0x55e   : > { %v2718_v48 = vunpack.c.1.s8 %v852_v52  ;;  %v3373_v50 = vpack.c.bf16 %v2973_v34, %v2957_v31  ;;  %v2958_v43 = vcvt.s32.f32 %v2446_v2  ;;  %v2974_v44 = vcvt.s32.f32 %v2462_v3 }
 0x55f   : > { %3899 = vmatpush.bf16.msra.mxu3 %v3518_v38  ;;  %v2413_v51 = vunpack.c.2.s8 %v11420_v35  ;;  %v3501_v1 = vpack.c.bf16 %v3229_v41, %v3213_v40  ;;  %v3214_v58 = vcvt.s32.f32 %v2702_v46  ;;  %v2429_v60 = vunpack.c.3.s8 %v11420_v35  ;;  %v3572_v38 = vpop.f32.mrf.mxu3 }
 0x560   : > { %v3230_v59 = vcvt.s32.f32 %v2718_v48  ;;  %3858 = vmatpush.bf16.msra.mxu0 %v3373_v50  ;;  %v3374_v56 = vpack.c.bf16 %v2974_v44, %v2958_v43  ;;  %v2669_v6 = vunpack.c.2.s8 %v835_v36  ;;  %v2685_v5 = vunpack.c.3.s8 %v835_v36  ;;  %v819_v50 = vld [vmem:[%s11133_s30 + $0x380] sm:$0xff] }
 0x561   : > { %v2925_v4 = vcvt.s32.f32 %v2413_v51  ;;  %3872 = vmatpush.bf16.msra.mxu1 %v3501_v1  ;;  %v2941_v12 = vcvt.s32.f32 %v2429_v60  ;;  %v2414_v14 = vunpack.c.2.s8 %v772_v63  ;;  %v2430_v39 = vunpack.c.3.s8 %v772_v63  ;;  %v756_v1 = vld [vmem:[%s11133_s30 + $0x108] sm:$0xff] }
 0x562   : > { %v3502_v10 = vpack.c.bf16 %v3230_v59, %v3214_v58  ;;  %3886 = vmatpush.bf16.msra.mxu2 %v3374_v56  ;;  %v3181_v42 = vcvt.s32.f32 %v2669_v6  ;;  %v3197_v52 = vcvt.s32.f32 %v2685_v5  ;;  %v2670_v16 = vunpack.c.2.s8 %v11433_v61 }
 0x563   : > { %v2686_v62 = vunpack.c.3.s8 %v11433_v61  ;;  %v3357_v18 = vpack.c.bf16 %v2941_v12, %v2925_v4  ;;  %v2926_v19 = vcvt.s32.f32 %v2414_v14  ;;  %v2942_v24 = vcvt.s32.f32 %v2430_v39  ;;  %v3532_v39 = vpop.f32.mrf.mxu0 }
 0x564   : > { %3900 = vmatpush.bf16.msra.mxu3 %v3502_v10  ;;  %v3545_v7 = vadd.f32 %v3544_v8, %v3530_v30  ;;  %v3485_v0 = vpack.c.bf16 %v3197_v52, %v3181_v42  ;;  %v3182_v13 = vcvt.s32.f32 %v2670_v16  ;;  %v3971_v15 = vperm.slane %v11436_v45, 0  ;;  %v820_v30 = vld [vmem:[%s11133_s30 + $0x388] sm:$0xff]  ;;  %v3546_v42 = vpop.f32.mrf.mxu1 }
 0x565   : > { %v3198_v22 = vcvt.s32.f32 %v2686_v62  ;;  %3859 = vmatpush.bf16.msra.mxu0 %v3357_v18  ;;  %v3358_v17 = vpack.c.bf16 %v2942_v24, %v2926_v19  ;;  %v4037_v25 = vperm.slane %v11441_v37, 0  ;;  %v2381_v23 = vunpack.c.0.s8 %v11420_v35 }
 0x566   : > { %v2397_v27 = vunpack.c.1.s8 %v11420_v35  ;;  %3873 = vmatpush.bf16.msra.mxu1 %v3485_v0  ;;  %v4003_v11 = vmul.f32 %v3971_v15, %v3545_v7  ;;  %v2637_v21 = vunpack.c.0.s8 %v835_v36  ;;  %v2653_v26 = vunpack.c.1.s8 %v835_v36  ;;  %v755_v36 = vld [vmem:[%s11133_s30 + $0x100] sm:$0xff] }
 0x567   : > { %v3486_v29 = vpack.c.bf16 %v3198_v22, %v3182_v13  ;;  %3887 = vmatpush.bf16.msra.mxu2 %v3358_v17  ;;  %v2893_v32 = vcvt.s32.f32 %v2381_v23  ;;  %v2382_v31 = vunpack.c.0.s8 %v772_v63  ;;  %v2398_v9 = vunpack.c.1.s8 %v772_v63 }
 0x568   : > { %v2909_v28 = vcvt.s32.f32 %v2397_v27  ;;  %v11451_v35 = vadd.f32 %v4037_v25, %v4003_v11  ;;  %v3149_v34 = vcvt.s32.f32 %v2637_v21  ;;  %v3165_v2 = vcvt.s32.f32 %v2653_v26 }
 0x569   : > { %3901 = vmatpush.bf16.msra.mxu3 %v3486_v29  ;;  %v2638_v3 = vunpack.c.0.s8 %v11433_v61  ;;  %v2894_v41 = vcvt.s32.f32 %v2382_v31  ;;  %v2910_v46 = vcvt.s32.f32 %v2398_v9  ;;  %v2654_v48 = vunpack.c.1.s8 %v11433_v61 }
 0x56a   : > { %v3341_v40 = vpack.c.bf16 %v2909_v28, %v2893_v32  ;;  %v4101_v43 = vmax.f32 %v11451_v35, 0.0  ;;  %v3469_v44 = vpack.c.bf16 %v3165_v2, %v3149_v34  ;;  %v3573_v63 = vadd.f32 %v3572_v38, %v3558_v33  ;;  %v3560_v2 = vpop.f32.mrf.mxu2 }
 0x56b   : > { %v3150_v51 = vcvt.s32.f32 %v2638_v3  ;;  %v3342_v58 = vpack.c.bf16 %v2910_v46, %v2894_v41  ;;  %v3166_v59 = vcvt.s32.f32 %v2654_v48  ;;  %v3972_v60 = vperm.slane %v11436_v45, 1  ;;  %v3574_v3 = vpop.f32.mrf.mxu3 }
 0x56c   : > { %3860 = vmatpush.bf16.msra.mxu0 %v3341_v40  ;;  %v4038_v56 = vperm.slane %v11441_v37, 1  ;;  %3874 = vmatpush.bf16.msra.mxu1 %v3469_v44  ;;  %v2349_v4 = vunpack.c.2.s8 %v755_v36  ;;  %v2365_v6 = vunpack.c.3.s8 %v755_v36  ;;  %v2605_v61 = vunpack.c.2.s8 %v819_v50  ;;  %v11474_v44 = vld [vmem:[%s11133_s30 + $0x60] sm:$0xff] }
 0x56d   : > { %v2621_v5 = vunpack.c.3.s8 %v819_v50  ;;  %3888 = vmatpush.bf16.msra.mxu2 %v3342_v58  ;;  %v3470_v8 = vpack.c.bf16 %v3166_v59, %v3150_v51  ;;  %v4004_v10 = vmul.f32 %v3972_v60, %v3573_v63  ;;  %v2350_v12 = vunpack.c.2.s8 %v756_v1 }
 0x56e   : > { %v2366_v14 = vunpack.c.3.s8 %v756_v1  ;;  %v2861_v52 = vcvt.s32.f32 %v2349_v4  ;;  %v2877_v16 = vcvt.s32.f32 %v2365_v6  ;;  %v3117_v62 = vcvt.s32.f32 %v2605_v61  ;;  %v803_v4 = vld [vmem:[%s11133_s30 + $0x2e0] sm:$0xff]  ;;  %v740_v6 = vld [vmem:[%s11133_s30 + $0x68] sm:$0xff] }
 0x56f   : > { %v3133_v18 = vcvt.s32.f32 %v2621_v5  ;;  %3902 = vmatpush.bf16.msra.mxu3 %v3470_v8  ;;  %v11466_v19 = vadd.f32 %v4038_v56, %v4004_v10  ;;  %v2862_v24 = vcvt.s32.f32 %v2350_v12  ;;  %v2606_v0 = vunpack.c.2.s8 %v820_v30 }
 0x570   : > { %v2878_v7 = vcvt.s32.f32 %v2366_v14  ;;  %v3325_v13 = vpack.c.bf16 %v2877_v16, %v2861_v52  ;;  %v2622_v17 = vunpack.c.3.s8 %v820_v30  ;;  %v3547_v23 = vadd.f32 %v3546_v42, %v3532_v39 }
 0x571   : > { %v3453_v22 = vpack.c.bf16 %v3133_v18, %v3117_v62  ;;  %v4102_v27 = vmax.f32 %v11466_v19, 0.0  ;;  %v3118_v11 = vcvt.s32.f32 %v2606_v0  ;;  %v2317_v21 = vunpack.c.0.s8 %v755_v36  ;;  %v3600_v0 = vpop.f32.mrf.mxu1 }
 0x572   : > { %v3326_v29 = vpack.c.bf16 %v2878_v7, %v2862_v24  ;;  %3861 = vmatpush.bf16.msra.mxu0 %v3325_v13  ;;  %v3134_v26 = vcvt.s32.f32 %v2622_v17  ;;  %v4019_v32 = vmul.f32 %v3971_v15, %v3547_v23  ;;  %v2333_v28 = vunpack.c.1.s8 %v755_v36  ;;  %v3586_v7 = vpop.f32.mrf.mxu0 }
 0x573   : > { %3875 = vmatpush.bf16.msra.mxu1 %v3453_v22  ;;  %v2573_v31 = vunpack.c.0.s8 %v819_v50  ;;  %v2829_v9 = vcvt.s32.f32 %v2317_v21  ;;  %v2589_v33 = vunpack.c.1.s8 %v819_v50  ;;  %v2318_v38 = vunpack.c.0.s8 %v756_v1 }
 0x574   : > { %3889 = vmatpush.bf16.msra.mxu2 %v3326_v29  ;;  %v2334_v34 = vunpack.c.1.s8 %v756_v1  ;;  %v3454_v40 = vpack.c.bf16 %v3134_v26, %v3118_v11  ;;  %v4085_v41 = vadd.f32 %v4037_v25, %v4019_v32  ;;  %v2845_v46 = vcvt.s32.f32 %v2333_v28 }
 0x575   : > { %v3085_v48 = vcvt.s32.f32 %v2573_v31  ;;  %v3101_v15 = vcvt.s32.f32 %v2589_v33  ;;  %v2830_v36 = vcvt.s32.f32 %v2318_v38  ;;  %v2574_v63 = vunpack.c.0.s8 %v820_v30 }
 0x576   : > { %v2846_v51 = vcvt.s32.f32 %v2334_v34  ;;  %3903 = vmatpush.bf16.msra.mxu3 %v3454_v40  ;;  %v4117_v50 = vmax.f32 %v4085_v41, 0.0  ;;  %v3309_v1 = vpack.c.bf16 %v2845_v46, %v2829_v9  ;;  %v2590_v58 = vunpack.c.1.s8 %v820_v30  ;;  %v11487_v30 = vld [vmem:[%s11133_s30 + $0x2e8] sm:$0xff] }
 0x577   : > { %v3575_v59 = vadd.f32 %v3574_v3, %v3560_v2  ;;  %v3437_v61 = vpack.c.bf16 %v3101_v15, %v3085_v48  ;;  %v3086_v8 = vcvt.s32.f32 %v2574_v63  ;;  %v2285_v25 = vunpack.c.2.s8 %v11474_v44  ;;  %v11504_v48 = vld [vmem:[%s11133_s30 + $0x250] sm:$0xff] }
 0x578   : > { %v3310_v5 = vpack.c.bf16 %v2846_v51, %v2830_v36  ;;  %v11481_v10 = vpack.c.bf16 %v4117_v50, %v4101_v43  ;;  %3862 = vmatpush.bf16.msra.mxu0 %v3309_v1  ;;  %v3102_v12 = vcvt.s32.f32 %v2590_v58  ;;  %v2301_v39 = vunpack.c.3.s8 %v11474_v44 }
 0x579   : > { %v4020_v14 = vmul.f32 %v3972_v60, %v3575_v59  ;;  %3876 = vmatpush.bf16.msra.mxu1 %v3437_v61  ;;  %v2797_v42 = vcvt.s32.f32 %v2285_v25  ;;  %v2541_v52 = vunpack.c.2.s8 %v803_v4  ;;  %v2557_v16 = vunpack.c.3.s8 %v803_v4  ;;  %v11512_v59 = vld [vmem:[%s11133_s30 + $0x4d0] sm:$0xff]  ;;  %v11521_v25 = vld [vmem:[%s11133_s30 + $0x4d8] sm:$0xff] }
 0x57a   : > { %3890 = vmatpush.bf16.msra.mxu2 %v3310_v5  ;;  %v2286_v62 = vunpack.c.2.s8 %v740_v6  ;;  %v3438_v18 = vpack.c.bf16 %v3102_v12, %v3086_v8  ;;  %v2813_v43 = vcvt.s32.f32 %v2301_v39  ;;  %v2302_v24 = vunpack.c.3.s8 %v740_v6  ;;  %v11518_v8 = vld [vmem:[%s11133_s30 + $0x258] sm:$0xff] }
 0x57b   : > { %v4086_v35 = vadd.f32 %v4038_v56, %v4020_v14  ;;  %v3053_v13 = vcvt.s32.f32 %v2541_v52  ;;  %v3069_v60 = vcvt.s32.f32 %v2557_v16  ;;  %v2542_v17 = vunpack.c.2.s8 %v11487_v30 }
 0x57c   : > { %v2798_v22 = vcvt.s32.f32 %v2286_v62  ;;  %3904 = vmatpush.bf16.msra.mxu3 %v3438_v18  ;;  %v3293_v29 = vpack.c.bf16 %v2813_v43, %v2797_v42  ;;  %v2814_v11 = vcvt.s32.f32 %v2302_v24  ;;  %v2558_v21 = vunpack.c.3.s8 %v11487_v30 }
 0x57d   : > { %v4118_v23 = vmax.f32 %v4086_v35, 0.0  ;;  %v3421_v26 = vpack.c.bf16 %v3069_v60, %v3053_v13  ;;  %v3054_v32 = vcvt.s32.f32 %v2542_v17  ;;  %v3601_v28 = vadd.f32 %v3600_v0, %v3586_v7  ;;  %v3614_v7 = vpop.f32.mrf.mxu2  ;;  %v3628_v0 = vpop.f32.mrf.mxu3 }
 0x57e   : > { %v3973_v56 = vperm.slane %v11436_v45, 2  ;;  %3863 = vmatpush.bf16.msra.mxu0 %v3293_v29  ;;  %v3294_v9 = vpack.c.bf16 %v2814_v11, %v2798_v22  ;;  %v3070_v33 = vcvt.s32.f32 %v2558_v21  ;;  %v4039_v38 = vperm.slane %v11441_v37, 2  ;;  %v3602_v29 = vpop.f32.mrf.mxu1 }
 0x57f   : > { %v11496_v31 = vpack.c.bf16 %v4118_v23, %v4102_v27  ;;  %3877 = vmatpush.bf16.msra.mxu1 %v3421_v26  ;;  %v2253_v2 = vunpack.c.0.s8 %v11474_v44  ;;  %v2269_v3 = vunpack.c.1.s8 %v11474_v44  ;;  %v2509_v40 = vunpack.c.0.s8 %v803_v4  ;;  %v3588_v23 = vpop.f32.mrf.mxu0 }
 0x580   : > { %v4005_v34 = vmul.f32 %v3973_v56, %v3601_v28  ;;  %3891 = vmatpush.bf16.msra.mxu2 %v3294_v9  ;;  %v3422_v19 = vpack.c.bf16 %v3070_v33, %v3054_v32  ;;  %v2525_v41 = vunpack.c.1.s8 %v803_v4  ;;  %v2254_v27 = vunpack.c.0.s8 %v740_v6 }
 0x581   : > { %v2270_v46 = vunpack.c.1.s8 %v740_v6  ;;  %v2765_v36 = vcvt.s32.f32 %v2253_v2  ;;  %v2781_v51 = vcvt.s32.f32 %v2269_v3  ;;  %v3021_v63 = vcvt.s32.f32 %v2509_v40 }
 0x582   : > { %v11508_v15 = vadd.f32 %v4039_v38, %v4005_v34  ;;  %3905 = vmatpush.bf16.msra.mxu3 %v3422_v19  ;;  %v3037_v44 = vcvt.s32.f32 %v2525_v41  ;;  %v2766_v50 = vcvt.s32.f32 %v2254_v27  ;;  %v2510_v58 = vunpack.c.0.s8 %v11487_v30 }
 0x583   : > { %v2782_v1 = vcvt.s32.f32 %v2270_v46  ;;  %v3277_v6 = vpack.c.bf16 %v2781_v51, %v2765_v36  ;;  %v2526_v61 = vunpack.c.1.s8 %v11487_v30  ;;  %v2479_v5 = vunpack.c.2.s8 %v11504_v48 }
 0x584   : > { %v4103_v4 = vmax.f32 %v11508_v15, 0.0  ;;  %v3405_v12 = vpack.c.bf16 %v3037_v44, %v3021_v63  ;;  %v3022_v39 = vcvt.s32.f32 %v2510_v58  ;;  %v2495_v42 = vunpack.c.3.s8 %v11504_v48 }
 0x585   : > { %v3278_v14 = vpack.c.bf16 %v2782_v1, %v2766_v50  ;;  %3864 = vmatpush.bf16.msra.mxu0 %v3277_v6  ;;  %v3038_v52 = vcvt.s32.f32 %v2526_v61  ;;  %v2991_v16 = vcvt.s32.f32 %v2479_v5  ;;  %v2735_v62 = vunpack.c.2.s8 %v11512_v59  ;;  %v11551_v61 = vld [vmem:[%s11133_s30 + $0x1b0] sm:$0xff] }
 0x586   : > { %v2751_v18 = vunpack.c.3.s8 %v11512_v59  ;;  %3878 = vmatpush.bf16.msra.mxu1 %v3405_v12  ;;  %v3007_v30 = vcvt.s32.f32 %v2495_v42  ;;  %v2480_v35 = vunpack.c.2.s8 %v11518_v8  ;;  %v2496_v43 = vunpack.c.3.s8 %v11518_v8 }
 0x587   : > { %3892 = vmatpush.bf16.msra.mxu2 %v3278_v14  ;;  %v2736_v24 = vunpack.c.2.s8 %v11521_v25  ;;  %v3406_v13 = vpack.c.bf16 %v3038_v52, %v3022_v39  ;;  %v3247_v60 = vcvt.s32.f32 %v2735_v62  ;;  %v2752_v17 = vunpack.c.3.s8 %v11521_v25  ;;  %v11557_v14 = vld [vmem:[%s11133_s30 + $0x430] sm:$0xff]  ;;  %v11562_v62 = vld [vmem:[%s11133_s30 + $0x1b8] sm:$0xff] }
 0x588   : > { %v3263_v22 = vcvt.s32.f32 %v2751_v18  ;;  %v3391_v11 = vpack.c.bf16 %v3007_v30, %v2991_v16  ;;  %v2992_v21 = vcvt.s32.f32 %v2480_v35  ;;  %v3008_v26 = vcvt.s32.f32 %v2496_v43  ;;  %3865 = vmatmul.bf16.vlgmr.msra.gmra.mxu0 %v11326_v55 }
 0x589   : > { %v3248_v32 = vcvt.s32.f32 %v2736_v24  ;;  %3906 = vmatpush.bf16.msra.mxu3 %v3406_v13  ;;  %v3264_v9 = vcvt.s32.f32 %v2752_v17  ;;  %v3629_v33 = vadd.f32 %v3628_v0, %v3614_v7  ;;  %v3974_v34 = vperm.slane %v11436_v45, 3  ;;  %3879 = vmatmul.bf16.vlgmr.msra.gmra.mxu1 %v11330_v47  ;;  %v11568_v0 = vld [vmem:[%s11133_s30 + $0x438] sm:$0xff]  ;;  %v3616_v13 = vpop.f32.mrf.mxu2 }
 0x58a   : > { %v3519_v28 = vpack.c.bf16 %v3263_v22, %v3247_v60  ;;  %3913 = vmatpush.bf16.msrb.mxu0 %v3391_v11  ;;  %v3392_v2 = vpack.c.bf16 %v3008_v26, %v2992_v21  ;;  %v4040_v3 = vperm.slane %v11441_v37, 3  ;;  %3893 = vmatmul.bf16.vlgmr.msra.gmra.mxu2 %v11326_v55  ;;  %v3603_v40 = vadd.f32 %v3602_v29, %v3588_v23  ;;  %v3630_v60 = vpop.f32.mrf.mxu3  ;;  %v3642_v29 = vpop.f32.mrf.mxu0 }
 0x58b   : > { %v2447_v19 = vunpack.c.0.s8 %v11504_v48  ;;  %v3520_v41 = vpack.c.bf16 %v3264_v9, %v3248_v32  ;;  %v4006_v27 = vmul.f32 %v3974_v34, %v3629_v33  ;;  %v2463_v46 = vunpack.c.1.s8 %v11504_v48  ;;  %v3656_v11 = vpop.f32.mrf.mxu1 }
 0x58c   : > { %3927 = vmatpush.bf16.msrb.mxu1 %v3519_v28  ;;  %v2703_v36 = vunpack.c.0.s8 %v11512_v59  ;;  %3941 = vmatpush.bf16.msrb.mxu2 %v3392_v2  ;;  %v4021_v51 = vmul.f32 %v3973_v56, %v3603_v40  ;;  %v2719_v44 = vunpack.c.1.s8 %v11512_v59  ;;  %v2448_v50 = vunpack.c.0.s8 %v11518_v8 }
 0x58d   : > { %3907 = vmatmul.bf16.vlgmr.msra.gmra.mxu3 %v11330_v47  ;;  %v2959_v63 = vcvt.s32.f32 %v2447_v19  ;;  %v11547_v1 = vadd.f32 %v4040_v3, %v4006_v27  ;;  %v2975_v48 = vcvt.s32.f32 %v2463_v46  ;;  %v2464_v6 = vunpack.c.1.s8 %v11518_v8 }
 0x58e   : > { %3955 = vmatpush.bf16.msrb.mxu3 %v3520_v41  ;;  %v3215_v58 = vcvt.s32.f32 %v2703_v36  ;;  %v4087_v56 = vadd.f32 %v4039_v38, %v4021_v51  ;;  %v3231_v5 = vcvt.s32.f32 %v2719_v44  ;;  %v2960_v12 = vcvt.s32.f32 %v2448_v50 }
 0x58f   : > { %v2704_v59 = vunpack.c.0.s8 %v11521_v25  ;;  %v4104_v39 = vmax.f32 %v11547_v1, 0.0  ;;  %v3375_v42 = vpack.c.bf16 %v2975_v48, %v2959_v63  ;;  %v2976_v52 = vcvt.s32.f32 %v2464_v6 }
 0x590   : > { %v2720_v16 = vunpack.c.1.s8 %v11521_v25  ;;  %v4119_v8 = vmax.f32 %v4087_v56, 0.0  ;;  %v3503_v18 = vpack.c.bf16 %v3231_v5, %v3215_v58  ;;  %v2415_v38 = vunpack.c.2.s8 %v11551_v61 }
 0x591   : > { %v3216_v30 = vcvt.s32.f32 %v2704_v59  ;;  %3914 = vmatpush.bf16.msrb.mxu0 %v3375_v42  ;;  %v3376_v35 = vpack.c.bf16 %v2976_v52, %v2960_v12  ;;  %v2431_v24 = vunpack.c.3.s8 %v11551_v61  ;;  %v2671_v7 = vunpack.c.2.s8 %v11557_v14  ;;  %v3670_v1 = vpop.f32.mrf.mxu2 }
 0x592   : > { %v3232_v43 = vcvt.s32.f32 %v2720_v16  ;;  %v11572_v25 = vpack.c.bf16 %v4119_v8, %v4103_v4  ;;  %3928 = vmatpush.bf16.msrb.mxu1 %v3503_v18  ;;  %v2927_v22 = vcvt.s32.f32 %v2415_v38  ;;  %v2687_v17 = vunpack.c.3.s8 %v11557_v14  ;;  %v757_v18 = vld [vmem:[%s11133_s30 + $0x110] sm:$0xff] }
 0x593   : > { %v2416_v23 = vunpack.c.2.s8 %v11562_v62  ;;  %3942 = vmatpush.bf16.msrb.mxu2 %v3376_v35  ;;  %v2943_v26 = vcvt.s32.f32 %v2431_v24  ;;  %v3183_v32 = vcvt.s32.f32 %v2671_v7  ;;  %v2432_v28 = vunpack.c.3.s8 %v11562_v62 }
 0x594   : > { %v3504_v21 = vpack.c.bf16 %v3232_v43, %v3216_v30  ;;  %v3199_v9 = vcvt.s32.f32 %v2687_v17  ;;  %v2672_v15 = vunpack.c.2.s8 %v11568_v0  ;;  %v2688_v4 = vunpack.c.3.s8 %v11568_v0 }
 0x595   : > { %v2928_v33 = vcvt.s32.f32 %v2416_v23  ;;  %v3359_v2 = vpack.c.bf16 %v2943_v26, %v2927_v22  ;;  %v2944_v40 = vcvt.s32.f32 %v2432_v28  ;;  %v3631_v19 = vadd.f32 %v3630_v60, %v3616_v13  ;;  %v11603_v60 = vld [vmem:[%s11133_s30 + $0x118] sm:$0xff] }
 0x596   : > { %3956 = vmatpush.bf16.msrb.mxu3 %v3504_v21  ;;  %v3657_v41 = vadd.f32 %v3656_v11, %v3642_v29  ;;  %v3487_v27 = vpack.c.bf16 %v3199_v9, %v3183_v32  ;;  %v3184_v46 = vcvt.s32.f32 %v2672_v15  ;;  %v3200_v36 = vcvt.s32.f32 %v2688_v4  ;;  %v11610_v29 = vld [vmem:[%s11133_s30 + $0x398] sm:$0xff] }
 0x597   : > { %v3975_v51 = vperm.slane %v11436_v45, 4  ;;  %3915 = vmatpush.bf16.msrb.mxu0 %v3359_v2  ;;  %v3360_v63 = vpack.c.bf16 %v2944_v40, %v2928_v33  ;;  %v4022_v44 = vmul.f32 %v3974_v34, %v3631_v19  ;;  %v4041_v50 = vperm.slane %v11441_v37, 4 }
 0x598   : > { %v2383_v48 = vunpack.c.0.s8 %v11551_v61  ;;  %3929 = vmatpush.bf16.msrb.mxu1 %v3487_v27  ;;  %v3488_v58 = vpack.c.bf16 %v3200_v36, %v3184_v46  ;;  %v2399_v56 = vunpack.c.1.s8 %v11551_v61  ;;  %v2639_v5 = vunpack.c.0.s8 %v11557_v14  ;;  %v3644_v36 = vpop.f32.mrf.mxu0 }
 0x599   : > { %v4007_v6 = vmul.f32 %v3975_v51, %v3657_v41  ;;  %3943 = vmatpush.bf16.msrb.mxu2 %v3360_v63  ;;  %v4088_v12 = vadd.f32 %v4040_v3, %v4022_v44  ;;  %v2655_v59 = vunpack.c.1.s8 %v11557_v14  ;;  %v2384_v42 = vunpack.c.0.s8 %v11562_v62  ;;  %v821_v14 = vld [vmem:[%s11133_s30 + $0x390] sm:$0xff]  ;;  %v3658_v63 = vpop.f32.mrf.mxu1 }
 0x59a   : > { %v2895_v34 = vcvt.s32.f32 %v2383_v48  ;;  %3957 = vmatpush.bf16.msrb.mxu3 %v3488_v58  ;;  %v2911_v16 = vcvt.s32.f32 %v2399_v56  ;;  %v3151_v61 = vcvt.s32.f32 %v2639_v5  ;;  %v2400_v8 = vunpack.c.1.s8 %v11562_v62 }
 0x59b   : > { %v11594_v52 = vadd.f32 %v4041_v50, %v4007_v6  ;;  %v4120_v30 = vmax.f32 %v4088_v12, 0.0  ;;  %v3167_v38 = vcvt.s32.f32 %v2655_v59  ;;  %v2896_v3 = vcvt.s32.f32 %v2384_v42 }
 0x59c   : > { %v2640_v35 = vunpack.c.0.s8 %v11568_v0  ;;  %v3343_v24 = vpack.c.bf16 %v2911_v16, %v2895_v34  ;;  %v2912_v7 = vcvt.s32.f32 %v2400_v8  ;;  %v2656_v13 = vunpack.c.1.s8 %v11568_v0 }
 0x59d   : > { %v4105_v43 = vmax.f32 %v11594_v52, 0.0  ;;  %v11607_v22 = vpack.c.bf16 %v4120_v30, %v4104_v39  ;;  %v3471_v62 = vpack.c.bf16 %v3167_v38, %v3151_v61  ;;  %v2351_v23 = vunpack.c.2.s8 %v757_v18  ;;  %v3684_v39 = vpop.f32.mrf.mxu3 }
 0x59e   : > { %v3152_v17 = vcvt.s32.f32 %v2640_v35  ;;  %3916 = vmatpush.bf16.msrb.mxu0 %v3343_v24  ;;  %v3344_v11 = vpack.c.bf16 %v2912_v7, %v2896_v3  ;;  %v3168_v21 = vcvt.s32.f32 %v2656_v13  ;;  %v2367_v26 = vunpack.c.3.s8 %v757_v18 }
 0x59f   : > { %v2607_v32 = vunpack.c.2.s8 %v821_v14  ;;  %3930 = vmatpush.bf16.msrb.mxu1 %v3471_v62  ;;  %v2863_v28 = vcvt.s32.f32 %v2351_v23  ;;  %v2623_v9 = vunpack.c.3.s8 %v821_v14  ;;  %v2352_v0 = vunpack.c.2.s8 %v11603_v60  ;;  %v741_v62 = vld [vmem:[%s11133_s30 + $0x70] sm:$0xff] }
 0x5a0   : > { %v2368_v33 = vunpack.c.3.s8 %v11603_v60  ;;  %3944 = vmatpush.bf16.msrb.mxu2 %v3344_v11  ;;  %v3472_v15 = vpack.c.bf16 %v3168_v21, %v3152_v17  ;;  %v2879_v4 = vcvt.s32.f32 %v2367_v26  ;;  %v2608_v40 = vunpack.c.2.s8 %v11610_v29 }
 0x5a1   : > { %v3119_v2 = vcvt.s32.f32 %v2607_v32  ;;  %v3135_v19 = vcvt.s32.f32 %v2623_v9  ;;  %v2864_v41 = vcvt.s32.f32 %v2352_v0  ;;  %v2624_v46 = vunpack.c.3.s8 %v11610_v29 }
 0x5a2   : > { %v2880_v27 = vcvt.s32.f32 %v2368_v33  ;;  %3958 = vmatpush.bf16.msrb.mxu3 %v3472_v15  ;;  %v3327_v44 = vpack.c.bf16 %v2879_v4, %v2863_v28  ;;  %v3120_v48 = vcvt.s32.f32 %v2608_v40  ;;  %v3685_v58 = vadd.f32 %v3684_v39, %v3670_v1  ;;  %v742_v1 = vld [vmem:[%s11133_s30 + $0x78] sm:$0xff] }
 0x5a3   : > { %v3976_v6 = vperm.slane %v11436_v45, 5  ;;  %v3455_v56 = vpack.c.bf16 %v3135_v19, %v3119_v2  ;;  %v3136_v12 = vcvt.s32.f32 %v2624_v46  ;;  %v4042_v34 = vperm.slane %v11441_v37, 5  ;;  %v806_v2 = vld [vmem:[%s11133_s30 + $0x2f8] sm:$0xff] }
 0x5a4   : > { %v3328_v5 = vpack.c.bf16 %v2880_v27, %v2864_v41  ;;  %3917 = vmatpush.bf16.msrb.mxu0 %v3327_v44  ;;  %v3659_v42 = vadd.f32 %v3658_v63, %v3644_v36  ;;  %v2319_v16 = vunpack.c.0.s8 %v757_v18  ;;  %v2335_v61 = vunpack.c.1.s8 %v757_v18  ;;  %v3672_v27 = vpop.f32.mrf.mxu2 }
 0x5a5   : > { %v4008_v59 = vmul.f32 %v3976_v6, %v3685_v58  ;;  %3931 = vmatpush.bf16.msrb.mxu1 %v3455_v56  ;;  %v3456_v8 = vpack.c.bf16 %v3136_v12, %v3120_v48  ;;  %v2575_v30 = vunpack.c.0.s8 %v821_v14  ;;  %v2591_v38 = vunpack.c.1.s8 %v821_v14  ;;  %v805_v14 = vld [vmem:[%s11133_s30 + $0x2f0] sm:$0xff]  ;;  %v3686_v46 = vpop.f32.mrf.mxu3 }
 0x5a6   : > { %3945 = vmatpush.bf16.msrb.mxu2 %v3328_v5  ;;  %v2320_v3 = vunpack.c.0.s8 %v11603_v60  ;;  %v4023_v24 = vmul.f32 %v3975_v51, %v3659_v42  ;;  %v2831_v7 = vcvt.s32.f32 %v2319_v16  ;;  %v2847_v13 = vcvt.s32.f32 %v2335_v61 }
 0x5a7   : > { %v11623_v35 = vadd.f32 %v4042_v34, %v4008_v59  ;;  %3959 = vmatpush.bf16.msrb.mxu3 %v3456_v8  ;;  %v3087_v18 = vcvt.s32.f32 %v2575_v30  ;;  %v3103_v17 = vcvt.s32.f32 %v2591_v38  ;;  %v2336_v23 = vunpack.c.1.s8 %v11603_v60 }
 0x5a8   : > { %v2832_v11 = vcvt.s32.f32 %v2320_v3  ;;  %v4089_v26 = vadd.f32 %v4041_v50, %v4023_v24  ;;  %v3311_v32 = vpack.c.bf16 %v2847_v13, %v2831_v7  ;;  %v2576_v51 = vunpack.c.0.s8 %v11610_v29 }
 0x5a9   : > { %v4106_v21 = vmax.f32 %v11623_v35, 0.0  ;;  %v3439_v28 = vpack.c.bf16 %v3103_v17, %v3087_v18  ;;  %v2848_v9 = vcvt.s32.f32 %v2336_v23  ;;  %v2592_v0 = vunpack.c.1.s8 %v11610_v29  ;;  %v893_v23 = vld [vmem:[%s10758_s27 + $0x30] sm:$0xff] }
 0x5aa   : > { %v2287_v33 = vunpack.c.2.s8 %v741_v62  ;;  %v4121_v39 = vmax.f32 %v4089_v26, 0.0  ;;  %3918 = vmatpush.bf16.msrb.mxu0 %v3311_v32  ;;  %v3088_v60 = vcvt.s32.f32 %v2576_v51  ;;  %v2303_v15 = vunpack.c.3.s8 %v741_v62 }
 0x5ab   : > { %v2543_v4 = vunpack.c.2.s8 %v805_v14  ;;  %3932 = vmatpush.bf16.msrb.mxu1 %v3439_v28  ;;  %v3312_v40 = vpack.c.bf16 %v2848_v9, %v2832_v11  ;;  %v3104_v19 = vcvt.s32.f32 %v2592_v0  ;;  %v2559_v50 = vunpack.c.3.s8 %v805_v14  ;;  %v901_v9 = vld [vmem:[%s10758_s27 + $0x70] sm:$0xff] }
 0x5ac   : > { %v2799_v41 = vcvt.s32.f32 %v2287_v33  ;;  %v11639_v36 = vpack.c.bf16 %v4121_v39, %v4105_v43  ;;  %v2815_v29 = vcvt.s32.f32 %v2303_v15  ;;  %v2288_v44 = vunpack.c.2.s8 %v742_v1 }
 0x5ad   : > { %v3055_v63 = vcvt.s32.f32 %v2543_v4  ;;  %3946 = vmatpush.bf16.msrb.mxu2 %v3312_v40  ;;  %v3440_v48 = vpack.c.bf16 %v3104_v19, %v3088_v60  ;;  %v3071_v58 = vcvt.s32.f32 %v2559_v50  ;;  %v2304_v56 = vunpack.c.3.s8 %v742_v1  ;;  %v909_v60 = vld [vmem:[%s10758_s27 + $0xb0] sm:$0xff] }
 0x5ae   : > { %v2544_v5 = vunpack.c.2.s8 %v806_v2  ;;  %v3295_v12 = vpack.c.bf16 %v2815_v29, %v2799_v41  ;;  %v2800_v59 = vcvt.s32.f32 %v2288_v44  ;;  %v2560_v42 = vunpack.c.3.s8 %v806_v2 }
 0x5af   : > { %v3687_v16 = vadd.f32 %v3686_v46, %v3672_v27  ;;  %3960 = vmatpush.bf16.msrb.mxu3 %v3440_v48  ;;  %v3423_v61 = vpack.c.bf16 %v3071_v58, %v3055_v63  ;;  %v2816_v8 = vcvt.s32.f32 %v2304_v56  ;;  %v2255_v52 = vunpack.c.0.s8 %v741_v62 }
 0x5b0   : > { %v3056_v30 = vcvt.s32.f32 %v2544_v5  ;;  %3919 = vmatpush.bf16.msrb.mxu0 %v3295_v12  ;;  %v3072_v43 = vcvt.s32.f32 %v2560_v42  ;;  %v2271_v3 = vunpack.c.1.s8 %v741_v62  ;;  %v2511_v24 = vunpack.c.0.s8 %v805_v14 }
 0x5b1   : > { %v4024_v38 = vmul.f32 %v3976_v6, %v3687_v16  ;;  %3933 = vmatpush.bf16.msrb.mxu1 %v3423_v61  ;;  %v3296_v7 = vpack.c.bf16 %v2816_v8, %v2800_v59  ;;  %v2767_v13 = vcvt.s32.f32 %v2255_v52  ;;  %v2527_v18 = vunpack.c.1.s8 %v805_v14 }
 0x5b2   : > { %v2256_v17 = vunpack.c.0.s8 %v742_v1  ;;  %v3424_v11 = vpack.c.bf16 %v3072_v43, %v3056_v30  ;;  %v2783_v32 = vcvt.s32.f32 %v2271_v3  ;;  %v3023_v51 = vcvt.s32.f32 %v2511_v24 }
 0x5b3   : > { %v4090_v26 = vadd.f32 %v4042_v34, %v4024_v38  ;;  %3947 = vmatpush.bf16.msrb.mxu2 %v3296_v7  ;;  %v3039_v45 = vcvt.s32.f32 %v2527_v18  ;;  %v2272_v6 = vunpack.c.1.s8 %v742_v1  ;;  %v2512_v28 = vunpack.c.0.s8 %v806_v2  ;;  %v917_v34 = vld [vmem:[%s10758_s27 + $0xf0] sm:$0xff]  ;;  %v11657_v7 = vld [vmem:[%s10758_s27 + $0x20] sm:$0xff] }
 0x5b4   : > { %v2768_v62 = vcvt.s32.f32 %v2256_v17  ;;  %3961 = vmatpush.bf16.msrb.mxu3 %v3424_v11  ;;  %v3279_v33 = vpack.c.bf16 %v2783_v32, %v2767_v13  ;;  %v2528_v14 = vunpack.c.1.s8 %v806_v2  ;;  %v4177_v39 = vunpack.c.2.s8 %v893_v23  ;;  %v899_v11 = vld [vmem:[%s10758_s27 + $0x60] sm:$0xff] }
 0x5b5   : > { %v4122_v0 = vmax.f32 %v4090_v26, 0.0  ;;  %v3407_v15 = vpack.c.bf16 %v3039_v45, %v3023_v51  ;;  %v2784_v4 = vcvt.s32.f32 %v2272_v6  ;;  %v3024_v40 = vcvt.s32.f32 %v2512_v28  ;;  %v11662_v45 = vld [vmem:[%s10758_s27 + $0xa0] sm:$0xff] }
 0x5b6   : > { %v4179_v37 = vunpack.c.3.s8 %v893_v23  ;;  %3920 = vmatpush.bf16.msrb.mxu0 %v3279_v33  ;;  %v3040_v1 = vcvt.s32.f32 %v2528_v14  ;;  %v4689_v41 = vcvt.s32.f32 %v4177_v39  ;;  %v4209_v50 = vunpack.c.2.s8 %v901_v9  ;;  %v915_v39 = vld [vmem:[%s10758_s27 + $0xe0] sm:$0xff] }
 0x5b7   : > { %v11651_v19 = vpack.c.bf16 %v4122_v0, %v4106_v21  ;;  %3934 = vmatpush.bf16.msrb.mxu1 %v3407_v15  ;;  %v3280_v27 = vpack.c.bf16 %v2784_v4, %v2768_v62  ;;  %v4211_v29 = vunpack.c.3.s8 %v901_v9  ;;  %v4241_v2 = vunpack.c.2.s8 %v909_v60 }
 0x5b8   : > { %v4691_v46 = vcvt.s32.f32 %v4179_v37  ;;  %v3408_v63 = vpack.c.bf16 %v3040_v1, %v3024_v40  ;;  %v4721_v44 = vcvt.s32.f32 %v4209_v50  ;;  %v4243_v48 = vunpack.c.3.s8 %v909_v60  ;;  %v3698_v37 = vpop.f32.mrf.mxu0 }
 0x5b9   : > { %v4273_v58 = vunpack.c.2.s8 %v917_v34  ;;  %3948 = vmatpush.bf16.msrb.mxu2 %v3280_v27  ;;  %v4723_v5 = vcvt.s32.f32 %v4211_v29  ;;  %v4753_v12 = vcvt.s32.f32 %v4241_v2  ;;  %v4275_v35 = vunpack.c.3.s8 %v917_v34  ;;  %3921 = vmatmul.bf16.vlgmr.msrb.gmra.mxu0 %v11326_v55 }
 0x5ba   : > { %v5187_v56 = vpack.c.bf16 %v4691_v46, %v4689_v41  ;;  %3962 = vmatpush.bf16.msrb.mxu3 %v3408_v63  ;;  %v4755_v21 = vcvt.s32.f32 %v4243_v48  ;;  %3935 = vmatmul.bf16.vlgmr.msrb.gmra.mxu1 %v11330_v47  ;;  %v4173_v42 = vunpack.c.0.s8 %v893_v23  ;;  %v4175_v16 = vunpack.c.1.s8 %v893_v23 }
 0x5bb   : > { %v4785_v59 = vcvt.s32.f32 %v4273_v58  ;;  %v5203_v61 = vpack.c.bf16 %v4723_v5, %v4721_v44  ;;  %v4787_v8 = vcvt.s32.f32 %v4275_v35  ;;  %v4205_v30 = vunpack.c.0.s8 %v901_v9 }
 0x5bc   : > { %5429 = vmatpush.bf16.msra.mxu0 %v5187_v56  ;;  %v4207_v52 = vunpack.c.1.s8 %v901_v9  ;;  %v5219_v43 = vpack.c.bf16 %v4755_v21, %v4753_v12  ;;  %3949 = vmatmul.bf16.vlgmr.msrb.gmra.mxu2 %v11326_v55  ;;  %v4685_v38 = vcvt.s32.f32 %v4173_v42  ;;  %v4687_v3 = vcvt.s32.f32 %v4175_v16  ;;  %v11670_v56 = vld [vmem:[%s11429_s12 + $0x1] ss:$2 sm:$0xff]  ;;  %v11674_v21 = vld [vmem:[%s11429_s12] ss:$2 sm:$0xff] }
 0x5bd   : > { %v4237_v24 = vunpack.c.0.s8 %v909_v60  ;;  %5443 = vmatpush.bf16.msra.mxu1 %v5203_v61  ;;  %v5235_v13 = vpack.c.bf16 %v4787_v8, %v4785_v59  ;;  %3963 = vmatmul.bf16.vlgmr.msrb.gmra.mxu3 %v11330_v47  ;;  %v4717_v18 = vcvt.s32.f32 %v4205_v30  ;;  %v4239_v23 = vunpack.c.1.s8 %v909_v60 }
 0x5be   : > { %v4719_v17 = vcvt.s32.f32 %v4207_v52  ;;  %5457 = vmatpush.bf16.msra.mxu2 %v5219_v43  ;;  %v5185_v26 = vpack.c.bf16 %v4687_v3, %v4685_v38  ;;  %v4269_v51 = vunpack.c.0.s8 %v917_v34  ;;  %v4271_v55 = vunpack.c.1.s8 %v917_v34  ;;  %v3712_v34 = vpop.f32.mrf.mxu1 }
 0x5bf   : > { %v4749_v32 = vcvt.s32.f32 %v4237_v24  ;;  %5471 = vmatpush.bf16.msra.mxu3 %v5235_v13  ;;  %v4751_v62 = vcvt.s32.f32 %v4239_v23  ;;  %v4169_v28 = vunpack.c.2.s8 %v11657_v7  ;;  %v4171_v9 = vunpack.c.3.s8 %v11657_v7  ;;  %v11683_v24 = vld [vmem:[%s10758_s27 + $0x10] sm:$0xff] }
 0x5c0   : > { %v5201_v6 = vpack.c.bf16 %v4719_v17, %v4717_v18  ;;  %5430 = vmatpush.bf16.msra.mxu0 %v5185_v26  ;;  %v4781_v47 = vcvt.s32.f32 %v4269_v51  ;;  %v4783_v0 = vcvt.s32.f32 %v4271_v55  ;;  %v4201_v33 = vunpack.c.2.s8 %v899_v11  ;;  %v897_v51 = vld [vmem:[%s10758_s27 + $0x50] sm:$0xff] }
 0x5c1   : > { %v4203_v14 = vunpack.c.3.s8 %v899_v11  ;;  %v5217_v60 = vpack.c.bf16 %v4751_v62, %v4749_v32  ;;  %v4681_v15 = vcvt.s32.f32 %v4169_v28  ;;  %v4683_v4 = vcvt.s32.f32 %v4171_v9  ;;  %v905_v9 = vld [vmem:[%s10758_s27 + $0x90] sm:$0xff] }
 0x5c2   : > { %5444 = vmatpush.bf16.msra.mxu1 %v5201_v6  ;;  %v4233_v40 = vunpack.c.2.s8 %v11662_v45  ;;  %v5233_v1 = vpack.c.bf16 %v4783_v0, %v4781_v47  ;;  %v4713_v41 = vcvt.s32.f32 %v4201_v33  ;;  %v4235_v27 = vunpack.c.3.s8 %v11662_v45 }
 0x5c3   : > { %v4715_v50 = vcvt.s32.f32 %v4203_v14  ;;  %5458 = vmatpush.bf16.msra.mxu2 %v5217_v60  ;;  %v5183_v46 = vpack.c.bf16 %v4683_v4, %v4681_v15  ;;  %v4265_v2 = vunpack.c.2.s8 %v915_v39  ;;  %v4267_v63 = vunpack.c.3.s8 %v915_v39 }
 0x5c4   : > { %v4745_v29 = vcvt.s32.f32 %v4233_v40  ;;  %5472 = vmatpush.bf16.msra.mxu3 %v5233_v1  ;;  %v4747_v48 = vcvt.s32.f32 %v4235_v27  ;;  %v3713_v58 = vadd.f32 %v3712_v34, %v3698_v37  ;;  %v3977_v5 = vperm.slane %v11670_v56, 6  ;;  %v3726_v40 = vpop.f32.mrf.mxu2  ;;  %v3740_v37 = vpop.f32.mrf.mxu3 }
 0x5c5   : > { %v5199_v44 = vpack.c.bf16 %v4715_v50, %v4713_v41  ;;  %5431 = vmatpush.bf16.msra.mxu0 %v5183_v46  ;;  %v4777_v12 = vcvt.s32.f32 %v4265_v2  ;;  %v4779_v35 = vcvt.s32.f32 %v4267_v63  ;;  %v4043_v59 = vperm.slane %v11674_v21, 6  ;;  %v3700_v63 = vpop.f32.mrf.mxu0 }
 0x5c6   : > { %v4165_v42 = vunpack.c.0.s8 %v11657_v7  ;;  %v5215_v16 = vpack.c.bf16 %v4747_v48, %v4745_v29  ;;  %v4009_v61 = vmul.f32 %v3977_v5, %v3713_v58  ;;  %v4167_v8 = vunpack.c.1.s8 %v11657_v7 }
 0x5c7   : > { %5445 = vmatpush.bf16.msra.mxu1 %v5199_v44  ;;  %v4197_v30 = vunpack.c.0.s8 %v899_v11  ;;  %v5231_v52 = vpack.c.bf16 %v4779_v35, %v4777_v12  ;;  %v4199_v38 = vunpack.c.1.s8 %v899_v11  ;;  %v4229_v3 = vunpack.c.0.s8 %v11662_v45  ;;  %v3714_v44 = vpop.f32.mrf.mxu1 }
 0x5c8   : > { %v4677_v43 = vcvt.s32.f32 %v4165_v42  ;;  %5459 = vmatpush.bf16.msra.mxu2 %v5215_v16  ;;  %v11687_v13 = vadd.f32 %v4043_v59, %v4009_v61  ;;  %v4679_v18 = vcvt.s32.f32 %v4167_v8  ;;  %v4231_v23 = vunpack.c.1.s8 %v11662_v45  ;;  %v11696_v45 = vld [vmem:[%s10758_s27 + $0xd0] sm:$0xff] }
 0x5c9   : > { %v4709_v17 = vcvt.s32.f32 %v4197_v30  ;;  %5473 = vmatpush.bf16.msra.mxu3 %v5231_v52  ;;  %v4711_v7 = vcvt.s32.f32 %v4199_v38  ;;  %v4741_v26 = vcvt.s32.f32 %v4229_v3  ;;  %v4261_v32 = vunpack.c.0.s8 %v915_v39 }
 0x5ca   : > { %v4263_v11 = vunpack.c.1.s8 %v915_v39  ;;  %v4107_v55 = vmax.f32 %v11687_v13, 0.0  ;;  %v5181_v6 = vpack.c.bf16 %v4679_v18, %v4677_v43  ;;  %v4743_v62 = vcvt.s32.f32 %v4231_v23 }
 0x5cb   : > { %v4161_v28 = vunpack.c.2.s8 %v11683_v24  ;;  %v5197_v47 = vpack.c.bf16 %v4711_v7, %v4709_v17  ;;  %v4773_v0 = vcvt.s32.f32 %v4261_v32  ;;  %v4163_v14 = vunpack.c.3.s8 %v11683_v24 }
 0x5cc   : > { %v4775_v33 = vcvt.s32.f32 %v4263_v11  ;;  %5432 = vmatpush.bf16.msra.mxu0 %v5181_v6  ;;  %v5213_v60 = vpack.c.bf16 %v4743_v62, %v4741_v26  ;;  %v4193_v4 = vunpack.c.2.s8 %v897_v51  ;;  %v4195_v39 = vunpack.c.3.s8 %v897_v51 }
 0x5cd   : > { %v4673_v15 = vcvt.s32.f32 %v4161_v28  ;;  %5446 = vmatpush.bf16.msra.mxu1 %v5197_v47  ;;  %v4675_v1 = vcvt.s32.f32 %v4163_v14  ;;  %v4225_v41 = vunpack.c.2.s8 %v905_v9  ;;  %v4227_v50 = vunpack.c.3.s8 %v905_v9 }
 0x5ce   : > { %v5229_v34 = vpack.c.bf16 %v4775_v33, %v4773_v0  ;;  %5460 = vmatpush.bf16.msra.mxu2 %v5213_v60  ;;  %v4705_v27 = vcvt.s32.f32 %v4193_v4  ;;  %v4707_v46 = vcvt.s32.f32 %v4195_v39  ;;  %v4257_v29 = vunpack.c.2.s8 %v11696_v45  ;;  %v887_v0 = vld [vmem:[%s10758_s27] sm:$0xff] }
 0x5cf   : > { %v4259_v2 = vunpack.c.3.s8 %v11696_v45  ;;  %v5179_v48 = vpack.c.bf16 %v4675_v1, %v4673_v15  ;;  %v4737_v58 = vcvt.s32.f32 %v4225_v41  ;;  %v4739_v12 = vcvt.s32.f32 %v4227_v50 }
 0x5d0   : > { %5474 = vmatpush.bf16.msra.mxu3 %v5229_v34  ;;  %v3741_v35 = vadd.f32 %v3740_v37, %v3726_v40  ;;  %v5195_v42 = vpack.c.bf16 %v4707_v46, %v4705_v27  ;;  %v4769_v16 = vcvt.s32.f32 %v4257_v29  ;;  %v3978_v8 = vperm.slane %v11670_v56, 7  ;;  %v903_v40 = vld [vmem:[%s10758_s27 + $0x80] sm:$0xff] }
 0x5d1   : > { %v4771_v61 = vcvt.s32.f32 %v4259_v2  ;;  %5433 = vmatpush.bf16.msra.mxu0 %v5179_v48  ;;  %v5211_v30 = vpack.c.bf16 %v4739_v12, %v4737_v58  ;;  %v4044_v52 = vperm.slane %v11674_v21, 7  ;;  %v3715_v43 = vadd.f32 %v3714_v44, %v3700_v63  ;;  %v911_v46 = vld [vmem:[%s10758_s27 + $0xc0] sm:$0xff]  ;;  %v3742_v48 = vpop.f32.mrf.mxu3 }
 0x5d2   : > { %v4157_v38 = vunpack.c.0.s8 %v11683_v24  ;;  %5447 = vmatpush.bf16.msra.mxu1 %v5195_v42  ;;  %v4010_v18 = vmul.f32 %v3978_v8, %v3741_v35  ;;  %v4159_v17 = vunpack.c.1.s8 %v11683_v24  ;;  %v4189_v23 = vunpack.c.0.s8 %v897_v51 }
 0x5d3   : > { %v5227_v3 = vpack.c.bf16 %v4771_v61, %v4769_v16  ;;  %5461 = vmatpush.bf16.msra.mxu2 %v5211_v30  ;;  %v4025_v7 = vmul.f32 %v3977_v5, %v3715_v43  ;;  %v4191_v32 = vunpack.c.1.s8 %v897_v51  ;;  %v4221_v11 = vunpack.c.0.s8 %v905_v9  ;;  %v895_v51 = vld [vmem:[%s10758_s27 + $0x40] sm:$0xff] }
 0x5d4   : > { %v4669_v26 = vcvt.s32.f32 %v4157_v38  ;;  %v11710_v6 = vadd.f32 %v4044_v52, %v4010_v18  ;;  %v4671_v62 = vcvt.s32.f32 %v4159_v17  ;;  %v4701_v28 = vcvt.s32.f32 %v4189_v23 }
 0x5d5   : > { %5475 = vmatpush.bf16.msra.mxu3 %v5227_v3  ;;  %v4223_v47 = vunpack.c.1.s8 %v905_v9  ;;  %v4091_v24 = vadd.f32 %v4043_v59, %v4025_v7  ;;  %v4703_v33 = vcvt.s32.f32 %v4191_v32  ;;  %v4733_v14 = vcvt.s32.f32 %v4221_v11 }
 0x5d6   : > { %v4253_v5 = vunpack.c.0.s8 %v11696_v45  ;;  %v4108_v60 = vmax.f32 %v11710_v6, 0.0  ;;  %v5177_v15 = vpack.c.bf16 %v4671_v62, %v4669_v26  ;;  %v4255_v39 = vunpack.c.1.s8 %v11696_v45  ;;  %v3728_v45 = vpop.f32.mrf.mxu2 }
 0x5d7   : > { %v4735_v4 = vcvt.s32.f32 %v4223_v47  ;;  %v4123_v37 = vmax.f32 %v4091_v24, 0.0  ;;  %v5193_v34 = vpack.c.bf16 %v4703_v33, %v4701_v28  ;;  %v4153_v1 = vunpack.c.2.s8 %v887_v0 }
 0x5d8   : > { %v4765_v9 = vcvt.s32.f32 %v4253_v5  ;;  %5434 = vmatpush.bf16.msra.mxu0 %v5177_v15  ;;  %v4767_v59 = vcvt.s32.f32 %v4255_v39  ;;  %v4155_v50 = vunpack.c.3.s8 %v887_v0  ;;  %v4185_v27 = vunpack.c.2.s8 %v895_v51  ;;  %v933_v39 = vld [vmem:[%s10758_s27 + $0x170] sm:$0xff] }
 0x5d9   : > { %v5209_v41 = vpack.c.bf16 %v4735_v4, %v4733_v14  ;;  %v11723_v29 = vpack.c.bf16 %v4123_v37, %v4107_v55  ;;  %5448 = vmatpush.bf16.msra.mxu1 %v5193_v34  ;;  %v4665_v2 = vcvt.s32.f32 %v4153_v1  ;;  %v4187_v63 = vunpack.c.3.s8 %v895_v51  ;;  %v925_v14 = vld [vmem:[%s10758_s27 + $0x130] sm:$0xff] }
 0x5da   : > { %v4217_v44 = vunpack.c.2.s8 %v903_v40  ;;  %v5225_v58 = vpack.c.bf16 %v4767_v59, %v4765_v9  ;;  %v4667_v12 = vcvt.s32.f32 %v4155_v50  ;;  %v4697_v35 = vcvt.s32.f32 %v4185_v27  ;;  %v941_v59 = vld [vmem:[%s10758_s27 + $0x1b0] sm:$0xff] }
 0x5db   : > { %5462 = vmatpush.bf16.msra.mxu2 %v5209_v41  ;;  %v4219_v42 = vunpack.c.3.s8 %v903_v40  ;;  %v4699_v16 = vcvt.s32.f32 %v4187_v63  ;;  %v4249_v30 = vunpack.c.2.s8 %v911_v46  ;;  %v4251_v43 = vunpack.c.3.s8 %v911_v46 }
 0x5dc   : > { %v4729_v61 = vcvt.s32.f32 %v4217_v44  ;;  %5476 = vmatpush.bf16.msra.mxu3 %v5225_v58  ;;  %v5175_v38 = vpack.c.bf16 %v4667_v12, %v4665_v2  ;;  %v3743_v55 = vadd.f32 %v3742_v48, %v3728_v45  ;;  %v4149_v3 = vunpack.c.0.s8 %v887_v0  ;;  %v949_v2 = vld [vmem:[%s10758_s27 + $0x1f0] sm:$0xff] }
 0x5dd   : > { %v4731_v13 = vcvt.s32.f32 %v4219_v42  ;;  %v5191_v18 = vpack.c.bf16 %v4699_v16, %v4697_v35  ;;  %v4761_v17 = vcvt.s32.f32 %v4249_v30  ;;  %v4763_v23 = vcvt.s32.f32 %v4251_v43 }
 0x5de   : > { %v4151_v7 = vunpack.c.1.s8 %v887_v0  ;;  %5435 = vmatpush.bf16.msra.mxu0 %v5175_v38  ;;  %v4026_v32 = vmul.f32 %v3978_v8, %v3743_v55  ;;  %v4661_v11 = vcvt.s32.f32 %v4149_v3  ;;  %v4181_v62 = vunpack.c.0.s8 %v895_v51 }
 0x5df   : > { %v5207_v26 = vpack.c.bf16 %v4731_v13, %v4729_v61  ;;  %5449 = vmatpush.bf16.msra.mxu1 %v5191_v18  ;;  %v5223_v28 = vpack.c.bf16 %v4763_v23, %v4761_v17  ;;  %v4183_v24 = vunpack.c.1.s8 %v895_v51  ;;  %v4213_v33 = vunpack.c.0.s8 %v903_v40 }
 0x5e0   : > { %v4663_v47 = vcvt.s32.f32 %v4151_v7  ;;  %v4092_v5 = vadd.f32 %v4044_v52, %v4026_v32  ;;  %v4693_v0 = vcvt.s32.f32 %v4181_v62  ;;  %v4215_v15 = vunpack.c.1.s8 %v903_v40 }
 0x5e1   : > { %5463 = vmatpush.bf16.msra.mxu2 %v5207_v26  ;;  %v4245_v4 = vunpack.c.0.s8 %v911_v46  ;;  %5477 = vmatpush.bf16.msra.mxu3 %v5223_v28  ;;  %v4695_v8 = vcvt.s32.f32 %v4183_v24  ;;  %v4725_v37 = vcvt.s32.f32 %v4213_v33  ;;  %v4247_v34 = vunpack.c.1.s8 %v911_v46  ;;  %v11741_v26 = vld [vmem:[%s10758_s27 + $0x120] sm:$0xff] }
 0x5e2   : > { %v5173_v56 = vpack.c.bf16 %v4663_v47, %v4661_v11  ;;  %v4124_v9 = vmax.f32 %v4092_v5, 0.0  ;;  %v4727_v1 = vcvt.s32.f32 %v4215_v15  ;;  %v4305_v41 = vunpack.c.2.s8 %v925_v14  ;;  %v11745_v47 = vld [vmem:[%s10758_s27 + $0x160] sm:$0xff] }
 0x5e3   : > { %v4757_v51 = vcvt.s32.f32 %v4245_v4  ;;  %v5189_v50 = vpack.c.bf16 %v4695_v8, %v4693_v0  ;;  %v4759_v27 = vcvt.s32.f32 %v4247_v34  ;;  %v4307_v21 = vunpack.c.3.s8 %v925_v14 }
 0x5e4   : > { %5436 = vmatpush.bf16.msra.mxu0 %v5173_v56  ;;  %v4337_v52 = vunpack.c.2.s8 %v933_v39  ;;  %v11735_v40 = vpack.c.bf16 %v4124_v9, %v4108_v60  ;;  %v5205_v63 = vpack.c.bf16 %v4727_v1, %v4725_v37  ;;  %v4817_v44 = vcvt.s32.f32 %v4305_v41  ;;  %v939_v56 = vld [vmem:[%s10758_s27 + $0x1a0] sm:$0xff] }
 0x5e5   : > { %v4339_v45 = vunpack.c.3.s8 %v933_v39  ;;  %5450 = vmatpush.bf16.msra.mxu1 %v5189_v50  ;;  %v5221_v46 = vpack.c.bf16 %v4759_v27, %v4757_v51  ;;  %v4819_v48 = vcvt.s32.f32 %v4307_v21  ;;  %v4369_v12 = vunpack.c.2.s8 %v941_v59  ;;  %v947_v1 = vld [vmem:[%s10758_s27 + $0x1e0] sm:$0xff]  ;;  %v3754_v27 = vpop.f32.mrf.mxu0  ;;  %v3768_v21 = vpop.f32.mrf.mxu1 }
 0x5e6   : > { %v4849_v58 = vcvt.s32.f32 %v4337_v52  ;;  %5464 = vmatpush.bf16.msra.mxu2 %v5205_v63  ;;  %v4371_v42 = vunpack.c.3.s8 %v941_v59  ;;  %v4401_v16 = vunpack.c.2.s8 %v949_v2  ;;  %v4403_v61 = vunpack.c.3.s8 %v949_v2 }
 0x5e7   : > { %v4851_v35 = vcvt.s32.f32 %v4339_v45  ;;  %5437 = vmatmul.bf16.vlgmr.msra.gmra.mxu0 %v11481_v10  ;;  %5478 = vmatpush.bf16.msra.mxu3 %v5221_v46  ;;  %v5251_v6 = vpack.c.bf16 %v4819_v48, %v4817_v44  ;;  %v4881_v60 = vcvt.s32.f32 %v4369_v12  ;;  %v4301_v30 = vunpack.c.0.s8 %v925_v14  ;;  %v11754_v45 = vld [vmem:[%s11429_s12 + $0x11] ss:$2 sm:$0xff] }
 0x5e8   : > { %v4303_v43 = vunpack.c.1.s8 %v925_v14  ;;  %v4883_v13 = vcvt.s32.f32 %v4371_v42  ;;  %v4913_v55 = vcvt.s32.f32 %v4401_v16  ;;  %v4915_v3 = vcvt.s32.f32 %v4403_v61  ;;  %5451 = vmatmul.bf16.vlgmr.msra.gmra.mxu1 %v11496_v31 }
 0x5e9   : > { %v5267_v38 = vpack.c.bf16 %v4851_v35, %v4849_v58  ;;  %5485 = vmatpush.bf16.msrb.mxu0 %v5251_v6  ;;  %5465 = vmatmul.bf16.vlgmr.msra.gmra.mxu2 %v11572_v25  ;;  %v4813_v18 = vcvt.s32.f32 %v4301_v30  ;;  %v4333_v23 = vunpack.c.0.s8 %v933_v39  ;;  %v4335_v7 = vunpack.c.1.s8 %v933_v39  ;;  %v11757_v35 = vld [vmem:[%s11429_s12 + $0x10] ss:$2 sm:$0xff] }
 0x5ea   : > { %v4815_v17 = vcvt.s32.f32 %v4303_v43  ;;  %v5283_v32 = vpack.c.bf16 %v4883_v13, %v4881_v60  ;;  %v5299_v11 = vpack.c.bf16 %v4915_v3, %v4913_v55  ;;  %5479 = vmatmul.bf16.vlgmr.msra.gmra.mxu3 %v11607_v22  ;;  %v4365_v62 = vunpack.c.0.s8 %v941_v59 }
 0x5eb   : > { %5499 = vmatpush.bf16.msrb.mxu1 %v5267_v38  ;;  %v4367_v28 = vunpack.c.1.s8 %v941_v59  ;;  %v4845_v33 = vcvt.s32.f32 %v4333_v23  ;;  %v4847_v14 = vcvt.s32.f32 %v4335_v7  ;;  %v4397_v5 = vunpack.c.0.s8 %v949_v2 }
 0x5ec   : > { %v5249_v24 = vpack.c.bf16 %v4815_v17, %v4813_v18  ;;  %5513 = vmatpush.bf16.msrb.mxu2 %v5283_v32  ;;  %5527 = vmatpush.bf16.msrb.mxu3 %v5299_v11  ;;  %v4877_v0 = vcvt.s32.f32 %v4365_v62  ;;  %v4399_v4 = vunpack.c.1.s8 %v949_v2  ;;  %v4297_v39 = vunpack.c.2.s8 %v11741_v26 }
 0x5ed   : > { %v4879_v15 = vcvt.s32.f32 %v4367_v28  ;;  %v5265_v8 = vpack.c.bf16 %v4847_v14, %v4845_v33  ;;  %v4909_v37 = vcvt.s32.f32 %v4397_v5  ;;  %v4299_v34 = vunpack.c.3.s8 %v11741_v26  ;;  %v11768_v33 = vld [vmem:[%s10758_s27 + $0x110] sm:$0xff] }
 0x5ee   : > { %5486 = vmatpush.bf16.msrb.mxu0 %v5249_v24  ;;  %v4329_v9 = vunpack.c.2.s8 %v11745_v47  ;;  %v4911_v41 = vcvt.s32.f32 %v4399_v4  ;;  %v4809_v59 = vcvt.s32.f32 %v4297_v39  ;;  %v4331_v50 = vunpack.c.3.s8 %v11745_v47 }
 0x5ef   : > { %v5281_v51 = vpack.c.bf16 %v4879_v15, %v4877_v0  ;;  %5500 = vmatpush.bf16.msrb.mxu1 %v5265_v8  ;;  %v4811_v52 = vcvt.s32.f32 %v4299_v34  ;;  %v4361_v63 = vunpack.c.2.s8 %v939_v56  ;;  %v4363_v44 = vunpack.c.3.s8 %v939_v56  ;;  %v929_v15 = vld [vmem:[%s10758_s27 + $0x150] sm:$0xff] }
 0x5f0   : > { %v4841_v2 = vcvt.s32.f32 %v4329_v9  ;;  %v5297_v46 = vpack.c.bf16 %v4911_v41, %v4909_v37  ;;  %v4843_v48 = vcvt.s32.f32 %v4331_v50  ;;  %v4393_v58 = vunpack.c.2.s8 %v947_v1  ;;  %v11776_v37 = vld [vmem:[%s10758_s27 + $0x190] sm:$0xff] }
 0x5f1   : > { %5514 = vmatpush.bf16.msrb.mxu2 %v5281_v51  ;;  %v4395_v12 = vunpack.c.3.s8 %v947_v1  ;;  %v5247_v42 = vpack.c.bf16 %v4811_v52, %v4809_v59  ;;  %v4873_v16 = vcvt.s32.f32 %v4361_v63  ;;  %v4875_v61 = vcvt.s32.f32 %v4363_v44  ;;  %v11781_v41 = vld [vmem:[%s10758_s27 + $0x1d0] sm:$0xff]  ;;  %v3782_v44 = vpop.f32.mrf.mxu2 }
 0x5f2   : > { %v3769_v6 = vadd.f32 %v3768_v21, %v3754_v27  ;;  %5528 = vmatpush.bf16.msrb.mxu3 %v5297_v46  ;;  %v5263_v60 = vpack.c.bf16 %v4843_v48, %v4841_v2  ;;  %v4905_v30 = vcvt.s32.f32 %v4393_v58  ;;  %v3979_v38 = vperm.slane %v11754_v45, 0  ;;  %v3796_v46 = vpop.f32.mrf.mxu3 }
 0x5f3   : > { %v4907_v43 = vcvt.s32.f32 %v4395_v12  ;;  %5487 = vmatpush.bf16.msrb.mxu0 %v5247_v42  ;;  %v5279_v13 = vpack.c.bf16 %v4875_v61, %v4873_v16  ;;  %v4045_v55 = vperm.slane %v11757_v35, 0  ;;  %v4293_v3 = vunpack.c.0.s8 %v11741_v26 }
 0x5f4   : > { %v4295_v18 = vunpack.c.1.s8 %v11741_v26  ;;  %5501 = vmatpush.bf16.msrb.mxu1 %v5263_v60  ;;  %v4011_v23 = vmul.f32 %v3979_v38, %v3769_v6  ;;  %v4325_v7 = vunpack.c.0.s8 %v11745_v47  ;;  %v4327_v32 = vunpack.c.1.s8 %v11745_v47 }
 0x5f5   : > { %v5295_v17 = vpack.c.bf16 %v4907_v43, %v4905_v30  ;;  %5515 = vmatpush.bf16.msrb.mxu2 %v5279_v13  ;;  %v4805_v11 = vcvt.s32.f32 %v4293_v3  ;;  %v4357_v28 = vunpack.c.0.s8 %v939_v56  ;;  %v4359_v24 = vunpack.c.1.s8 %v939_v56  ;;  %v3756_v30 = vpop.f32.mrf.mxu0  ;;  %v3770_v43 = vpop.f32.mrf.mxu1 }
 0x5f6   : > { %v4807_v62 = vcvt.s32.f32 %v4295_v18  ;;  %v11772_v26 = vadd.f32 %v4045_v55, %v4011_v23  ;;  %v4837_v14 = vcvt.s32.f32 %v4325_v7  ;;  %v4839_v5 = vcvt.s32.f32 %v4327_v32 }
 0x5f7   : > { %5529 = vmatpush.bf16.msrb.mxu3 %v5295_v17  ;;  %v4389_v0 = vunpack.c.0.s8 %v947_v1  ;;  %v4869_v47 = vcvt.s32.f32 %v4357_v28  ;;  %v4871_v39 = vcvt.s32.f32 %v4359_v24  ;;  %v4391_v8 = vunpack.c.1.s8 %v947_v1 }
 0x5f8   : > { %v5245_v4 = vpack.c.bf16 %v4807_v62, %v4805_v11  ;;  %v4109_v56 = vmax.f32 %v11772_v26, 0.0  ;;  %v5261_v34 = vpack.c.bf16 %v4839_v5, %v4837_v14  ;;  %v4289_v51 = vunpack.c.2.s8 %v11768_v33 }
 0x5f9   : > { %v4901_v9 = vcvt.s32.f32 %v4389_v0  ;;  %v5277_v59 = vpack.c.bf16 %v4871_v39, %v4869_v47  ;;  %v4903_v50 = vcvt.s32.f32 %v4391_v8  ;;  %v4291_v27 = vunpack.c.3.s8 %v11768_v33 }
 0x5fa   : > { %5488 = vmatpush.bf16.msrb.mxu0 %v5245_v4  ;;  %v4321_v21 = vunpack.c.2.s8 %v929_v15  ;;  %5502 = vmatpush.bf16.msrb.mxu1 %v5261_v34  ;;  %v4801_v52 = vcvt.s32.f32 %v4289_v51  ;;  %v4323_v2 = vunpack.c.3.s8 %v929_v15  ;;  %v4353_v1 = vunpack.c.2.s8 %v11776_v37  ;;  %v919_v51 = vld [vmem:[%s10758_s27 + $0x100] sm:$0xff] }
 0x5fb   : > { %v4355_v63 = vunpack.c.3.s8 %v11776_v37  ;;  %5516 = vmatpush.bf16.msrb.mxu2 %v5277_v59  ;;  %v5293_v48 = vpack.c.bf16 %v4903_v50, %v4901_v9  ;;  %v4803_v58 = vcvt.s32.f32 %v4291_v27  ;;  %v4385_v42 = vunpack.c.2.s8 %v11781_v41 }
 0x5fc   : > { %v4833_v12 = vcvt.s32.f32 %v4321_v21  ;;  %v4835_v16 = vcvt.s32.f32 %v4323_v2  ;;  %v4865_v61 = vcvt.s32.f32 %v4353_v1  ;;  %v4387_v60 = vunpack.c.3.s8 %v11781_v41 }
 0x5fd   : > { %v4867_v6 = vcvt.s32.f32 %v4355_v63  ;;  %5530 = vmatpush.bf16.msrb.mxu3 %v5293_v48  ;;  %v5243_v13 = vpack.c.bf16 %v4803_v58, %v4801_v52  ;;  %v4897_v3 = vcvt.s32.f32 %v4385_v42  ;;  %v3797_v18 = vadd.f32 %v3796_v46, %v3782_v44  ;;  %v935_v48 = vld [vmem:[%s10758_s27 + $0x180] sm:$0xff] }
 0x5fe   : > { %v3980_v17 = vperm.slane %v11754_v45, 1  ;;  %v5259_v23 = vpack.c.bf16 %v4835_v16, %v4833_v12  ;;  %v4899_v32 = vcvt.s32.f32 %v4387_v60  ;;  %v4046_v11 = vperm.slane %v11757_v35, 1  ;;  %v943_v16 = vld [vmem:[%s10758_s27 + $0x1c0] sm:$0xff] }
 0x5ff   : > { %v5275_v7 = vpack.c.bf16 %v4867_v6, %v4865_v61  ;;  %5489 = vmatpush.bf16.msrb.mxu0 %v5243_v13  ;;  %v3771_v28 = vadd.f32 %v3770_v43, %v3756_v30  ;;  %v4285_v24 = vunpack.c.0.s8 %v11768_v33  ;;  %v4287_v14 = vunpack.c.1.s8 %v11768_v33  ;;  %v3784_v30 = vpop.f32.mrf.mxu2  ;;  %v3798_v43 = vpop.f32.mrf.mxu3 }
 0x600   : > { %v4012_v62 = vmul.f32 %v3980_v17, %v3797_v18  ;;  %5503 = vmatpush.bf16.msrb.mxu1 %v5259_v23  ;;  %v5291_v5 = vpack.c.bf16 %v4899_v32, %v4897_v3  ;;  %v4317_v0 = vunpack.c.0.s8 %v929_v15  ;;  %v4319_v4 = vunpack.c.1.s8 %v929_v15  ;;  %v927_v15 = vld [vmem:[%s10758_s27 + $0x140] sm:$0xff] }
 0x601   : > { %5517 = vmatpush.bf16.msrb.mxu2 %v5275_v7  ;;  %v4349_v47 = vunpack.c.0.s8 %v11776_v37  ;;  %v4027_v8 = vmul.f32 %v3979_v38, %v3771_v28  ;;  %v4797_v34 = vcvt.s32.f32 %v4285_v24  ;;  %v4799_v9 = vcvt.s32.f32 %v4287_v14 }
 0x602   : > { %v11797_v39 = vadd.f32 %v4046_v11, %v4012_v62  ;;  %5531 = vmatpush.bf16.msrb.mxu3 %v5291_v5  ;;  %v4829_v33 = vcvt.s32.f32 %v4317_v0  ;;  %v4831_v59 = vcvt.s32.f32 %v4319_v4  ;;  %v4351_v50 = vunpack.c.1.s8 %v11776_v37 }
 0x603   : > { %v4861_v27 = vcvt.s32.f32 %v4349_v47  ;;  %v4093_v52 = vadd.f32 %v4045_v55, %v4027_v8  ;;  %v5241_v2 = vpack.c.bf16 %v4799_v9, %v4797_v34  ;;  %v4381_v38 = vunpack.c.0.s8 %v11781_v41 }
 0x604   : > { %v4110_v21 = vmax.f32 %v11797_v39, 0.0  ;;  %v5257_v1 = vpack.c.bf16 %v4831_v59, %v4829_v33  ;;  %v4863_v63 = vcvt.s32.f32 %v4351_v50  ;;  %v4383_v44 = vunpack.c.1.s8 %v11781_v41 }
 0x605   : > { %v4281_v46 = vunpack.c.2.s8 %v919_v51  ;;  %v4125_v58 = vmax.f32 %v4093_v52, 0.0  ;;  %5490 = vmatpush.bf16.msrb.mxu0 %v5241_v2  ;;  %v4893_v37 = vcvt.s32.f32 %v4381_v38  ;;  %v4283_v12 = vunpack.c.3.s8 %v919_v51  ;;  %v957_v52 = vld [vmem:[%s10758_s27 + $0x230] sm:$0xff] }
 0x606   : > { %v4313_v42 = vunpack.c.2.s8 %v927_v15  ;;  %5504 = vmatpush.bf16.msrb.mxu1 %v5257_v1  ;;  %v5273_v61 = vpack.c.bf16 %v4863_v63, %v4861_v27  ;;  %v4895_v6 = vcvt.s32.f32 %v4383_v44  ;;  %v4315_v55 = vunpack.c.3.s8 %v927_v15 }
 0x607   : > { %v4793_v60 = vcvt.s32.f32 %v4281_v46  ;;  %v11813_v13 = vpack.c.bf16 %v4125_v58, %v4109_v56  ;;  %v4795_v41 = vcvt.s32.f32 %v4283_v12  ;;  %v4345_v18 = vunpack.c.2.s8 %v935_v48  ;;  %v965_v58 = vld [vmem:[%s10758_s27 + $0x270] sm:$0xff] }
 0x608   : > { %v4825_v3 = vcvt.s32.f32 %v4313_v42  ;;  %5518 = vmatpush.bf16.msrb.mxu2 %v5273_v61  ;;  %v5289_v23 = vpack.c.bf16 %v4895_v6, %v4893_v37  ;;  %v4827_v7 = vcvt.s32.f32 %v4315_v55  ;;  %v4347_v32 = vunpack.c.3.s8 %v935_v48  ;;  %v973_v61 = vld [vmem:[%s10758_s27 + $0x2b0] sm:$0xff] }
 0x609   : > { %v4377_v62 = vunpack.c.2.s8 %v943_v16  ;;  %v5239_v28 = vpack.c.bf16 %v4795_v41, %v4793_v60  ;;  %v4857_v24 = vcvt.s32.f32 %v4345_v18  ;;  %v4379_v14 = vunpack.c.3.s8 %v943_v16 }
 0x60a   : > { %v3799_v5 = vadd.f32 %v3798_v43, %v3784_v30  ;;  %5532 = vmatpush.bf16.msrb.mxu3 %v5289_v23  ;;  %v5255_v0 = vpack.c.bf16 %v4827_v7, %v4825_v3  ;;  %v4859_v4 = vcvt.s32.f32 %v4347_v32  ;;  %v4277_v26 = vunpack.c.0.s8 %v919_v51 }
 0x60b   : > { %v4889_v47 = vcvt.s32.f32 %v4377_v62  ;;  %5491 = vmatpush.bf16.msrb.mxu0 %v5239_v28  ;;  %v4891_v56 = vcvt.s32.f32 %v4379_v14  ;;  %v4279_v34 = vunpack.c.1.s8 %v919_v51  ;;  %v4309_v9 = vunpack.c.0.s8 %v927_v15 }
 0x60c   : > { %v4028_v8 = vmul.f32 %v3980_v17, %v3799_v5  ;;  %5505 = vmatpush.bf16.msrb.mxu1 %v5255_v0  ;;  %v5271_v33 = vpack.c.bf16 %v4859_v4, %v4857_v24  ;;  %v4789_v59 = vcvt.s32.f32 %v4277_v26  ;;  %v4311_v50 = vunpack.c.1.s8 %v927_v15  ;;  %v981_v5 = vld [vmem:[%s10758_s27 + $0x2f0] sm:$0xff] }
 0x60d   : > { %v4341_v27 = vunpack.c.0.s8 %v935_v48  ;;  %v5287_v2 = vpack.c.bf16 %v4891_v56, %v4889_v47  ;;  %v4791_v1 = vcvt.s32.f32 %v4279_v34  ;;  %v4821_v63 = vcvt.s32.f32 %v4309_v9 }
 0x60e   : > { %v4094_v38 = vadd.f32 %v4046_v11, %v4028_v8  ;;  %5519 = vmatpush.bf16.msrb.mxu2 %v5271_v33  ;;  %v4823_v44 = vcvt.s32.f32 %v4311_v50  ;;  %v4343_v46 = vunpack.c.1.s8 %v935_v48  ;;  %v4373_v51 = vunpack.c.0.s8 %v943_v16  ;;  %v11830_v33 = vld [vmem:[%s10758_s27 + $0x220] sm:$0xff] }
 0x60f   : > { %v4853_v17 = vcvt.s32.f32 %v4341_v27  ;;  %5533 = vmatpush.bf16.msrb.mxu3 %v5287_v2  ;;  %v5237_v12 = vpack.c.bf16 %v4791_v1, %v4789_v59  ;;  %v4375_v42 = vunpack.c.1.s8 %v943_v16  ;;  %v4433_v15 = vunpack.c.2.s8 %v957_v52  ;;  %v963_v2 = vld [vmem:[%s10758_s27 + $0x260] sm:$0xff] }
 0x610   : > { %v4126_v37 = vmax.f32 %v4094_v38, 0.0  ;;  %v5253_v6 = vpack.c.bf16 %v4823_v44, %v4821_v63  ;;  %v4855_v60 = vcvt.s32.f32 %v4343_v46  ;;  %v4885_v55 = vcvt.s32.f32 %v4373_v51  ;;  %v971_v46 = vld [vmem:[%s10758_s27 + $0x2a0] sm:$0xff] }
 0x611   : > { %v4435_v30 = vunpack.c.3.s8 %v957_v52  ;;  %5492 = vmatpush.bf16.msrb.mxu0 %v5237_v12  ;;  %v4887_v43 = vcvt.s32.f32 %v4375_v42  ;;  %v4945_v48 = vcvt.s32.f32 %v4433_v15  ;;  %v4465_v41 = vunpack.c.2.s8 %v965_v58 }
 0x612   : > { %v11824_v11 = vpack.c.bf16 %v4126_v37, %v4110_v21  ;;  %5506 = vmatpush.bf16.msrb.mxu1 %v5253_v6  ;;  %v5269_v3 = vpack.c.bf16 %v4855_v60, %v4853_v17  ;;  %v4467_v23 = vunpack.c.3.s8 %v965_v58  ;;  %v4497_v16 = vunpack.c.2.s8 %v973_v61 }
 0x613   : > { %v4947_v18 = vcvt.s32.f32 %v4435_v30  ;;  %v5285_v7 = vpack.c.bf16 %v4887_v43, %v4885_v55  ;;  %v4977_v32 = vcvt.s32.f32 %v4465_v41  ;;  %v4499_v62 = vunpack.c.3.s8 %v973_v61  ;;  %v3810_v43 = vpop.f32.mrf.mxu0 }
 0x614   : > { %v4429_v28 = vunpack.c.0.s8 %v957_v52  ;;  %5520 = vmatpush.bf16.msrb.mxu2 %v5269_v3  ;;  %v4979_v14 = vcvt.s32.f32 %v4467_v23  ;;  %v5009_v39 = vcvt.s32.f32 %v4497_v16  ;;  %5493 = vmatmul.bf16.vlgmr.msrb.gmra.mxu0 %v11639_v36  ;;  %v4431_v21 = vunpack.c.1.s8 %v957_v52 }
 0x615   : > { %v5315_v24 = vpack.c.bf16 %v4947_v18, %v4945_v48  ;;  %5534 = vmatpush.bf16.msrb.mxu3 %v5285_v7  ;;  %v5011_v0 = vcvt.s32.f32 %v4499_v62  ;;  %5507 = vmatmul.bf16.vlgmr.msrb.gmra.mxu1 %v11651_v19  ;;  %v4461_v47 = vunpack.c.0.s8 %v965_v58  ;;  %v4463_v26 = vunpack.c.1.s8 %v965_v58  ;;  %v3824_v48 = vpop.f32.mrf.mxu1 }
 0x616   : > { %v4941_v4 = vcvt.s32.f32 %v4429_v28  ;;  %v5331_v56 = vpack.c.bf16 %v4979_v14, %v4977_v32  ;;  %v4943_v8 = vcvt.s32.f32 %v4431_v21  ;;  %v4493_v34 = vunpack.c.0.s8 %v973_v61 }
 0x617   : > { %5541 = vmatpush.bf16.msra.mxu0 %v5315_v24  ;;  %v4495_v9 = vunpack.c.1.s8 %v973_v61  ;;  %v5347_v59 = vpack.c.bf16 %v5011_v0, %v5009_v39  ;;  %5521 = vmatmul.bf16.vlgmr.msrb.gmra.mxu2 %v11723_v29  ;;  %v4973_v50 = vcvt.s32.f32 %v4461_v47  ;;  %v4975_v27 = vcvt.s32.f32 %v4463_v26 }
 0x618   : > { %v4529_v52 = vunpack.c.2.s8 %v981_v5  ;;  %5555 = vmatpush.bf16.msra.mxu1 %v5331_v56  ;;  %5535 = vmatmul.bf16.vlgmr.msrb.gmra.mxu3 %v11735_v40  ;;  %v5313_v38 = vpack.c.bf16 %v4943_v8, %v4941_v4  ;;  %v5005_v1 = vcvt.s32.f32 %v4493_v34  ;;  %v4531_v44 = vunpack.c.3.s8 %v981_v5  ;;  %v979_v34 = vld [vmem:[%s10758_s27 + $0x2e0] sm:$0xff] }
 0x619   : > { %v5007_v63 = vcvt.s32.f32 %v4495_v9  ;;  %5569 = vmatpush.bf16.msra.mxu2 %v5347_v59  ;;  %v5329_v17 = vpack.c.bf16 %v4975_v27, %v4973_v50  ;;  %v4425_v58 = vunpack.c.2.s8 %v11830_v33  ;;  %v4427_v37 = vunpack.c.3.s8 %v11830_v33 }
 0x61a   : > { %v5041_v51 = vcvt.s32.f32 %v4529_v52  ;;  %v5043_v42 = vcvt.s32.f32 %v4531_v44  ;;  %v4457_v15 = vunpack.c.2.s8 %v963_v2  ;;  %v4459_v61 = vunpack.c.3.s8 %v963_v2  ;;  %v953_v52 = vld [vmem:[%s10758_s27 + $0x210] sm:$0xff] }
 0x61b   : > { %5542 = vmatpush.bf16.msra.mxu0 %v5313_v38  ;;  %v5345_v12 = vpack.c.bf16 %v5007_v63, %v5005_v1  ;;  %v4937_v6 = vcvt.s32.f32 %v4425_v58  ;;  %v4939_v60 = vcvt.s32.f32 %v4427_v37  ;;  %v4489_v55 = vunpack.c.2.s8 %v971_v46  ;;  %v961_v58 = vld [vmem:[%s10758_s27 + $0x250] sm:$0xff] }
 0x61c   : > { %v4491_v30 = vunpack.c.3.s8 %v971_v46  ;;  %5556 = vmatpush.bf16.msra.mxu1 %v5329_v17  ;;  %v5363_v41 = vpack.c.bf16 %v5043_v42, %v5041_v51  ;;  %v4969_v3 = vcvt.s32.f32 %v4457_v15  ;;  %v4971_v18 = vcvt.s32.f32 %v4459_v61  ;;  %v11852_v37 = vld [vmem:[%s10758_s27 + $0x290] sm:$0xff]  ;;  %v3838_v61 = vpop.f32.mrf.mxu2 }
 0x61d   : > { %v4525_v23 = vunpack.c.0.s8 %v981_v5  ;;  %5570 = vmatpush.bf16.msra.mxu2 %v5345_v12  ;;  %v5311_v16 = vpack.c.bf16 %v4939_v60, %v4937_v6  ;;  %v5001_v7 = vcvt.s32.f32 %v4489_v55  ;;  %v4527_v62 = vunpack.c.1.s8 %v981_v5  ;;  %v3852_v6 = vpop.f32.mrf.mxu3 }
 0x61e   : > { %v5003_v32 = vcvt.s32.f32 %v4491_v30  ;;  %5583 = vmatpush.bf16.msra.mxu3 %v5363_v41  ;;  %v5327_v28 = vpack.c.bf16 %v4971_v18, %v4969_v3  ;;  %v3825_v14 = vadd.f32 %v3824_v48, %v3810_v43  ;;  %v3981_v39 = vperm.slane %v11754_v45, 2 }
 0x61f   : > { %v5037_v24 = vcvt.s32.f32 %v4525_v23  ;;  %5543 = vmatpush.bf16.msra.mxu0 %v5311_v16  ;;  %v5039_v0 = vcvt.s32.f32 %v4527_v62  ;;  %v4047_v4 = vperm.slane %v11757_v35, 2  ;;  %v4421_v47 = vunpack.c.0.s8 %v11830_v33  ;;  %v3812_v62 = vpop.f32.mrf.mxu0 }
 0x620   : > { %v5343_v21 = vpack.c.bf16 %v5003_v32, %v5001_v7  ;;  %5557 = vmatpush.bf16.msra.mxu1 %v5327_v28  ;;  %v4013_v26 = vmul.f32 %v3981_v39, %v3825_v14  ;;  %v4423_v5 = vunpack.c.1.s8 %v11830_v33  ;;  %v4453_v56 = vunpack.c.0.s8 %v963_v2  ;;  %v3826_v28 = vpop.f32.mrf.mxu1 }
 0x621   : > { %v4455_v8 = vunpack.c.1.s8 %v963_v2  ;;  %v5361_v9 = vpack.c.bf16 %v5039_v0, %v5037_v24  ;;  %v4933_v59 = vcvt.s32.f32 %v4421_v47  ;;  %v4485_v50 = vunpack.c.0.s8 %v971_v46 }
 0x622   : > { %5571 = vmatpush.bf16.msra.mxu2 %v5343_v21  ;;  %v4487_v27 = vunpack.c.1.s8 %v971_v46  ;;  %v11848_v38 = vadd.f32 %v4047_v4, %v4013_v26  ;;  %v4935_v1 = vcvt.s32.f32 %v4423_v5  ;;  %v4965_v63 = vcvt.s32.f32 %v4453_v56 }
 0x623   : > { %v4967_v44 = vcvt.s32.f32 %v4455_v8  ;;  %5584 = vmatpush.bf16.msra.mxu3 %v5361_v9  ;;  %v4997_v33 = vcvt.s32.f32 %v4485_v50  ;;  %v4521_v2 = vunpack.c.2.s8 %v979_v34  ;;  %v4523_v51 = vunpack.c.3.s8 %v979_v34 }
 0x624   : > { %v4999_v17 = vcvt.s32.f32 %v4487_v27  ;;  %v4111_v12 = vmax.f32 %v11848_v38, 0.0  ;;  %v5309_v42 = vpack.c.bf16 %v4935_v1, %v4933_v59  ;;  %v4417_v15 = vunpack.c.2.s8 %v953_v52 }
 0x625   : > { %v5325_v46 = vpack.c.bf16 %v4967_v44, %v4965_v63  ;;  %v5033_v55 = vcvt.s32.f32 %v4521_v2  ;;  %v5035_v30 = vcvt.s32.f32 %v4523_v51  ;;  %v4419_v43 = vunpack.c.3.s8 %v953_v52 }
 0x626   : > { %v5341_v60 = vpack.c.bf16 %v4999_v17, %v4997_v33  ;;  %5544 = vmatpush.bf16.msra.mxu0 %v5309_v42  ;;  %v4929_v48 = vcvt.s32.f32 %v4417_v15  ;;  %v4449_v41 = vunpack.c.2.s8 %v961_v58  ;;  %v4451_v3 = vunpack.c.3.s8 %v961_v58 }
 0x627   : > { %5558 = vmatpush.bf16.msra.mxu1 %v5325_v46  ;;  %v4481_v18 = vunpack.c.2.s8 %v11852_v37  ;;  %v5359_v23 = vpack.c.bf16 %v5035_v30, %v5033_v55  ;;  %v4931_v16 = vcvt.s32.f32 %v4419_v43  ;;  %v4483_v7 = vunpack.c.3.s8 %v11852_v37  ;;  %v11874_v43 = vld [vmem:[%s10758_s27 + $0x240] sm:$0xff] }
 0x628   : > { %5572 = vmatpush.bf16.msra.mxu2 %v5341_v60  ;;  %v3853_v32 = vadd.f32 %v3852_v6, %v3838_v61  ;;  %v4961_v24 = vcvt.s32.f32 %v4449_v41  ;;  %v4963_v14 = vcvt.s32.f32 %v4451_v3  ;;  %v3982_v0 = vperm.slane %v11754_v45, 3  ;;  %v977_v61 = vld [vmem:[%s10758_s27 + $0x2d0] sm:$0xff]  ;;  %v951_v6 = vld [vmem:[%s10758_s27 + $0x200] sm:$0xff] }
 0x629   : > { %v4993_v21 = vcvt.s32.f32 %v4481_v18  ;;  %5585 = vmatpush.bf16.msra.mxu3 %v5359_v23  ;;  %v5307_v47 = vpack.c.bf16 %v4931_v16, %v4929_v48  ;;  %v4995_v26 = vcvt.s32.f32 %v4483_v7  ;;  %v4048_v5 = vperm.slane %v11757_v35, 3 }
 0x62a   : > { %v4517_v56 = vunpack.c.0.s8 %v979_v34  ;;  %v5323_v8 = vpack.c.bf16 %v4963_v14, %v4961_v24  ;;  %v4014_v9 = vmul.f32 %v3982_v0, %v3853_v32  ;;  %v4519_v59 = vunpack.c.1.s8 %v979_v34  ;;  %v3840_v24 = vpop.f32.mrf.mxu2  ;;  %v3854_v14 = vpop.f32.mrf.mxu3 }
 0x62b   : > { %v3827_v50 = vadd.f32 %v3826_v28, %v3812_v62  ;;  %5545 = vmatpush.bf16.msra.mxu0 %v5307_v47  ;;  %v5339_v27 = vpack.c.bf16 %v4995_v26, %v4993_v21  ;;  %v4413_v63 = vunpack.c.0.s8 %v953_v52  ;;  %v4415_v44 = vunpack.c.1.s8 %v953_v52  ;;  %v967_v28 = vld [vmem:[%s10758_s27 + $0x280] sm:$0xff] }
 0x62c   : > { %v5029_v1 = vcvt.s32.f32 %v4517_v56  ;;  %5559 = vmatpush.bf16.msra.mxu1 %v5323_v8  ;;  %v11863_v33 = vadd.f32 %v4048_v5, %v4014_v9  ;;  %v5031_v17 = vcvt.s32.f32 %v4519_v59  ;;  %v4445_v51 = vunpack.c.0.s8 %v961_v58 }
 0x62d   : > { %v4029_v2 = vmul.f32 %v3981_v39, %v3827_v50  ;;  %5573 = vmatpush.bf16.msra.mxu2 %v5339_v27  ;;  %v4925_v34 = vcvt.s32.f32 %v4413_v63  ;;  %v4927_v42 = vcvt.s32.f32 %v4415_v44  ;;  %v4447_v46 = vunpack.c.1.s8 %v961_v58 }
 0x62e   : > { %v4477_v15 = vunpack.c.0.s8 %v11852_v37  ;;  %v4112_v52 = vmax.f32 %v11863_v33, 0.0  ;;  %v5357_v60 = vpack.c.bf16 %v5031_v17, %v5029_v1  ;;  %v4957_v30 = vcvt.s32.f32 %v4445_v51 }
 0x62f   : > { %v4095_v55 = vadd.f32 %v4047_v4, %v4029_v2  ;;  %v5305_v39 = vpack.c.bf16 %v4927_v42, %v4925_v34  ;;  %v4959_v48 = vcvt.s32.f32 %v4447_v46  ;;  %v4479_v41 = vunpack.c.1.s8 %v11852_v37 }
 0x630   : > { %v4989_v3 = vcvt.s32.f32 %v4477_v15  ;;  %5586 = vmatpush.bf16.msra.mxu3 %v5357_v60  ;;  %v4513_v18 = vunpack.c.2.s8 %v977_v61  ;;  %v4515_v23 = vunpack.c.3.s8 %v977_v61  ;;  %v4409_v16 = vunpack.c.2.s8 %v951_v6 }
 0x631   : > { %v4127_v58 = vmax.f32 %v4095_v55, 0.0  ;;  %5546 = vmatpush.bf16.msra.mxu0 %v5305_v39  ;;  %v5321_v7 = vpack.c.bf16 %v4959_v48, %v4957_v30  ;;  %v4991_v32 = vcvt.s32.f32 %v4479_v41  ;;  %v4411_v62 = vunpack.c.3.s8 %v951_v6  ;;  %v975_v30 = vld [vmem:[%s10758_s27 + $0x2c0] sm:$0xff] }
 0x632   : > { %v4441_v4 = vunpack.c.2.s8 %v11874_v43  ;;  %v5025_v37 = vcvt.s32.f32 %v4513_v18  ;;  %v5027_v47 = vcvt.s32.f32 %v4515_v23  ;;  %v4921_v26 = vcvt.s32.f32 %v4409_v16  ;;  %v989_v23 = vld [vmem:[%s10758_s27 + $0x330] sm:$0xff] }
 0x633   : > { %v11881_v21 = vpack.c.bf16 %v4127_v58, %v4111_v12  ;;  %5560 = vmatpush.bf16.msra.mxu1 %v5321_v7  ;;  %v5337_v56 = vpack.c.bf16 %v4991_v32, %v4989_v3  ;;  %v4923_v8 = vcvt.s32.f32 %v4411_v62  ;;  %v4443_v9 = vunpack.c.3.s8 %v11874_v43  ;;  %v997_v62 = vld [vmem:[%s10758_s27 + $0x370] sm:$0xff] }
 0x634   : > { %v4953_v59 = vcvt.s32.f32 %v4441_v4  ;;  %v5355_v50 = vpack.c.bf16 %v5027_v47, %v5025_v37  ;;  %v4473_v27 = vunpack.c.2.s8 %v967_v28  ;;  %v4475_v1 = vunpack.c.3.s8 %v967_v28  ;;  %v1005_v37 = vld [vmem:[%s10758_s27 + $0x3b0] sm:$0xff] }
 0x635   : > { %v3855_v63 = vadd.f32 %v3854_v14, %v3840_v24  ;;  %5574 = vmatpush.bf16.msra.mxu2 %v5337_v56  ;;  %v5303_v44 = vpack.c.bf16 %v4923_v8, %v4921_v26  ;;  %v4955_v17 = vcvt.s32.f32 %v4443_v9  ;;  %v4509_v38 = vunpack.c.0.s8 %v977_v61 }
 0x636   : > { %v4511_v12 = vunpack.c.1.s8 %v977_v61  ;;  %5587 = vmatpush.bf16.msra.mxu3 %v5355_v50  ;;  %v4985_v2 = vcvt.s32.f32 %v4473_v27  ;;  %v4987_v51 = vcvt.s32.f32 %v4475_v1  ;;  %v4405_v42 = vunpack.c.0.s8 %v951_v6 }
 0x637   : > { %v4030_v34 = vmul.f32 %v3982_v0, %v3855_v63  ;;  %5547 = vmatpush.bf16.msra.mxu0 %v5303_v44  ;;  %v5319_v46 = vpack.c.bf16 %v4955_v17, %v4953_v59  ;;  %v5021_v15 = vcvt.s32.f32 %v4509_v38  ;;  %v4407_v55 = vunpack.c.1.s8 %v951_v6 }
 0x638   : > { %v5023_v60 = vcvt.s32.f32 %v4511_v12  ;;  %v5335_v39 = vpack.c.bf16 %v4987_v51, %v4985_v2  ;;  %v4917_v61 = vcvt.s32.f32 %v4405_v42  ;;  %v4437_v41 = vunpack.c.0.s8 %v11874_v43 }
 0x639   : > { %v4096_v48 = vadd.f32 %v4048_v5, %v4030_v34  ;;  %5561 = vmatpush.bf16.msra.mxu1 %v5319_v46  ;;  %v4919_v0 = vcvt.s32.f32 %v4407_v55  ;;  %v4439_v58 = vunpack.c.1.s8 %v11874_v43  ;;  %v4469_v18 = vunpack.c.0.s8 %v967_v28 }
 0x63a   : > { %v5353_v3 = vpack.c.bf16 %v5023_v60, %v5021_v15  ;;  %5575 = vmatpush.bf16.msra.mxu2 %v5335_v39  ;;  %v4949_v6 = vcvt.s32.f32 %v4437_v41  ;;  %v4471_v7 = vunpack.c.1.s8 %v967_v28  ;;  %v4505_v32 = vunpack.c.2.s8 %v975_v30 }
 0x63b   : > { %v4128_v16 = vmax.f32 %v4096_v48, 0.0  ;;  %v5301_v4 = vpack.c.bf16 %v4919_v0, %v4917_v61  ;;  %v4951_v5 = vcvt.s32.f32 %v4439_v58  ;;  %v4981_v24 = vcvt.s32.f32 %v4469_v18  ;;  %v11901_v61 = vld [vmem:[%s10758_s27 + $0x3f0] sm:$0xff]  ;;  %v987_v58 = vld [vmem:[%s10758_s27 + $0x320] sm:$0xff] }
 0x63c   : > { %5588 = vmatpush.bf16.msra.mxu3 %v5353_v3  ;;  %v4507_v14 = vunpack.c.3.s8 %v975_v30  ;;  %v4983_v26 = vcvt.s32.f32 %v4471_v7  ;;  %v5017_v43 = vcvt.s32.f32 %v4505_v32  ;;  %v4561_v56 = vunpack.c.2.s8 %v989_v23  ;;  %v995_v7 = vld [vmem:[%s10758_s27 + $0x360] sm:$0xff] }
 0x63d   : > { %v11896_v47 = vpack.c.bf16 %v4128_v16, %v4112_v52  ;;  %5548 = vmatpush.bf16.msra.mxu0 %v5301_v4  ;;  %v5317_v8 = vpack.c.bf16 %v4951_v5, %v4949_v6  ;;  %v4563_v59 = vunpack.c.3.s8 %v989_v23  ;;  %v4593_v28 = vunpack.c.2.s8 %v997_v62 }
 0x63e   : > { %v5019_v9 = vcvt.s32.f32 %v4507_v14  ;;  %v5333_v50 = vpack.c.bf16 %v4983_v26, %v4981_v24  ;;  %v5073_v27 = vcvt.s32.f32 %v4561_v56  ;;  %v4595_v1 = vunpack.c.3.s8 %v997_v62  ;;  %v1003_v56 = vld [vmem:[%s10758_s27 + $0x3a0] sm:$0xff] }
 0x63f   : > { %v4625_v63 = vunpack.c.2.s8 %v1005_v37  ;;  %5562 = vmatpush.bf16.msra.mxu1 %v5317_v8  ;;  %v5075_v17 = vcvt.s32.f32 %v4563_v59  ;;  %v5105_v38 = vcvt.s32.f32 %v4593_v28  ;;  %v4627_v12 = vunpack.c.3.s8 %v1005_v37 }
 0x640   : > { %v5351_v44 = vpack.c.bf16 %v5019_v9, %v5017_v43  ;;  %5576 = vmatpush.bf16.msra.mxu2 %v5333_v50  ;;  %v5107_v33 = vcvt.s32.f32 %v4595_v1  ;;  %5549 = vmatmul.bf16.vlgmr.msra.gmra.mxu0 %v11813_v13  ;;  %v4501_v2 = vunpack.c.0.s8 %v975_v30  ;;  %v4503_v51 = vunpack.c.1.s8 %v975_v30  ;;  %v3880_v50 = vpop.f32.mrf.mxu1 }
 0x641   : > { %v5137_v52 = vcvt.s32.f32 %v4625_v63  ;;  %v5379_v34 = vpack.c.bf16 %v5075_v17, %v5073_v27  ;;  %v5139_v42 = vcvt.s32.f32 %v4627_v12  ;;  %v4557_v46 = vunpack.c.0.s8 %v989_v23 }
 0x642   : > { %5589 = vmatpush.bf16.msra.mxu3 %v5351_v44  ;;  %v4559_v15 = vunpack.c.1.s8 %v989_v23  ;;  %v5395_v60 = vpack.c.bf16 %v5107_v33, %v5105_v38  ;;  %5563 = vmatmul.bf16.vlgmr.msra.gmra.mxu1 %v11824_v11  ;;  %v5013_v55 = vcvt.s32.f32 %v4501_v2  ;;  %v5015_v39 = vcvt.s32.f32 %v4503_v51 }
 0x643   : > { %v4589_v48 = vunpack.c.0.s8 %v997_v62  ;;  %5597 = vmatpush.bf16.msrb.mxu0 %v5379_v34  ;;  %v5411_v41 = vpack.c.bf16 %v5139_v42, %v5137_v52  ;;  %5577 = vmatmul.bf16.vlgmr.msra.gmra.mxu2 %v11881_v21  ;;  %v5069_v30 = vcvt.s32.f32 %v4557_v46  ;;  %v4591_v0 = vunpack.c.1.s8 %v997_v62 }
 0x644   : > { %v5071_v3 = vcvt.s32.f32 %v4559_v15  ;;  %5611 = vmatpush.bf16.msrb.mxu1 %v5395_v60  ;;  %v5349_v18 = vpack.c.bf16 %v5015_v39, %v5013_v55  ;;  %v4621_v16 = vunpack.c.0.s8 %v1005_v37  ;;  %v4623_v6 = vunpack.c.1.s8 %v1005_v37  ;;  %v3866_v37 = vpop.f32.mrf.mxu0 }
 0x645   : > { %v5101_v23 = vcvt.s32.f32 %v4589_v48  ;;  %5625 = vmatpush.bf16.msrb.mxu2 %v5411_v41  ;;  %v5103_v4 = vcvt.s32.f32 %v4591_v0  ;;  %v4657_v5 = vunpack.c.2.s8 %v11901_v61  ;;  %v4659_v24 = vunpack.c.3.s8 %v11901_v61 }
 0x646   : > { %v5377_v32 = vpack.c.bf16 %v5071_v3, %v5069_v30  ;;  %5590 = vmatpush.bf16.msra.mxu3 %v5349_v18  ;;  %v5133_v14 = vcvt.s32.f32 %v4621_v16  ;;  %v5135_v26 = vcvt.s32.f32 %v4623_v6  ;;  %v4553_v43 = vunpack.c.2.s8 %v987_v58 }
 0x647   : > { %v4555_v62 = vunpack.c.3.s8 %v987_v58  ;;  %v5393_v8 = vpack.c.bf16 %v5103_v4, %v5101_v23  ;;  %v5169_v9 = vcvt.s32.f32 %v4657_v5  ;;  %v5171_v59 = vcvt.s32.f32 %v4659_v24  ;;  %v11917_v23 = vld [vmem:[%s10758_s27 + $0x3e0] sm:$0xff] }
 0x648   : > { %5598 = vmatpush.bf16.msrb.mxu0 %v5377_v32  ;;  %v4585_v28 = vunpack.c.2.s8 %v995_v7  ;;  %v5409_v27 = vpack.c.bf16 %v5135_v26, %v5133_v14  ;;  %v5065_v1 = vcvt.s32.f32 %v4553_v43  ;;  %v4587_v44 = vunpack.c.3.s8 %v995_v7  ;;  %v11924_v26 = vld [vmem:[%s10758_s27 + $0x310] sm:$0xff] }
 0x649   : > { %v5067_v63 = vcvt.s32.f32 %v4555_v62  ;;  %5612 = vmatpush.bf16.msrb.mxu1 %v5393_v8  ;;  %5591 = vmatmul.bf16.vlgmr.msra.gmra.mxu3 %v11896_v47  ;;  %v5427_v17 = vpack.c.bf16 %v5171_v59, %v5169_v9  ;;  %v4617_v12 = vunpack.c.2.s8 %v1003_v56  ;;  %v4619_v33 = vunpack.c.3.s8 %v1003_v56  ;;  %v11929_v9 = vld [vmem:[%s10758_s27 + $0x350] sm:$0xff] }
 0x64a   : > { %v5097_v38 = vcvt.s32.f32 %v4585_v28  ;;  %5626 = vmatpush.bf16.msrb.mxu2 %v5409_v27  ;;  %v5099_v2 = vcvt.s32.f32 %v4587_v44  ;;  %v3881_v51 = vadd.f32 %v3880_v50, %v3866_v37  ;;  %v3983_v34 = vperm.slane %v11754_v45, 4  ;;  %v3894_v50 = vpop.f32.mrf.mxu2  ;;  %v3908_v27 = vpop.f32.mrf.mxu3 }
 0x64b   : > { %v5375_v52 = vpack.c.bf16 %v5067_v63, %v5065_v1  ;;  %5639 = vmatpush.bf16.msrb.mxu3 %v5427_v17  ;;  %v5129_v42 = vcvt.s32.f32 %v4617_v12  ;;  %v5131_v46 = vcvt.s32.f32 %v4619_v33  ;;  %v4049_v15 = vperm.slane %v11757_v35, 4 }
 0x64c   : > { %v4653_v60 = vunpack.c.0.s8 %v11901_v61  ;;  %v5391_v55 = vpack.c.bf16 %v5099_v2, %v5097_v38  ;;  %v4015_v39 = vmul.f32 %v3983_v34, %v3881_v51  ;;  %v4655_v48 = vunpack.c.1.s8 %v11901_v61 }
 0x64d   : > { %5599 = vmatpush.bf16.msrb.mxu0 %v5375_v52  ;;  %v4549_v41 = vunpack.c.0.s8 %v987_v58  ;;  %v5407_v30 = vpack.c.bf16 %v5131_v46, %v5129_v42  ;;  %v4551_v0 = vunpack.c.1.s8 %v987_v58  ;;  %v4581_v18 = vunpack.c.0.s8 %v995_v7  ;;  %v1001_v52 = vld [vmem:[%s10758_s27 + $0x390] sm:$0xff] }
 0x64e   : > { %v5165_v3 = vcvt.s32.f32 %v4653_v60  ;;  %5613 = vmatpush.bf16.msrb.mxu1 %v5391_v55  ;;  %v11921_v16 = vadd.f32 %v4049_v15, %v4015_v39  ;;  %v5167_v6 = vcvt.s32.f32 %v4655_v48  ;;  %v4583_v4 = vunpack.c.1.s8 %v995_v7  ;;  %v11938_v46 = vld [vmem:[%s11429_s12 + $0x11] ss:$2 sm:$0xff]  ;;  %v3868_v55 = vpop.f32.mrf.mxu0  ;;  %v3882_v39 = vpop.f32.mrf.mxu1 }
 0x64f   : > { %v5061_v32 = vcvt.s32.f32 %v4549_v41  ;;  %5627 = vmatpush.bf16.msrb.mxu2 %v5407_v30  ;;  %v5063_v5 = vcvt.s32.f32 %v4551_v0  ;;  %v5093_v61 = vcvt.s32.f32 %v4581_v18  ;;  %v4613_v24 = vunpack.c.0.s8 %v1003_v56 }
 0x650   : > { %v4615_v14 = vunpack.c.1.s8 %v1003_v56  ;;  %v4113_v58 = vmax.f32 %v11921_v16, 0.0  ;;  %v5425_v43 = vpack.c.bf16 %v5167_v6, %v5165_v3  ;;  %v5095_v62 = vcvt.s32.f32 %v4583_v4  ;;  %v11942_v3 = vld [vmem:[%s11429_s12 + $0x10] ss:$2 sm:$0xff] }
 0x651   : > { %v4649_v8 = vunpack.c.2.s8 %v11917_v23  ;;  %v5373_v59 = vpack.c.bf16 %v5063_v5, %v5061_v32  ;;  %v5125_v28 = vcvt.s32.f32 %v4613_v24  ;;  %v4651_v7 = vunpack.c.3.s8 %v11917_v23 }
 0x652   : > { %v5127_v37 = vcvt.s32.f32 %v4615_v14  ;;  %5640 = vmatpush.bf16.msrb.mxu3 %v5425_v43  ;;  %v5389_v56 = vpack.c.bf16 %v5095_v62, %v5093_v61  ;;  %v4545_v63 = vunpack.c.2.s8 %v11924_v26  ;;  %v4547_v44 = vunpack.c.3.s8 %v11924_v26 }
 0x653   : > { %v5161_v1 = vcvt.s32.f32 %v4649_v8  ;;  %5600 = vmatpush.bf16.msrb.mxu0 %v5373_v59  ;;  %v5163_v38 = vcvt.s32.f32 %v4651_v7  ;;  %v4577_v12 = vunpack.c.2.s8 %v11929_v9  ;;  %v4579_v33 = vunpack.c.3.s8 %v11929_v9 }
 0x654   : > { %v5405_v17 = vpack.c.bf16 %v5127_v37, %v5125_v28  ;;  %5614 = vmatpush.bf16.msrb.mxu1 %v5389_v56  ;;  %v5057_v2 = vcvt.s32.f32 %v4545_v63  ;;  %v5059_v51 = vcvt.s32.f32 %v4547_v44  ;;  %v3909_v42 = vadd.f32 %v3908_v27, %v3894_v50  ;;  %v1009_v27 = vld [vmem:[%s10758_s27 + $0x3d0] sm:$0xff] }
 0x655   : > { %v3984_v60 = vperm.slane %v11938_v46, 5  ;;  %v5423_v48 = vpack.c.bf16 %v5163_v38, %v5161_v1  ;;  %v5089_v41 = vcvt.s32.f32 %v4577_v12  ;;  %v5091_v30 = vcvt.s32.f32 %v4579_v33 }
 0x656   : > { %5628 = vmatpush.bf16.msrb.mxu2 %v5405_v17  ;;  %v4050_v0 = vperm.slane %v11942_v3, 5  ;;  %v5371_v18 = vpack.c.bf16 %v5059_v51, %v5057_v2  ;;  %v4609_v32 = vunpack.c.2.s8 %v1001_v52  ;;  %v4611_v4 = vunpack.c.3.s8 %v1001_v52 }
 0x657   : > { %v4016_v6 = vmul.f32 %v3984_v60, %v3909_v42  ;;  %5641 = vmatpush.bf16.msrb.mxu3 %v5423_v48  ;;  %v5387_v5 = vpack.c.bf16 %v5091_v30, %v5089_v41  ;;  %v3883_v61 = vadd.f32 %v3882_v39, %v3868_v55  ;;  %v4645_v24 = vunpack.c.0.s8 %v11917_v23  ;;  %v991_v48 = vld [vmem:[%s10758_s27 + $0x340] sm:$0xff] }
 0x658   : > { %v4647_v14 = vunpack.c.1.s8 %v11917_v23  ;;  %5601 = vmatpush.bf16.msrb.mxu0 %v5371_v18  ;;  %v5121_v62 = vcvt.s32.f32 %v4609_v32  ;;  %v5123_v8 = vcvt.s32.f32 %v4611_v4  ;;  %v4541_v59 = vunpack.c.0.s8 %v11924_v26  ;;  %v3896_v18 = vpop.f32.mrf.mxu2 }
 0x659   : > { %v11951_v43 = vadd.f32 %v4050_v0, %v4016_v6  ;;  %5615 = vmatpush.bf16.msrb.mxu1 %v5387_v5  ;;  %v4031_v28 = vmul.f32 %v3983_v34, %v3883_v61  ;;  %v5157_v37 = vcvt.s32.f32 %v4645_v24  ;;  %v4543_v50 = vunpack.c.1.s8 %v11924_v26  ;;  %v983_v34 = vld [vmem:[%s10758_s27 + $0x300] sm:$0xff]  ;;  %v3910_v6 = vpop.f32.mrf.mxu3 }
 0x65a   : > { %v5159_v7 = vcvt.s32.f32 %v4647_v14  ;;  %v5403_v56 = vpack.c.bf16 %v5123_v8, %v5121_v62  ;;  %v5053_v1 = vcvt.s32.f32 %v4541_v59  ;;  %v4573_v63 = vunpack.c.0.s8 %v11929_v9 }
 0x65b   : > { %v4114_v23 = vmax.f32 %v11951_v43, 0.0  ;;  %v4097_v44 = vadd.f32 %v4049_v15, %v4031_v28  ;;  %v5055_v38 = vcvt.s32.f32 %v4543_v50  ;;  %v4575_v45 = vunpack.c.1.s8 %v11929_v9  ;;  %v999_v9 = vld [vmem:[%s10758_s27 + $0x380] sm:$0xff] }
 0x65c   : > { %v5421_v17 = vpack.c.bf16 %v5159_v7, %v5157_v37  ;;  %5629 = vmatpush.bf16.msrb.mxu2 %v5403_v56  ;;  %v5085_v12 = vcvt.s32.f32 %v4573_v63  ;;  %v4605_v26 = vunpack.c.0.s8 %v1001_v52  ;;  %v4607_v33 = vunpack.c.1.s8 %v1001_v52 }
 0x65d   : > { %v4641_v2 = vunpack.c.2.s8 %v1009_v27  ;;  %v4129_v51 = vmax.f32 %v4097_v44, 0.0  ;;  %v5369_v42 = vpack.c.bf16 %v5055_v38, %v5053_v1  ;;  %v5087_v55 = vcvt.s32.f32 %v4575_v45 }
 0x65e   : > { %5642 = vmatpush.bf16.msrb.mxu3 %v5421_v17  ;;  %v4643_v39 = vunpack.c.3.s8 %v1009_v27  ;;  %v5117_v35 = vcvt.s32.f32 %v4605_v26  ;;  %v5119_v41 = vcvt.s32.f32 %v4607_v33  ;;  %v4537_v30 = vunpack.c.2.s8 %v983_v34 }
 0x65f   : > { %v5153_v15 = vcvt.s32.f32 %v4641_v2  ;;  %v11968_v32 = vpack.c.bf16 %v4129_v51, %v4113_v58  ;;  %5602 = vmatpush.bf16.msrb.mxu0 %v5369_v42  ;;  %v5385_v52 = vpack.c.bf16 %v5087_v55, %v5085_v12  ;;  %v4539_v5 = vunpack.c.3.s8 %v983_v34  ;;  %v894_v42 = vld [vmem:[%s10758_s27 + $0x38] sm:$0xff] }
 0x660   : > { %v5155_v4 = vcvt.s32.f32 %v4643_v39  ;;  %v5401_v61 = vpack.c.bf16 %v5119_v41, %v5117_v35  ;;  %v5049_v24 = vcvt.s32.f32 %v4537_v30  ;;  %v4569_v14 = vunpack.c.2.s8 %v991_v48 }
 0x661   : > { %v4571_v62 = vunpack.c.3.s8 %v991_v48  ;;  %5616 = vmatpush.bf16.msrb.mxu1 %v5385_v52  ;;  %v5051_v59 = vcvt.s32.f32 %v4539_v5  ;;  %v3911_v28 = vadd.f32 %v3910_v6, %v3896_v18  ;;  %v4601_v37 = vunpack.c.2.s8 %v999_v9 }
 0x662   : > { %v5419_v8 = vpack.c.bf16 %v5155_v4, %v5153_v15  ;;  %5630 = vmatpush.bf16.msrb.mxu2 %v5401_v61  ;;  %v5081_v7 = vcvt.s32.f32 %v4569_v14  ;;  %v4603_v56 = vunpack.c.3.s8 %v999_v9  ;;  %v4637_v16 = vunpack.c.0.s8 %v1009_v27  ;;  %v1007_v14 = vld [vmem:[%s10758_s27 + $0x3c0] sm:$0xff] }
 0x663   : > { %v5083_v50 = vcvt.s32.f32 %v4571_v62  ;;  %v5367_v58 = vpack.c.bf16 %v5051_v59, %v5049_v24  ;;  %v4032_v1 = vmul.f32 %v3984_v60, %v3911_v28  ;;  %v5113_v63 = vcvt.s32.f32 %v4601_v37 }
 0x664   : > { %5643 = vmatpush.bf16.msrb.mxu3 %v5419_v8  ;;  %v4639_v44 = vunpack.c.1.s8 %v1009_v27  ;;  %v5115_v38 = vcvt.s32.f32 %v4603_v56  ;;  %v5149_v45 = vcvt.s32.f32 %v4637_v16  ;;  %v4533_v12 = vunpack.c.0.s8 %v983_v34  ;;  %v902_v27 = vld [vmem:[%s10758_s27 + $0x78] sm:$0xff] }
 0x665   : > { %v5383_v17 = vpack.c.bf16 %v5083_v50, %v5081_v7  ;;  %5603 = vmatpush.bf16.msrb.mxu0 %v5367_v58  ;;  %v4098_v26 = vadd.f32 %v4050_v0, %v4032_v1  ;;  %v4535_v2 = vunpack.c.1.s8 %v983_v34  ;;  %v4565_v51 = vunpack.c.0.s8 %v991_v48  ;;  %v910_v34 = vld [vmem:[%s10758_s27 + $0xb8] sm:$0xff] }
 0x666   : > { %v5151_v33 = vcvt.s32.f32 %v4639_v44  ;;  %v5399_v55 = vpack.c.bf16 %v5115_v38, %v5113_v63  ;;  %v5045_v39 = vcvt.s32.f32 %v4533_v12  ;;  %v4567_v60 = vunpack.c.1.s8 %v991_v48 }
 0x667   : > { %5617 = vmatpush.bf16.msrb.mxu1 %v5383_v17  ;;  %v4597_v35 = vunpack.c.0.s8 %v999_v9  ;;  %v4130_v41 = vmax.f32 %v4098_v26, 0.0  ;;  %v5047_v30 = vcvt.s32.f32 %v4535_v2  ;;  %v5077_v18 = vcvt.s32.f32 %v4565_v51 }
 0x668   : > { %v5417_v15 = vpack.c.bf16 %v5151_v33, %v5149_v45  ;;  %5631 = vmatpush.bf16.msrb.mxu2 %v5399_v55  ;;  %v5079_v6 = vcvt.s32.f32 %v4567_v60  ;;  %v4599_v52 = vunpack.c.1.s8 %v999_v9  ;;  %v4178_v4 = vunpack.c.2.s8 %v894_v42  ;;  %v918_v55 = vld [vmem:[%s10758_s27 + $0xf8] sm:$0xff] }
 0x669   : > { %v5109_v0 = vcvt.s32.f32 %v4597_v35  ;;  %v11979_v5 = vpack.c.bf16 %v4130_v41, %v4114_v23  ;;  %v5365_v61 = vpack.c.bf16 %v5047_v30, %v5045_v39  ;;  %v4180_v48 = vunpack.c.3.s8 %v894_v42 }
 0x66a   : > { %5644 = vmatpush.bf16.msrb.mxu3 %v5417_v15  ;;  %v4210_v24 = vunpack.c.2.s8 %v902_v27  ;;  %v5381_v62 = vpack.c.bf16 %v5079_v6, %v5077_v18  ;;  %v5111_v8 = vcvt.s32.f32 %v4599_v52  ;;  %v4690_v59 = vcvt.s32.f32 %v4178_v4  ;;  %v892_v6 = vld [vmem:[%s10758_s27 + $0x28] sm:$0xff] }
 0x66b   : > { %v4212_v28 = vunpack.c.3.s8 %v902_v27  ;;  %5604 = vmatpush.bf16.msrb.mxu0 %v5365_v61  ;;  %v4692_v37 = vcvt.s32.f32 %v4180_v48  ;;  %v4242_v9 = vunpack.c.2.s8 %v910_v34  ;;  %v4244_v50 = vunpack.c.3.s8 %v910_v34  ;;  %v900_v61 = vld [vmem:[%s10758_s27 + $0x68] sm:$0xff] }
 0x66c   : > { %v4722_v7 = vcvt.s32.f32 %v4210_v24  ;;  %5618 = vmatpush.bf16.msrb.mxu1 %v5381_v62  ;;  %v5397_v56 = vpack.c.bf16 %v5111_v8, %v5109_v0  ;;  %v4633_v43 = vunpack.c.2.s8 %v1007_v14  ;;  %v4635_v23 = vunpack.c.3.s8 %v1007_v14 }
 0x66d   : > { %v4724_v16 = vcvt.s32.f32 %v4212_v28  ;;  %v5188_v58 = vpack.c.bf16 %v4692_v37, %v4690_v59  ;;  %v4754_v1 = vcvt.s32.f32 %v4242_v9  ;;  %v4756_v63 = vcvt.s32.f32 %v4244_v50  ;;  %v908_v59 = vld [vmem:[%s10758_s27 + $0xa8] sm:$0xff]  ;;  %v3922_v9 = vpop.f32.mrf.mxu0  ;;  %v3936_v50 = vpop.f32.mrf.mxu1 }
 0x66e   : > { %v4174_v44 = vunpack.c.0.s8 %v894_v42  ;;  %5632 = vmatpush.bf16.msrb.mxu2 %v5397_v56  ;;  %5605 = vmatmul.bf16.vlgmr.msrb.gmra.mxu0 %v11968_v32  ;;  %v5145_v38 = vcvt.s32.f32 %v4633_v43  ;;  %v5147_v45 = vcvt.s32.f32 %v4635_v23  ;;  %v4176_v12 = vunpack.c.1.s8 %v894_v42 }
 0x66f   : > { %v5204_v17 = vpack.c.bf16 %v4724_v16, %v4722_v7  ;;  %5653 = vmatpush.bf16.msra.mxu0 %v5188_v58  ;;  %v5220_v26 = vpack.c.bf16 %v4756_v63, %v4754_v1  ;;  %v4206_v2 = vunpack.c.0.s8 %v902_v27  ;;  %v4208_v51 = vunpack.c.1.s8 %v902_v27  ;;  %5619 = vmatmul.bf16.vlgmr.msrb.gmra.mxu1 %v11979_v5 }
 0x670   : > { %v4686_v33 = vcvt.s32.f32 %v4174_v44  ;;  %v5415_v39 = vpack.c.bf16 %v5147_v45, %v5145_v38  ;;  %v4688_v60 = vcvt.s32.f32 %v4176_v12  ;;  %v4238_v35 = vunpack.c.0.s8 %v910_v34 }
 0x671   : > { %5667 = vmatpush.bf16.msra.mxu1 %v5204_v17  ;;  %v4240_v41 = vunpack.c.1.s8 %v910_v34  ;;  %v4718_v15 = vcvt.s32.f32 %v4206_v2  ;;  %v4720_v30 = vcvt.s32.f32 %v4208_v51  ;;  %v4629_v42 = vunpack.c.0.s8 %v1007_v14 }
 0x672   : > { %5681 = vmatpush.bf16.msra.mxu2 %v5220_v26  ;;  %v4631_v18 = vunpack.c.1.s8 %v1007_v14  ;;  %5645 = vmatpush.bf16.msrb.mxu3 %v5415_v39  ;;  %v5186_v52 = vpack.c.bf16 %v4688_v60, %v4686_v33  ;;  %v4750_v0 = vcvt.s32.f32 %v4238_v35  ;;  %v4274_v4 = vunpack.c.2.s8 %v918_v55 }
 0x673   : > { %v4752_v27 = vcvt.s32.f32 %v4240_v41  ;;  %v5202_v48 = vpack.c.bf16 %v4720_v30, %v4718_v15  ;;  %v5141_v24 = vcvt.s32.f32 %v4629_v42  ;;  %v4276_v8 = vunpack.c.3.s8 %v918_v55 }
 0x674   : > { %v5143_v62 = vcvt.s32.f32 %v4631_v18  ;;  %5654 = vmatpush.bf16.msra.mxu0 %v5186_v52  ;;  %v4786_v28 = vcvt.s32.f32 %v4274_v4  ;;  %v4170_v37 = vunpack.c.2.s8 %v892_v6  ;;  %v4172_v7 = vunpack.c.3.s8 %v892_v6  ;;  %v916_v4 = vld [vmem:[%s10758_s27 + $0xe8] sm:$0xff] }
 0x675   : > { %v5218_v34 = vpack.c.bf16 %v4752_v27, %v4750_v0  ;;  %5668 = vmatpush.bf16.msra.mxu1 %v5202_v48  ;;  %v4788_v56 = vcvt.s32.f32 %v4276_v8  ;;  %v4202_v16 = vunpack.c.2.s8 %v900_v61  ;;  %v4204_v43 = vunpack.c.3.s8 %v900_v61  ;;  %v890_v8 = vld [vmem:[%s10758_s27 + $0x18] sm:$0xff] }
 0x676   : > { %v5413_v14 = vpack.c.bf16 %v5143_v62, %v5141_v24  ;;  %v4682_v23 = vcvt.s32.f32 %v4170_v37  ;;  %v4684_v58 = vcvt.s32.f32 %v4172_v7  ;;  %v4234_v1 = vunpack.c.2.s8 %v908_v59  ;;  %v11999_v7 = vld [vmem:[%s10758_s27 + $0x58] sm:$0xff] }
 0x677   : > { %5682 = vmatpush.bf16.msra.mxu2 %v5218_v34  ;;  %v4236_v63 = vunpack.c.3.s8 %v908_v59  ;;  %v5236_v44 = vpack.c.bf16 %v4788_v56, %v4786_v28  ;;  %v4714_v17 = vcvt.s32.f32 %v4202_v16  ;;  %v4716_v38 = vcvt.s32.f32 %v4204_v43  ;;  %v3950_v56 = vpop.f32.mrf.mxu2  ;;  %v3964_v16 = vpop.f32.mrf.mxu3 }
 0x678   : > { %5646 = vmatpush.bf16.msrb.mxu3 %v5413_v14  ;;  %v3937_v45 = vadd.f32 %v3936_v50, %v3922_v9  ;;  %v5184_v12 = vpack.c.bf16 %v4684_v58, %v4682_v23  ;;  %v4746_v26 = vcvt.s32.f32 %v4234_v1  ;;  %v3985_v2 = vperm.slane %v11938_v46, 6 }
 0x679   : > { %v4748_v33 = vcvt.s32.f32 %v4236_v63  ;;  %v5200_v51 = vpack.c.bf16 %v4716_v38, %v4714_v17  ;;  %v4051_v39 = vperm.slane %v11942_v3, 6  ;;  %v4270_v60 = vunpack.c.0.s8 %v918_v55  ;;  %v906_v38 = vld [vmem:[%s10758_s27 + $0x98] sm:$0xff] }
 0x67a   : > { %v4272_v35 = vunpack.c.1.s8 %v918_v55  ;;  %5655 = vmatpush.bf16.msra.mxu0 %v5184_v12  ;;  %v4017_v15 = vmul.f32 %v3985_v2, %v3937_v45  ;;  %v4166_v30 = vunpack.c.0.s8 %v892_v6  ;;  %v4168_v42 = vunpack.c.1.s8 %v892_v6 }
 0x67b   : > { %v5216_v41 = vpack.c.bf16 %v4748_v33, %v4746_v26  ;;  %5669 = vmatpush.bf16.msra.mxu1 %v5200_v51  ;;  %v4782_v18 = vcvt.s32.f32 %v4270_v60  ;;  %v4198_v0 = vunpack.c.0.s8 %v900_v61  ;;  %v4200_v27 = vunpack.c.1.s8 %v900_v61  ;;  %v3924_v51 = vpop.f32.mrf.mxu0  ;;  %v3938_v60 = vpop.f32.mrf.mxu1 }
 0x67c   : > { %5695 = vmatpush.bf16.msra.mxu3 %v5236_v44  ;;  %v4784_v52 = vcvt.s32.f32 %v4272_v35  ;;  %v11995_v48 = vadd.f32 %v4051_v39, %v4017_v15  ;;  %v4678_v55 = vcvt.s32.f32 %v4166_v30  ;;  %v4680_v24 = vcvt.s32.f32 %v4168_v42 }
 0x67d   : > { %5683 = vmatpush.bf16.msra.mxu2 %v5216_v41  ;;  %v4230_v62 = vunpack.c.0.s8 %v908_v59  ;;  %v4710_v28 = vcvt.s32.f32 %v4198_v0  ;;  %v4712_v37 = vcvt.s32.f32 %v4200_v27  ;;  %v4232_v6 = vunpack.c.1.s8 %v908_v59 }
 0x67e   : > { %v5234_v34 = vpack.c.bf16 %v4784_v52, %v4782_v18  ;;  %v4115_v9 = vmax.f32 %v11995_v48, 0.0  ;;  %v5182_v61 = vpack.c.bf16 %v4680_v24, %v4678_v55  ;;  %v4266_v14 = vunpack.c.2.s8 %v916_v4 }
 0x67f   : > { %v4742_v50 = vcvt.s32.f32 %v4230_v62  ;;  %v5198_v43 = vpack.c.bf16 %v4712_v37, %v4710_v28  ;;  %v4744_v23 = vcvt.s32.f32 %v4232_v6  ;;  %v4268_v58 = vunpack.c.3.s8 %v916_v4 }
 0x680   : > { %5696 = vmatpush.bf16.msra.mxu3 %v5234_v34  ;;  %v4162_v1 = vunpack.c.2.s8 %v890_v8  ;;  %5656 = vmatpush.bf16.msra.mxu0 %v5182_v61  ;;  %v4778_v63 = vcvt.s32.f32 %v4266_v14  ;;  %v4164_v44 = vunpack.c.3.s8 %v890_v8  ;;  %v4194_v59 = vunpack.c.2.s8 %v11999_v7 }
 0x681   : > { %v4196_v17 = vunpack.c.3.s8 %v11999_v7  ;;  %5670 = vmatpush.bf16.msra.mxu1 %v5198_v43  ;;  %v5214_v45 = vpack.c.bf16 %v4744_v23, %v4742_v50  ;;  %v4780_v12 = vcvt.s32.f32 %v4268_v58  ;;  %v3965_v33 = vadd.f32 %v3964_v16, %v3950_v56 }
 0x682   : > { %v4674_v26 = vcvt.s32.f32 %v4162_v1  ;;  %v4676_v35 = vcvt.s32.f32 %v4164_v44  ;;  %v4706_v41 = vcvt.s32.f32 %v4194_v59  ;;  %v3986_v30 = vperm.slane %v11938_v46, 7  ;;  %v914_v1 = vld [vmem:[%s10758_s27 + $0xd8] sm:$0xff] }
 0x683   : > { %v4708_v15 = vcvt.s32.f32 %v4196_v17  ;;  %5684 = vmatpush.bf16.msra.mxu2 %v5214_v45  ;;  %v5232_v42 = vpack.c.bf16 %v4780_v12, %v4778_v63  ;;  %v4052_v18 = vperm.slane %v11942_v3, 7  ;;  %v4226_v52 = vunpack.c.2.s8 %v906_v38  ;;  %v888_v17 = vld [vmem:[%s10758_s27 + $0x8] sm:$0xff] }
 0x684   : > { %v4228_v0 = vunpack.c.3.s8 %v906_v38  ;;  %v5180_v27 = vpack.c.bf16 %v4676_v35, %v4674_v26  ;;  %v4018_v24 = vmul.f32 %v3986_v30, %v3965_v33  ;;  %v3939_v62 = vadd.f32 %v3938_v60, %v3924_v51  ;;  %v896_v35 = vld [vmem:[%s10758_s27 + $0x48] sm:$0xff] }
 0x685   : > { %v5196_v55 = vpack.c.bf16 %v4708_v15, %v4706_v41  ;;  %5697 = vmatpush.bf16.msra.mxu3 %v5232_v42  ;;  %v4738_v34 = vcvt.s32.f32 %v4226_v52  ;;  %v4262_v37 = vunpack.c.0.s8 %v916_v4  ;;  %v4264_v6 = vunpack.c.1.s8 %v916_v4  ;;  %v3952_v52 = vpop.f32.mrf.mxu2 }
 0x686   : > { %v4740_v28 = vcvt.s32.f32 %v4228_v0  ;;  %5657 = vmatpush.bf16.msra.mxu0 %v5180_v27  ;;  %v12011_v61 = vadd.f32 %v4052_v18, %v4018_v24  ;;  %v4033_v50 = vmul.f32 %v3985_v2, %v3939_v62  ;;  %v4158_v14 = vunpack.c.0.s8 %v890_v8  ;;  %v3966_v0 = vpop.f32.mrf.mxu3  ;;  %v904_v62 = vld [vmem:[%s10758_s27 + $0x88] sm:$0xff] }
 0x687   : > { %5671 = vmatpush.bf16.msra.mxu1 %v5196_v55  ;;  %v4160_v56 = vunpack.c.1.s8 %v890_v8  ;;  %v4774_v43 = vcvt.s32.f32 %v4262_v37  ;;  %v4776_v23 = vcvt.s32.f32 %v4264_v6  ;;  %v4190_v58 = vunpack.c.0.s8 %v11999_v7 }
 0x688   : > { %v5212_v16 = vpack.c.bf16 %v4740_v28, %v4738_v34  ;;  %v4116_v4 = vmax.f32 %v12011_v61, 0.0  ;;  %v4099_v63 = vadd.f32 %v4051_v39, %v4033_v50  ;;  %v4670_v44 = vcvt.s32.f32 %v4158_v14 }
 0x689   : > { %v4672_v59 = vcvt.s32.f32 %v4160_v56  ;;  %v5230_v45 = vpack.c.bf16 %v4776_v23, %v4774_v43  ;;  %v4192_v2 = vunpack.c.1.s8 %v11999_v7  ;;  %v4702_v8 = vcvt.s32.f32 %v4190_v58 }
 0x68a   : > { %5685 = vmatpush.bf16.msra.mxu2 %v5212_v16  ;;  %v4222_v12 = vunpack.c.0.s8 %v906_v38  ;;  %v4131_v26 = vmax.f32 %v4099_v63, 0.0  ;;  %v4224_v51 = vunpack.c.1.s8 %v906_v38  ;;  %v4258_v60 = vunpack.c.2.s8 %v914_v1 }
 0x68b   : > { %v5178_v33 = vpack.c.bf16 %v4672_v59, %v4670_v44  ;;  %5698 = vmatpush.bf16.msra.mxu3 %v5230_v45  ;;  %v4704_v41 = vcvt.s32.f32 %v4192_v2  ;;  %v4260_v42 = vunpack.c.3.s8 %v914_v1  ;;  %v4154_v39 = vunpack.c.2.s8 %v888_v17 }
 0x68c   : > { %v4734_v15 = vcvt.s32.f32 %v4222_v12  ;;  %v12025_v27 = vpack.c.bf16 %v4131_v26, %v4115_v9  ;;  %v4736_v7 = vcvt.s32.f32 %v4224_v51  ;;  %v4770_v55 = vcvt.s32.f32 %v4258_v60  ;;  %v926_v60 = vld [vmem:[%s10758_s27 + $0x138] sm:$0xff] }
 0x68d   : > { %5658 = vmatpush.bf16.msra.mxu0 %v5178_v33  ;;  %v4156_v24 = vunpack.c.3.s8 %v888_v17  ;;  %v5194_v34 = vpack.c.bf16 %v4704_v41, %v4702_v8  ;;  %v4772_v38 = vcvt.s32.f32 %v4260_v42  ;;  %v4666_v28 = vcvt.s32.f32 %v4154_v39 }
 0x68e   : > { %v4186_v37 = vunpack.c.2.s8 %v896_v35  ;;  %v5210_v6 = vpack.c.bf16 %v4736_v7, %v4734_v15  ;;  %v4188_v14 = vunpack.c.3.s8 %v896_v35  ;;  %v3967_v56 = vadd.f32 %v3966_v0, %v3952_v52  ;;  %5633 = vmatmul.bf16.vlgmr.msrb.gmra.mxu2 %v12025_v27  ;;  %v934_v0 = vld [vmem:[%s10758_s27 + $0x178] sm:$0xff] }
 0x68f   : > { %v4668_v50 = vcvt.s32.f32 %v4156_v24  ;;  %5672 = vmatpush.bf16.msra.mxu1 %v5194_v34  ;;  %v5228_v16 = vpack.c.bf16 %v4772_v38, %v4770_v55  ;;  %v4218_v9 = vunpack.c.2.s8 %v904_v62  ;;  %v4220_v43 = vunpack.c.3.s8 %v904_v62  ;;  %v942_v24 = vld [vmem:[%s10758_s27 + $0x1b8] sm:$0xff] }
 0x690   : > { %v4698_v48 = vcvt.s32.f32 %v4186_v37  ;;  %5686 = vmatpush.bf16.msra.mxu2 %v5210_v6  ;;  %v4700_v58 = vcvt.s32.f32 %v4188_v14  ;;  %v4034_v63 = vmul.f32 %v3986_v30, %v3967_v56  ;;  %v4254_v44 = vunpack.c.0.s8 %v914_v1  ;;  %v912_v37 = vld [vmem:[%s10758_s27 + $0xc8] sm:$0xff] }
 0x691   : > { %v5176_v23 = vpack.c.bf16 %v4668_v50, %v4666_v28  ;;  %5699 = vmatpush.bf16.msra.mxu3 %v5228_v16  ;;  %v4730_v59 = vcvt.s32.f32 %v4218_v9  ;;  %v4732_v45 = vcvt.s32.f32 %v4220_v43  ;;  %v4256_v2 = vunpack.c.1.s8 %v914_v1 }
 0x692   : > { %v4150_v8 = vunpack.c.0.s8 %v888_v17  ;;  %v5192_v12 = vpack.c.bf16 %v4700_v58, %v4698_v48  ;;  %v4100_v26 = vadd.f32 %v4052_v18, %v4034_v63  ;;  %v4766_v33 = vcvt.s32.f32 %v4254_v44 }
 0x693   : > { %5659 = vmatpush.bf16.msra.mxu0 %v5176_v23  ;;  %v4152_v51 = vunpack.c.1.s8 %v888_v17  ;;  %v5208_v41 = vpack.c.bf16 %v4732_v45, %v4730_v59  ;;  %v4768_v15 = vcvt.s32.f32 %v4256_v2  ;;  %v4182_v30 = vunpack.c.0.s8 %v896_v35 }
 0x694   : > { %v4662_v46 = vcvt.s32.f32 %v4150_v8  ;;  %5673 = vmatpush.bf16.msra.mxu1 %v5192_v12  ;;  %v4132_v42 = vmax.f32 %v4100_v26, 0.0  ;;  %v4184_v1 = vunpack.c.1.s8 %v896_v35  ;;  %v4214_v52 = vunpack.c.0.s8 %v904_v62 }
 0x695   : > { %v4664_v39 = vcvt.s32.f32 %v4152_v51  ;;  %5687 = vmatpush.bf16.msra.mxu2 %v5208_v41  ;;  %v5226_v7 = vpack.c.bf16 %v4768_v15, %v4766_v33  ;;  %v4694_v55 = vcvt.s32.f32 %v4182_v30  ;;  %v4216_v3 = vunpack.c.1.s8 %v904_v62 }
 0x696   : > { %v4306_v18 = vunpack.c.2.s8 %v926_v60  ;;  %v12038_v17 = vpack.c.bf16 %v4132_v42, %v4116_v4  ;;  %v4696_v38 = vcvt.s32.f32 %v4184_v1  ;;  %v4726_v28 = vcvt.s32.f32 %v4214_v52  ;;  %v950_v42 = vld [vmem:[%s10758_s27 + $0x1f8] sm:$0xff]  ;;  %v924_v52 = vld [vmem:[%s10758_s27 + $0x128] sm:$0xff] }
 0x697   : > { %v5174_v34 = vpack.c.bf16 %v4664_v39, %v4662_v46  ;;  %5700 = vmatpush.bf16.msra.mxu3 %v5226_v7  ;;  %v4728_v6 = vcvt.s32.f32 %v4216_v3  ;;  %v4308_v50 = vunpack.c.3.s8 %v926_v60  ;;  %v4338_v14 = vunpack.c.2.s8 %v934_v0 }
 0x698   : > { %v4818_v35 = vcvt.s32.f32 %v4306_v18  ;;  %v5190_v56 = vpack.c.bf16 %v4696_v38, %v4694_v55  ;;  %v4340_v16 = vunpack.c.3.s8 %v934_v0  ;;  %v4370_v48 = vunpack.c.2.s8 %v942_v24  ;;  %5647 = vmatmul.bf16.vlgmr.msrb.gmra.mxu3 %v12038_v17 }
 0x699   : > { %5660 = vmatpush.bf16.msra.mxu0 %v5174_v34  ;;  %v4372_v62 = vunpack.c.3.s8 %v942_v24  ;;  %v5206_v9 = vpack.c.bf16 %v4728_v6, %v4726_v28  ;;  %v4820_v61 = vcvt.s32.f32 %v4308_v50  ;;  %v4850_v4 = vcvt.s32.f32 %v4338_v14  ;;  %v932_v34 = vld [vmem:[%s10758_s27 + $0x168] sm:$0xff] }
 0x69a   : > { %v4250_v43 = vunpack.c.2.s8 %v912_v37  ;;  %5674 = vmatpush.bf16.msra.mxu1 %v5190_v56  ;;  %v4852_v23 = vcvt.s32.f32 %v4340_v16  ;;  %v4882_v58 = vcvt.s32.f32 %v4370_v48  ;;  %v4252_v44 = vunpack.c.3.s8 %v912_v37  ;;  %v940_v14 = vld [vmem:[%s10758_s27 + $0x1a8] sm:$0xff] }
 0x69b   : > { %v4884_v63 = vcvt.s32.f32 %v4372_v62  ;;  %5688 = vmatpush.bf16.msra.mxu2 %v5206_v9  ;;  %v5252_v59 = vpack.c.bf16 %v4820_v61, %v4818_v35  ;;  %v4302_v2 = vunpack.c.0.s8 %v926_v60  ;;  %v4304_v8 = vunpack.c.1.s8 %v926_v60  ;;  %v5438_v9 = vpop.f32.mrf.mxu0 }
 0x69c   : > { %5661 = vmatmul.bf16.vlgmr.msra.gmra.mxu0 %v11481_v10  ;;  %v4762_v45 = vcvt.s32.f32 %v4250_v43  ;;  %v5268_v12 = vpack.c.bf16 %v4852_v23, %v4850_v4  ;;  %v4764_v33 = vcvt.s32.f32 %v4252_v44  ;;  %v4334_v51 = vunpack.c.0.s8 %v934_v0 }
 0x69d   : > { %v5284_v26 = vpack.c.bf16 %v4884_v63, %v4882_v58  ;;  %5709 = vmatpush.bf16.msrb.mxu0 %v5252_v59  ;;  %5675 = vmatmul.bf16.vlgmr.msra.gmra.mxu1 %v11496_v31  ;;  %v4814_v41 = vcvt.s32.f32 %v4302_v2  ;;  %v4816_v15 = vcvt.s32.f32 %v4304_v8  ;;  %v4336_v46 = vunpack.c.1.s8 %v934_v0 }
 0x69e   : > { %v4366_v30 = vunpack.c.0.s8 %v942_v24  ;;  %5723 = vmatpush.bf16.msrb.mxu1 %v5268_v12  ;;  %v5224_v10 = vpack.c.bf16 %v4764_v33, %v4762_v45  ;;  %v4846_v39 = vcvt.s32.f32 %v4334_v51  ;;  %v4368_v1 = vunpack.c.1.s8 %v942_v24  ;;  %5689 = vmatmul.bf16.vlgmr.msra.gmra.mxu2 %v11572_v25 }
 0x69f   : > { %5737 = vmatpush.bf16.msrb.mxu2 %v5284_v26  ;;  %v4246_v60 = vunpack.c.0.s8 %v912_v37  ;;  %v5250_v7 = vpack.c.bf16 %v4816_v15, %v4814_v41  ;;  %v4848_v55 = vcvt.s32.f32 %v4336_v46  ;;  %v4248_v18 = vunpack.c.1.s8 %v912_v37  ;;  %v5452_v37 = vpop.f32.mrf.mxu1 }
 0x6a0   : > { %v4878_v3 = vcvt.s32.f32 %v4366_v30  ;;  %5701 = vmatpush.bf16.msra.mxu3 %v5224_v10  ;;  %v4880_v31 = vcvt.s32.f32 %v4368_v1  ;;  %v4402_v38 = vunpack.c.2.s8 %v950_v42  ;;  %v4404_v28 = vunpack.c.3.s8 %v950_v42  ;;  %v948_v10 = vld [vmem:[%s10758_s27 + $0x1e8] sm:$0xff] }
 0x6a1   : > { %v4758_v0 = vcvt.s32.f32 %v4246_v60  ;;  %5710 = vmatpush.bf16.msrb.mxu0 %v5250_v7  ;;  %v5266_v6 = vpack.c.bf16 %v4848_v55, %v4846_v39  ;;  %v4760_v50 = vcvt.s32.f32 %v4248_v18  ;;  %v4298_v35 = vunpack.c.2.s8 %v924_v52  ;;  %v922_v55 = vld [vmem:[%s10758_s27 + $0x118] sm:$0xff] }
 0x6a2   : > { %v4300_v24 = vunpack.c.3.s8 %v924_v52  ;;  %v5282_v56 = vpack.c.bf16 %v4880_v31, %v4878_v3  ;;  %v4914_v16 = vcvt.s32.f32 %v4402_v38  ;;  %v4916_v48 = vcvt.s32.f32 %v4404_v28 }
 0x6a3   : > { %v4330_v62 = vunpack.c.2.s8 %v932_v34  ;;  %5724 = vmatpush.bf16.msrb.mxu1 %v5266_v6  ;;  %v5222_v61 = vpack.c.bf16 %v4760_v50, %v4758_v0  ;;  %v4810_v25 = vcvt.s32.f32 %v4298_v35  ;;  %v4332_v43 = vunpack.c.3.s8 %v932_v34  ;;  %v930_v6 = vld [vmem:[%s10758_s27 + $0x158] sm:$0xff] }
 0x6a4   : > { %v4812_v4 = vcvt.s32.f32 %v4300_v24  ;;  %5738 = vmatpush.bf16.msrb.mxu2 %v5282_v56  ;;  %v5300_v23 = vpack.c.bf16 %v4916_v48, %v4914_v16  ;;  %v4362_v63 = vunpack.c.2.s8 %v940_v14  ;;  %v4364_v44 = vunpack.c.3.s8 %v940_v14  ;;  %v938_v16 = vld [vmem:[%s10758_s27 + $0x198] sm:$0xff] }
 0x6a5   : > { %v4842_v58 = vcvt.s32.f32 %v4330_v62  ;;  %5702 = vmatpush.bf16.msra.mxu3 %v5222_v61  ;;  %v4844_v45 = vcvt.s32.f32 %v4332_v43  ;;  %v5453_v2 = vadd.f32 %v5452_v37, %v5438_v9  ;;  %v4398_v8 = vunpack.c.0.s8 %v950_v42 }
 0x6a6   : > { %v5248_v59 = vpack.c.bf16 %v4812_v4, %v4810_v25  ;;  %v4874_v12 = vcvt.s32.f32 %v4362_v63  ;;  %v4876_v26 = vcvt.s32.f32 %v4364_v44  ;;  %v4400_v33 = vunpack.c.1.s8 %v950_v42 }
 0x6a7   : > { %v4294_v51 = vunpack.c.0.s8 %v924_v52  ;;  %v5264_v41 = vpack.c.bf16 %v4844_v45, %v4842_v58  ;;  %v4910_v15 = vcvt.s32.f32 %v4398_v8  ;;  %v4296_v46 = vunpack.c.1.s8 %v924_v52 }
 0x6a8   : > { %5711 = vmatpush.bf16.msrb.mxu0 %v5248_v59  ;;  %v4326_v30 = vunpack.c.0.s8 %v932_v34  ;;  %v5280_v39 = vpack.c.bf16 %v4876_v26, %v4874_v12  ;;  %v4912_v1 = vcvt.s32.f32 %v4400_v33  ;;  %v4328_v7 = vunpack.c.1.s8 %v932_v34  ;;  %5703 = vmatmul.bf16.vlgmr.msra.gmra.mxu3 %v11607_v22  ;;  %v5466_v34 = vpop.f32.mrf.mxu2  ;;  %v5480_v59 = vpop.f32.mrf.mxu3 }
 0x6a9   : > { %5751 = vmatpush.bf16.msrb.mxu3 %v5300_v23  ;;  %v4806_v60 = vcvt.s32.f32 %v4294_v51  ;;  %5725 = vmatpush.bf16.msrb.mxu1 %v5264_v41  ;;  %v4808_v3 = vcvt.s32.f32 %v4296_v46  ;;  %v4358_v42 = vunpack.c.0.s8 %v940_v14  ;;  %v4360_v31 = vunpack.c.1.s8 %v940_v14 }
 0x6aa   : > { %v4838_v18 = vcvt.s32.f32 %v4326_v30  ;;  %5739 = vmatpush.bf16.msrb.mxu2 %v5280_v39  ;;  %v5298_v0 = vpack.c.bf16 %v4912_v1, %v4910_v15  ;;  %v4840_v38 = vcvt.s32.f32 %v4328_v7  ;;  %v4394_v52 = vunpack.c.2.s8 %v948_v10 }
 0x6ab   : > { %v4396_v28 = vunpack.c.3.s8 %v948_v10  ;;  %v5246_v50 = vpack.c.bf16 %v4808_v3, %v4806_v60  ;;  %v4870_v35 = vcvt.s32.f32 %v4358_v42  ;;  %v4872_v24 = vcvt.s32.f32 %v4360_v31  ;;  %v946_v60 = vld [vmem:[%s10758_s27 + $0x1d8] sm:$0xff]  ;;  %v920_v31 = vld [vmem:[%s10758_s27 + $0x108] sm:$0xff] }
 0x6ac   : > { %v4290_v56 = vunpack.c.2.s8 %v922_v55  ;;  %v5262_v22 = vpack.c.bf16 %v4840_v38, %v4838_v18  ;;  %v4906_v48 = vcvt.s32.f32 %v4394_v52  ;;  %v4292_v9 = vunpack.c.3.s8 %v922_v55 }
 0x6ad   : > { %5752 = vmatpush.bf16.msrb.mxu3 %v5298_v0  ;;  %v4908_v62 = vcvt.s32.f32 %v4396_v28  ;;  %5712 = vmatpush.bf16.msrb.mxu0 %v5246_v50  ;;  %v5278_v37 = vpack.c.bf16 %v4872_v24, %v4870_v35  ;;  %v4322_v61 = vunpack.c.2.s8 %v930_v6  ;;  %v4324_v25 = vunpack.c.3.s8 %v930_v6 }
 0x6ae   : > { %v4802_v14 = vcvt.s32.f32 %v4290_v56  ;;  %5726 = vmatpush.bf16.msrb.mxu1 %v5262_v22  ;;  %v4804_v43 = vcvt.s32.f32 %v4292_v9  ;;  %v5467_v23 = vadd.f32 %v5466_v34, %v5453_v2  ;;  %v4354_v58 = vunpack.c.2.s8 %v938_v16 }
 0x6af   : > { %v5296_v4 = vpack.c.bf16 %v4908_v62, %v4906_v48  ;;  %5740 = vmatpush.bf16.msrb.mxu2 %v5278_v37  ;;  %v4834_v63 = vcvt.s32.f32 %v4322_v61  ;;  %v4836_v44 = vcvt.s32.f32 %v4324_v25  ;;  %v4356_v45 = vunpack.c.3.s8 %v938_v16  ;;  %v936_v48 = vld [vmem:[%s10758_s27 + $0x188] sm:$0xff] }
 0x6b0   : > { %v5244_v8 = vpack.c.bf16 %v4804_v43, %v4802_v14  ;;  %v12054_v12 = vadd.f32 %v5480_v59, %v5467_v23  ;;  %v4866_v26 = vcvt.s32.f32 %v4354_v58  ;;  %v4390_v33 = vunpack.c.0.s8 %v948_v10 }
 0x6b1   : > { %5753 = vmatpush.bf16.msrb.mxu3 %v5296_v4  ;;  %v5260_v51 = vpack.c.bf16 %v4836_v44, %v4834_v63  ;;  %v4868_v41 = vcvt.s32.f32 %v4356_v45  ;;  %v4392_v15 = vunpack.c.1.s8 %v948_v10  ;;  %v4286_v46 = vunpack.c.0.s8 %v922_v55  ;;  %v928_v10 = vld [vmem:[%s10758_s27 + $0x148] sm:$0xff] }
 0x6b2   : > { %5713 = vmatpush.bf16.msrb.mxu0 %v5244_v8  ;;  %v4902_v2 = vcvt.s32.f32 %v4390_v33  ;;  %v4288_v30 = vunpack.c.1.s8 %v922_v55  ;;  %v4318_v39 = vunpack.c.0.s8 %v930_v6  ;;  %v4320_v1 = vunpack.c.1.s8 %v930_v6 }
 0x6b3   : > { %5727 = vmatpush.bf16.msrb.mxu1 %v5260_v51  ;;  %v5276_v7 = vpack.c.bf16 %v4868_v41, %v4866_v26  ;;  %v4904_v3 = vcvt.s32.f32 %v4392_v15  ;;  %v4798_v18 = vcvt.s32.f32 %v4286_v46  ;;  %v4350_v42 = vunpack.c.0.s8 %v938_v16 }
 0x6b4   : > { %v4800_v0 = vcvt.s32.f32 %v4288_v30  ;;  %v4830_v38 = vcvt.s32.f32 %v4318_v39  ;;  %v4832_v52 = vcvt.s32.f32 %v4320_v1  ;;  %v4352_v28 = vunpack.c.1.s8 %v938_v16 }
 0x6b5   : > { %5741 = vmatpush.bf16.msrb.mxu2 %v5276_v7  ;;  %v5294_v50 = vpack.c.bf16 %v4904_v3, %v4902_v2  ;;  %v4862_v35 = vcvt.s32.f32 %v4350_v42  ;;  %v4386_v24 = vunpack.c.2.s8 %v946_v60  ;;  %v4388_v55 = vunpack.c.3.s8 %v946_v60  ;;  %v958_v2 = vld [vmem:[%s10758_s27 + $0x238] sm:$0xff] }
 0x6b6   : > { %v5242_v56 = vpack.c.bf16 %v4800_v0, %v4798_v18  ;;  %v5258_v6 = vpack.c.bf16 %v4832_v52, %v4830_v38  ;;  %v4864_v34 = vcvt.s32.f32 %v4352_v28  ;;  %v4282_v22 = vunpack.c.2.s8 %v920_v31 }
 0x6b7   : > { %5754 = vmatpush.bf16.msrb.mxu3 %v5294_v50  ;;  %v4898_v62 = vcvt.s32.f32 %v4386_v24  ;;  %v4900_v9 = vcvt.s32.f32 %v4388_v55  ;;  %v4284_v37 = vunpack.c.3.s8 %v920_v31  ;;  %v4314_v14 = vunpack.c.2.s8 %v928_v10 }
 0x6b8   : > { %5714 = vmatpush.bf16.msrb.mxu0 %v5242_v56  ;;  %5728 = vmatpush.bf16.msrb.mxu1 %v5258_v6  ;;  %v5274_v61 = vpack.c.bf16 %v4864_v34, %v4862_v35  ;;  %v4794_v16 = vcvt.s32.f32 %v4282_v22  ;;  %v4316_v25 = vunpack.c.3.s8 %v928_v10  ;;  %v4346_v58 = vunpack.c.2.s8 %v936_v48  ;;  %v974_v35 = vld [vmem:[%s10758_s27 + $0x2b8] sm:$0xff]  ;;  %v944_v6 = vld [vmem:[%s10758_s27 + $0x1c8] sm:$0xff] }
 0x6b9   : > { %v5292_v4 = vpack.c.bf16 %v4900_v9, %v4898_v62  ;;  %v4796_v43 = vcvt.s32.f32 %v4284_v37  ;;  %v4826_v23 = vcvt.s32.f32 %v4314_v14  ;;  %v4348_v44 = vunpack.c.3.s8 %v936_v48 }
 0x6ba   : > { %5742 = vmatpush.bf16.msrb.mxu2 %v5274_v61  ;;  %v4828_v63 = vcvt.s32.f32 %v4316_v25  ;;  %v4382_v59 = vunpack.c.0.s8 %v946_v60  ;;  %v4858_v8 = vcvt.s32.f32 %v4346_v58  ;;  %v4384_v26 = vunpack.c.1.s8 %v946_v60  ;;  %v966_v60 = vld [vmem:[%s10758_s27 + $0x278] sm:$0xff]  ;;  %v12064_v61 = vpop.f32.mrf.mxu0 }
 0x6bb   : > { %5755 = vmatpush.bf16.msrb.mxu3 %v5292_v4  ;;  %v5240_v45 = vpack.c.bf16 %v4796_v43, %v4794_v16  ;;  %v4278_v33 = vunpack.c.0.s8 %v920_v31  ;;  %v4860_v41 = vcvt.s32.f32 %v4348_v44  ;;  %v4280_v46 = vunpack.c.1.s8 %v920_v31 }
 0x6bc   : > { %v5256_v51 = vpack.c.bf16 %v4828_v63, %v4826_v23  ;;  %v4894_v15 = vcvt.s32.f32 %v4382_v59  ;;  %v4896_v30 = vcvt.s32.f32 %v4384_v26  ;;  %v4310_v1 = vunpack.c.0.s8 %v928_v10 }
 0x6bd   : > { %5715 = vmatpush.bf16.msrb.mxu0 %v5240_v45  ;;  %v4790_v39 = vcvt.s32.f32 %v4278_v33  ;;  %v4312_v7 = vunpack.c.1.s8 %v928_v10  ;;  %v5272_v3 = vpack.c.bf16 %v4860_v41, %v4858_v8  ;;  %v4792_v18 = vcvt.s32.f32 %v4280_v46  ;;  %v12069_v46 = vld [vmem:[%s10758_s27 + $0x2f8] sm:$0xff] }
 0x6be   : > { %5729 = vmatpush.bf16.msrb.mxu1 %v5256_v51  ;;  %v4342_v42 = vunpack.c.0.s8 %v936_v48  ;;  %v4344_v0 = vunpack.c.1.s8 %v936_v48  ;;  %v5290_v38 = vpack.c.bf16 %v4896_v30, %v4894_v15  ;;  %v4822_v52 = vcvt.s32.f32 %v4310_v1  ;;  %v12071_v30 = vpop.f32.mrf.mxu1 }
 0x6bf   : > { %v4824_v28 = vcvt.s32.f32 %v4312_v7  ;;  %v4434_v50 = vunpack.c.2.s8 %v958_v2  ;;  %5743 = vmatpush.bf16.msrb.mxu2 %v5272_v3  ;;  %v5238_v31 = vpack.c.bf16 %v4792_v18, %v4790_v39  ;;  %v4436_v56 = vunpack.c.3.s8 %v958_v2 }
 0x6c0   : > { %v4854_v24 = vcvt.s32.f32 %v4342_v42  ;;  %v4856_v55 = vcvt.s32.f32 %v4344_v0  ;;  %5756 = vmatpush.bf16.msrb.mxu3 %v5290_v38  ;;  %v4466_v22 = vunpack.c.2.s8 %v966_v60  ;;  %v4468_v62 = vunpack.c.3.s8 %v966_v60  ;;  %v956_v42 = vld [vmem:[%s10758_s27 + $0x228] sm:$0xff] }
 0x6c1   : > { %v5254_v10 = vpack.c.bf16 %v4824_v28, %v4822_v52  ;;  %v4946_v34 = vcvt.s32.f32 %v4434_v50  ;;  %5716 = vmatpush.bf16.msrb.mxu0 %v5238_v31  ;;  %v4948_v48 = vcvt.s32.f32 %v4436_v56  ;;  %v4498_v37 = vunpack.c.2.s8 %v974_v35  ;;  %v964_v28 = vld [vmem:[%s10758_s27 + $0x268] sm:$0xff] }
 0x6c2   : > { %v5270_v9 = vpack.c.bf16 %v4856_v55, %v4854_v24  ;;  %v4500_v14 = vunpack.c.3.s8 %v974_v35  ;;  %v4978_v16 = vcvt.s32.f32 %v4466_v22  ;;  %v4980_v25 = vcvt.s32.f32 %v4468_v62  ;;  %v12079_v22 = vpop.f32.mrf.mxu2 }
 0x6c3   : > { %5730 = vmatpush.bf16.msrb.mxu1 %v5254_v10  ;;  %v4378_v4 = vunpack.c.2.s8 %v944_v6  ;;  %v4380_v43 = vunpack.c.3.s8 %v944_v6  ;;  %v5316_v23 = vpack.c.bf16 %v4948_v48, %v4946_v34  ;;  %v5010_v58 = vcvt.s32.f32 %v4498_v37 }
 0x6c4   : > { %5744 = vmatpush.bf16.msrb.mxu2 %v5270_v9  ;;  %v5012_v63 = vcvt.s32.f32 %v4500_v14  ;;  %v4430_v44 = vunpack.c.0.s8 %v958_v2  ;;  %v5332_v59 = vpack.c.bf16 %v4980_v25, %v4978_v16  ;;  %5717 = vmatmul.bf16.vlgmr.msrb.gmra.mxu0 %v11639_v36  ;;  %v4432_v26 = vunpack.c.1.s8 %v958_v2 }
 0x6c5   : > { %v4890_v45 = vcvt.s32.f32 %v4378_v4  ;;  %v4892_v8 = vcvt.s32.f32 %v4380_v43  ;;  %5765 = vmatpush.bf16.msra.mxu0 %v5316_v23  ;;  %v4462_v41 = vunpack.c.0.s8 %v966_v60  ;;  %v4464_v15 = vunpack.c.1.s8 %v966_v60 }
 0x6c6   : > { %v5348_v33 = vpack.c.bf16 %v5012_v63, %v5010_v58  ;;  %5731 = vmatmul.bf16.vlgmr.msrb.gmra.mxu1 %v11651_v19  ;;  %v4942_v51 = vcvt.s32.f32 %v4430_v44  ;;  %v4944_v36 = vcvt.s32.f32 %v4432_v26  ;;  %v4494_v1 = vunpack.c.0.s8 %v974_v35 }
 0x6c7   : > { %5779 = vmatpush.bf16.msra.mxu1 %v5332_v59  ;;  %v5288_v39 = vpack.c.bf16 %v4892_v8, %v4890_v45  ;;  %5745 = vmatmul.bf16.vlgmr.msrb.gmra.mxu2 %v11723_v29  ;;  %v4496_v2 = vunpack.c.1.s8 %v974_v35  ;;  %v4974_v7 = vcvt.s32.f32 %v4462_v41  ;;  %v4976_v19 = vcvt.s32.f32 %v4464_v15  ;;  %v972_v35 = vld [vmem:[%s10758_s27 + $0x2a8] sm:$0xff]  ;;  %v5508_v8 = vpop.f32.mrf.mxu1 }
 0x6c8   : > { %5793 = vmatpush.bf16.msra.mxu2 %v5348_v33  ;;  %v4374_v3 = vunpack.c.0.s8 %v944_v6  ;;  %v4376_v18 = vunpack.c.1.s8 %v944_v6  ;;  %v5314_v0 = vpack.c.bf16 %v4944_v36, %v4942_v51  ;;  %v5006_v60 = vcvt.s32.f32 %v4494_v1  ;;  %v5494_v6 = vpop.f32.mrf.mxu0  ;;  %v12083_v33 = vpop.f32.mrf.mxu3  ;;  %v980_v36 = vld [vmem:[%s10758_s27 + $0x2e8] sm:$0xff] }
 0x6c9   : > { %5757 = vmatpush.bf16.msrb.mxu3 %v5288_v39  ;;  %v5008_v38 = vcvt.s32.f32 %v4496_v2  ;;  %v4530_v52 = vunpack.c.2.s8 %v12069_v46  ;;  %v5330_v50 = vpack.c.bf16 %v4976_v19, %v4974_v7  ;;  %v4532_v24 = vunpack.c.3.s8 %v12069_v46 }
 0x6ca   : > { %v4886_v31 = vcvt.s32.f32 %v4374_v3  ;;  %v4888_v29 = vcvt.s32.f32 %v4376_v18  ;;  %5766 = vmatpush.bf16.msra.mxu0 %v5314_v0  ;;  %v4426_v10 = vunpack.c.2.s8 %v956_v42  ;;  %v4428_v34 = vunpack.c.3.s8 %v956_v42 }
 0x6cb   : > { %v5346_v55 = vpack.c.bf16 %v5008_v38, %v5006_v60  ;;  %v5042_v56 = vcvt.s32.f32 %v4530_v52  ;;  %5780 = vmatpush.bf16.msra.mxu1 %v5330_v50  ;;  %v5044_v9 = vcvt.s32.f32 %v4532_v24  ;;  %v4458_v48 = vunpack.c.2.s8 %v964_v28  ;;  %v954_v60 = vld [vmem:[%s10758_s27 + $0x218] sm:$0xff] }
 0x6cc   : > { %v5286_v62 = vpack.c.bf16 %v4888_v29, %v4886_v31  ;;  %v4460_v37 = vunpack.c.3.s8 %v964_v28  ;;  %v4938_v14 = vcvt.s32.f32 %v4426_v10  ;;  %v4940_v16 = vcvt.s32.f32 %v4428_v34  ;;  %v962_v31 = vld [vmem:[%s10758_s27 + $0x258] sm:$0xff] }
 0x6cd   : > { %5794 = vmatpush.bf16.msra.mxu2 %v5346_v55  ;;  %v4490_v25 = vunpack.c.2.s8 %v972_v35  ;;  %v4492_v4 = vunpack.c.3.s8 %v972_v35  ;;  %v5364_v43 = vpack.c.bf16 %v5044_v9, %v5042_v56  ;;  %v4970_v23 = vcvt.s32.f32 %v4458_v48  ;;  %v5522_v56 = vpop.f32.mrf.mxu2 }
 0x6ce   : > { %5758 = vmatpush.bf16.msrb.mxu3 %v5286_v62  ;;  %v4972_v58 = vcvt.s32.f32 %v4460_v37  ;;  %v5495_v63 = vadd.f32 %v5494_v6, %v12054_v12  ;;  %v5312_v44 = vpack.c.bf16 %v4940_v16, %v4938_v14  ;;  %v4526_v26 = vunpack.c.0.s8 %v12069_v46  ;;  %v970_v62 = vld [vmem:[%s10758_s27 + $0x298] sm:$0xff] }
 0x6cf   : > { %v5002_v59 = vcvt.s32.f32 %v4490_v25  ;;  %v5004_v45 = vcvt.s32.f32 %v4492_v4  ;;  %v4528_v15 = vunpack.c.1.s8 %v12069_v46  ;;  %v4422_v39 = vunpack.c.0.s8 %v956_v42 }
 0x6d0   : > { %v5328_v51 = vpack.c.bf16 %v4972_v58, %v4970_v23  ;;  %v5509_v41 = vadd.f32 %v5508_v8, %v5495_v63  ;;  %5767 = vmatpush.bf16.msra.mxu0 %v5312_v44  ;;  %v5038_v12 = vcvt.s32.f32 %v4526_v26  ;;  %v4424_v2 = vunpack.c.1.s8 %v956_v42  ;;  %v5536_v58 = vpop.f32.mrf.mxu3 }
 0x6d1   : > { %v5344_v1 = vpack.c.bf16 %v5004_v45, %v5002_v59  ;;  %5759 = vmatmul.bf16.vlgmr.msrb.gmra.mxu3 %v11735_v40  ;;  %v4454_v7 = vunpack.c.0.s8 %v964_v28  ;;  %v5040_v19 = vcvt.s32.f32 %v4528_v15  ;;  %v4934_v3 = vcvt.s32.f32 %v4422_v39 }
 0x6d2   : > { %5807 = vmatpush.bf16.msra.mxu3 %v5364_v43  ;;  %5781 = vmatpush.bf16.msra.mxu1 %v5328_v51  ;;  %v4456_v18 = vunpack.c.1.s8 %v964_v28  ;;  %v4486_v0 = vunpack.c.0.s8 %v972_v35  ;;  %v4936_v38 = vcvt.s32.f32 %v4424_v2  ;;  %v4488_v52 = vunpack.c.1.s8 %v972_v35 }
 0x6d3   : > { %5795 = vmatpush.bf16.msra.mxu2 %v5344_v1  ;;  %v4966_v46 = vcvt.s32.f32 %v4454_v7  ;;  %v4522_v50 = vunpack.c.2.s8 %v980_v36  ;;  %v5362_v29 = vpack.c.bf16 %v5040_v19, %v5038_v12  ;;  %v4524_v40 = vunpack.c.3.s8 %v980_v36 }
 0x6d4   : > { %v4968_v24 = vcvt.s32.f32 %v4456_v18  ;;  %v4998_v55 = vcvt.s32.f32 %v4486_v0  ;;  %v5310_v42 = vpack.c.bf16 %v4936_v38, %v4934_v3  ;;  %v5000_v10 = vcvt.s32.f32 %v4488_v52  ;;  %v978_v3 = vld [vmem:[%s10758_s27 + $0x2d8] sm:$0xff]  ;;  %v952_v52 = vld [vmem:[%s10758_s27 + $0x208] sm:$0xff] }
 0x6d5   : > { %v5034_v34 = vcvt.s32.f32 %v4522_v50  ;;  %v4418_v6 = vunpack.c.2.s8 %v954_v60  ;;  %v5036_v9 = vcvt.s32.f32 %v4524_v40  ;;  %v4420_v48 = vunpack.c.3.s8 %v954_v60 }
 0x6d6   : > { %5808 = vmatpush.bf16.msra.mxu3 %v5362_v29  ;;  %v5326_v28 = vpack.c.bf16 %v4968_v24, %v4966_v46  ;;  %v4450_v37 = vunpack.c.2.s8 %v962_v31  ;;  %5768 = vmatpush.bf16.msra.mxu0 %v5310_v42  ;;  %v5342_v14 = vpack.c.bf16 %v5000_v10, %v4998_v55  ;;  %v4452_v16 = vunpack.c.3.s8 %v962_v31  ;;  %v960_v55 = vld [vmem:[%s10758_s27 + $0x248] sm:$0xff] }
 0x6d7   : > { %v4930_v35 = vcvt.s32.f32 %v4418_v6  ;;  %v5523_v25 = vadd.f32 %v5522_v56, %v5509_v41  ;;  %v5360_v4 = vpack.c.bf16 %v5036_v9, %v5034_v34  ;;  %v4932_v43 = vcvt.s32.f32 %v4420_v48  ;;  %v968_v9 = vld [vmem:[%s10758_s27 + $0x288] sm:$0xff] }
 0x6d8   : > { %5782 = vmatpush.bf16.msra.mxu1 %v5326_v28  ;;  %v4962_v23 = vcvt.s32.f32 %v4450_v37  ;;  %v4482_v63 = vunpack.c.2.s8 %v970_v62  ;;  %5796 = vmatpush.bf16.msra.mxu2 %v5342_v14  ;;  %v4964_v44 = vcvt.s32.f32 %v4452_v16  ;;  %v4484_v45 = vunpack.c.3.s8 %v970_v62 }
 0x6d9   : > { %v12091_v59 = vadd.f32 %v5536_v58, %v5523_v25  ;;  %v5308_v8 = vpack.c.bf16 %v4932_v43, %v4930_v35  ;;  %v4518_v51 = vunpack.c.0.s8 %v980_v36  ;;  %v4520_v15 = vunpack.c.1.s8 %v980_v36 }
 0x6da   : > { %5809 = vmatpush.bf16.msra.mxu3 %v5360_v4  ;;  %v4994_v26 = vcvt.s32.f32 %v4482_v63  ;;  %v5324_v39 = vpack.c.bf16 %v4964_v44, %v4962_v23  ;;  %v4996_v41 = vcvt.s32.f32 %v4484_v45  ;;  %v4414_v1 = vunpack.c.0.s8 %v954_v60 }
 0x6db   : > { %5769 = vmatpush.bf16.msra.mxu0 %v5308_v8  ;;  %v5030_v12 = vcvt.s32.f32 %v4518_v51  ;;  %v5032_v2 = vcvt.s32.f32 %v4520_v15  ;;  %v4416_v7 = vunpack.c.1.s8 %v954_v60  ;;  %v4446_v19 = vunpack.c.0.s8 %v962_v31 }
 0x6dc   : > { %5783 = vmatpush.bf16.msra.mxu1 %v5324_v39  ;;  %v5340_v18 = vpack.c.bf16 %v4996_v41, %v4994_v26  ;;  %v4926_v0 = vcvt.s32.f32 %v4414_v1  ;;  %v4448_v38 = vunpack.c.1.s8 %v962_v31  ;;  %v4478_v46 = vunpack.c.0.s8 %v970_v62 }
 0x6dd   : > { %v5358_v50 = vpack.c.bf16 %v5032_v2, %v5030_v12  ;;  %v4928_v29 = vcvt.s32.f32 %v4416_v7  ;;  %v4958_v36 = vcvt.s32.f32 %v4446_v19  ;;  %v4480_v24 = vunpack.c.1.s8 %v970_v62  ;;  %v990_v12 = vld [vmem:[%s10758_s27 + $0x338] sm:$0xff] }
 0x6de   : > { %5797 = vmatpush.bf16.msra.mxu2 %v5340_v18  ;;  %v4960_v40 = vcvt.s32.f32 %v4448_v38  ;;  %v4990_v56 = vcvt.s32.f32 %v4478_v46  ;;  %v4514_v42 = vunpack.c.2.s8 %v978_v3  ;;  %v4516_v10 = vunpack.c.3.s8 %v978_v3 }
 0x6df   : > { %5810 = vmatpush.bf16.msra.mxu3 %v5358_v50  ;;  %v5306_v60 = vpack.c.bf16 %v4928_v29, %v4926_v0  ;;  %v4992_v34 = vcvt.s32.f32 %v4480_v24  ;;  %v4410_v6 = vunpack.c.2.s8 %v952_v52  ;;  %v4412_v28 = vunpack.c.3.s8 %v952_v52 }
 0x6e0   : > { %v5322_v31 = vpack.c.bf16 %v4960_v40, %v4958_v36  ;;  %v5026_v48 = vcvt.s32.f32 %v4514_v42  ;;  %v5028_v37 = vcvt.s32.f32 %v4516_v10  ;;  %v4442_v14 = vunpack.c.2.s8 %v960_v55 }
 0x6e1   : > { %5770 = vmatpush.bf16.msra.mxu0 %v5306_v60  ;;  %v5338_v35 = vpack.c.bf16 %v4992_v34, %v4990_v56  ;;  %v4922_v16 = vcvt.s32.f32 %v4410_v6  ;;  %v4924_v62 = vcvt.s32.f32 %v4412_v28  ;;  %v4444_v25 = vunpack.c.3.s8 %v960_v55  ;;  %v1006_v56 = vld [vmem:[%s10758_s27 + $0x3b8] sm:$0xff]  ;;  %v976_v34 = vld [vmem:[%s10758_s27 + $0x2c8] sm:$0xff] }
 0x6e2   : > { %5784 = vmatpush.bf16.msra.mxu1 %v5322_v31  ;;  %v5356_v4 = vpack.c.bf16 %v5028_v37, %v5026_v48  ;;  %v4954_v43 = vcvt.s32.f32 %v4442_v14  ;;  %v4474_v23 = vunpack.c.2.s8 %v968_v9  ;;  %v4476_v44 = vunpack.c.3.s8 %v968_v9 }
 0x6e3   : > { %5798 = vmatpush.bf16.msra.mxu2 %v5338_v35  ;;  %v5304_v58 = vpack.c.bf16 %v4924_v62, %v4922_v16  ;;  %v4956_v63 = vcvt.s32.f32 %v4444_v25  ;;  %v4510_v45 = vunpack.c.0.s8 %v978_v3  ;;  %v4512_v26 = vunpack.c.1.s8 %v978_v3  ;;  %v998_v3 = vld [vmem:[%s10758_s27 + $0x378] sm:$0xff]  ;;  %v12101_v35 = vpop.f32.mrf.mxu0 }
 0x6e4   : > { %5811 = vmatpush.bf16.msra.mxu3 %v5356_v4  ;;  %v4986_v8 = vcvt.s32.f32 %v4474_v23  ;;  %v4406_v51 = vunpack.c.0.s8 %v952_v52  ;;  %v4988_v39 = vcvt.s32.f32 %v4476_v44  ;;  %v4408_v1 = vunpack.c.1.s8 %v952_v52 }
 0x6e5   : > { %5771 = vmatpush.bf16.msra.mxu0 %v5304_v58  ;;  %v5320_v15 = vpack.c.bf16 %v4956_v63, %v4954_v43  ;;  %v5022_v41 = vcvt.s32.f32 %v4510_v45  ;;  %v5024_v2 = vcvt.s32.f32 %v4512_v26  ;;  %v4438_v19 = vunpack.c.0.s8 %v960_v55 }
 0x6e6   : > { %v4918_v7 = vcvt.s32.f32 %v4406_v51  ;;  %v4440_v18 = vunpack.c.1.s8 %v960_v55  ;;  %v5336_v0 = vpack.c.bf16 %v4988_v39, %v4986_v8  ;;  %v4920_v38 = vcvt.s32.f32 %v4408_v1  ;;  %v12106_v1 = vld [vmem:[%s10758_s27 + $0x3f8] sm:$0xff] }
 0x6e7   : > { %5785 = vmatpush.bf16.msra.mxu1 %v5320_v15  ;;  %v4470_v46 = vunpack.c.0.s8 %v968_v9  ;;  %v4472_v50 = vunpack.c.1.s8 %v968_v9  ;;  %v5354_v29 = vpack.c.bf16 %v5024_v2, %v5022_v41  ;;  %v4950_v36 = vcvt.s32.f32 %v4438_v19  ;;  %v12108_v2 = vpop.f32.mrf.mxu1 }
 0x6e8   : > { %v4952_v24 = vcvt.s32.f32 %v4440_v18  ;;  %v4562_v40 = vunpack.c.2.s8 %v990_v12  ;;  %5799 = vmatpush.bf16.msra.mxu2 %v5336_v0  ;;  %v5302_v52 = vpack.c.bf16 %v4920_v38, %v4918_v7  ;;  %v4564_v60 = vunpack.c.3.s8 %v990_v12 }
 0x6e9   : > { %v4982_v42 = vcvt.s32.f32 %v4470_v46  ;;  %v4984_v10 = vcvt.s32.f32 %v4472_v50  ;;  %5812 = vmatpush.bf16.msra.mxu3 %v5354_v29  ;;  %v4594_v28 = vunpack.c.2.s8 %v998_v3  ;;  %v4596_v31 = vunpack.c.3.s8 %v998_v3  ;;  %v988_v46 = vld [vmem:[%s10758_s27 + $0x328] sm:$0xff] }
 0x6ea   : > { %v5318_v55 = vpack.c.bf16 %v4952_v24, %v4950_v36  ;;  %v5074_v6 = vcvt.s32.f32 %v4562_v40  ;;  %5772 = vmatpush.bf16.msra.mxu0 %v5302_v52  ;;  %v5076_v9 = vcvt.s32.f32 %v4564_v60  ;;  %v4626_v37 = vunpack.c.2.s8 %v1006_v56  ;;  %v996_v24 = vld [vmem:[%s10758_s27 + $0x368] sm:$0xff] }
 0x6eb   : > { %v5334_v48 = vpack.c.bf16 %v4984_v10, %v4982_v42  ;;  %v4628_v14 = vunpack.c.3.s8 %v1006_v56  ;;  %v5106_v16 = vcvt.s32.f32 %v4594_v28  ;;  %v5108_v62 = vcvt.s32.f32 %v4596_v31  ;;  %v12116_v28 = vpop.f32.mrf.mxu2 }
 0x6ec   : > { %5786 = vmatpush.bf16.msra.mxu1 %v5318_v55  ;;  %v4506_v25 = vunpack.c.2.s8 %v976_v34  ;;  %v4508_v4 = vunpack.c.3.s8 %v976_v34  ;;  %v5380_v43 = vpack.c.bf16 %v5076_v9, %v5074_v6  ;;  %v5138_v23 = vcvt.s32.f32 %v4626_v37 }
 0x6ed   : > { %5800 = vmatpush.bf16.msra.mxu2 %v5334_v48  ;;  %v5140_v58 = vcvt.s32.f32 %v4628_v14  ;;  %v4558_v63 = vunpack.c.0.s8 %v990_v12  ;;  %v5396_v44 = vpack.c.bf16 %v5108_v62, %v5106_v16  ;;  %5773 = vmatmul.bf16.vlgmr.msra.gmra.mxu0 %v11813_v13  ;;  %v4560_v26 = vunpack.c.1.s8 %v990_v12 }
 0x6ee   : > { %v5018_v45 = vcvt.s32.f32 %v4506_v25  ;;  %v5020_v8 = vcvt.s32.f32 %v4508_v4  ;;  %5821 = vmatpush.bf16.msrb.mxu0 %v5380_v43  ;;  %v4590_v39 = vunpack.c.0.s8 %v998_v3  ;;  %v4592_v41 = vunpack.c.1.s8 %v998_v3 }
 0x6ef   : > { %v5412_v51 = vpack.c.bf16 %v5140_v58, %v5138_v23  ;;  %5787 = vmatmul.bf16.vlgmr.msra.gmra.mxu1 %v11824_v11  ;;  %v5070_v15 = vcvt.s32.f32 %v4558_v63  ;;  %v5072_v13 = vcvt.s32.f32 %v4560_v26  ;;  %v4622_v19 = vunpack.c.0.s8 %v1006_v56 }
 0x6f0   : > { %5835 = vmatpush.bf16.msrb.mxu1 %v5396_v44  ;;  %v5352_v7 = vpack.c.bf16 %v5020_v8, %v5018_v45  ;;  %5801 = vmatmul.bf16.vlgmr.msra.gmra.mxu2 %v11881_v21  ;;  %v4624_v12 = vunpack.c.1.s8 %v1006_v56  ;;  %v5102_v18 = vcvt.s32.f32 %v4590_v39  ;;  %v5104_v11 = vcvt.s32.f32 %v4592_v41  ;;  %v1004_v56 = vld [vmem:[%s10758_s27 + $0x3a8] sm:$0xff]  ;;  %v5564_v8 = vpop.f32.mrf.mxu1 }
 0x6f1   : > { %5849 = vmatpush.bf16.msrb.mxu2 %v5412_v51  ;;  %v4502_v0 = vunpack.c.0.s8 %v976_v34  ;;  %v4504_v38 = vunpack.c.1.s8 %v976_v34  ;;  %v5378_v50 = vpack.c.bf16 %v5072_v13, %v5070_v15  ;;  %v5134_v3 = vcvt.s32.f32 %v4622_v19  ;;  %v5550_v34 = vpop.f32.mrf.mxu0 }
 0x6f2   : > { %5813 = vmatpush.bf16.msra.mxu3 %v5352_v7  ;;  %v5136_v29 = vcvt.s32.f32 %v4624_v12  ;;  %v4658_v36 = vunpack.c.2.s8 %v12106_v1  ;;  %v5394_v40 = vpack.c.bf16 %v5104_v11, %v5102_v18  ;;  %v4660_v42 = vunpack.c.3.s8 %v12106_v1  ;;  %v1012_v7 = vld [vmem:[%s10758_s27 + $0x3e8] sm:$0xff] }
 0x6f3   : > { %v5014_v52 = vcvt.s32.f32 %v4502_v0  ;;  %v5016_v21 = vcvt.s32.f32 %v4504_v38  ;;  %5822 = vmatpush.bf16.msrb.mxu0 %v5378_v50  ;;  %v4554_v55 = vunpack.c.2.s8 %v988_v46  ;;  %v4556_v6 = vunpack.c.3.s8 %v988_v46  ;;  %v986_v50 = vld [vmem:[%s10758_s27 + $0x318] sm:$0xff] }
 0x6f4   : > { %v5410_v10 = vpack.c.bf16 %v5136_v29, %v5134_v3  ;;  %v5170_v60 = vcvt.s32.f32 %v4658_v36  ;;  %5836 = vmatpush.bf16.msrb.mxu1 %v5394_v40  ;;  %v5172_v48 = vcvt.s32.f32 %v4660_v42  ;;  %v4586_v9 = vunpack.c.2.s8 %v996_v24  ;;  %v12124_v3 = vpop.f32.mrf.mxu3 }
 0x6f5   : > { %v5350_v31 = vpack.c.bf16 %v5016_v21, %v5014_v52  ;;  %v4588_v37 = vunpack.c.3.s8 %v996_v24  ;;  %v5066_v14 = vcvt.s32.f32 %v4554_v55  ;;  %v5068_v16 = vcvt.s32.f32 %v4556_v6 }
 0x6f6   : > { %5850 = vmatpush.bf16.msrb.mxu2 %v5410_v10  ;;  %v4618_v62 = vunpack.c.2.s8 %v1004_v56  ;;  %v4620_v25 = vunpack.c.3.s8 %v1004_v56  ;;  %v5428_v4 = vpack.c.bf16 %v5172_v48, %v5170_v60  ;;  %v5098_v43 = vcvt.s32.f32 %v4586_v9  ;;  %v5578_v10 = vpop.f32.mrf.mxu2 }
 0x6f7   : > { %5814 = vmatpush.bf16.msra.mxu3 %v5350_v31  ;;  %v5100_v23 = vcvt.s32.f32 %v4588_v37  ;;  %v5551_v58 = vadd.f32 %v5550_v34, %v12091_v59  ;;  %v5376_v63 = vpack.c.bf16 %v5068_v16, %v5066_v14  ;;  %v4654_v26 = vunpack.c.0.s8 %v12106_v1  ;;  %v1002_v34 = vld [vmem:[%s10758_s27 + $0x398] sm:$0xff] }
 0x6f8   : > { %v5130_v44 = vcvt.s32.f32 %v4618_v62  ;;  %v5132_v45 = vcvt.s32.f32 %v4620_v25  ;;  %v4656_v39 = vunpack.c.1.s8 %v12106_v1  ;;  %v4550_v41 = vunpack.c.0.s8 %v988_v46 }
 0x6f9   : > { %v5392_v51 = vpack.c.bf16 %v5100_v23, %v5098_v43  ;;  %v5565_v15 = vadd.f32 %v5564_v8, %v5551_v58  ;;  %5823 = vmatpush.bf16.msrb.mxu0 %v5376_v63  ;;  %v5166_v59 = vcvt.s32.f32 %v4654_v26  ;;  %v4552_v19 = vunpack.c.1.s8 %v988_v46 }
 0x6fa   : > { %5815 = vmatmul.bf16.vlgmr.msra.gmra.mxu3 %v11896_v47  ;;  %v5408_v13 = vpack.c.bf16 %v5132_v45, %v5130_v44  ;;  %v4582_v12 = vunpack.c.0.s8 %v996_v24  ;;  %v5168_v18 = vcvt.s32.f32 %v4656_v39  ;;  %v5062_v11 = vcvt.s32.f32 %v4550_v41  ;;  %v994_v47 = vld [vmem:[%s10758_s27 + $0x358] sm:$0xff] }
 0x6fb   : > { %5863 = vmatpush.bf16.msrb.mxu3 %v5428_v4  ;;  %5837 = vmatpush.bf16.msrb.mxu1 %v5392_v51  ;;  %v4584_v0 = vunpack.c.1.s8 %v996_v24  ;;  %v4614_v38 = vunpack.c.0.s8 %v1004_v56  ;;  %v5064_v1 = vcvt.s32.f32 %v4552_v19  ;;  %v4616_v36 = vunpack.c.1.s8 %v1004_v56 }
 0x6fc   : > { %5851 = vmatpush.bf16.msrb.mxu2 %v5408_v13  ;;  %v5094_v29 = vcvt.s32.f32 %v4582_v12  ;;  %v4650_v40 = vunpack.c.2.s8 %v1012_v7  ;;  %v5426_v52 = vpack.c.bf16 %v5168_v18, %v5166_v59  ;;  %v4652_v46 = vunpack.c.3.s8 %v1012_v7 }
 0x6fd   : > { %v5096_v21 = vcvt.s32.f32 %v4584_v0  ;;  %v5126_v42 = vcvt.s32.f32 %v4614_v38  ;;  %v5374_v60 = vpack.c.bf16 %v5064_v1, %v5062_v11  ;;  %v5128_v55 = vcvt.s32.f32 %v4616_v36  ;;  %v1010_v11 = vld [vmem:[%s10758_s27 + $0x3d8] sm:$0xff]  ;;  %v984_v36 = vld [vmem:[%s10758_s27 + $0x308] sm:$0xff] }
 0x6fe   : > { %v5162_v6 = vcvt.s32.f32 %v4650_v40  ;;  %v4546_v24 = vunpack.c.2.s8 %v986_v50  ;;  %v5164_v48 = vcvt.s32.f32 %v4652_v46  ;;  %v4548_v9 = vunpack.c.3.s8 %v986_v50 }
 0x6ff   : > { %5864 = vmatpush.bf16.msrb.mxu3 %v5426_v52  ;;  %v5390_v31 = vpack.c.bf16 %v5096_v21, %v5094_v29  ;;  %v4578_v37 = vunpack.c.2.s8 %v994_v47  ;;  %5824 = vmatpush.bf16.msrb.mxu0 %v5374_v60  ;;  %v5406_v14 = vpack.c.bf16 %v5128_v55, %v5126_v42  ;;  %v4580_v16 = vunpack.c.3.s8 %v994_v47  ;;  %v992_v42 = vld [vmem:[%s10758_s27 + $0x348] sm:$0xff] }
 0x700   : > { %v5058_v56 = vcvt.s32.f32 %v4546_v24  ;;  %v5579_v62 = vadd.f32 %v5578_v10, %v5565_v15  ;;  %v5424_v25 = vpack.c.bf16 %v5164_v48, %v5162_v6  ;;  %v5060_v4 = vcvt.s32.f32 %v4548_v9  ;;  %v5592_v15 = vpop.f32.mrf.mxu3 }
 0x701   : > { %5838 = vmatpush.bf16.msrb.mxu1 %v5390_v31  ;;  %v5090_v43 = vcvt.s32.f32 %v4578_v37  ;;  %v4610_v23 = vunpack.c.2.s8 %v1002_v34  ;;  %5852 = vmatpush.bf16.msrb.mxu2 %v5406_v14  ;;  %v5092_v58 = vcvt.s32.f32 %v4580_v16  ;;  %v4612_v63 = vunpack.c.3.s8 %v1002_v34  ;;  %v1000_v31 = vld [vmem:[%s10758_s27 + $0x388] sm:$0xff] }
 0x702   : > { %v4646_v44 = vunpack.c.0.s8 %v1012_v7  ;;  %v5372_v45 = vpack.c.bf16 %v5060_v4, %v5058_v56  ;;  %v4648_v26 = vunpack.c.1.s8 %v1012_v7  ;;  %v4542_v51 = vunpack.c.0.s8 %v986_v50  ;;  %v12136_v4 = vpop.f32.mrf.mxu1 }
 0x703   : > { %5865 = vmatpush.bf16.msrb.mxu3 %v5424_v25  ;;  %v5122_v8 = vcvt.s32.f32 %v4610_v23  ;;  %v5388_v39 = vpack.c.bf16 %v5092_v58, %v5090_v43  ;;  %v5124_v41 = vcvt.s32.f32 %v4612_v63  ;;  %v4544_v19 = vunpack.c.1.s8 %v986_v50 }
 0x704   : > { %v5158_v13 = vcvt.s32.f32 %v4646_v44  ;;  %5825 = vmatpush.bf16.msrb.mxu0 %v5372_v45  ;;  %v5160_v59 = vcvt.s32.f32 %v4648_v26  ;;  %v5054_v12 = vcvt.s32.f32 %v4542_v51  ;;  %v4574_v18 = vunpack.c.0.s8 %v994_v47  ;;  %v12138_v26 = vpop.f32.mrf.mxu2 }
 0x705   : > { %5839 = vmatpush.bf16.msrb.mxu1 %v5388_v39  ;;  %v5404_v0 = vpack.c.bf16 %v5124_v41, %v5122_v8  ;;  %v4576_v38 = vunpack.c.1.s8 %v994_v47  ;;  %v4606_v1 = vunpack.c.0.s8 %v1002_v34  ;;  %v4608_v29 = vunpack.c.1.s8 %v1002_v34  ;;  %v12134_v34 = vpop.f32.mrf.mxu0 }
 0x706   : > { %v5422_v7 = vpack.c.bf16 %v5160_v59, %v5158_v13  ;;  %v5056_v40 = vcvt.s32.f32 %v4544_v19  ;;  %v5086_v52 = vcvt.s32.f32 %v4574_v18  ;;  %v12130_v21 = vadd.f32 %v5592_v15, %v5579_v62  ;;  %v1008_v18 = vld [vmem:[%s10758_s27 + $0x3c8] sm:$0xff] }
 0x707   : > { %5853 = vmatpush.bf16.msrb.mxu2 %v5404_v0  ;;  %v5088_v46 = vcvt.s32.f32 %v4576_v38  ;;  %v5118_v10 = vcvt.s32.f32 %v4606_v1  ;;  %v5120_v50 = vcvt.s32.f32 %v4608_v29  ;;  %v4642_v60 = vunpack.c.2.s8 %v1010_v11 }
 0x708   : > { %5866 = vmatpush.bf16.msrb.mxu3 %v5422_v7  ;;  %v5370_v55 = vpack.c.bf16 %v5056_v40, %v5054_v12  ;;  %v4644_v6 = vunpack.c.3.s8 %v1010_v11  ;;  %v4538_v24 = vunpack.c.2.s8 %v984_v36  ;;  %v4540_v47 = vunpack.c.3.s8 %v984_v36 }
 0x709   : > { %v5386_v48 = vpack.c.bf16 %v5088_v46, %v5086_v52  ;;  %v5402_v9 = vpack.c.bf16 %v5120_v50, %v5118_v10  ;;  %v5154_v37 = vcvt.s32.f32 %v4642_v60  ;;  %v4570_v14 = vunpack.c.2.s8 %v992_v42  ;;  %v12141_v50 = vpop.f32.mrf.mxu3 }
 0x70a   : > { %5826 = vmatpush.bf16.msrb.mxu0 %v5370_v55  ;;  %v5156_v56 = vcvt.s32.f32 %v4644_v6  ;;  %v5050_v16 = vcvt.s32.f32 %v4538_v24  ;;  %v5052_v62 = vcvt.s32.f32 %v4540_v47  ;;  %v4572_v25 = vunpack.c.3.s8 %v992_v42 }
 0x70b   : > { %5840 = vmatpush.bf16.msrb.mxu1 %v5386_v48  ;;  %5854 = vmatpush.bf16.msrb.mxu2 %v5402_v9  ;;  %v5082_v43 = vcvt.s32.f32 %v4570_v14  ;;  %v4602_v23 = vunpack.c.2.s8 %v1000_v31  ;;  %v4604_v58 = vunpack.c.3.s8 %v1000_v31  ;;  %v4638_v8 = vunpack.c.0.s8 %v1010_v11  ;;  %v5620_v14 = vpop.f32.mrf.mxu1 }
 0x70c   : > { %v5420_v63 = vpack.c.bf16 %v5156_v56, %v5154_v37  ;;  %v5368_v44 = vpack.c.bf16 %v5052_v62, %v5050_v16  ;;  %v5084_v45 = vcvt.s32.f32 %v4572_v25  ;;  %v4640_v41 = vunpack.c.1.s8 %v1010_v11 }
 0x70d   : > { %v5114_v51 = vcvt.s32.f32 %v4602_v23  ;;  %v5116_v39 = vcvt.s32.f32 %v4604_v58  ;;  %v4534_v13 = vunpack.c.0.s8 %v984_v36  ;;  %v5150_v59 = vcvt.s32.f32 %v4638_v8  ;;  %v5606_v55 = vpop.f32.mrf.mxu0 }
 0x70e   : > { %5867 = vmatpush.bf16.msrb.mxu3 %v5420_v63  ;;  %5827 = vmatpush.bf16.msrb.mxu0 %v5368_v44  ;;  %v5384_v15 = vpack.c.bf16 %v5084_v45, %v5082_v43  ;;  %v4536_v19 = vunpack.c.1.s8 %v984_v36  ;;  %v4566_v12 = vunpack.c.0.s8 %v992_v42  ;;  %v5152_v38 = vcvt.s32.f32 %v4640_v41 }
 0x70f   : > { %v5400_v0 = vpack.c.bf16 %v5116_v39, %v5114_v51  ;;  %v5046_v1 = vcvt.s32.f32 %v4534_v13  ;;  %v4568_v29 = vunpack.c.1.s8 %v992_v42  ;;  %v4598_v52 = vunpack.c.0.s8 %v1000_v31 }
 0x710   : > { %5841 = vmatpush.bf16.msrb.mxu1 %v5384_v15  ;;  %v5048_v7 = vcvt.s32.f32 %v4536_v19  ;;  %v5078_v40 = vcvt.s32.f32 %v4566_v12  ;;  %v4600_v46 = vunpack.c.1.s8 %v1000_v31  ;;  %v5418_v10 = vpack.c.bf16 %v5152_v38, %v5150_v59 }
 0x711   : > { %5855 = vmatpush.bf16.msrb.mxu2 %v5400_v0  ;;  %v5080_v11 = vcvt.s32.f32 %v4568_v29  ;;  %v4634_v60 = vunpack.c.2.s8 %v1008_v18  ;;  %v5110_v36 = vcvt.s32.f32 %v4598_v52  ;;  %v4636_v47 = vunpack.c.3.s8 %v1008_v18  ;;  %v5634_v43 = vpop.f32.mrf.mxu2 }
 0x712   : > { %v5366_v6 = vpack.c.bf16 %v5048_v7, %v5046_v1  ;;  %v5112_v24 = vcvt.s32.f32 %v4600_v46  ;;  %5868 = vmatpush.bf16.msrb.mxu3 %v5418_v10  ;;  %v4630_v42 = vunpack.c.0.s8 %v1008_v18  ;;  %v4632_v37 = vunpack.c.1.s8 %v1008_v18 }
 0x713   : > { %v5382_v48 = vpack.c.bf16 %v5080_v11, %v5078_v40  ;;  %v5146_v9 = vcvt.s32.f32 %v4634_v60  ;;  %v5148_v31 = vcvt.s32.f32 %v4636_v47  ;;  %v5607_v16 = vadd.f32 %v5606_v55, %v12130_v21  ;;  %v12154_v39 = vpop.f32.mrf.mxu1 }
 0x714   : > { %5828 = vmatpush.bf16.msrb.mxu0 %v5366_v6  ;;  %v5398_v56 = vpack.c.bf16 %v5112_v24, %v5110_v36  ;;  %v5142_v62 = vcvt.s32.f32 %v4630_v42  ;;  %v5144_v25 = vcvt.s32.f32 %v4632_v37  ;;  %v5455_v7 = vadd.f32 %v12071_v30, %v12064_v61 }
 0x715   : > { %5842 = vmatpush.bf16.msrb.mxu1 %v5382_v48  ;;  %v5416_v23 = vpack.c.bf16 %v5148_v31, %v5146_v9  ;;  %v5621_v58 = vadd.f32 %v5620_v14, %v5607_v16  ;;  %v12150_v21 = vpop.f32.mrf.mxu0 }
 0x716   : > { %5856 = vmatpush.bf16.msrb.mxu2 %v5398_v56  ;;  %v5414_v63 = vpack.c.bf16 %v5144_v25, %v5142_v62  ;;  %v5469_v52 = vadd.f32 %v12079_v22, %v5455_v7 }
 0x717   : > { %5829 = vmatmul.bf16.vlgmr.msrb.gmra.mxu0 %v11968_v32  ;;  %5869 = vmatpush.bf16.msrb.mxu3 %v5416_v23  ;;  %v5635_v44 = vadd.f32 %v5634_v43, %v5621_v58 }
 0x718   : > { %5843 = vmatmul.bf16.vlgmr.msrb.gmra.mxu1 %v11979_v5  ;;  %v5483_v55 = vadd.f32 %v12083_v33, %v5469_v52 }
 0x719   : > { %5857 = vmatmul.bf16.vlgmr.msrb.gmra.mxu2 %v12025_v27  ;;  %v12152_v51 = vpop.f32.mrf.mxu2 }
 0x71a   : > { %v5497_v24 = vadd.f32 %v12101_v35, %v5483_v55 }
 0x71b   : > { %v5648_v45 = vpop.f32.mrf.mxu3  ;;  %5870 = vmatpush.bf16.msrb.mxu3 %v5414_v63  ;;  %v5676_v13 = vpop.f32.mrf.mxu1 }
 0x71c   : > { %v12147_v8 = vadd.f32 %v5648_v45, %v5635_v44  ;;  %v5511_v61 = vadd.f32 %v12108_v2, %v5497_v24 }
 0x71d   : > { %v5662_v32 = vpop.f32.mrf.mxu0 }
 0x71e   : > { %5871 = vmatmul.bf16.vlgmr.msrb.gmra.mxu3 %v12038_v17  ;;  %v5677_v29 = vadd.f32 %v5676_v13, %v5662_v32  ;;  %v5525_v22 = vadd.f32 %v12116_v28, %v5511_v61 }
 0x720   : > { %v5539_v25 = vadd.f32 %v12124_v3, %v5525_v22 }
 0x721   : > { %v5690_v5 = vpop.f32.mrf.mxu2 }
 0x722   : > { %v5691_v40 = vadd.f32 %v5690_v5, %v5677_v29  ;;  %v5553_v35 = vadd.f32 %v12134_v34, %v5539_v25  ;;  %v12174_v29 = vld [vmem:[%s10998_s20 + $0x10] sm:$0xf] }
 0x723   : > { %v12156_v41 = vpop.f32.mrf.mxu3  ;;  %v5678_v19 = vpop.f32.mrf.mxu1 }
 0x724   : > { %v5567_v28 = vadd.f32 %v12136_v4, %v5553_v35 }
 0x725   : > { %v5664_v15 = vpop.f32.mrf.mxu0 }
 0x726   : > { %v5679_v6 = vadd.f32 %v5678_v19, %v5664_v15  ;;  %v5581_v15 = vadd.f32 %v12138_v26, %v5567_v28  ;;  %v5883_v26 = vperm.slane %v12174_v29, 1 }
 0x729   : > { %v5692_v27 = vpop.f32.mrf.mxu2 }
 0x72a   : > { %v5693_v48 = vadd.f32 %v5692_v27, %v5679_v6  ;;  %v5595_v27 = vadd.f32 %v12141_v50, %v5581_v15  ;;  %v12181_v6 = vld [vmem:[%s10998_s20 + $0x18] sm:$0xf] }
 0x72b   : > { %v5704_v59 = vpop.f32.mrf.mxu3 }
 0x72c   : > { %v5705_v11 = vadd.f32 %v5704_v59, %v5691_v40 }
 0x733   : > { %v5706_v18 = vpop.f32.mrf.mxu3 }
 0x734   : > { %v5707_v14 = vadd.f32 %v5706_v18, %v5693_v48 }
 0x741   : > { %v5718_v12 = vpop.f32.mrf.mxu0 }
 0x742   : > { %v5719_v36 = vadd.f32 %v5718_v12, %v5705_v11  ;;  %v10565_v12 = vld [vmem:[%s10998_s20 + $0x20] sm:$0xf] }
 0x743   : > { %v5732_v0 = vpop.f32.mrf.mxu1  ;;  %v5877_v18 = vperm.slane %v10565_v12, 1 }
 0x744   : > { %v5733_v37 = vadd.f32 %v5732_v0, %v5719_v36 }
 0x745   : > { %v5879_v50 = vmul.f32 %v5877_v18, %v12147_v8 }
 0x747   : > { %v5885_v36 = vadd.f32 %v5883_v26, %v5879_v50  ;;  %v10254_v50 = vld [vmem:[%s10772_s25 + $0x324] sm:$0xf] }
 0x749   : > { %v5720_v17 = vpop.f32.mrf.mxu0 }
 0x74a   : > { %v5746_v38 = vpop.f32.mrf.mxu2  ;;  %v5721_v31 = vadd.f32 %v5720_v17, %v5707_v14 }
 0x74b   : > { %v5734_v46 = vpop.f32.mrf.mxu1  ;;  %v5747_v30 = vadd.f32 %v5746_v38, %v5733_v37  ;;  %v5609_v38 = vadd.f32 %v12150_v21, %v5595_v27 }
 0x74c   : > { %v5735_v43 = vadd.f32 %v5734_v46, %v5721_v31  ;;  %v10567_v46 = vld [vmem:[%s10998_s20 + $0x28] sm:$0xf] }
 0x752   : > { %v5748_v10 = vpop.f32.mrf.mxu2 }
 0x753   : > { %v5749_v63 = vadd.f32 %v5748_v10, %v5735_v43  ;;  %v5878_v10 = vperm.slane %v10567_v46, 1  ;;  %v9500_v43 = vld [vmem:[%s10772_s25 + $0x7a0] sm:$0xf] }
 0x754   : > { %v5760_v1 = vpop.f32.mrf.mxu3 }
 0x755   : > { %v5761_v16 = vadd.f32 %v5760_v1, %v5747_v30  ;;  %v5623_v1 = vadd.f32 %v12154_v39, %v5609_v38  ;;  %v5884_v39 = vperm.slane %v12181_v6, 1 }
 0x75c   : > { %v5762_v47 = vpop.f32.mrf.mxu3 }
 0x75d   : > { %v5763_v2 = vadd.f32 %v5762_v47, %v5749_v63  ;;  %v9438_v63 = vld [vmem:[%s10772_s25 + $0x3e0] sm:$0xf0] }
 0x76a   : > { %v5774_v60 = vpop.f32.mrf.mxu0 }
 0x76b   : > { %v5775_v33 = vadd.f32 %v5774_v60, %v5761_v16  ;;  %v5637_v60 = vadd.f32 %v12152_v51, %v5623_v1  ;;  %v5889_v51 = vadd.f32 %v5885_v36, %v11269_v54  ;;  %v9436_v54 = vld [vmem:[%s10772_s25 + $0x3a0] sm:$0xf] }
 0x76c   : > { %v5788_v9 = vpop.f32.mrf.mxu1  ;;  %v9492_v1 = vld [vmem:[%s10772_s25 + $0x720] sm:$0xf] }
 0x76d   : > { %v5789_v44 = vadd.f32 %v5788_v9, %v5775_v33  ;;  %v5651_v24 = vadd.f32 %v12156_v41, %v5637_v60 }
 0x76f   : > { %v5881_v37 = vmul.f32 %v5877_v18, %v5651_v24  ;;  %v10374_v24 = vld [vmem:[%s10772_s25 + $0x6dc] sm:$0xf0] }
 0x771   : > { %v5887_v31 = vadd.f32 %v5883_v26, %v5881_v37  ;;  %v9486_v37 = vld [vmem:[%s10772_s25 + $0x6e0] sm:$0xf0] }
 0x772   : > { %v5776_v56 = vpop.f32.mrf.mxu0 }
 0x773   : > { %v5802_v42 = vpop.f32.mrf.mxu2  ;;  %v5777_v5 = vadd.f32 %v5776_v56, %v5763_v2  ;;  %v10398_v2 = vld [vmem:[%s10772_s25 + $0x7a4] sm:$0xf] }
 0x774   : > { %v5790_v23 = vpop.f32.mrf.mxu1  ;;  %v5803_v32 = vadd.f32 %v5802_v42, %v5789_v44 }
 0x775   : > { %v5791_v0 = vadd.f32 %v5790_v23, %v5777_v5  ;;  %v10406_v23 = vld [vmem:[%s10772_s25 + $0x7dc] sm:$0xf0] }
 0x776   : > { %v9501_v44 = vor.u32 %v10406_v23, %v9500_v43  ;;  %v10214_v43 = vld [vmem:[%s10772_s25 + $0x1dc] sm:$0xf0] }
 0x778   : > { %6151 = vmatpush.bf16.msra.mxu1 %v9501_v44  ;;  %v9406_v44 = vld [vmem:[%s10772_s25 + $0x1e0] sm:$0xf0] }
 0x77b   : > { %v5804_v58 = vpop.f32.mrf.mxu2 }
 0x77c   : > { %v5805_v17 = vadd.f32 %v5804_v58, %v5791_v0  ;;  %v10270_v58 = vld [vmem:[%s10772_s25 + $0x3a4] sm:$0xf] }
 0x77d   : > { %v5816_v62 = vpop.f32.mrf.mxu3 }
 0x77e   : > { %v5817_v13 = vadd.f32 %v5816_v62, %v5803_v32  ;;  %v5891_v62 = vadd.f32 %v5887_v31, %v11315_v57  ;;  %v9502_v32 = vld [vmem:[%s10772_s25 + $0x7e0] sm:$0xf0] }
 0x77f   : > { %v9505_v28 = vor.u32 %v10398_v2, %v9502_v32  ;;  %v9414_v31 = vld [vmem:[%s10772_s25 + $0x260] sm:$0xf0] }
 0x780   : > { %v10334_v32 = vld [vmem:[%s10772_s25 + $0x5a4] sm:$0xf] }
 0x781   : > { %6179 = vmatpush.bf16.msra.mxu3 %v9505_v28  ;;  %v9470_v28 = vld [vmem:[%s10772_s25 + $0x5e0] sm:$0xf0] }
 0x785   : > { %v5818_v59 = vpop.f32.mrf.mxu3 }
 0x786   : > { %v5819_v40 = vadd.f32 %v5818_v59, %v5805_v17  ;;  %v9428_v17 = vld [vmem:[%s10772_s25 + $0x320] sm:$0xf] }
 0x794   : > { %v5830_v45 = vpop.f32.mrf.mxu0 }
 0x795   : > { %v5831_v3 = vadd.f32 %v5830_v45, %v5817_v13  ;;  %v5844_v34 = vpop.f32.mrf.mxu1  ;;  %v9441_v45 = vor.u32 %v10270_v58, %v9438_v63  ;;  %v10342_v58 = vld [vmem:[%s10772_s25 + $0x5dc] sm:$0xf0]  ;;  %v10206_v63 = vld [vmem:[%s10772_s25 + $0x1a4] sm:$0xf] }
 0x796   : > { %v9409_v2 = vor.u32 %v10206_v63, %v9406_v44  ;;  %v9732_v44 = vld [vmem:[%s10772_s25 + $0x728] sm:$0xf] }
 0x797   : > { %v5845_v4 = vadd.f32 %v5844_v34, %v5831_v3  ;;  %6165 = vmatpush.bf16.msra.mxu2 %v9441_v45 }
 0x79c   : > { %v5858_v19 = vpop.f32.mrf.mxu2  ;;  %v5832_v7 = vpop.f32.mrf.mxu0 }
 0x79d   : > { %v5859_v52 = vadd.f32 %v5858_v19, %v5845_v4  ;;  %v5833_v21 = vadd.f32 %v5832_v7, %v5819_v40  ;;  %v5846_v48 = vpop.f32.mrf.mxu1  ;;  %v10262_v4 = vld [vmem:[%s10772_s25 + $0x35c] sm:$0xf0]  ;;  %v9430_v40 = vld [vmem:[%s10772_s25 + $0x360] sm:$0xf0] }
 0x79e   : > { %v9429_v26 = vor.u32 %v10262_v4, %v9428_v17  ;;  %v10390_v7 = vld [vmem:[%s10772_s25 + $0x75c] sm:$0xf0]  ;;  %v9433_v46 = vor.u32 %v10254_v50, %v9430_v40  ;;  %v10318_v17 = vld [vmem:[%s10772_s25 + $0x524] sm:$0xf] }
 0x79f   : > { %v5847_v8 = vadd.f32 %v5846_v48, %v5833_v21  ;;  %v9420_v21 = vld [vmem:[%s10772_s25 + $0x2a0] sm:$0xf]  ;;  %v9422_v48 = vld [vmem:[%s10772_s25 + $0x2e0] sm:$0xf0] }
 0x7a0   : > { %6166 = vmatpush.bf16.msra.mxu2 %v9433_v46  ;;  %v9462_v4 = vld [vmem:[%s10772_s25 + $0x560] sm:$0xf0]  ;;  %v9452_v50 = vld [vmem:[%s10772_s25 + $0x4a0] sm:$0xf] }
 0x7a1   : > { %v5872_v11 = vpop.f32.mrf.mxu3  ;;  %v10174_v46 = vld [vmem:[%s10772_s25 + $0xa4] sm:$0xf] }
 0x7a2   : > { %v5873_v55 = vadd.f32 %v5872_v11, %v5859_v52  ;;  %v9493_v52 = vor.u32 %v10390_v7, %v9492_v1  ;;  %v9494_v11 = vld [vmem:[%s10772_s25 + $0x760] sm:$0xf0]  ;;  %v9465_v1 = vor.u32 %v10318_v17, %v9462_v4  ;;  %v10182_v7 = vld [vmem:[%s10772_s25 + $0xdc] sm:$0xf0]  ;;  %v10375_v17 = vld [vmem:[%s10772_s25 + $0x6e4] sm:$0xf0] }
 0x7a3   : > { %v10239_v4 = vld [vmem:[%s10772_s25 + $0x2ac] sm:$0xf] }
 0x7a4   : > { %v5880_v47 = vmul.f32 %v5878_v10, %v5873_v55  ;;  %v5860_v9 = vpop.f32.mrf.mxu2  ;;  %6152 = vmatpush.bf16.msra.mxu1 %v9493_v52  ;;  %v10246_v55 = vld [vmem:[%s10772_s25 + $0x2dc] sm:$0xf0] }
 0x7a5   : > { %v5861_v14 = vadd.f32 %v5860_v9, %v5847_v8  ;;  %v9421_v36 = vor.u32 %v10246_v55, %v9420_v21  ;;  %v10310_v52 = vld [vmem:[%s10772_s25 + $0x4dc] sm:$0xf0]  ;;  %v10302_v21 = vld [vmem:[%s10772_s25 + $0x4a4] sm:$0xf] }
 0x7a6   : > { %v5886_v42 = vadd.f32 %v5884_v39, %v5880_v47  ;;  %v10238_v47 = vld [vmem:[%s10772_s25 + $0x2a4] sm:$0xf] }
 0x7a7   : > { %v9425_v8 = vor.u32 %v10238_v47, %v9422_v48  ;;  %v9454_v55 = vld [vmem:[%s10772_s25 + $0x4e0] sm:$0xf0]  ;;  %v9444_v47 = vld [vmem:[%s10772_s25 + $0x420] sm:$0xf] }
 0x7a8   : > { %v5890_v61 = vadd.f32 %v5886_v42, %v11273_v53  ;;  %v10278_v53 = vld [vmem:[%s10772_s25 + $0x3dc] sm:$0xf0]  ;;  %v10366_v42 = vld [vmem:[%s10772_s25 + $0x6a4] sm:$0xf] }
 0x7a9   : > { %v5874_v30 = vpop.f32.mrf.mxu3  ;;  %v9437_v35 = vor.u32 %v10278_v53, %v9436_v54  ;;  %6167 = vmatpush.bf16.msra.mxu2 %v9425_v8  ;;  %v9404_v53 = vld [vmem:[%s10772_s25 + $0x1a0] sm:$0xf]  ;;  %v10158_v8 = vld [vmem:[%s10772_s25 + $0x24] sm:$0xf] }
 0x7aa   : > { %v5875_v22 = vadd.f32 %v5874_v30, %v5861_v14  ;;  %v5893_v41 = vadd.f32 %v5890_v61, %v5889_v51  ;;  %v9489_v14 = vor.u32 %v10366_v42, %v9486_v37  ;;  %v9476_v30 = vld [vmem:[%s10772_s25 + $0x620] sm:$0xf]  ;;  %v9405_v23 = vor.u32 %v10214_v43, %v9404_v53  ;;  %v9382_v42 = vld [vmem:[%s10772_s25 + $0x60] sm:$0xf0]  ;;  %v9750_v43 = vld [vmem:[%s10772_s25 + $0x7e8] sm:$0xf0] }
 0x7ab   : > { %6137 = vmatpush.bf16.msra.mxu0 %v9437_v35  ;;  %v9468_v35 = vld [vmem:[%s10772_s25 + $0x5a0] sm:$0xf] }
 0x7ac   : > { %v5882_v56 = vmul.f32 %v5878_v10, %v5875_v22  ;;  %5894 = vadd.xlane.f32.xlu2 %v5893_v41  ;;  %v10382_v10 = vld [vmem:[%s10772_s25 + $0x724] sm:$0xf]  ;;  %v10358_v41 = vld [vmem:[%s10772_s25 + $0x65c] sm:$0xf0]  ;;  %v9469_v45 = vor.u32 %v10342_v58, %v9468_v35  ;;  %v9604_v35 = vld [vmem:[%s10772_s25 + $0x328] sm:$0xf] }
 0x7ad   : > { %v9497_v60 = vor.u32 %v10382_v10, %v9494_v11  ;;  %v9390_v10 = vld [vmem:[%s10772_s25 + $0xe0] sm:$0xf0]  ;;  %v9453_v11 = vor.u32 %v10310_v52, %v9452_v50  ;;  %v9718_v52 = vld [vmem:[%s10772_s25 + $0x6e8] sm:$0xf0] }
 0x7ae   : > { %v5888_v16 = vadd.f32 %v5884_v39, %v5882_v56  ;;  %v9484_v39 = vld [vmem:[%s10772_s25 + $0x6a0] sm:$0xf]  ;;  %v10222_v56 = vld [vmem:[%s10772_s25 + $0x224] sm:$0xf] }
 0x7af   : > { %6138 = vmatpush.bf16.msra.mxu0 %v9429_v26  ;;  %6180 = vmatpush.bf16.msra.mxu3 %v9497_v60  ;;  %v9485_v9 = vor.u32 %v10374_v24, %v9484_v39  ;;  %v9388_v26 = vld [vmem:[%s10772_s25 + $0xa0] sm:$0xf]  ;;  %v9393_v60 = vor.u32 %v10174_v46, %v9390_v10  ;;  %v9457_v39 = vor.u32 %v10302_v21, %v9454_v55  ;;  %v9572_v10 = vld [vmem:[%s10772_s25 + $0x228] sm:$0xf] }
 0x7b0   : > { %v5892_v33 = vadd.f32 %v5888_v16, %v11319_v49  ;;  %v9477_v16 = vor.u32 %v10358_v41, %v9476_v30  ;;  %v9389_v40 = vor.u32 %v10182_v7, %v9388_v26  ;;  %v10166_v24 = vld [vmem:[%s10772_s25 + $0x5c] sm:$0xf0]  ;;  %v9620_v30 = vld [vmem:[%s10772_s25 + $0x3a8] sm:$0xf] }
 0x7b1   : > { %6153 = vmatpush.bf16.msra.mxu1 %v9485_v9  ;;  %v10294_v9 = vld [vmem:[%s10772_s25 + $0x45c] sm:$0xf0]  ;;  %v10279_v41 = vld [vmem:[%s10772_s25 + $0x3e4] sm:$0xf0] }
 0x7b2   : > { %v5896_v25 = vadd.f32 %v5892_v33, %v5891_v62  ;;  %v9445_v37 = vor.u32 %v10294_v9, %v9444_v47  ;;  %v10359_v55 = vld [vmem:[%s10772_s25 + $0x664] sm:$0xf0]  ;;  %v9702_v9 = vld [vmem:[%s10772_s25 + $0x668] sm:$0xf0] }
 0x7b3   : > { %6139 = vmatpush.bf16.msra.mxu0 %v9421_v36  ;;  %6181 = vmatpush.bf16.msra.mxu3 %v9489_v14  ;;  %v9380_v36 = vld [vmem:[%s10772_s25 + $0x20] sm:$0xf]  ;;  %v9385_v14 = vor.u32 %v10158_v8, %v9382_v42 }
 0x7b4   : > { %5897 = vadd.xlane.f32.xlu0 %v5896_v25  ;;  %v9478_v25 = vld [vmem:[%s10772_s25 + $0x660] sm:$0xf0]  ;;  %v9381_v48 = vor.u32 %v10166_v24, %v9380_v36  ;;  %v9574_v36 = vld [vmem:[%s10772_s25 + $0x268] sm:$0xf0] }
 0x7b5   : > { %6154 = vmatpush.bf16.msra.mxu1 %v9477_v16  ;;  %v9621_v16 = vor.u32 %v10279_v41, %v9620_v30 }
 0x7b9   : > { %6155 = vmatpush.bf16.msra.mxu1 %v9469_v45  ;;  %v10391_v45 = vld [vmem:[%s10772_s25 + $0x764] sm:$0xf0] }
 0x81f   : > { %v5895_v57 = vpop.xlane.xlu2 %5894 }
 0x820   : > { %v5899_v49 = vmul.f32 %v5895_v57, %v11135_v20  ;;  %v9473_v57 = vor.u32 %v10334_v32, %v9470_v28  ;;  %v9733_v32 = vor.u32 %v10391_v45, %v9732_v44  ;;  %v9606_v28 = vld [vmem:[%s10772_s25 + $0x368] sm:$0xf0]  ;;  %v9668_v44 = vld [vmem:[%s10772_s25 + $0x528] sm:$0xf] }
 0x821   : > { %v10327_v45 = vld [vmem:[%s10772_s25 + $0x564] sm:$0xf0] }
 0x822   : > { %v12198_v5 = vsub.f32 %v5889_v51, %v5899_v49  ;;  %v12200_v13 = vsub.f32 %v5890_v61, %v5899_v49  ;;  %v9412_v51 = vld [vmem:[%s10772_s25 + $0x220] sm:$0xf] }
 0x823   : > { %v10230_v61 = vld [vmem:[%s10772_s25 + $0x25c] sm:$0xf0] }
 0x824   : > { %v5905_v15 = vmul.f32 %v12198_v5, %v12198_v5  ;;  %v5906_v59 = vmul.f32 %v12200_v13, %v12200_v13  ;;  %v9413_v22 = vor.u32 %v10230_v61, %v9412_v51  ;;  %v9396_v49 = vld [vmem:[%s10772_s25 + $0x120] sm:$0xf]  ;;  %v10286_v51 = vld [vmem:[%s10772_s25 + $0x424] sm:$0xf] }
 0x825   : > { %v9446_v61 = vld [vmem:[%s10772_s25 + $0x460] sm:$0xf0] }
 0x826   : > { %v5909_v3 = vadd.f32 %v5906_v59, %v5905_v15  ;;  %6140 = vmatpush.bf16.msra.mxu0 %v9413_v22  ;;  %v10198_v15 = vld [vmem:[%s10772_s25 + $0x15c] sm:$0xf0]  ;;  %v9449_v22 = vor.u32 %v10286_v51, %v9446_v61  ;;  %v10215_v51 = vld [vmem:[%s10772_s25 + $0x1e4] sm:$0xf0] }
 0x827   : > { %v5898_v27 = vpop.xlane.xlu0 %5897  ;;  %v9460_v59 = vld [vmem:[%s10772_s25 + $0x520] sm:$0xf]  ;;  %v9684_v61 = vld [vmem:[%s10772_s25 + $0x5a8] sm:$0xf] }
 0x828   : > { %v5900_v34 = vmul.f32 %v5898_v27, %v11135_v20  ;;  %5910 = vadd.xlane.f32.xlu1 %v5909_v3  ;;  %v9397_v3 = vor.u32 %v10198_v15, %v9396_v49  ;;  %v10326_v27 = vld [vmem:[%s10772_s25 + $0x55c] sm:$0xf0]  ;;  %v9734_v49 = vld [vmem:[%s10772_s25 + $0x768] sm:$0xf0] }
 0x82a   : > { %v12207_v19 = vsub.f32 %v5891_v62, %v5900_v34  ;;  %v12209_v12 = vsub.f32 %v5892_v33, %v5900_v34  ;;  %v9417_v62 = vor.u32 %v10222_v56, %v9414_v31  ;;  %v10350_v33 = vld [vmem:[%s10772_s25 + $0x624] sm:$0xf]  ;;  %6141 = vmatpush.bf16.msra.mxu0 %v9405_v23  ;;  %v9748_v56 = vld [vmem:[%s10772_s25 + $0x7a8] sm:$0xf] }
 0x82b   : > { %v9481_v54 = vor.u32 %v10350_v33, %v9478_v25  ;;  %v10190_v34 = vld [vmem:[%s10772_s25 + $0x124] sm:$0xf]  ;;  %v10407_v31 = vld [vmem:[%s10772_s25 + $0x7e4] sm:$0xf0]  ;;  %v10271_v33 = vld [vmem:[%s10772_s25 + $0x3ac] sm:$0xf] }
 0x82c   : > { %v5907_v18 = vmul.f32 %v12207_v19, %v12207_v19  ;;  %v5908_v0 = vmul.f32 %v12209_v12, %v12209_v12  ;;  %6168 = vmatpush.bf16.msra.mxu2 %v9417_v62  ;;  %v9749_v62 = vor.u32 %v10407_v31, %v9748_v56  ;;  %v9622_v25 = vld [vmem:[%s10772_s25 + $0x3e8] sm:$0xf0]  ;;  %v10263_v23 = vld [vmem:[%s10772_s25 + $0x364] sm:$0xf0] }
 0x82d   : > { %6182 = vmatpush.bf16.msra.mxu3 %v9481_v54  ;;  %v10399_v54 = vld [vmem:[%s10772_s25 + $0x7ac] sm:$0xf]  ;;  %v9625_v53 = vor.u32 %v10271_v33, %v9622_v25  ;;  %v9605_v63 = vor.u32 %v10263_v23, %v9604_v35  ;;  %v10343_v56 = vld [vmem:[%s10772_s25 + $0x5e4] sm:$0xf0] }
 0x82e   : > { %v5912_v38 = vadd.f32 %v5908_v0, %v5907_v18  ;;  %v9398_v18 = vld [vmem:[%s10772_s25 + $0x160] sm:$0xf0]  ;;  %v9461_v0 = vor.u32 %v10326_v27, %v9460_v59  ;;  %6142 = vmatpush.bf16.msra.mxu0 %v9397_v3  ;;  %v9753_v58 = vor.u32 %v10399_v54, %v9750_v43  ;;  %v10207_v31 = vld [vmem:[%s10772_s25 + $0x1ac] sm:$0xf]  ;;  %v9540_v35 = vld [vmem:[%s10772_s25 + $0x128] sm:$0xf] }
 0x82f   : > { %v9558_v33 = vld [vmem:[%s10772_s25 + $0x1e8] sm:$0xf0]  ;;  %v10199_v23 = vld [vmem:[%s10772_s25 + $0x164] sm:$0xf0] }
 0x830   : > { %5913 = vadd.xlane.f32.xlu2 %v5912_v38  ;;  %6169 = vmatpush.bf16.msra.mxu2 %v9409_v2  ;;  %v9401_v38 = vor.u32 %v10190_v34, %v9398_v18  ;;  %v10255_v2 = vld [vmem:[%s10772_s25 + $0x32c] sm:$0xf]  ;;  %v9588_v34 = vld [vmem:[%s10772_s25 + $0x2a8] sm:$0xf] }
 0x831   : > { %6183 = vmatpush.bf16.msra.mxu3 %v9473_v57  ;;  %6156 = vmatpush.bf16.msra.mxu1 %v9461_v0  ;;  %v10383_v57 = vld [vmem:[%s10772_s25 + $0x72c] sm:$0xf]  ;;  %v9609_v59 = vor.u32 %v10255_v2, %v9606_v28  ;;  %v10247_v18 = vld [vmem:[%s10772_s25 + $0x2e4] sm:$0xf0] }
 0x832   : > { %6143 = vmatpush.bf16.msra.mxu0 %v9389_v40  ;;  %v9737_v3 = vor.u32 %v10383_v57, %v9734_v49  ;;  %v9716_v0 = vld [vmem:[%s10772_s25 + $0x6a8] sm:$0xf]  ;;  %v10367_v40 = vld [vmem:[%s10772_s25 + $0x6ac] sm:$0xf] }
 0x833   : > { %v9717_v7 = vor.u32 %v10375_v17, %v9716_v0  ;;  %v9721_v46 = vor.u32 %v10367_v40, %v9718_v52  ;;  %v10335_v25 = vld [vmem:[%s10772_s25 + $0x5ac] sm:$0xf]  ;;  %v10311_v0 = vld [vmem:[%s10772_s25 + $0x4e4] sm:$0xf0] }
 0x834   : > { %6170 = vmatpush.bf16.msra.mxu2 %v9401_v38  ;;  %v9589_v38 = vor.u32 %v10247_v18, %v9588_v34  ;;  %v9686_v54 = vld [vmem:[%s10772_s25 + $0x5e8] sm:$0xf0]  ;;  %v10183_v34 = vld [vmem:[%s10772_s25 + $0xe4] sm:$0xf0] }
 0x835   : > { %6184 = vmatpush.bf16.msra.mxu3 %v9465_v1  ;;  %6157 = vmatpush.bf16.msra.mxu1 %v9453_v11  ;;  %v9590_v1 = vld [vmem:[%s10772_s25 + $0x2e8] sm:$0xf0]  ;;  %v10231_v11 = vld [vmem:[%s10772_s25 + $0x264] sm:$0xf0]  ;;  %v9689_v43 = vor.u32 %v10335_v25, %v9686_v54  ;;  %v5950_v54 = vperm.slane %v12181_v6, 3 }
 0x836   : > { %6144 = vmatpush.bf16.msra.mxu0 %v9381_v48  ;;  %v9593_v50 = vor.u32 %v10239_v4, %v9590_v1  ;;  %v9573_v21 = vor.u32 %v10231_v11, %v9572_v10  ;;  %v10351_v48 = vld [vmem:[%s10772_s25 + $0x62c] sm:$0xf]  ;;  %v9652_v18 = vld [vmem:[%s10772_s25 + $0x4a8] sm:$0xf] }
 0x837   : > { %v9705_v42 = vor.u32 %v10351_v48, %v9702_v9  ;;  %v10191_v2 = vld [vmem:[%s10772_s25 + $0x12c] sm:$0xf]  ;;  %v9653_v1 = vor.u32 %v10311_v0, %v9652_v18  ;;  %v9508_v10 = vld [vmem:[%s10772_s25 + $0x28] sm:$0xf]  ;;  %v10256_v0 = vld [vmem:[%s10772_s25 + $0x334] sm:$0xf] }
 0x838   : > { %6171 = vmatpush.bf16.msra.mxu2 %v9393_v60  ;;  %v9700_v60 = vld [vmem:[%s10772_s25 + $0x628] sm:$0xf]  ;;  %v9542_v28 = vld [vmem:[%s10772_s25 + $0x168] sm:$0xf0] }
 0x839   : > { %6185 = vmatpush.bf16.msra.mxu3 %v9457_v39  ;;  %6158 = vmatpush.bf16.msra.mxu1 %v9445_v37  ;;  %v10223_v39 = vld [vmem:[%s10772_s25 + $0x22c] sm:$0xf]  ;;  %v9701_v24 = vor.u32 %v10359_v55, %v9700_v60  ;;  %v10167_v11 = vld [vmem:[%s10772_s25 + $0x64] sm:$0xf0] }
 0x83a   : > { %6519 = vmatpush.bf16.msrb.mxu0 %v9621_v16  ;;  %v9577_v47 = vor.u32 %v10223_v39, %v9574_v36  ;;  %v10319_v57 = vld [vmem:[%s10772_s25 + $0x52c] sm:$0xf]  ;;  %v9636_v39 = vld [vmem:[%s10772_s25 + $0x428] sm:$0xf] }
 0x83b   : > { %v9670_v49 = vld [vmem:[%s10772_s25 + $0x568] sm:$0xf0]  ;;  %v10295_v36 = vld [vmem:[%s10772_s25 + $0x464] sm:$0xf0] }
 0x83c   : > { %6172 = vmatpush.bf16.msra.mxu2 %v9385_v14  ;;  %v9556_v14 = vld [vmem:[%s10772_s25 + $0x1a8] sm:$0xf]  ;;  %v9510_v48 = vld [vmem:[%s10772_s25 + $0x68] sm:$0xf0] }
 0x83d   : > { %6186 = vmatpush.bf16.msra.mxu3 %v9449_v22  ;;  %6533 = vmatpush.bf16.msrb.mxu1 %v9749_v62  ;;  %v9557_v41 = vor.u32 %v10215_v51, %v9556_v14  ;;  %v9685_v62 = vor.u32 %v10343_v56, %v9684_v61  ;;  %v10287_v9 = vld [vmem:[%s10772_s25 + $0x42c] sm:$0xf]  ;;  %v9637_v14 = vor.u32 %v10295_v36, %v9636_v39  ;;  %v10570_v61 = vld [vmem:[%s10998_s20 + $0x8] sm:$0xf]  ;;  %v9756_v39 = vld [vmem:[%s10772_s25 + $0x7b0] sm:$0xf] }
 0x83e   : > { %6520 = vmatpush.bf16.msrb.mxu0 %v9605_v63  ;;  %v9541_v63 = vor.u32 %v10199_v23, %v9540_v35  ;;  %v9638_v51 = vld [vmem:[%s10772_s25 + $0x468] sm:$0xf0]  ;;  %v10408_v36 = vld [vmem:[%s10772_s25 + $0x7ec] sm:$0xf0] }
 0x840   : > { %6547 = vmatpush.bf16.msrb.mxu2 %v9625_v53  ;;  %v9561_v53 = vor.u32 %v10207_v31, %v9558_v33  ;;  %v9641_v33 = vor.u32 %v10287_v9, %v9638_v51 }
 0x841   : > { %6561 = vmatpush.bf16.msrb.mxu3 %v9753_v58  ;;  %6534 = vmatpush.bf16.msrb.mxu1 %v9733_v32  ;;  %v9669_v32 = vor.u32 %v10327_v45, %v9668_v44 }
 0x842   : > { %6521 = vmatpush.bf16.msrb.mxu0 %v9589_v38  ;;  %v10175_v38 = vld [vmem:[%s10772_s25 + $0xac] sm:$0xf] }
 0x844   : > { %6548 = vmatpush.bf16.msrb.mxu2 %v9609_v59  ;;  %v9545_v59 = vor.u32 %v10191_v2, %v9542_v28  ;;  %v9630_v28 = vld [vmem:[%s10772_s25 + $0x3f0] sm:$0xf0] }
 0x845   : > { %6562 = vmatpush.bf16.msrb.mxu3 %v9737_v3  ;;  %6535 = vmatpush.bf16.msrb.mxu1 %v9717_v7  ;;  %v9673_v3 = vor.u32 %v10319_v57, %v9670_v49  ;;  %v9526_v7 = vld [vmem:[%s10772_s25 + $0xe8] sm:$0xf0]  ;;  %v10400_v57 = vld [vmem:[%s10772_s25 + $0x7b4] sm:$0xf] }
 0x846   : > { %6522 = vmatpush.bf16.msrb.mxu0 %v9573_v21  ;;  %v9529_v52 = vor.u32 %v10175_v38, %v9526_v7  ;;  %v9614_v38 = vld [vmem:[%s10772_s25 + $0x370] sm:$0xf0]  ;;  %v5958_v7 = vld [vmem:[%s436_s16 + $0x8] sm:$0xff] }
 0x848   : > { %6549 = vmatpush.bf16.msrb.mxu2 %v9593_v50  ;;  %v10303_v50 = vld [vmem:[%s10772_s25 + $0x4ac] sm:$0xf] }
 0x849   : > { %6563 = vmatpush.bf16.msrb.mxu3 %v9721_v46  ;;  %6536 = vmatpush.bf16.msrb.mxu1 %v9701_v24  ;;  %v9654_v46 = vld [vmem:[%s10772_s25 + $0x4e8] sm:$0xf0] }
 0x84a   : > { %6523 = vmatpush.bf16.msrb.mxu0 %v9557_v41  ;;  %v9657_v55 = vor.u32 %v10303_v50, %v9654_v46  ;;  %v10159_v24 = vld [vmem:[%s10772_s25 + $0x2c] sm:$0xf]  ;;  %v5944_v41 = vperm.slane %v10570_v61, 3  ;;  %v5960_v50 = vld [vmem:[%s436_s16 + $0x18] sm:$0xff]  ;;  %v9628_v46 = vld [vmem:[%s10772_s25 + $0x3b0] sm:$0xf] }
 0x84b   : > { %v9740_v61 = vld [vmem:[%s10772_s25 + $0x730] sm:$0xf] }
 0x84c   : > { %6550 = vmatpush.bf16.msrb.mxu2 %v9577_v47  ;;  %v9509_v47 = vor.u32 %v10167_v11, %v9508_v10  ;;  %v10280_v10 = vld [vmem:[%s10772_s25 + $0x3ec] sm:$0xf0]  ;;  %v10384_v11 = vld [vmem:[%s10772_s25 + $0x734] sm:$0xf] }
 0x84d   : > { %6564 = vmatpush.bf16.msrb.mxu3 %v9705_v42  ;;  %6537 = vmatpush.bf16.msrb.mxu1 %v9685_v62 }
 0x84e   : > { %6524 = vmatpush.bf16.msrb.mxu0 %v9541_v63 }
 0x850   : > { %6551 = vmatpush.bf16.msrb.mxu2 %v9561_v53 }
 0x851   : > { %6565 = vmatpush.bf16.msrb.mxu3 %v9689_v43  ;;  %6538 = vmatpush.bf16.msrb.mxu1 %v9669_v32  ;;  %v10272_v32 = vld [vmem:[%s10772_s25 + $0x3b4] sm:$0xf] }
 0x854   : > { %6552 = vmatpush.bf16.msrb.mxu2 %v9545_v59 }
 0x855   : > { %6566 = vmatpush.bf16.msrb.mxu3 %v9673_v3  ;;  %6539 = vmatpush.bf16.msrb.mxu1 %v9653_v1  ;;  %v5959_v1 = vld [vmem:[%s436_s16 + $0x10] sm:$0xff] }
 0x858   : > { %6553 = vmatpush.bf16.msrb.mxu2 %v9529_v52  ;;  %v12401_v52 = vpack.c.bf16 %v5960_v50, %v5958_v7  ;;  %v9678_v50 = vld [vmem:[%s10772_s25 + $0x570] sm:$0xf0] }
 0x859   : > { %6567 = vmatpush.bf16.msrb.mxu3 %v9657_v55  ;;  %6540 = vmatpush.bf16.msrb.mxu1 %v9637_v14  ;;  %v9726_v14 = vld [vmem:[%s10772_s25 + $0x6f0] sm:$0xf0] }
 0x85d   : > { %6568 = vmatpush.bf16.msrb.mxu3 %v9641_v33  ;;  %v9596_v33 = vld [vmem:[%s10772_s25 + $0x2b0] sm:$0xf] }
 0x89b   : > { %v5911_v15 = vpop.xlane.xlu1 %5910 }
 0x89c   : > { %v5915_v27 = vmul.f32 %v5911_v15, %v11135_v20 }
 0x89e   : > { %v12294_v26 = vadd.f32 1e-05, %v5915_v27  ;;  %v9524_v27 = vld [vmem:[%s10772_s25 + $0xa8] sm:$0xf] }
 0x89f   : > { %v9525_v4 = vor.u32 %v10183_v34, %v9524_v27  ;;  %v9633_v34 = vor.u32 %v10272_v32, %v9630_v28  ;;  %v10336_v28 = vld [vmem:[%s10772_s25 + $0x5b4] sm:$0xf] }
 0x8a0   : > { %10536 = vrsqrt.f32 %v12294_v26  ;;  %vm5925_vm2 = vweird.f32 %v12294_v26 }
 0x8a1   : > { %6525 = vmatpush.bf16.msrb.mxu0 %v9525_v4  ;;  %v5957_v4 = vld [vmem:[%s436_s16] sm:$0xff] }
 0x8a3   : > { %v5914_v8 = vpop.xlane.xlu2 %5913 }
 0x8a4   : > { %v5916_v37 = vmul.f32 %v5914_v8, %v11135_v20  ;;  %v10569_v8 = vld [vmem:[%s10998_s20] sm:$0xf] }
 0x8a5   : > { %v5943_v42 = vperm.slane %v10569_v8, 3  ;;  %6526 = vmatpush.bf16.msrb.mxu0 %v9509_v47  ;;  %v9757_v47 = vor.u32 %v10408_v36, %v9756_v39  ;;  %v9612_v8 = vld [vmem:[%s10772_s25 + $0x330] sm:$0xf] }
 0x8a6   : > { %v12311_v30 = vpop.eup %10536  ;;  %v12313_v22 = vadd.f32 1e-05, %v5916_v37  ;;  %v9548_v36 = vld [vmem:[%s10772_s25 + $0x130] sm:$0xf] }
 0x8a7   : > { %v5920_v16 = vmul.f32 %v12311_v30, %v12294_v26  ;;  %vm5926_vm1 = vweird.f32 %v12311_v30 }
 0x8a8   : > { %10538 = vrsqrt.f32 %v12313_v22  ;;  %vm5927_vm3 = vmor %vm5925_vm2, %vm5926_vm1  ;;  %vm5935_vm5 = vweird.f32 %v12313_v22 }
 0x8a9   : > { %v5921_v58 = vmul.f32 %v12311_v30, %v5920_v16  ;;  %v9513_v16 = vor.u32 %v10159_v24, %v9510_v48  ;;  %v10240_v24 = vld [vmem:[%s10772_s25 + $0x2b4] sm:$0xf] }
 0x8aa   : > { %v9598_v48 = vld [vmem:[%s10772_s25 + $0x2f0] sm:$0xf0] }
 0x8ab   : > { %v5922_v15 = vmul.f32 0.5, %v5921_v58  ;;  %6554 = vmatpush.bf16.msrb.mxu2 %v9513_v16  ;;  %v9601_v9 = vor.u32 %v10240_v24, %v9598_v48  ;;  %v9582_v16 = vld [vmem:[%s10772_s25 + $0x270] sm:$0xf0]  ;;  %v10200_v24 = vld [vmem:[%s10772_s25 + $0x16c] sm:$0xf0] }
 0x8ac   : > { %v9549_v48 = vor.u32 %v10200_v24, %v9548_v36 }
 0x8ad   : > { %v5923_v17 = vsub.f32 1.5, %v5922_v15 }
 0x8ae   : > { %v10539_v40 = vpop.eup %10538 }
 0x8af   : > { %v5924_v60 = vmul.f32 %v12311_v30, %v5923_v17  ;;  %v5930_v21 = vmul.f32 %v10539_v40, %v12313_v22  ;;  %vm5936_vm4 = vweird.f32 %v10539_v40  ;;  %v9617_v17 = vor.u32 %v10256_v0, %v9614_v38  ;;  %v9550_v0 = vld [vmem:[%s10772_s25 + $0x170] sm:$0xf0] }
 0x8b0   : > { %vm5937_vm6 = vmor %vm5935_vm5, %vm5936_vm4 }
 0x8b1   : > { %v5928_v37 = vsel %vm5927_vm3, %v12311_v30, %v5924_v60  ;;  %v5931_v26 = vmul.f32 %v10539_v40, %v5930_v21  ;;  %v5949_v30 = vperm.slane %v12174_v29, 3  ;;  %v9629_v60 = vor.u32 %v10280_v10, %v9628_v46  ;;  %v9742_v21 = vld [vmem:[%s10772_s25 + $0x770] sm:$0xf0]  ;;  %v9692_v10 = vld [vmem:[%s10772_s25 + $0x5b0] sm:$0xf] }
 0x8b2   : > { %v5939_v56 = vmul.f32 %v5928_v37, %v12198_v5  ;;  %v5940_v31 = vmul.f32 %v5928_v37, %v12200_v13  ;;  %v9745_v55 = vor.u32 %v10384_v11, %v9742_v21  ;;  %v10368_v37 = vld [vmem:[%s10772_s25 + $0x6b4] sm:$0xf]  ;;  %v10344_v11 = vld [vmem:[%s10772_s25 + $0x5ec] sm:$0xf0] }
 0x8b3   : > { %v5932_v62 = vmul.f32 0.5, %v5931_v26  ;;  %v9729_v51 = vor.u32 %v10368_v37, %v9726_v14  ;;  %v9693_v21 = vor.u32 %v10344_v11, %v9692_v10  ;;  %v10328_v37 = vld [vmem:[%s10772_s25 + $0x56c] sm:$0xf0] }
 0x8b4   : > { %v5945_v53 = vmul.f32 %v5943_v42, %v5939_v56  ;;  %v5946_v43 = vmul.f32 %v5944_v41, %v5940_v31  ;;  %v10224_v56 = vld [vmem:[%s10772_s25 + $0x234] sm:$0xf] }
 0x8b5   : > { %v5933_v25 = vsub.f32 1.5, %v5932_v62  ;;  %v9585_v62 = vor.u32 %v10224_v56, %v9582_v16  ;;  %v10184_v56 = vld [vmem:[%s10772_s25 + $0xec] sm:$0xf0] }
 0x8b6   : > { %v12362_v35 = vadd.f32 %v5949_v30, %v5945_v53  ;;  %v12364_v23 = vadd.f32 %v5950_v54, %v5946_v43  ;;  %v9710_v53 = vld [vmem:[%s10772_s25 + $0x670] sm:$0xf0] }
 0x8b7   : > { %v5934_v5 = vmul.f32 %v10539_v40, %v5933_v25  ;;  %v10248_v25 = vld [vmem:[%s10772_s25 + $0x2ec] sm:$0xf0] }
 0x8b8   : > { %v5961_v44 = vpack.c.bf16 %v12364_v23, %v12362_v35 }
 0x8b9   : > { %v5938_v13 = vsel %vm5937_vm6, %v10539_v40, %v5934_v5  ;;  %v12399_v40 = vpack.c.bf16 %v5959_v1, %v5957_v4  ;;  %v9724_v5 = vld [vmem:[%s10772_s25 + $0x6b0] sm:$0xf]  ;;  %v10320_v1 = vld [vmem:[%s10772_s25 + $0x534] sm:$0xf] }
 0x8ba   : > { %v5941_v29 = vmul.f32 %v5938_v13, %v12207_v19  ;;  %v5942_v6 = vmul.f32 %v5938_v13, %v12209_v12  ;;  %v9758_v19 = vld [vmem:[%s10772_s25 + $0x7f0] sm:$0xf0]  ;;  %v12380_v49 = vunpack.c.l.b16 %v5961_v44  ;;  %v12384_v15 = vunpack.c.h.b16 %v5961_v44  ;;  %v10376_v13 = vld [vmem:[%s10772_s25 + $0x6ec] sm:$0xf0] }
 0x8bb   : > { %v9761_v18 = vor.u32 %v10400_v57, %v9758_v19  ;;  %v9580_v44 = vld [vmem:[%s10772_s25 + $0x230] sm:$0xf]  ;;  %v9694_v57 = vld [vmem:[%s10772_s25 + $0x5f0] sm:$0xf0]  ;;  %v9681_v46 = vor.u32 %v10320_v1, %v9678_v50 }
 0x8bc   : > { %v5947_v58 = vmul.f32 %v5943_v42, %v5941_v29  ;;  %v5948_v63 = vmul.f32 %v5944_v41, %v5942_v6  ;;  %v10264_v42 = vld [vmem:[%s10772_s25 + $0x36c] sm:$0xf0]  ;;  %v10208_v29 = vld [vmem:[%s10772_s25 + $0x1b4] sm:$0xf]  ;;  %v9725_v6 = vor.u32 %v10376_v13, %v9724_v5  ;;  %v9697_v19 = vor.u32 %v10336_v28, %v9694_v57 }
 0x8bd   : > { %v9613_v26 = vor.u32 %v10264_v42, %v9612_v8  ;;  %v10392_v41 = vld [vmem:[%s10772_s25 + $0x76c] sm:$0xf0] }
 0x8be   : > { %v12370_v22 = vadd.f32 %v5949_v30, %v5947_v58  ;;  %v12372_v45 = vadd.f32 %v5950_v54, %v5948_v63  ;;  %v9741_v31 = vor.u32 %v10392_v41, %v9740_v61  ;;  %v10352_v30 = vld [vmem:[%s10772_s25 + $0x634] sm:$0xf]  ;;  %v9597_v54 = vor.u32 %v10248_v25, %v9596_v33  ;;  %v10216_v4 = vld [vmem:[%s10772_s25 + $0x1ec] sm:$0xf0] }
 0x8bf   : > { %v9713_v43 = vor.u32 %v10352_v30, %v9710_v53  ;;  %v9566_v58 = vld [vmem:[%s10772_s25 + $0x1f0] sm:$0xf0]  ;;  %v9676_v42 = vld [vmem:[%s10772_s25 + $0x530] sm:$0xf] }
 0x8c0   : > { %v5962_v2 = vpack.c.bf16 %v12372_v45, %v12370_v22  ;;  %v9569_v63 = vor.u32 %v10208_v29, %v9566_v58  ;;  %v9677_v14 = vor.u32 %v10328_v37, %v9676_v42  ;;  %v9532_v41 = vld [vmem:[%s10772_s25 + $0xb0] sm:$0xf] }
 0x8c1   : > { %v9533_v16 = vor.u32 %v10184_v56, %v9532_v41  ;;  %v9660_v25 = vld [vmem:[%s10772_s25 + $0x4b0] sm:$0xf] }
 0x8c2   : > { %v12382_v12 = vunpack.c.l.b16 %v5962_v2  ;;  %v12386_v59 = vunpack.c.h.b16 %v5962_v2  ;;  %v10232_v2 = vld [vmem:[%s10772_s25 + $0x26c] sm:$0xf0] }
 0x8c3   : > { %v9581_v32 = vor.u32 %v10232_v2, %v9580_v44  ;;  %v10312_v30 = vld [vmem:[%s10772_s25 + $0x4ec] sm:$0xf0] }
 0x8c4   : > { %v5973_v3 = vpack.c.b16 %v12382_v12, %v12380_v49  ;;  %v5974_v27 = vpack.c.b16 %v12386_v59, %v12384_v15  ;;  %v9516_v53 = vld [vmem:[%s10772_s25 + $0x30] sm:$0xf] }
 0x8c5   : > { %v9644_v13 = vld [vmem:[%s10772_s25 + $0x430] sm:$0xf] }
 0x8c6   : > { %6145 = vmatmul.bf16.vlgmr.msra.gmra.mxu0 %v5973_v3  ;;  %6159 = vmatmul.bf16.vlgmr.msra.gmra.mxu1 %v5974_v27  ;;  %v10296_v29 = vld [vmem:[%s10772_s25 + $0x46c] sm:$0xf0] }
 0x8c7   : > { %6173 = vmatmul.bf16.vlgmr.msra.gmra.mxu2 %v5973_v3  ;;  %6187 = vmatmul.bf16.vlgmr.msra.gmra.mxu3 %v5974_v27  ;;  %v9708_v3 = vld [vmem:[%s10772_s25 + $0x630] sm:$0xf] }
 0x8c8   : > { %6603 = vmatpush.bf16.msra.mxu2 %v9633_v34  ;;  %6617 = vmatpush.bf16.msra.mxu3 %v9761_v18  ;;  %v10360_v27 = vld [vmem:[%s10772_s25 + $0x66c] sm:$0xf0]  ;;  %v10192_v18 = vld [vmem:[%s10772_s25 + $0x134] sm:$0xf] }
 0x8c9   : > { %6575 = vmatpush.bf16.msra.mxu0 %v9629_v60  ;;  %6589 = vmatpush.bf16.msra.mxu1 %v9757_v47  ;;  %v9709_v34 = vor.u32 %v10360_v27, %v9708_v3  ;;  %v9553_v38 = vor.u32 %v10192_v18, %v9550_v0  ;;  %v10176_v60 = vld [vmem:[%s10772_s25 + $0xb4] sm:$0xf] }
 0x8ca   : > { %v10304_v47 = vld [vmem:[%s10772_s25 + $0x4b4] sm:$0xf] }
 0x8cb   : > { %v12470_v27 = vld [vmem:[%s10998_s20 + $0x10] sm:$0xf0] }
 0x8cc   : > { %6604 = vmatpush.bf16.msra.mxu2 %v9617_v17  ;;  %6618 = vmatpush.bf16.msra.mxu3 %v9745_v55  ;;  %v9564_v17 = vld [vmem:[%s10772_s25 + $0x1b0] sm:$0xf]  ;;  %v9534_v55 = vld [vmem:[%s10772_s25 + $0xf0] sm:$0xf0]  ;;  %v6195_v18 = vperm.slane %v12470_v27, 4 }
 0x8cd   : > { %6576 = vmatpush.bf16.msra.mxu0 %v9613_v26  ;;  %6590 = vmatpush.bf16.msra.mxu1 %v9741_v31  ;;  %v9565_v7 = vor.u32 %v10216_v4, %v9564_v17  ;;  %v9537_v39 = vor.u32 %v10176_v60, %v9534_v55  ;;  %v10160_v26 = vld [vmem:[%s10772_s25 + $0x34] sm:$0xf]  ;;  %v12475_v55 = vld [vmem:[%s10998_s20] sm:$0xf0] }
 0x8ce   : > { %v10288_v31 = vld [vmem:[%s10772_s25 + $0x434] sm:$0xf] }
 0x8d0   : > { %6605 = vmatpush.bf16.msra.mxu2 %v9601_v9  ;;  %6619 = vmatpush.bf16.msra.mxu3 %v9729_v51  ;;  %v9662_v9 = vld [vmem:[%s10772_s25 + $0x4f0] sm:$0xf0] }
 0x8d1   : > { %6577 = vmatpush.bf16.msra.mxu0 %v9597_v54  ;;  %6591 = vmatpush.bf16.msra.mxu1 %v9725_v6  ;;  %v9665_v8 = vor.u32 %v10304_v47, %v9662_v9  ;;  %v9518_v51 = vld [vmem:[%s10772_s25 + $0x70] sm:$0xf0]  ;;  %v9661_v54 = vor.u32 %v10312_v30, %v9660_v25  ;;  %v9645_v6 = vor.u32 %v10296_v29, %v9644_v13  ;;  %v5965_v9 = vperm.slane %v12475_v55, 4 }
 0x8d2   : > { %v9521_v61 = vor.u32 %v10160_v26, %v9518_v51 }
 0x8d4   : > { %6606 = vmatpush.bf16.msra.mxu2 %v9585_v62  ;;  %6620 = vmatpush.bf16.msra.mxu3 %v9713_v43  ;;  %v9646_v62 = vld [vmem:[%s10772_s25 + $0x470] sm:$0xf0]  ;;  %v10168_v43 = vld [vmem:[%s10772_s25 + $0x6c] sm:$0xf0] }
 0x8d5   : > { %6578 = vmatpush.bf16.msra.mxu0 %v9581_v32  ;;  %6592 = vmatpush.bf16.msra.mxu1 %v9709_v34  ;;  %v9649_v33 = vor.u32 %v10288_v31, %v9646_v62  ;;  %v9517_v5 = vor.u32 %v10168_v43, %v9516_v53  ;;  %v1056_v34 = vld [vmem:[%s10998_s20 + $0x18] sm:$0xf0]  ;;  %v1057_v43 = vld [vmem:[%s10998_s20 + $0x20] sm:$0xf0] }
 0x8d6   : > { %6527 = vmatmul.bf16.vlgmr.msrb.gmra.mxu0 %v12399_v40  ;;  %6541 = vmatmul.bf16.vlgmr.msrb.gmra.mxu1 %v12401_v52  ;;  %v6197_v13 = vperm.slane %v1057_v43, 4 }
 0x8d7   : > { %6555 = vmatmul.bf16.vlgmr.msrb.gmra.mxu2 %v12399_v40  ;;  %6569 = vmatmul.bf16.vlgmr.msrb.gmra.mxu3 %v12401_v52 }
 0x8d8   : > { %6607 = vmatpush.bf16.msra.mxu2 %v9569_v63  ;;  %6621 = vmatpush.bf16.msra.mxu3 %v9697_v19 }
 0x8d9   : > { %6579 = vmatpush.bf16.msra.mxu0 %v9565_v7  ;;  %6593 = vmatpush.bf16.msra.mxu1 %v9693_v21 }
 0x8dc   : > { %6608 = vmatpush.bf16.msra.mxu2 %v9553_v38  ;;  %6622 = vmatpush.bf16.msra.mxu3 %v9681_v46 }
 0x8dd   : > { %6580 = vmatpush.bf16.msra.mxu0 %v9549_v48  ;;  %6594 = vmatpush.bf16.msra.mxu1 %v9677_v14 }
 0x8e0   : > { %6609 = vmatpush.bf16.msra.mxu2 %v9537_v39  ;;  %6623 = vmatpush.bf16.msra.mxu3 %v9665_v8  ;;  %v12478_v39 = vld [vmem:[%s10998_s20 + $0x8] sm:$0xf0] }
 0x8e1   : > { %6581 = vmatpush.bf16.msra.mxu0 %v9533_v16  ;;  %6595 = vmatpush.bf16.msra.mxu1 %v9661_v54  ;;  %v5966_v8 = vperm.slane %v12478_v39, 4 }
 0x8e4   : > { %6610 = vmatpush.bf16.msra.mxu2 %v9521_v61  ;;  %6624 = vmatpush.bf16.msra.mxu3 %v9649_v33 }
 0x8e5   : > { %6582 = vmatpush.bf16.msra.mxu0 %v9517_v5  ;;  %6596 = vmatpush.bf16.msra.mxu1 %v9645_v6  ;;  %v1058_v5 = vld [vmem:[%s10998_s20 + $0x28] sm:$0xf0] }
 0x8e6   : > { %v6198_v29 = vperm.slane %v1058_v5, 4  ;;  %v9822_v5 = vld [vmem:[%s10772_s25 + $0x3b8] sm:$0xf] }
 0x8e7   : > { %6611 = vmatmul.bf16.vlgmr.msra.gmra.mxu2 %v12399_v40  ;;  %6625 = vmatmul.bf16.vlgmr.msra.gmra.mxu3 %v12401_v52 }
 0x8e8   : > { %6583 = vmatmul.bf16.vlgmr.msra.gmra.mxu0 %v12399_v40  ;;  %6597 = vmatmul.bf16.vlgmr.msra.gmra.mxu1 %v12401_v52  ;;  %v6196_v40 = vperm.slane %v1056_v34, 4 }
 0x943   : > { %v6146_v58 = vpop.f32.mrf.mxu0  ;;  %v6160_v63 = vpop.f32.mrf.mxu1 }
 0x944   : > { %v6147_v31 = vadd.f32 %v6146_v58, %v5965_v9 }
 0x946   : > { %v6161_v25 = vadd.f32 %v6160_v63, %v6147_v31 }
 0x94a   : > { %v6174_v44 = vpop.f32.mrf.mxu2  ;;  %v6188_v2 = vpop.f32.mrf.mxu3 }
 0x94b   : > { %v6148_v32 = vpop.f32.mrf.mxu0  ;;  %v6162_v28 = vpop.f32.mrf.mxu1  ;;  %v6175_v16 = vadd.f32 %v6174_v44, %v5966_v8 }
 0x94c   : > { %v6149_v51 = vadd.f32 %v6148_v32, %v5965_v9 }
 0x94d   : > { %v6189_v30 = vadd.f32 %v6188_v2, %v6175_v16 }
 0x94e   : > { %v6163_v62 = vadd.f32 %v6162_v28, %v6149_v51 }
 0x950   : > { %v6193_v54 = vpack.c.bf16 %v6163_v62, %v6161_v25 }
 0x952   : > { %v6176_v57 = vpop.f32.mrf.mxu2  ;;  %v6190_v19 = vpop.f32.mrf.mxu3 }
 0x953   : > { %v6528_v3 = vpop.f32.mrf.mxu0  ;;  %v6542_v0 = vpop.f32.mrf.mxu1  ;;  %v6177_v61 = vadd.f32 %v6176_v57, %v5966_v8 }
 0x954   : > { %v6529_v17 = vadd.f32 %v6528_v3, %v6195_v18 }
 0x955   : > { %v6191_v33 = vadd.f32 %v6190_v19, %v6177_v61 }
 0x956   : > { %v6543_v7 = vadd.f32 %v6542_v0, %v6529_v17 }
 0x957   : > { %v6194_v53 = vpack.c.bf16 %v6191_v33, %v6189_v30 }
 0x95a   : > { %v6556_v38 = vpop.f32.mrf.mxu2  ;;  %v6570_v52 = vpop.f32.mrf.mxu3 }
 0x95b   : > { %v6557_v4 = vadd.f32 %v6556_v38, %v6196_v40  ;;  %v6530_v1 = vpop.f32.mrf.mxu0  ;;  %v6544_v60 = vpop.f32.mrf.mxu1 }
 0x95c   : > { %v6531_v46 = vadd.f32 %v6530_v1, %v6195_v18 }
 0x95d   : > { %v6571_v50 = vadd.f32 %v6570_v52, %v6557_v4 }
 0x95e   : > { %v6545_v24 = vadd.f32 %v6544_v60, %v6531_v46  ;;  %v6675_v60 = vlaneseq }
 0x95f   : > { %v6631_v36 = vpack.c.bf16 %v6571_v50, %v6543_v7 }
 0x961   : > { %v6637_v42 = vunpack.c.l.b16 %v6631_v36  ;;  %v6638_v37 = vunpack.c.h.b16 %v6631_v36  ;;  %v6677_v36 = vstv %s5956_s14 }
 0x962   : > { %v6558_v10 = vpop.f32.mrf.mxu2  ;;  %v6572_v21 = vpop.f32.mrf.mxu3 }
 0x963   : > { %v6559_v11 = vadd.f32 %v6558_v10, %v6196_v40 }
 0x965   : > { %v6573_v47 = vadd.f32 %v6572_v21, %v6559_v11  ;;  %v6584_v6 = vpop.f32.mrf.mxu0  ;;  %v6598_v58 = vpop.f32.mrf.mxu1  ;;  %v6676_v21 = vand.u32 127, %v6675_v60 }
 0x966   : > { %v6585_v57 = vadd.f32 %v6584_v6, %v6197_v13 }
 0x967   : > { %v6633_v48 = vpack.c.bf16 %v6573_v47, %v6545_v24  ;;  %vm6678_vm7 = vcmp.lt.s32.totalorder %v6676_v21, %v6677_v36  ;;  %v9870_v21 = vld [vmem:[%s10772_s25 + $0x6b8] sm:$0xf] }
 0x968   : > { %v6599_v34 = vadd.f32 %v6598_v58, %v6585_v57  ;;  %v10273_v57 = vld [vmem:[%s10772_s25 + $0x3bc] sm:$0xf]  ;;  %v10377_v36 = vld [vmem:[%s10772_s25 + $0x6f4] sm:$0xf0] }
 0x969   : > { %v6639_v26 = vunpack.c.l.b16 %v6633_v48  ;;  %v6640_v14 = vunpack.c.h.b16 %v6633_v48 }
 0x96a   : > { %v6612_v32 = vpop.f32.mrf.mxu2  ;;  %v6626_v44 = vpop.f32.mrf.mxu3 }
 0x96b   : > { %v6641_v41 = vpack.c.b16 %v6639_v26, %v6637_v42  ;;  %v6642_v56 = vpack.c.b16 %v6640_v14, %v6638_v37  ;;  %v6613_v3 = vadd.f32 %v6612_v32, %v6198_v29  ;;  %v10409_v32 = vld [vmem:[%s10772_s25 + $0x7f4] sm:$0xf0] }
 0x96d   : > { %6652 = vmatpush.bf16.xpose.msrb.mxu0 %v6641_v41  ;;  %6666 = vmatpush.bf16.xpose.msrb.mxu1 %v6642_v56  ;;  %v6627_v18 = vadd.f32 %v6626_v44, %v6613_v3  ;;  %v6586_v28 = vpop.f32.mrf.mxu0  ;;  %v6600_v40 = vpop.f32.mrf.mxu1  ;;  %v9824_v3 = vld [vmem:[%s10772_s25 + $0x3f8] sm:$0xf0] }
 0x96e   : > { %v6587_v19 = vadd.f32 %v6586_v28, %v6197_v13  ;;  %v10281_v13 = vld [vmem:[%s10772_s25 + $0x3f4] sm:$0xf0]  ;;  %v9888_v28 = vld [vmem:[%s10772_s25 + $0x7f8] sm:$0xf0] }
 0x96f   : > { %v6632_v2 = vpack.c.bf16 %v6627_v18, %v6599_v34  ;;  %v9823_v6 = vor.u32 %v10281_v13, %v9822_v5  ;;  %v9827_v34 = vor.u32 %v10273_v57, %v9824_v3  ;;  %v10401_v18 = vld [vmem:[%s10772_s25 + $0x7bc] sm:$0xf] }
 0x970   : > { %v6601_v38 = vadd.f32 %v6600_v40, %v6587_v19  ;;  %v9814_v19 = vld [vmem:[%s10772_s25 + $0x338] sm:$0xf]  ;;  %v9864_v13 = vld [vmem:[%s10772_s25 + $0x678] sm:$0xf0] }
 0x971   : > { %v6733_v4 = vunpack.c.l.b16 %v6632_v2  ;;  %v6734_v1 = vunpack.c.h.b16 %v6632_v2  ;;  %v9891_v2 = vor.u32 %v10401_v18, %v9888_v28  ;;  %v9878_v40 = vld [vmem:[%s10772_s25 + $0x738] sm:$0xf]  ;;  %v9792_v18 = vld [vmem:[%s10772_s25 + $0x1f8] sm:$0xf0] }
 0x972   : > { %v6614_v63 = vpop.f32.mrf.mxu2  ;;  %v6628_v52 = vpop.f32.mrf.mxu3 }
 0x973   : > { %v6615_v0 = vadd.f32 %v6614_v63, %v6198_v29  ;;  %v9886_v29 = vld [vmem:[%s10772_s25 + $0x7b8] sm:$0xf] }
 0x974   : > { %6653 = vmatmul.bf16.vlgmr.msrb.gmra.mxu0 %v6193_v54  ;;  %6667 = vmatmul.bf16.vlgmr.msrb.gmra.mxu1 %v6194_v53  ;;  %v9887_v44 = vor.u32 %v10409_v32, %v9886_v29  ;;  %v10265_v63 = vld [vmem:[%s10772_s25 + $0x374] sm:$0xf0] }
 0x975   : > { %v6629_v17 = vadd.f32 %v6628_v52, %v6615_v0  ;;  %6936 = vmatpush.bf16.msra.mxu0 %v9823_v6  ;;  %v9815_v0 = vor.u32 %v10265_v63, %v9814_v19  ;;  %v10257_v52 = vld [vmem:[%s10772_s25 + $0x33c] sm:$0xf]  ;;  %v9790_v29 = vld [vmem:[%s10772_s25 + $0x1b8] sm:$0xf] }
 0x976   : > { %6950 = vmatpush.bf16.msra.mxu1 %v9887_v44  ;;  %v10217_v6 = vld [vmem:[%s10772_s25 + $0x1f4] sm:$0xf0]  ;;  %v10337_v19 = vld [vmem:[%s10772_s25 + $0x5bc] sm:$0xf] }
 0x977   : > { %v6634_v7 = vpack.c.bf16 %v6629_v17, %v6601_v38  ;;  %v10393_v38 = vld [vmem:[%s10772_s25 + $0x774] sm:$0xf0]  ;;  %v9791_v28 = vor.u32 %v10217_v6, %v9790_v29  ;;  %v9856_v63 = vld [vmem:[%s10772_s25 + $0x5f8] sm:$0xf0] }
 0x978   : > { %v9879_v17 = vor.u32 %v10393_v38, %v9878_v40  ;;  %v9854_v32 = vld [vmem:[%s10772_s25 + $0x5b8] sm:$0xf] }
 0x979   : > { %v6735_v50 = vunpack.c.l.b16 %v6634_v7  ;;  %v6736_v46 = vunpack.c.h.b16 %v6634_v7  ;;  %6937 = vmatpush.bf16.msra.mxu0 %v9815_v0  ;;  %v10345_v44 = vld [vmem:[%s10772_s25 + $0x5f4] sm:$0xf0] }
 0x97a   : > { %6951 = vmatpush.bf16.msra.mxu1 %v9879_v17  ;;  %v9859_v17 = vor.u32 %v10337_v19, %v9856_v63  ;;  %v10297_v19 = vld [vmem:[%s10772_s25 + $0x474] sm:$0xf0]  ;;  %v10161_v63 = vld [vmem:[%s10772_s25 + $0x3c] sm:$0xf] }
 0x97b   : > { %v6737_v10 = vpack.c.b16 %v6735_v50, %v6733_v4  ;;  %v6738_v11 = vpack.c.b16 %v6736_v46, %v6734_v1  ;;  %v9816_v4 = vld [vmem:[%s10772_s25 + $0x378] sm:$0xf0]  ;;  %v9806_v46 = vld [vmem:[%s10772_s25 + $0x2b8] sm:$0xf] }
 0x97c   : > { %v10385_v1 = vld [vmem:[%s10772_s25 + $0x73c] sm:$0xf]  ;;  %v9819_v7 = vor.u32 %v10257_v52, %v9816_v4 }
 0x97d   : > { %6751 = vmatpush.bf16.msrb.mxu2 %v6737_v10  ;;  %6765 = vmatpush.bf16.msrb.mxu3 %v6738_v11  ;;  %v9880_v50 = vld [vmem:[%s10772_s25 + $0x778] sm:$0xf0]  ;;  %v10249_v10 = vld [vmem:[%s10772_s25 + $0x2f4] sm:$0xf0] }
 0x97e   : > { %v9883_v11 = vor.u32 %v10385_v1, %v9880_v50  ;;  %v9807_v60 = vor.u32 %v10249_v10, %v9806_v46 }
 0x980   : > { %6938 = vmatpush.bf16.msra.mxu0 %v9807_v60 }
 0x981   : > { %6964 = vmatpush.bf16.msra.mxu2 %v9827_v34  ;;  %6978 = vmatpush.bf16.msra.mxu3 %v9891_v2  ;;  %v10209_v34 = vld [vmem:[%s10772_s25 + $0x1bc] sm:$0xf]  ;;  %v9855_v2 = vor.u32 %v10345_v44, %v9854_v32  ;;  %v9766_v44 = vld [vmem:[%s10772_s25 + $0x38] sm:$0xf] }
 0x982   : > { %v9795_v0 = vor.u32 %v10209_v34, %v9792_v18  ;;  %v10305_v32 = vld [vmem:[%s10772_s25 + $0x4bc] sm:$0xf]  ;;  %v10169_v34 = vld [vmem:[%s10772_s25 + $0x74] sm:$0xf0] }
 0x983   : > { %v9830_v18 = vld [vmem:[%s10772_s25 + $0x438] sm:$0xf] }
 0x985   : > { %6965 = vmatpush.bf16.msra.mxu2 %v9819_v7  ;;  %6979 = vmatpush.bf16.msra.mxu3 %v9883_v11 }
 0x9f1   : > { %v6654_v24 = vpop.f32.mrf.mxu0  ;;  %v6668_v47 = vpop.f32.mrf.mxu1 }
 0x9f2   : > { %v6669_v48 = vadd.f32 %v6668_v47, %v6654_v24  ;;  %v10241_v24 = vld [vmem:[%s10772_s25 + $0x2bc] sm:$0xf]  ;;  %v9871_v47 = vor.u32 %v10377_v36, %v9870_v21 }
 0x9f4   : > { %v6673_v9 = vmul.f32 0.0625, %v6669_v48  ;;  %v9808_v48 = vld [vmem:[%s10772_s25 + $0x2f8] sm:$0xf0]  ;;  %6952 = vmatpush.bf16.msra.mxu1 %v9871_v47 }
 0x9f6   : > { %v6679_v8 = vsel %vm6678_vm7, %v6673_v9, -1e+30  ;;  %v10369_v9 = vld [vmem:[%s10772_s25 + $0x6bc] sm:$0xf] }
 0x9f7   : > { %v6682_v42 = vsel %vm6681_vm8, %v6679_v8, -inf }
 0x9f8   : > { %6683 = vmax.xlane.f32.xlu0 %v6682_v42 }
 0x9f9   : > { %v6656_v37 = vpop.f32.mrf.mxu0  ;;  %v6670_v26 = vpop.f32.mrf.mxu1 }
 0x9fa   : > { %v6671_v14 = vadd.f32 %v6670_v26, %v6656_v37  ;;  %v9811_v37 = vor.u32 %v10241_v24, %v9808_v48  ;;  %v9798_v26 = vld [vmem:[%s10772_s25 + $0x238] sm:$0xf] }
 0x9fc   : > { %v6674_v51 = vmul.f32 0.0625, %v6671_v14  ;;  %v10233_v14 = vld [vmem:[%s10772_s25 + $0x274] sm:$0xf0]  ;;  %6966 = vmatpush.bf16.msra.mxu2 %v9811_v37 }
 0x9fd   : > { %v10201_v37 = vld [vmem:[%s10772_s25 + $0x174] sm:$0xf0] }
 0x9fe   : > { %v6680_v61 = vsel %vm6678_vm7, %v6674_v51, -1e+30  ;;  %v9862_v51 = vld [vmem:[%s10772_s25 + $0x638] sm:$0xf] }
 0x9ff   : > { %v6685_v41 = vsel %vm6681_vm8, %v6680_v61, -inf }
 0xa00   : > { %6686 = vmax.xlane.f32.xlu1 %v6685_v41 }
 0xa6b   : > { %v6684_v56 = vpop.xlane.xlu0 %6683 }
 0xa6c   : > { %v6688_v31 = vsub.f32 %v6679_v8, %v6684_v56  ;;  %v9872_v8 = vld [vmem:[%s10772_s25 + $0x6f8] sm:$0xf0] }
 0xa6d   : > { %v9875_v56 = vor.u32 %v10369_v9, %v9872_v8 }
 0xa6e   : > { %v6690_v16 = vmul.f32 1.442695, %v6688_v31  ;;  %v10361_v31 = vld [vmem:[%s10772_s25 + $0x674] sm:$0xf0] }
 0xa6f   : > { %6980 = vmatpush.bf16.msra.mxu3 %v9875_v56  ;;  %v10321_v56 = vld [vmem:[%s10772_s25 + $0x53c] sm:$0xf] }
 0xa70   : > { %10540 = vpow2.f32 %v6690_v16  ;;  %v10225_v16 = vld [vmem:[%s10772_s25 + $0x23c] sm:$0xf] }
 0xa73   : > { %v6687_v62 = vpop.xlane.xlu1 %6686 }
 0xa74   : > { %v6689_v33 = vsub.f32 %v6680_v61, %v6687_v62  ;;  %v9800_v62 = vld [vmem:[%s10772_s25 + $0x278] sm:$0xf0] }
 0xa75   : > { %v9803_v5 = vor.u32 %v10225_v16, %v9800_v62  ;;  %v9774_v62 = vld [vmem:[%s10772_s25 + $0xb8] sm:$0xf] }
 0xa76   : > { %v12488_v25 = vpop.eup %10540  ;;  %v6692_v30 = vmul.f32 1.442695, %v6689_v33  ;;  %v9799_v33 = vor.u32 %v10233_v14, %v9798_v26  ;;  %v9846_v26 = vld [vmem:[%s10772_s25 + $0x538] sm:$0xf] }
 0xa77   : > { %v6694_v54 = vsel %vm6681_vm8, %v12488_v25, 0.0  ;;  %6967 = vmatpush.bf16.msra.mxu2 %v9803_v5  ;;  %v10177_v5 = vld [vmem:[%s10772_s25 + $0xbc] sm:$0xf] }
 0xa78   : > { %10542 = vpow2.f32 %v6692_v30  ;;  %6695 = vadd.xlane.f32.xlu2 %v6694_v54  ;;  %v10353_v30 = vld [vmem:[%s10772_s25 + $0x63c] sm:$0xf]  ;;  %6939 = vmatpush.bf16.msra.mxu0 %v9799_v33  ;;  %v10185_v33 = vld [vmem:[%s10772_s25 + $0xf4] sm:$0xf0] }
 0xa79   : > { %v9867_v3 = vor.u32 %v10353_v30, %v9864_v13  ;;  %v9838_v30 = vld [vmem:[%s10772_s25 + $0x4b8] sm:$0xf]  ;;  %v9776_v13 = vld [vmem:[%s10772_s25 + $0xf8] sm:$0xf0] }
 0xa7a   : > { %v9779_v6 = vor.u32 %v10177_v5, %v9776_v13 }
 0xa7b   : > { %6981 = vmatpush.bf16.msra.mxu3 %v9867_v3  ;;  %6968 = vmatpush.bf16.msra.mxu2 %v9795_v0  ;;  %v9831_v0 = vor.u32 %v10297_v19, %v9830_v18 }
 0xa7c   : > { %6940 = vmatpush.bf16.msra.mxu0 %v9791_v28  ;;  %v9767_v28 = vor.u32 %v10169_v34, %v9766_v44 }
 0xa7e   : > { %v12492_v53 = vpop.eup %10542 }
 0xa7f   : > { %v6697_v43 = vsel %vm6681_vm8, %v12492_v53, 0.0  ;;  %6982 = vmatpush.bf16.msra.mxu3 %v9859_v17 }
 0xa80   : > { %6698 = vadd.xlane.f32.xlu0 %v6697_v43  ;;  %v9863_v43 = vor.u32 %v10361_v31, %v9862_v51  ;;  %v10329_v51 = vld [vmem:[%s10772_s25 + $0x574] sm:$0xf0]  ;;  %v9848_v31 = vld [vmem:[%s10772_s25 + $0x578] sm:$0xf0] }
 0xa81   : > { %v9851_v16 = vor.u32 %v10321_v56, %v9848_v31 }
 0xa82   : > { %6953 = vmatpush.bf16.msra.mxu1 %v9863_v43  ;;  %v10313_v43 = vld [vmem:[%s10772_s25 + $0x4f4] sm:$0xf0] }
 0xa83   : > { %6983 = vmatpush.bf16.msra.mxu3 %v9851_v16  ;;  %v9839_v29 = vor.u32 %v10313_v43, %v9838_v30  ;;  %v868_v30 = vld [vmem:[%s11133_s30 + $0x268] sm:$0xff] }
 0xa86   : > { %6954 = vmatpush.bf16.msra.mxu1 %v9855_v2  ;;  %v9768_v2 = vld [vmem:[%s10772_s25 + $0x78] sm:$0xf0] }
 0xaeb   : > { %v12502_v58 = vpop.xlane.xlu2 %6695 }
 0xaec   : > { %10544 = vrcp.f32 %v12502_v58  ;;  %v6711_v4 = vand.u32 2147483648, %v12502_v58  ;;  %vm6705_vm10 = vweird.f32 %v12502_v58  ;;  %v6709_v1 = vand.u32 2147483647, %v12502_v58 }
 0xaee   : > { %v6712_v60 = vor.u32 1.1754944e-38, %v6711_v4  ;;  %vm6710_vm13 = vcmp.eq.f32.partialorder %v6709_v1, 8.507059e+37 }
 0xaf2   : > { %v12523_v42 = vpop.eup %10544 }
 0xaf3   : > { %v6701_v61 = vmul.f32 %v12523_v42, %v12502_v58  ;;  %v6699_v41 = vpop.xlane.xlu0 %6698  ;;  %vm6706_vm9 = vweird.f32 %v12523_v42 }
 0xaf4   : > { %10546 = vrcp.f32 %v6699_v41  ;;  %vm6707_vm11 = vmor %vm6705_vm10, %vm6706_vm9  ;;  %v6726_v50 = vand.u32 2147483648, %v6699_v41  ;;  %v6724_v11 = vand.u32 2147483647, %v6699_v41  ;;  %vm6720_vm14 = vweird.f32 %v6699_v41 }
 0xaf5   : > { %v6702_v54 = vsub.f32 1.0, %v6701_v61  ;;  %v10193_v61 = vld [vmem:[%s10772_s25 + $0x13c] sm:$0xf] }
 0xaf6   : > { %v6727_v36 = vor.u32 1.1754944e-38, %v6726_v50  ;;  %vm6725_vm0 = vcmp.eq.f32.partialorder %v6724_v11, 8.507059e+37  ;;  %v6774_v11 = vperm.slane %v12475_v55, 5 }
 0xaf7   : > { %v6703_v57 = vmul.f32 %v12523_v42, %v6702_v54  ;;  %v9775_v54 = vor.u32 %v10185_v33, %v9774_v62  ;;  %v867_v62 = vld [vmem:[%s11133_s30 + $0x260] sm:$0xff] }
 0xaf8   : > { %v883_v33 = vld [vmem:[%s11133_s30 + $0x4e0] sm:$0xff]  ;;  %v7120_v43 = vunpack.c.3.s8 %v867_v62 }
 0xaf9   : > { %v6704_v38 = vadd.f32 %v12523_v42, %v6703_v57  ;;  %v9840_v57 = vld [vmem:[%s10772_s25 + $0x4f8] sm:$0xf0]  ;;  %v7180_v5 = vunpack.c.2.s8 %v883_v33  ;;  %v7184_v13 = vunpack.c.3.s8 %v883_v33 }
 0xafa   : > { %v10547_v40 = vpop.eup %10546  ;;  %v9843_v3 = vor.u32 %v10305_v32, %v9840_v57  ;;  %v7121_v32 = vunpack.c.3.s8 %v868_v30  ;;  %v7248_v44 = vcvt.s32.f32 %v7120_v43  ;;  %v7046_v43 = vperm.slane %v12475_v55, 6 }
 0xafb   : > { %v6716_v52 = vmul.f32 %v10547_v40, %v6699_v41  ;;  %v6708_v46 = vsel %vm6707_vm11, %v12523_v42, %v6704_v38  ;;  %vm6721_vm12 = vweird.f32 %v10547_v40  ;;  %v9782_v42 = vld [vmem:[%s10772_s25 + $0x138] sm:$0xf]  ;;  %v9847_v41 = vor.u32 %v10329_v51, %v9846_v26  ;;  %v10289_v38 = vld [vmem:[%s10772_s25 + $0x43c] sm:$0xf] }
 0xafc   : > { %v6713_v58 = vsel %vm6710_vm13, %v6712_v60, %v6708_v46  ;;  %vm6722_vm15 = vmor %vm6720_vm14, %vm6721_vm12  ;;  %v9783_v14 = vor.u32 %v10201_v37, %v9782_v42  ;;  %6984 = vmatpush.bf16.msra.mxu3 %v9843_v3  ;;  %v7312_v34 = vcvt.s32.f32 %v7184_v13  ;;  %v7052_v13 = vperm.slane %v12470_v27, 6 }
 0xafd   : > { %v6717_v7 = vsub.f32 1.0, %v6716_v52  ;;  %v6714_v48 = vmul.f32 %v12488_v25, %v6713_v58  ;;  %v9784_v25 = vld [vmem:[%s10772_s25 + $0x178] sm:$0xf0]  ;;  %6955 = vmatpush.bf16.msra.mxu1 %v9847_v41  ;;  %v6775_v58 = vperm.slane %v12478_v39, 5 }
 0xafe   : > { %6941 = vmatpush.bf16.msra.mxu0 %v9783_v14  ;;  %v9832_v52 = vld [vmem:[%s10772_s25 + $0x478] sm:$0xf0] }
 0xaff   : > { %v6718_v10 = vmul.f32 %v10547_v40, %v6717_v7  ;;  %v9835_v17 = vor.u32 %v10289_v38, %v9832_v52  ;;  %v7112_v38 = vunpack.c.1.s8 %v867_v62 }
 0xb01   : > { %v6719_v21 = vadd.f32 %v10547_v40, %v6718_v10  ;;  %6956 = vmatpush.bf16.msra.mxu1 %v9839_v29  ;;  %6985 = vmatpush.bf16.msra.mxu3 %v9835_v17  ;;  %v884_v29 = vld [vmem:[%s11133_s30 + $0x4e8] sm:$0xff] }
 0xb02   : > { %6942 = vmatpush.bf16.msra.mxu0 %v9775_v54  ;;  %v7116_v54 = vunpack.c.2.s8 %v867_v62  ;;  %v7181_v57 = vunpack.c.2.s8 %v884_v29 }
 0xb03   : > { %v6723_v24 = vsel %vm6722_vm15, %v10547_v40, %v6719_v21  ;;  %v9771_v40 = vor.u32 %v10161_v63, %v9768_v2 }
 0xb04   : > { %v6728_v47 = vsel %vm6725_vm0, %v6727_v36, %v6723_v24  ;;  %v7244_v3 = vcvt.s32.f32 %v7116_v54  ;;  %v7309_v19 = vcvt.s32.f32 %v7181_v57 }
 0xb05   : > { %v6729_v9 = vmul.f32 %v12492_v53, %v6728_v47  ;;  %v9787_v53 = vor.u32 %v10193_v61, %v9784_v25  ;;  %6957 = vmatpush.bf16.msra.mxu1 %v9831_v0 }
 0xb06   : > { %6943 = vmatpush.bf16.msra.mxu0 %v9767_v28  ;;  %v7249_v28 = vcvt.s32.f32 %v7121_v32  ;;  %v7344_v2 = vpack.c.bf16 %v7248_v44, %v7244_v3  ;;  %v880_v3 = vld [vmem:[%s11133_s30 + $0x448] sm:$0xff] }
 0xb07   : > { %v6730_v8 = vpack.c.bf16 %v6729_v9, %v6714_v48  ;;  %6969 = vmatpush.bf16.msra.mxu2 %v9787_v53 }
 0xb09   : > { %9762 = vmatmul.msk.bf16.vlgmr.msrb.gmra.mxu2 %vm6681_vm8, %v6730_v8  ;;  %9763 = vmatmul.msk.bf16.vlgmr.msrb.gmra.mxu3 %vm6681_vm8, %v6730_v8 }
 0xb0a   : > { %7380 = vmatpush.bf16.msrb.mxu0 %v7344_v2 }
 0xb0b   : > { %6970 = vmatpush.bf16.msra.mxu2 %v9779_v6  ;;  %v7117_v6 = vunpack.c.2.s8 %v868_v30 }
 0xb0d   : > { %v7245_v18 = vcvt.s32.f32 %v7117_v6  ;;  %v864_v6 = vld [vmem:[%s11133_s30 + $0x1c8] sm:$0xff] }
 0xb0e   : > { %v7101_v44 = vunpack.c.2.s8 %v864_v6 }
 0xb0f   : > { %6971 = vmatpush.bf16.msra.mxu2 %v9771_v40  ;;  %v7108_v40 = vunpack.c.0.s8 %v867_v62  ;;  %v7345_v52 = vpack.c.bf16 %v7249_v28, %v7245_v18  ;;  %v7169_v18 = vunpack.c.3.s8 %v880_v3 }
 0xb13   : > { %7408 = vmatpush.bf16.msrb.mxu2 %v7345_v52  ;;  %v7297_v52 = vcvt.s32.f32 %v7169_v18 }
 0xb8c   : > { %v6753_v4 = vpop.f32.mrf.mxu2  ;;  %v6767_v1 = vpop.f32.mrf.mxu3 }
 0xb94   : > { %v6755_v7 = vpop.f32.mrf.mxu2  ;;  %v6769_v50 = vpop.f32.mrf.mxu3 }
 0xb95   : > { %v6772_v46 = vpack.c.bf16 %v6755_v7, %v6753_v4  ;;  %v6773_v10 = vpack.c.bf16 %v6769_v50, %v6767_v1  ;;  %v7172_v4 = vunpack.c.0.s8 %v883_v33  ;;  %v7176_v1 = vunpack.c.1.s8 %v883_v33 }
 0xb96   : > { %v7236_v7 = vcvt.s32.f32 %v7108_v40  ;;  %v7240_v50 = vcvt.s32.f32 %v7112_v38 }
 0xb97   : > { %6944 = vmatmul.bf16.vlgmr.msra.gmra.mxu0 %v6772_v46  ;;  %6958 = vmatmul.bf16.vlgmr.msra.gmra.mxu1 %v6773_v10 }
 0xb98   : > { %6972 = vmatmul.bf16.vlgmr.msra.gmra.mxu2 %v6772_v46  ;;  %6986 = vmatmul.bf16.vlgmr.msra.gmra.mxu3 %v6773_v10  ;;  %v7109_v46 = vunpack.c.0.s8 %v868_v30  ;;  %v7113_v10 = vunpack.c.1.s8 %v868_v30 }
 0xc14   : > { %v6945_v60 = vpop.f32.mrf.mxu0  ;;  %v6959_v36 = vpop.f32.mrf.mxu1 }
 0xc15   : > { %v6946_v21 = vadd.f32 %v6945_v60, %v6774_v11  ;;  %v7304_v60 = vcvt.s32.f32 %v7176_v1 }
 0xc17   : > { %v6960_v48 = vadd.f32 %v6959_v36, %v6946_v21  ;;  %v7173_v21 = vunpack.c.0.s8 %v884_v29  ;;  %v7340_v36 = vpack.c.bf16 %v7240_v50, %v7236_v7 }
 0xc19   : > { %v12581_v37 = vadd.f32 %v6960_v48, %v12362_v35  ;;  %7381 = vmatpush.bf16.msrb.mxu0 %v7340_v36  ;;  %v7097_v36 = vunpack.c.1.s8 %v864_v6 }
 0xc1b   : > { %v6973_v24 = vpop.f32.mrf.mxu2  ;;  %v6987_v47 = vpop.f32.mrf.mxu3 }
 0xc1c   : > { %v6974_v9 = vadd.f32 %v6973_v24, %v6775_v58  ;;  %v6947_v8 = vpop.f32.mrf.mxu0  ;;  %v6961_v61 = vpop.f32.mrf.mxu1  ;;  %v7237_v24 = vcvt.s32.f32 %v7109_v46 }
 0xc1d   : > { %v6948_v14 = vadd.f32 %v6947_v8, %v6774_v11  ;;  %v7300_v11 = vcvt.s32.f32 %v7172_v4 }
 0xc1e   : > { %v6988_v42 = vadd.f32 %v6987_v47, %v6974_v9  ;;  %v7241_v47 = vcvt.s32.f32 %v7113_v10  ;;  %v7301_v9 = vcvt.s32.f32 %v7173_v21 }
 0xc1f   : > { %v6962_v41 = vadd.f32 %v6961_v61, %v6948_v14  ;;  %v7372_v48 = vpack.c.bf16 %v7304_v60, %v7300_v11 }
 0xc20   : > { %v12584_v26 = vadd.f32 %v6988_v42, %v12364_v23  ;;  %v7341_v42 = vpack.c.bf16 %v7241_v47, %v7237_v24 }
 0xc21   : > { %v12589_v35 = vadd.f32 %v6962_v41, %v12370_v22  ;;  %v7185_v22 = vunpack.c.3.s8 %v884_v29 }
 0xc22   : > { %v6996_v51 = vadd.f32 %v12584_v26, %v12581_v37  ;;  %7409 = vmatpush.bf16.msrb.mxu2 %v7341_v42  ;;  %v875_v42 = vld [vmem:[%s11133_s30 + $0x3a0] sm:$0xff] }
 0xc23   : > { %v6975_v25 = vpop.f32.mrf.mxu2  ;;  %v6989_v56 = vpop.f32.mrf.mxu3  ;;  %v7313_v63 = vcvt.s32.f32 %v7185_v22 }
 0xc24   : > { %v6976_v53 = vadd.f32 %v6975_v25, %v6775_v58  ;;  %6997 = vadd.xlane.f32.xlu1 %v6996_v51  ;;  %v7177_v58 = vunpack.c.1.s8 %v884_v29  ;;  %v879_v29 = vld [vmem:[%s11133_s30 + $0x440] sm:$0xff] }
 0xc25   : > { %v7377_v17 = vpack.c.bf16 %v7313_v63, %v7309_v19  ;;  %v7164_v57 = vunpack.c.2.s8 %v879_v29  ;;  %v7168_v22 = vunpack.c.3.s8 %v879_v29  ;;  %v7156_v10 = vunpack.c.0.s8 %v879_v29 }
 0xc26   : > { %v6990_v31 = vadd.f32 %v6989_v56, %v6976_v53  ;;  %v7305_v8 = vcvt.s32.f32 %v7177_v58  ;;  %v7160_v11 = vunpack.c.1.s8 %v879_v29  ;;  %v7093_v58 = vunpack.c.0.s8 %v864_v6 }
 0xc27   : > { %7422 = vmatpush.bf16.msrb.mxu3 %v7377_v17  ;;  %v7292_v63 = vcvt.s32.f32 %v7164_v57  ;;  %v7296_v2 = vcvt.s32.f32 %v7168_v22  ;;  %v7284_v24 = vcvt.s32.f32 %v7156_v10  ;;  %v7148_v29 = vunpack.c.2.s8 %v875_v42 }
 0xc28   : > { %v12592_v16 = vadd.f32 %v6990_v31, %v12372_v45  ;;  %v7308_v45 = vcvt.s32.f32 %v7180_v5  ;;  %v7373_v14 = vpack.c.bf16 %v7305_v8, %v7301_v9  ;;  %v7047_v5 = vperm.slane %v12478_v39, 6  ;;  %v859_v8 = vld [vmem:[%s11133_s30 + $0x120] sm:$0xff] }
 0xc29   : > { %v7368_v4 = vpack.c.bf16 %v7296_v2, %v7292_v63  ;;  %v7288_v47 = vcvt.s32.f32 %v7160_v11  ;;  %v7161_v9 = vunpack.c.1.s8 %v880_v3  ;;  %v7076_v63 = vunpack.c.0.s8 %v859_v8 }
 0xc2a   : > { %v6999_v23 = vadd.f32 %v12592_v16, %v12589_v35  ;;  %v7376_v0 = vpack.c.bf16 %v7312_v34, %v7308_v45  ;;  %v7105_v45 = vunpack.c.3.s8 %v864_v6  ;;  %v7165_v34 = vunpack.c.2.s8 %v880_v3 }
 0xc2b   : > { %7423 = vmatpush.bf16.msrb.mxu3 %v7373_v14  ;;  %v7152_v6 = vunpack.c.3.s8 %v875_v42 }
 0xc2c   : > { %7000 = vadd.xlane.f32.xlu2 %v6999_v23  ;;  %7394 = vmatpush.bf16.msrb.mxu1 %v7376_v0  ;;  %v7229_v0 = vcvt.s32.f32 %v7101_v44  ;;  %v7233_v40 = vcvt.s32.f32 %v7105_v45  ;;  %v7293_v38 = vcvt.s32.f32 %v7165_v34 }
 0xc2d   : > { %v7280_v44 = vcvt.s32.f32 %v7152_v6 }
 0xc2e   : > { %v7337_v50 = vpack.c.bf16 %v7233_v40, %v7229_v0  ;;  %v7369_v46 = vpack.c.bf16 %v7297_v52, %v7293_v38  ;;  %v7080_v38 = vunpack.c.1.s8 %v859_v8 }
 0xc30   : > { %7395 = vmatpush.bf16.msrb.mxu1 %v7372_v48  ;;  %7410 = vmatpush.bf16.msrb.mxu2 %v7337_v50  ;;  %v7157_v48 = vunpack.c.0.s8 %v880_v3  ;;  %v7276_v3 = vcvt.s32.f32 %v7148_v29 }
 0xc31   : > { %7424 = vmatpush.bf16.msrb.mxu3 %v7369_v46  ;;  %v7208_v46 = vcvt.s32.f32 %v7080_v38  ;;  %v869_v38 = vld [vmem:[%s11133_s30 + $0x270] sm:$0xff] }
 0xc32   : > { %v7360_v2 = vpack.c.bf16 %v7280_v44, %v7276_v3 }
 0xc34   : > { %7396 = vmatpush.bf16.msrb.mxu1 %v7368_v4  ;;  %v7140_v4 = vunpack.c.0.s8 %v875_v42 }
 0xc97   : > { %v6998_v51 = vpop.xlane.xlu1 %6997 }
 0xc98   : > { %v7002_v61 = vmul.f32 %v6998_v51, %v11135_v20  ;;  %v7221_v51 = vcvt.s32.f32 %v7093_v58 }
 0xc9a   : > { %v12602_v25 = vsub.f32 %v12581_v37, %v7002_v61  ;;  %v12605_v41 = vsub.f32 %v12584_v26, %v7002_v61  ;;  %v7225_v61 = vcvt.s32.f32 %v7097_v36 }
 0xc9c   : > { %v7008_v53 = vmul.f32 %v12602_v25, %v12602_v25  ;;  %v7009_v56 = vmul.f32 %v12605_v41, %v12605_v41 }
 0xc9e   : > { %v7012_v31 = vadd.f32 %v7009_v56, %v7008_v53  ;;  %v7084_v53 = vunpack.c.2.s8 %v859_v8  ;;  %v860_v56 = vld [vmem:[%s11133_s30 + $0x128] sm:$0xff] }
 0xc9f   : > { %v7001_v23 = vpop.xlane.xlu2 %7000  ;;  %v7085_v57 = vunpack.c.2.s8 %v860_v56  ;;  %v7089_v22 = vunpack.c.3.s8 %v860_v56  ;;  %v7077_v10 = vunpack.c.0.s8 %v860_v56  ;;  %v7081_v11 = vunpack.c.1.s8 %v860_v56 }
 0xca0   : > { %v7003_v62 = vmul.f32 %v7001_v23, %v11135_v20  ;;  %7013 = vadd.xlane.f32.xlu0 %v7012_v31  ;;  %v7364_v31 = vpack.c.bf16 %v7288_v47, %v7284_v24  ;;  %v7285_v23 = vcvt.s32.f32 %v7157_v48  ;;  %v871_v24 = vld [vmem:[%s11133_s30 + $0x300] sm:$0xff] }
 0xca1   : > { %v7205_v48 = vcvt.s32.f32 %v7077_v10 }
 0xca2   : > { %v12613_v37 = vsub.f32 %v12589_v35, %v7003_v62  ;;  %v12616_v26 = vsub.f32 %v12592_v16, %v7003_v62  ;;  %v863_v35 = vld [vmem:[%s11133_s30 + $0x1c0] sm:$0xff]  ;;  %v7289_v62 = vcvt.s32.f32 %v7161_v9  ;;  %7397 = vmatpush.bf16.msrb.mxu1 %v7364_v31  ;;  %v7209_v9 = vcvt.s32.f32 %v7081_v11  ;;  %v872_v31 = vld [vmem:[%s11133_s30 + $0x308] sm:$0xff] }
 0xca3   : > { %v7100_v32 = vunpack.c.2.s8 %v863_v35  ;;  %v7104_v16 = vunpack.c.3.s8 %v863_v35  ;;  %v7092_v1 = vunpack.c.0.s8 %v863_v35  ;;  %v7096_v7 = vunpack.c.1.s8 %v863_v35 }
 0xca4   : > { %v7010_v33 = vmul.f32 %v12613_v37, %v12613_v37  ;;  %v7011_v30 = vmul.f32 %v12616_v26, %v12616_v26  ;;  %v7212_v35 = vcvt.s32.f32 %v7084_v53  ;;  %v7325_v56 = vpack.c.bf16 %v7209_v9, %v7205_v48 }
 0xca5   : > { %v7228_v28 = vcvt.s32.f32 %v7100_v32  ;;  %v7232_v19 = vcvt.s32.f32 %v7104_v16  ;;  %v7220_v60 = vcvt.s32.f32 %v7092_v1  ;;  %v7224_v21 = vcvt.s32.f32 %v7096_v7  ;;  %v855_v7 = vld [vmem:[%s11133_s30 + $0x80] sm:$0xff] }
 0xca6   : > { %v7015_v54 = vadd.f32 %v7011_v30, %v7010_v33  ;;  %v7088_v33 = vunpack.c.3.s8 %v859_v8  ;;  %v876_v30 = vld [vmem:[%s11133_s30 + $0x3a8] sm:$0xff]  ;;  %v7365_v32 = vpack.c.bf16 %v7289_v62, %v7285_v23  ;;  %v7144_v1 = vunpack.c.1.s8 %v875_v42  ;;  %7398 = vmatpush.bf16.msrb.mxu1 %v7360_v2 }
 0xca7   : > { %v7336_v17 = vpack.c.bf16 %v7232_v19, %v7228_v28  ;;  %v7332_v14 = vpack.c.bf16 %v7224_v21, %v7220_v60  ;;  %v7149_v45 = vunpack.c.2.s8 %v876_v30  ;;  %v7153_v34 = vunpack.c.3.s8 %v876_v30  ;;  %v856_v42 = vld [vmem:[%s11133_s30 + $0x88] sm:$0xff] }
 0xca8   : > { %7016 = vadd.xlane.f32.xlu1 %v7015_v54  ;;  %v7333_v54 = vpack.c.bf16 %v7225_v61, %v7221_v51  ;;  %v7216_v16 = vcvt.s32.f32 %v7088_v33  ;;  %7425 = vmatpush.bf16.msrb.mxu3 %v7365_v32  ;;  %v7213_v28 = vcvt.s32.f32 %v7085_v57  ;;  %v7217_v19 = vcvt.s32.f32 %v7089_v22 }
 0xca9   : > { %7382 = vmatpush.bf16.msrb.mxu0 %v7336_v17  ;;  %v7277_v0 = vcvt.s32.f32 %v7149_v45  ;;  %v7281_v40 = vcvt.s32.f32 %v7153_v34  ;;  %v7204_v17 = vcvt.s32.f32 %v7076_v63  ;;  %v7268_v60 = vcvt.s32.f32 %v7140_v4 }
 0xcaa   : > { %7411 = vmatpush.bf16.msrb.mxu2 %v7333_v54  ;;  %v7328_v18 = vpack.c.bf16 %v7216_v16, %v7212_v35  ;;  %v7329_v52 = vpack.c.bf16 %v7217_v19, %v7213_v28  ;;  %v7272_v21 = vcvt.s32.f32 %v7144_v1  ;;  %v7141_v58 = vunpack.c.0.s8 %v876_v30 }
 0xcab   : > { %v7361_v50 = vpack.c.bf16 %v7281_v40, %v7277_v0  ;;  %v7145_v36 = vunpack.c.1.s8 %v876_v30  ;;  %v7324_v47 = vpack.c.bf16 %v7208_v46, %v7204_v17  ;;  %v7068_v8 = vunpack.c.2.s8 %v855_v7 }
 0xcac   : > { %v7269_v51 = vcvt.s32.f32 %v7141_v58  ;;  %v7072_v53 = vunpack.c.3.s8 %v855_v7  ;;  %v7132_v62 = vunpack.c.2.s8 %v871_v24  ;;  %v7136_v33 = vunpack.c.3.s8 %v871_v24 }
 0xcad   : > { %7383 = vmatpush.bf16.msrb.mxu0 %v7332_v14  ;;  %7426 = vmatpush.bf16.msrb.mxu3 %v7361_v50  ;;  %v7356_v14 = vpack.c.bf16 %v7272_v21, %v7268_v60  ;;  %v7273_v61 = vcvt.s32.f32 %v7145_v36  ;;  %v7196_v23 = vcvt.s32.f32 %v7068_v8  ;;  %v7069_v35 = vunpack.c.2.s8 %v856_v42 }
 0xcae   : > { %7412 = vmatpush.bf16.msrb.mxu2 %v7329_v52  ;;  %v7200_v30 = vcvt.s32.f32 %v7072_v53  ;;  %v7073_v29 = vunpack.c.3.s8 %v856_v42  ;;  %v7260_v6 = vcvt.s32.f32 %v7132_v62  ;;  %v7264_v32 = vcvt.s32.f32 %v7136_v33 }
 0xcaf   : > { %7399 = vmatpush.bf16.msrb.mxu1 %v7356_v14  ;;  %v7357_v54 = vpack.c.bf16 %v7273_v61, %v7269_v51  ;;  %v7133_v16 = vunpack.c.2.s8 %v872_v31  ;;  %v7137_v57 = vunpack.c.3.s8 %v872_v31  ;;  %v7197_v3 = vcvt.s32.f32 %v7069_v35  ;;  %v886_v14 = vld [vmem:[%s11133_s30 + $0x4f8] sm:$0xff] }
 0xcb0   : > { %v7320_v22 = vpack.c.bf16 %v7200_v30, %v7196_v23  ;;  %v7201_v44 = vcvt.s32.f32 %v7073_v29  ;;  %v7060_v45 = vunpack.c.0.s8 %v855_v7  ;;  %v7352_v34 = vpack.c.bf16 %v7264_v32, %v7260_v6 }
 0xcb1   : > { %7384 = vmatpush.bf16.msrb.mxu0 %v7328_v18  ;;  %7427 = vmatpush.bf16.msrb.mxu3 %v7357_v54  ;;  %v7261_v18 = vcvt.s32.f32 %v7133_v16  ;;  %v7265_v28 = vcvt.s32.f32 %v7137_v57  ;;  %v7064_v19 = vunpack.c.1.s8 %v855_v7  ;;  %v7124_v0 = vunpack.c.0.s8 %v871_v24  ;;  %v885_v7 = vld [vmem:[%s11133_s30 + $0x4f0] sm:$0xff] }
 0xcb2   : > { %7413 = vmatpush.bf16.msrb.mxu2 %v7325_v56  ;;  %v7321_v63 = vpack.c.bf16 %v7201_v44, %v7197_v3  ;;  %v7188_v2 = vcvt.s32.f32 %v7060_v45  ;;  %v7128_v40 = vunpack.c.1.s8 %v871_v24  ;;  %v7061_v4 = vunpack.c.0.s8 %v856_v42  ;;  %v870_v24 = vld [vmem:[%s11133_s30 + $0x278] sm:$0xff] }
 0xcb3   : > { %7400 = vmatpush.bf16.msrb.mxu1 %v7352_v34  ;;  %v7353_v52 = vpack.c.bf16 %v7265_v28, %v7261_v18  ;;  %v7192_v17 = vcvt.s32.f32 %v7064_v19  ;;  %v7065_v1 = vunpack.c.1.s8 %v856_v42  ;;  %v7252_v50 = vcvt.s32.f32 %v7124_v0 }
 0xcb4   : > { %v7256_v46 = vcvt.s32.f32 %v7128_v40  ;;  %v7125_v10 = vunpack.c.0.s8 %v872_v31  ;;  %v7129_v11 = vunpack.c.1.s8 %v872_v31  ;;  %v7189_v21 = vcvt.s32.f32 %v7061_v4 }
 0xcb5   : > { %7385 = vmatpush.bf16.msrb.mxu0 %v7324_v47  ;;  %7428 = vmatpush.bf16.msrb.mxu3 %v7353_v52  ;;  %v7316_v60 = vpack.c.bf16 %v7192_v17, %v7188_v2  ;;  %v7193_v58 = vcvt.s32.f32 %v7065_v1  ;;  %v7118_v36 = vunpack.c.2.s8 %v869_v38  ;;  %v7122_v8 = vunpack.c.3.s8 %v869_v38  ;;  %v865_v52 = vld [vmem:[%s11133_s30 + $0x1d0] sm:$0xff] }
 0xcb6   : > { %7414 = vmatpush.bf16.msrb.mxu2 %v7321_v63  ;;  %v7348_v47 = vpack.c.bf16 %v7256_v46, %v7252_v50  ;;  %v7253_v48 = vcvt.s32.f32 %v7125_v10  ;;  %v7257_v9 = vcvt.s32.f32 %v7129_v11  ;;  %v7182_v61 = vunpack.c.2.s8 %v885_v7 }
 0xcb7   : > { %v7317_v42 = vpack.c.bf16 %v7193_v58, %v7189_v21  ;;  %v7246_v51 = vcvt.s32.f32 %v7118_v36  ;;  %v7186_v53 = vunpack.c.3.s8 %v885_v7  ;;  %v7250_v31 = vcvt.s32.f32 %v7122_v8 }
 0xcb8   : > { %7401 = vmatpush.bf16.msrb.mxu1 %v7348_v47  ;;  %v7349_v56 = vpack.c.bf16 %v7257_v9, %v7253_v48  ;;  %v7119_v23 = vunpack.c.2.s8 %v870_v24  ;;  %v7123_v62 = vunpack.c.3.s8 %v870_v24  ;;  %v7310_v33 = vcvt.s32.f32 %v7182_v61  ;;  %v866_v47 = vld [vmem:[%s11133_s30 + $0x1d8] sm:$0xff] }
 0xcb9   : > { %7386 = vmatpush.bf16.msrb.mxu0 %v7320_v22  ;;  %v7314_v54 = vcvt.s32.f32 %v7186_v53  ;;  %v7183_v30 = vunpack.c.2.s8 %v886_v14  ;;  %v7187_v35 = vunpack.c.3.s8 %v886_v14  ;;  %v7346_v29 = vpack.c.bf16 %v7250_v31, %v7246_v51  ;;  %v12648_v48 = vld [vmem:[%s10998_s20 + $0x18] sm:$0xf0] }
 0xcba   : > { %7415 = vmatpush.bf16.msrb.mxu2 %v7317_v42  ;;  %7429 = vmatpush.bf16.msrb.mxu3 %v7349_v56  ;;  %v7247_v6 = vcvt.s32.f32 %v7119_v23  ;;  %v7251_v32 = vcvt.s32.f32 %v7123_v62  ;;  %v7110_v16 = vunpack.c.0.s8 %v869_v38  ;;  %v7114_v44 = vunpack.c.1.s8 %v869_v38  ;;  %v882_v42 = vld [vmem:[%s11133_s30 + $0x458] sm:$0xff] }
 0xcbb   : > { %v7378_v57 = vpack.c.bf16 %v7314_v54, %v7310_v33  ;;  %v7311_v22 = vcvt.s32.f32 %v7183_v30  ;;  %v7315_v3 = vcvt.s32.f32 %v7187_v35  ;;  %v7174_v28 = vunpack.c.0.s8 %v885_v7 }
 0xcbc   : > { %v7347_v34 = vpack.c.bf16 %v7251_v32, %v7247_v6  ;;  %v7238_v18 = vcvt.s32.f32 %v7110_v16  ;;  %v7178_v19 = vunpack.c.1.s8 %v885_v7  ;;  %v7242_v0 = vcvt.s32.f32 %v7114_v44  ;;  %v881_v7 = vld [vmem:[%s11133_s30 + $0x450] sm:$0xff] }
 0xcbd   : > { %7387 = vmatpush.bf16.msrb.mxu0 %v7316_v60  ;;  %7450 = vmatpush.bf16.msra.mxu1 %v7378_v57  ;;  %v7379_v2 = vpack.c.bf16 %v7315_v3, %v7311_v22  ;;  %v7111_v40 = vunpack.c.0.s8 %v870_v24  ;;  %v7302_v17 = vcvt.s32.f32 %v7174_v28  ;;  %v7115_v38 = vunpack.c.1.s8 %v870_v24 }
 0xcbe   : > { %7464 = vmatpush.bf16.msra.mxu2 %v7347_v34  ;;  %v7306_v4 = vcvt.s32.f32 %v7178_v19  ;;  %v7175_v1 = vunpack.c.0.s8 %v886_v14  ;;  %v7342_v46 = vpack.c.bf16 %v7242_v0, %v7238_v18  ;;  %v7179_v11 = vunpack.c.1.s8 %v886_v14 }
 0xcbf   : > { %7478 = vmatpush.bf16.msra.mxu3 %v7379_v2  ;;  %v7239_v10 = vcvt.s32.f32 %v7111_v40  ;;  %v7243_v21 = vcvt.s32.f32 %v7115_v38  ;;  %v7102_v36 = vunpack.c.2.s8 %v865_v52  ;;  %v7053_v9 = vperm.slane %v12648_v48, 6  ;;  %v12660_v38 = vld [vmem:[%s11133_s30 + $0x130] sm:$0xff] }
 0xcc0   : > { %v7374_v60 = vpack.c.bf16 %v7306_v4, %v7302_v17  ;;  %v7303_v58 = vcvt.s32.f32 %v7175_v1  ;;  %v7307_v24 = vcvt.s32.f32 %v7179_v11  ;;  %v7106_v8 = vunpack.c.3.s8 %v865_v52 }
 0xcc1   : > { %7436 = vmatpush.bf16.msra.mxu0 %v7346_v29  ;;  %v7343_v51 = vpack.c.bf16 %v7243_v21, %v7239_v10  ;;  %v7230_v61 = vcvt.s32.f32 %v7102_v36  ;;  %v7166_v14 = vunpack.c.2.s8 %v881_v7  ;;  %v7170_v53 = vunpack.c.3.s8 %v881_v7  ;;  %v12663_v36 = vld [vmem:[%s11133_s30 + $0x3b0] sm:$0xff] }
 0xcc2   : > { %7451 = vmatpush.bf16.msra.mxu1 %v7374_v60  ;;  %v7375_v56 = vpack.c.bf16 %v7307_v24, %v7303_v58  ;;  %v7234_v31 = vcvt.s32.f32 %v7106_v8  ;;  %v7103_v23 = vunpack.c.2.s8 %v866_v47  ;;  %v7107_v62 = vunpack.c.3.s8 %v866_v47 }
 0xcc3   : > { %7465 = vmatpush.bf16.msra.mxu2 %v7343_v51  ;;  %v7294_v54 = vcvt.s32.f32 %v7166_v14  ;;  %v7298_v30 = vcvt.s32.f32 %v7170_v53  ;;  %v7167_v35 = vunpack.c.2.s8 %v882_v42  ;;  %v7171_v29 = vunpack.c.3.s8 %v882_v42 }
 0xcc4   : > { %7479 = vmatpush.bf16.msra.mxu3 %v7375_v56  ;;  %v7338_v32 = vpack.c.bf16 %v7234_v31, %v7230_v61  ;;  %v7231_v16 = vcvt.s32.f32 %v7103_v23  ;;  %v7235_v57 = vcvt.s32.f32 %v7107_v62  ;;  %v7098_v19 = vunpack.c.1.s8 %v865_v52 }
 0xcc5   : > { %7437 = vmatpush.bf16.msra.mxu0 %v7342_v46  ;;  %v7370_v22 = vpack.c.bf16 %v7298_v30, %v7294_v54  ;;  %v7295_v3 = vcvt.s32.f32 %v7167_v35  ;;  %v7299_v44 = vcvt.s32.f32 %v7171_v29  ;;  %v7162_v4 = vunpack.c.1.s8 %v881_v7 }
 0xcc6   : > { %v7339_v28 = vpack.c.bf16 %v7235_v57, %v7231_v16  ;;  %v7226_v17 = vcvt.s32.f32 %v7098_v19  ;;  %v7095_v46 = vunpack.c.0.s8 %v866_v47  ;;  %v7099_v10 = vunpack.c.1.s8 %v866_v47 }
 0xcc7   : > { %7452 = vmatpush.bf16.msra.mxu1 %v7370_v22  ;;  %v7371_v0 = vpack.c.bf16 %v7299_v44, %v7295_v3  ;;  %v7290_v60 = vcvt.s32.f32 %v7162_v4  ;;  %v7159_v21 = vunpack.c.0.s8 %v882_v42  ;;  %v7163_v58 = vunpack.c.1.s8 %v882_v42 }
 0xcc8   : > { %7466 = vmatpush.bf16.msra.mxu2 %v7339_v28  ;;  %v7223_v8 = vcvt.s32.f32 %v7095_v46  ;;  %v7227_v51 = vcvt.s32.f32 %v7099_v10  ;;  %v7086_v61 = vunpack.c.2.s8 %v12660_v38  ;;  %v7090_v47 = vunpack.c.3.s8 %v12660_v38 }
 0xcc9   : > { %7438 = vmatpush.bf16.msra.mxu0 %v7338_v32  ;;  %7480 = vmatpush.bf16.msra.mxu3 %v7371_v0  ;;  %v7287_v53 = vcvt.s32.f32 %v7159_v21  ;;  %v7291_v56 = vcvt.s32.f32 %v7163_v58  ;;  %v7150_v42 = vunpack.c.2.s8 %v12663_v36  ;;  %v7154_v35 = vunpack.c.3.s8 %v12663_v36 }
 0xcca   : > { %v7335_v23 = vpack.c.bf16 %v7227_v51, %v7223_v8  ;;  %v7214_v62 = vcvt.s32.f32 %v7086_v61  ;;  %v7218_v30 = vcvt.s32.f32 %v7090_v47  ;;  %v7078_v46 = vunpack.c.0.s8 %v12660_v38 }
 0xccb   : > { %v7367_v54 = vpack.c.bf16 %v7291_v56, %v7287_v53  ;;  %v7278_v57 = vcvt.s32.f32 %v7150_v42  ;;  %v7282_v3 = vcvt.s32.f32 %v7154_v35  ;;  %v7142_v58 = vunpack.c.0.s8 %v12663_v36 }
 0xccc   : > { %7467 = vmatpush.bf16.msra.mxu2 %v7335_v23  ;;  %v7330_v22 = vpack.c.bf16 %v7218_v30, %v7214_v62  ;;  %v7206_v21 = vcvt.s32.f32 %v7078_v46  ;;  %v7146_v61 = vunpack.c.1.s8 %v12663_v36 }
 0xccd   : > { %7481 = vmatpush.bf16.msra.mxu3 %v7367_v54  ;;  %v7270_v53 = vcvt.s32.f32 %v7142_v58 }
 0xcce   : > { %v7274_v23 = vcvt.s32.f32 %v7146_v61  ;;  %v1021_v61 = vld [vmem:[%s10758_s27 + $0x430] sm:$0xff] }
 0xd13   : > { %v7014_v45 = vpop.xlane.xlu0 %7013 }
 0xd14   : > { %v7018_v63 = vmul.f32 %v7014_v45, %v11135_v20  ;;  %v7094_v45 = vunpack.c.0.s8 %v865_v52 }
 0xd16   : > { %v12643_v50 = vadd.f32 1e-05, %v7018_v63  ;;  %v7158_v63 = vunpack.c.0.s8 %v881_v7  ;;  %v7222_v40 = vcvt.s32.f32 %v7094_v45  ;;  %v12667_v7 = vld [vmem:[%s11133_s30 + $0x138] sm:$0xff] }
 0xd17   : > { %v7087_v29 = vunpack.c.2.s8 %v12667_v7  ;;  %v7091_v44 = vunpack.c.3.s8 %v12667_v7  ;;  %v7079_v56 = vunpack.c.0.s8 %v12667_v7  ;;  %v7083_v47 = vunpack.c.1.s8 %v12667_v7 }
 0xd18   : > { %10548 = vrsqrt.f32 %v12643_v50  ;;  %vm7028_vm1 = vweird.f32 %v12643_v50  ;;  %v7286_v52 = vcvt.s32.f32 %v7158_v63  ;;  %v7334_v11 = vpack.c.bf16 %v7226_v17, %v7222_v40 }
 0xd19   : > { %v7215_v45 = vcvt.s32.f32 %v7087_v29  ;;  %v7362_v17 = vpack.c.bf16 %v7282_v3, %v7278_v57  ;;  %v7207_v54 = vcvt.s32.f32 %v7079_v56  ;;  %v7211_v30 = vcvt.s32.f32 %v7083_v47  ;;  %v873_v29 = vld [vmem:[%s11133_s30 + $0x310] sm:$0xff]  ;;  %v858_v57 = vld [vmem:[%s11133_s30 + $0x98] sm:$0xff] }
 0xd1a   : > { %7439 = vmatpush.bf16.msra.mxu0 %v7334_v11  ;;  %v7366_v14 = vpack.c.bf16 %v7290_v60, %v7286_v52  ;;  %v7067_v58 = vunpack.c.1.s8 %v858_v57 }
 0xd1b   : > { %v7017_v33 = vpop.xlane.xlu1 %7016 }
 0xd1c   : > { %v7019_v6 = vmul.f32 %v7017_v33, %v11135_v20  ;;  %7453 = vmatpush.bf16.msra.mxu1 %v7366_v14  ;;  %v12703_v14 = vld [vmem:[%s11133_s30 + $0x90] sm:$0xff] }
 0xd1d   : > { %v7070_v35 = vunpack.c.2.s8 %v12703_v14  ;;  %v7062_v46 = vunpack.c.0.s8 %v12703_v14 }
 0xd1e   : > { %v10549_v34 = vpop.eup %10548  ;;  %v12654_v18 = vadd.f32 1e-05, %v7019_v6  ;;  %v12674_v6 = vld [vmem:[%s11133_s30 + $0x3b8] sm:$0xff]  ;;  %7440 = vmatpush.bf16.msra.mxu0 %v7330_v22  ;;  %v7327_v22 = vpack.c.bf16 %v7211_v30, %v7207_v54  ;;  %v7566_v54 = vunpack.c.2.s8 %v1021_v61  ;;  %v7568_v30 = vunpack.c.3.s8 %v1021_v61 }
 0xd1f   : > { %v7023_v2 = vmul.f32 %v10549_v34, %v12643_v50  ;;  %vm7029_vm2 = vweird.f32 %v10549_v34  ;;  %v7151_v63 = vunpack.c.2.s8 %v12674_v6  ;;  %v7219_v50 = vcvt.s32.f32 %v7091_v44 }
 0xd20   : > { %10550 = vrsqrt.f32 %v12654_v18  ;;  %vm7038_vm3 = vweird.f32 %v12654_v18  ;;  %vm7030_vm5 = vmor %vm7028_vm1, %vm7029_vm2  ;;  %7454 = vmatpush.bf16.msra.mxu1 %v7362_v17  ;;  %v7143_v62 = vunpack.c.0.s8 %v12674_v6  ;;  %v7147_v36 = vunpack.c.1.s8 %v12674_v6 }
 0xd21   : > { %v7024_v1 = vmul.f32 %v10549_v34, %v7023_v2  ;;  %v7155_v2 = vunpack.c.3.s8 %v12674_v6  ;;  %v7331_v11 = vpack.c.bf16 %v7219_v50, %v7215_v45  ;;  %v7074_v44 = vunpack.c.3.s8 %v12703_v14 }
 0xd22   : > { %v7275_v3 = vcvt.s32.f32 %v7147_v36  ;;  %v7198_v6 = vcvt.s32.f32 %v7070_v35 }
 0xd23   : > { %v7025_v24 = vmul.f32 0.5, %v7024_v1  ;;  %v7279_v1 = vcvt.s32.f32 %v7151_v63  ;;  %v7283_v52 = vcvt.s32.f32 %v7155_v2  ;;  %7468 = vmatpush.bf16.msra.mxu2 %v7331_v11  ;;  %v7202_v63 = vcvt.s32.f32 %v7074_v44 }
 0xd24   : > { %v7071_v2 = vunpack.c.2.s8 %v858_v57  ;;  %v7126_v11 = vunpack.c.0.s8 %v873_v29  ;;  %v7564_v44 = vunpack.c.1.s8 %v1021_v61 }
 0xd25   : > { %v7026_v31 = vsub.f32 1.5, %v7025_v24  ;;  %v7363_v60 = vpack.c.bf16 %v7283_v52, %v7279_v1 }
 0xd26   : > { %v10551_v33 = vpop.eup %10550  ;;  %v7199_v17 = vcvt.s32.f32 %v7071_v2 }
 0xd27   : > { %v7027_v32 = vmul.f32 %v10549_v34, %v7026_v31  ;;  %v7033_v16 = vmul.f32 %v10551_v33, %v12654_v18  ;;  %vm7039_vm4 = vweird.f32 %v10551_v33  ;;  %7482 = vmatpush.bf16.msra.mxu3 %v7363_v60  ;;  %v7358_v18 = vpack.c.bf16 %v7274_v23, %v7270_v53  ;;  %7469 = vmatpush.bf16.msra.mxu2 %v7327_v22 }
 0xd28   : > { %vm7040_vm6 = vmor %vm7038_vm3, %vm7039_vm4  ;;  %v7190_v60 = vcvt.s32.f32 %v7062_v46  ;;  %v7254_v53 = vcvt.s32.f32 %v7126_v11  ;;  %v7195_v23 = vcvt.s32.f32 %v7067_v58  ;;  %v7696_v22 = vcvt.s32.f32 %v7568_v30 }
 0xd29   : > { %v7031_v28 = vsel %vm7030_vm5, %v10549_v34, %v7027_v32  ;;  %v7034_v19 = vmul.f32 %v10551_v33, %v7033_v16  ;;  %v7271_v16 = vcvt.s32.f32 %v7143_v62  ;;  %7455 = vmatpush.bf16.msra.mxu1 %v7358_v18 }
 0xd2a   : > { %v7042_v0 = vmul.f32 %v7031_v28, %v12602_v25  ;;  %v7043_v40 = vmul.f32 %v7031_v28, %v12605_v41  ;;  %v7082_v25 = vunpack.c.1.s8 %v12660_v38  ;;  %v7134_v28 = vunpack.c.2.s8 %v873_v29 }
 0xd2b   : > { %v7035_v4 = vmul.f32 0.5, %v7034_v19  ;;  %v874_v19 = vld [vmem:[%s11133_s30 + $0x318] sm:$0xff] }
 0xd2c   : > { %v7048_v34 = vmul.f32 %v7046_v43, %v7042_v0  ;;  %v7049_v10 = vmul.f32 %v7047_v5, %v7043_v40  ;;  %v7210_v51 = vcvt.s32.f32 %v7082_v25  ;;  %v7075_v0 = vunpack.c.3.s8 %v858_v57 }
 0xd2d   : > { %v7036_v41 = vsub.f32 1.5, %v7035_v4  ;;  %v7135_v4 = vunpack.c.2.s8 %v874_v19  ;;  %v7139_v52 = vunpack.c.3.s8 %v874_v19  ;;  %v7130_v25 = vunpack.c.1.s8 %v873_v29 }
 0xd2e   : > { %v12695_v24 = vadd.f32 %v7052_v13, %v7048_v34  ;;  %v12699_v8 = vadd.f32 %v7053_v9, %v7049_v10  ;;  %v7326_v31 = vpack.c.bf16 %v7210_v51, %v7206_v21  ;;  %v7203_v50 = vcvt.s32.f32 %v7075_v0  ;;  %v1045_v0 = vld [vmem:[%s10758_s27 + $0x4f0] sm:$0xff] }
 0xd2f   : > { %v7037_v38 = vmul.f32 %v10551_v33, %v7036_v41  ;;  %v7066_v34 = vunpack.c.1.s8 %v12703_v14  ;;  %v7267_v10 = vcvt.s32.f32 %v7139_v52  ;;  %v7063_v41 = vunpack.c.0.s8 %v858_v57 }
 0xd30   : > { %7441 = vmatpush.bf16.msra.mxu0 %v7326_v31  ;;  %v7323_v48 = vpack.c.bf16 %v7203_v50, %v7199_v17  ;;  %v7127_v51 = vunpack.c.0.s8 %v874_v19  ;;  %v7258_v56 = vcvt.s32.f32 %v7130_v25  ;;  %v7131_v62 = vunpack.c.1.s8 %v874_v19 }
 0xd31   : > { %v7041_v42 = vsel %vm7040_vm6, %v10551_v33, %v7037_v38  ;;  %v7194_v21 = vcvt.s32.f32 %v7066_v34  ;;  %v1037_v38 = vld [vmem:[%s10758_s27 + $0x4b0] sm:$0xff]  ;;  %v7191_v47 = vcvt.s32.f32 %v7063_v41  ;;  %v7694_v57 = vcvt.s32.f32 %v7566_v54 }
 0xd32   : > { %v7044_v7 = vmul.f32 %v7041_v42, %v12613_v37  ;;  %v7045_v32 = vmul.f32 %v7041_v42, %v12616_v26  ;;  %v7138_v37 = vunpack.c.3.s8 %v873_v29  ;;  %v7359_v26 = vpack.c.bf16 %v7275_v3, %v7271_v16  ;;  %7470 = vmatpush.bf16.msra.mxu2 %v7323_v48  ;;  %v1029_v29 = vld [vmem:[%s10758_s27 + $0x470] sm:$0xff]  ;;  %v1035_v48 = vld [vmem:[%s10758_s27 + $0x4a0] sm:$0xff] }
 0xd33   : > { %v7318_v31 = vpack.c.bf16 %v7194_v21, %v7190_v60  ;;  %v7255_v36 = vcvt.s32.f32 %v7127_v51  ;;  %v7350_v42 = vpack.c.bf16 %v7258_v56, %v7254_v53  ;;  %v7630_v35 = vunpack.c.2.s8 %v1037_v38 }
 0xd34   : > { %v7050_v33 = vmul.f32 %v7046_v43, %v7044_v7  ;;  %v7051_v45 = vmul.f32 %v7047_v5, %v7045_v32  ;;  %v7262_v43 = vcvt.s32.f32 %v7134_v28  ;;  %v7266_v39 = vcvt.s32.f32 %v7138_v37  ;;  %7483 = vmatpush.bf16.msra.mxu3 %v7359_v26 }
 0xd35   : > { %v7322_v5 = vpack.c.bf16 %v7202_v63, %v7198_v6  ;;  %v7319_v7 = vpack.c.bf16 %v7195_v23, %v7191_v47  ;;  %v7259_v32 = vcvt.s32.f32 %v7131_v62  ;;  %v7632_v18 = vunpack.c.3.s8 %v1037_v38  ;;  %v1019_v6 = vld [vmem:[%s10758_s27 + $0x420] sm:$0xff] }
 0xd36   : > { %v12725_v40 = vadd.f32 %v7052_v13, %v7050_v33  ;;  %v12729_v55 = vadd.f32 %v7053_v9, %v7051_v45  ;;  %v7354_v13 = vpack.c.bf16 %v7266_v39, %v7262_v43  ;;  %v7263_v9 = vcvt.s32.f32 %v7135_v4  ;;  %v1027_v47 = vld [vmem:[%s10758_s27 + $0x460] sm:$0xff] }
 0xd37   : > { %7442 = vmatpush.bf16.msra.mxu0 %v7322_v5  ;;  %v7562_v16 = vunpack.c.0.s8 %v1021_v61  ;;  %v7758_v3 = vcvt.s32.f32 %v7630_v35  ;;  %7471 = vmatpush.bf16.msra.mxu2 %v7319_v7  ;;  %v7351_v33 = vpack.c.bf16 %v7259_v32, %v7255_v36  ;;  %v7760_v45 = vcvt.s32.f32 %v7632_v18 }
 0xd38   : > { %v12733_v1 = vpack.c.bf16 %v12725_v40, %v12695_v24  ;;  %v12737_v27 = vpack.c.bf16 %v12729_v55, %v12699_v8  ;;  %7456 = vmatpush.bf16.msra.mxu1 %v7354_v13  ;;  %v7355_v14 = vpack.c.bf16 %v7267_v10, %v7263_v9  ;;  %v7598_v37 = vunpack.c.2.s8 %v1029_v29 }
 0xd39   : > { %v7690_v28 = vcvt.s32.f32 %v7562_v16  ;;  %v7808_v19 = vpack.c.bf16 %v7696_v22, %v7694_v57  ;;  %v7692_v26 = vcvt.s32.f32 %v7564_v44  ;;  %v7600_v63 = vunpack.c.3.s8 %v1029_v29  ;;  %v1017_v16 = vld [vmem:[%s10758_s27 + $0x410] sm:$0xff] }
 0xd3a   : > { %7388 = vmatmul.bf16.vlgmr.msrb.gmra.mxu0 %v12733_v1  ;;  %7402 = vmatmul.bf16.vlgmr.msrb.gmra.mxu1 %v12737_v27  ;;  %v7626_v2 = vunpack.c.0.s8 %v1037_v38  ;;  %v7840_v43 = vpack.c.bf16 %v7760_v45, %v7758_v3  ;;  %v7726_v39 = vcvt.s32.f32 %v7598_v37  ;;  %v7628_v5 = vunpack.c.1.s8 %v1037_v38 }
 0xd3b   : > { %7416 = vmatmul.bf16.vlgmr.msrb.gmra.mxu2 %v12733_v1  ;;  %7430 = vmatmul.bf16.vlgmr.msrb.gmra.mxu3 %v12737_v27  ;;  %v7558_v17 = vunpack.c.2.s8 %v1019_v6  ;;  %v7806_v50 = vpack.c.bf16 %v7692_v26, %v7690_v28  ;;  %v7728_v4 = vcvt.s32.f32 %v7600_v63  ;;  %v7560_v52 = vunpack.c.3.s8 %v1019_v6  ;;  %v1033_v63 = vld [vmem:[%s10758_s27 + $0x490] sm:$0xff] }
 0xd3c   : > { %7484 = vmatpush.bf16.msra.mxu3 %v7355_v14  ;;  %7443 = vmatpush.bf16.msra.mxu0 %v7318_v31  ;;  %v7754_v13 = vcvt.s32.f32 %v7626_v2  ;;  %v7756_v9 = vcvt.s32.f32 %v7628_v5  ;;  %v7662_v34 = vunpack.c.2.s8 %v1045_v0  ;;  %v7664_v10 = vunpack.c.3.s8 %v1045_v0 }
 0xd3d   : > { %7457 = vmatpush.bf16.msra.mxu1 %v7350_v42  ;;  %7886 = vmatpush.bf16.msrb.mxu2 %v7840_v43  ;;  %v7686_v46 = vcvt.s32.f32 %v7558_v17  ;;  %v7824_v11 = vpack.c.bf16 %v7728_v4, %v7726_v39  ;;  %v7688_v25 = vcvt.s32.f32 %v7560_v52  ;;  %v7594_v41 = vunpack.c.0.s8 %v1029_v29 }
 0xd3e   : > { %v7596_v60 = vunpack.c.1.s8 %v1029_v29  ;;  %v7838_v21 = vpack.c.bf16 %v7756_v9, %v7754_v13  ;;  %v7790_v58 = vcvt.s32.f32 %v7662_v34  ;;  %v7792_v51 = vcvt.s32.f32 %v7664_v10 }
 0xd3f   : > { %v7622_v61 = vunpack.c.2.s8 %v1035_v48  ;;  %v7804_v38 = vpack.c.bf16 %v7688_v25, %v7686_v46  ;;  %v7722_v14 = vcvt.s32.f32 %v7594_v41  ;;  %v7624_v56 = vunpack.c.3.s8 %v1035_v48  ;;  %v1025_v25 = vld [vmem:[%s10758_s27 + $0x450] sm:$0xff] }
 0xd40   : > { %7485 = vmatpush.bf16.msra.mxu3 %v7351_v33  ;;  %7858 = vmatpush.bf16.msrb.mxu0 %v7808_v19  ;;  %v7724_v53 = vcvt.s32.f32 %v7596_v60  ;;  %v7856_v31 = vpack.c.bf16 %v7792_v51, %v7790_v58  ;;  %v7554_v62 = vunpack.c.0.s8 %v1019_v6  ;;  %v7556_v36 = vunpack.c.1.s8 %v1019_v6  ;;  %v1043_v6 = vld [vmem:[%s10758_s27 + $0x4e0] sm:$0xff] }
 0xd41   : > { %7872 = vmatpush.bf16.msrb.mxu1 %v7824_v11  ;;  %7887 = vmatpush.bf16.msrb.mxu2 %v7838_v21  ;;  %v7750_v23 = vcvt.s32.f32 %v7622_v61  ;;  %v7752_v54 = vcvt.s32.f32 %v7624_v56  ;;  %v7658_v30 = vunpack.c.0.s8 %v1045_v0  ;;  %v7660_v35 = vunpack.c.1.s8 %v1045_v0 }
 0xd42   : > { %v7822_v42 = vpack.c.bf16 %v7724_v53, %v7722_v14  ;;  %v7682_v29 = vcvt.s32.f32 %v7554_v62  ;;  %v7684_v7 = vcvt.s32.f32 %v7556_v36  ;;  %v7590_v32 = vunpack.c.2.s8 %v1027_v47 }
 0xd43   : > { %v7592_v18 = vunpack.c.3.s8 %v1027_v47  ;;  %v7836_v57 = vpack.c.bf16 %v7752_v54, %v7750_v23  ;;  %v7786_v22 = vcvt.s32.f32 %v7658_v30  ;;  %v7788_v3 = vcvt.s32.f32 %v7660_v35  ;;  %v1015_v23 = vld [vmem:[%s10758_s27 + $0x400] sm:$0xff] }
 0xd44   : > { %7859 = vmatpush.bf16.msrb.mxu0 %v7806_v50  ;;  %7900 = vmatpush.bf16.msrb.mxu3 %v7856_v31  ;;  %v7618_v44 = vunpack.c.0.s8 %v1035_v48  ;;  %v7802_v33 = vpack.c.bf16 %v7684_v7, %v7682_v29  ;;  %v7718_v45 = vcvt.s32.f32 %v7590_v32  ;;  %v7550_v19 = vunpack.c.2.s8 %v1017_v16 }
 0xd45   : > { %7873 = vmatpush.bf16.msrb.mxu1 %v7822_v42  ;;  %v7720_v28 = vcvt.s32.f32 %v7592_v18  ;;  %7888 = vmatpush.bf16.msrb.mxu2 %v7836_v57  ;;  %v7552_v26 = vunpack.c.3.s8 %v1017_v16  ;;  %v7654_v43 = vunpack.c.2.s8 %v1043_v6  ;;  %v7656_v39 = vunpack.c.3.s8 %v1043_v6 }
 0xd46   : > { %v7746_v37 = vcvt.s32.f32 %v7618_v44  ;;  %v7678_v5 = vcvt.s32.f32 %v7550_v19  ;;  %v7586_v50 = vunpack.c.0.s8 %v1027_v47  ;;  %v7588_v4 = vunpack.c.1.s8 %v1027_v47 }
 0xd47   : > { %v7820_v2 = vpack.c.bf16 %v7720_v28, %v7718_v45  ;;  %v7680_v17 = vcvt.s32.f32 %v7552_v26  ;;  %v7782_v52 = vcvt.s32.f32 %v7654_v43  ;;  %v7614_v9 = vunpack.c.2.s8 %v1033_v63  ;;  %v1041_v28 = vld [vmem:[%s10758_s27 + $0x4d0] sm:$0xff]  ;;  %v1031_v26 = vld [vmem:[%s10758_s27 + $0x480] sm:$0xff] }
 0xd48   : > { %7860 = vmatpush.bf16.msrb.mxu0 %v7804_v38  ;;  %v7714_v34 = vcvt.s32.f32 %v7586_v50  ;;  %v7716_v10 = vcvt.s32.f32 %v7588_v4  ;;  %v7616_v11 = vunpack.c.3.s8 %v1033_v63  ;;  %v7546_v21 = vunpack.c.0.s8 %v1017_v16  ;;  %v1022_v4 = vld [vmem:[%s10758_s27 + $0x438] sm:$0xff] }
 0xd49   : > { %7874 = vmatpush.bf16.msrb.mxu1 %v7820_v2  ;;  %v7800_v46 = vpack.c.bf16 %v7680_v17, %v7678_v5  ;;  %v7742_v60 = vcvt.s32.f32 %v7614_v9  ;;  %v7548_v58 = vunpack.c.1.s8 %v1017_v16  ;;  %v7650_v38 = vunpack.c.0.s8 %v1043_v6 }
 0xd4a   : > { %7444 = vmatmul.bf16.vlgmr.msra.gmra.mxu0 %v12733_v1  ;;  %7458 = vmatmul.bf16.vlgmr.msra.gmra.mxu1 %v12737_v27  ;;  %v7818_v51 = vpack.c.bf16 %v7716_v10, %v7714_v34  ;;  %v7744_v61 = vcvt.s32.f32 %v7616_v11  ;;  %v7652_v14 = vunpack.c.1.s8 %v1043_v6  ;;  %v7674_v53 = vcvt.s32.f32 %v7546_v21 }
 0xd4b   : > { %7472 = vmatmul.bf16.vlgmr.msra.gmra.mxu2 %v12733_v1  ;;  %7486 = vmatmul.bf16.vlgmr.msra.gmra.mxu3 %v12737_v27  ;;  %v7620_v1 = vunpack.c.1.s8 %v1035_v48  ;;  %v7854_v27 = vpack.c.bf16 %v7788_v3, %v7786_v22  ;;  %v7784_v48 = vcvt.s32.f32 %v7656_v39  ;;  %v7676_v56 = vcvt.s32.f32 %v7548_v58 }
 0xd4c   : > { %7861 = vmatpush.bf16.msrb.mxu0 %v7802_v33  ;;  %v7582_v47 = vunpack.c.2.s8 %v1025_v25  ;;  %v7584_v31 = vunpack.c.3.s8 %v1025_v25  ;;  %v7832_v62 = vpack.c.bf16 %v7744_v61, %v7742_v60  ;;  %v7778_v36 = vcvt.s32.f32 %v7650_v38 }
 0xd4d   : > { %v7748_v0 = vcvt.s32.f32 %v7620_v1  ;;  %7901 = vmatpush.bf16.msrb.mxu3 %v7854_v27  ;;  %v7852_v41 = vpack.c.bf16 %v7784_v48, %v7782_v52  ;;  %7875 = vmatpush.bf16.msrb.mxu1 %v7818_v51  ;;  %v7780_v42 = vcvt.s32.f32 %v7652_v14  ;;  %v7610_v54 = vunpack.c.0.s8 %v1033_v63  ;;  %v1038_v14 = vld [vmem:[%s10758_s27 + $0x4b8] sm:$0xff] }
 0xd4e   : > { %v7798_v30 = vpack.c.bf16 %v7676_v56, %v7674_v53  ;;  %v7710_v35 = vcvt.s32.f32 %v7582_v47  ;;  %v7712_v29 = vcvt.s32.f32 %v7584_v31  ;;  %v7612_v7 = vunpack.c.1.s8 %v1033_v63  ;;  %v1039_v31 = vld [vmem:[%s10758_s27 + $0x4c0] sm:$0xff] }
 0xd4f   : > { %v7834_v13 = vpack.c.bf16 %v7748_v0, %v7746_v37  ;;  %v7850_v32 = vpack.c.bf16 %v7780_v42, %v7778_v36  ;;  %v7738_v18 = vcvt.s32.f32 %v7610_v54  ;;  %v7542_v16 = vunpack.c.2.s8 %v1015_v23 }
 0xd50   : > { %7862 = vmatpush.bf16.msrb.mxu0 %v7800_v46  ;;  %v7544_v57 = vunpack.c.3.s8 %v1015_v23  ;;  %v7816_v22 = vpack.c.bf16 %v7712_v29, %v7710_v35  ;;  %v7740_v3 = vcvt.s32.f32 %v7612_v7  ;;  %v7646_v1 = vunpack.c.2.s8 %v1041_v28  ;;  %v1023_v46 = vld [vmem:[%s10758_s27 + $0x440] sm:$0xff] }
 0xd51   : > { %7889 = vmatpush.bf16.msrb.mxu2 %v7834_v13  ;;  %7902 = vmatpush.bf16.msrb.mxu3 %v7852_v41  ;;  %v7670_v44 = vcvt.s32.f32 %v7542_v16  ;;  %v7648_v27 = vunpack.c.3.s8 %v1041_v28  ;;  %v7578_v37 = vunpack.c.0.s8 %v1025_v25  ;;  %v7580_v19 = vunpack.c.1.s8 %v1025_v25 }
 0xd52   : > { %v7672_v6 = vcvt.s32.f32 %v7544_v57  ;;  %7876 = vmatpush.bf16.msrb.mxu1 %v7816_v22  ;;  %v7830_v33 = vpack.c.bf16 %v7740_v3, %v7738_v18  ;;  %v7774_v63 = vcvt.s32.f32 %v7646_v1  ;;  %v7606_v0 = vunpack.c.2.s8 %v1031_v26 }
 0xd53   : > { %v7776_v2 = vcvt.s32.f32 %v7648_v27  ;;  %v7608_v43 = vunpack.c.3.s8 %v1031_v26  ;;  %v7706_v39 = vcvt.s32.f32 %v7578_v37  ;;  %v7708_v5 = vcvt.s32.f32 %v7580_v19 }
 0xd54   : > { %7863 = vmatpush.bf16.msrb.mxu0 %v7798_v30  ;;  %v7796_v45 = vpack.c.bf16 %v7672_v6, %v7670_v44  ;;  %v7538_v17 = vunpack.c.0.s8 %v1015_v23  ;;  %v7540_v50 = vunpack.c.1.s8 %v1015_v23  ;;  %v7734_v52 = vcvt.s32.f32 %v7606_v0  ;;  %v1030_v6 = vld [vmem:[%s10758_s27 + $0x478] sm:$0xff] }
 0xd55   : > { %7890 = vmatpush.bf16.msrb.mxu2 %v7832_v62  ;;  %7903 = vmatpush.bf16.msrb.mxu3 %v7850_v32  ;;  %v7848_v13 = vpack.c.bf16 %v7776_v2, %v7774_v63  ;;  %v7736_v48 = vcvt.s32.f32 %v7608_v43  ;;  %v7642_v9 = vunpack.c.0.s8 %v1041_v28  ;;  %v7814_v34 = vpack.c.bf16 %v7708_v5, %v7706_v39 }
 0xd56   : > { %v7666_v10 = vcvt.s32.f32 %v7538_v17  ;;  %v7668_v11 = vcvt.s32.f32 %v7540_v50  ;;  %v7644_v25 = vunpack.c.1.s8 %v1041_v28  ;;  %v7567_v21 = vunpack.c.2.s8 %v1022_v4  ;;  %v1020_v17 = vld [vmem:[%s10758_s27 + $0x428] sm:$0xff] }
 0xd57   : > { %v7828_v41 = vpack.c.bf16 %v7736_v48, %v7734_v52  ;;  %v7770_v60 = vcvt.s32.f32 %v7642_v9  ;;  %7877 = vmatpush.bf16.msrb.mxu1 %v7814_v34  ;;  %v7569_v61 = vunpack.c.3.s8 %v1022_v4  ;;  %v7574_v38 = vunpack.c.2.s8 %v1023_v46 }
 0xd58   : > { %7864 = vmatpush.bf16.msrb.mxu0 %v7796_v45  ;;  %v7794_v58 = vpack.c.bf16 %v7668_v11, %v7666_v10  ;;  %v7772_v51 = vcvt.s32.f32 %v7644_v25  ;;  %v7695_v53 = vcvt.s32.f32 %v7567_v21  ;;  %v7576_v56 = vunpack.c.3.s8 %v1023_v46 }
 0xd59   : > { %7891 = vmatpush.bf16.msrb.mxu2 %v7830_v33  ;;  %7904 = vmatpush.bf16.msrb.mxu3 %v7848_v13  ;;  %v7602_v47 = vunpack.c.0.s8 %v1031_v26  ;;  %v7697_v62 = vcvt.s32.f32 %v7569_v61  ;;  %v7702_v36 = vcvt.s32.f32 %v7574_v38  ;;  %v7604_v42 = vunpack.c.1.s8 %v1031_v26  ;;  %v1036_v38 = vld [vmem:[%s10758_s27 + $0x4a8] sm:$0xff] }
 0xd5a   : > { %v7846_v23 = vpack.c.bf16 %v7772_v51, %v7770_v60  ;;  %v7704_v54 = vcvt.s32.f32 %v7576_v56  ;;  %v7631_v35 = vunpack.c.2.s8 %v1038_v14  ;;  %v7633_v29 = vunpack.c.3.s8 %v1038_v14 }
 0xd5b   : > { %v7730_v30 = vcvt.s32.f32 %v7602_v47  ;;  %v7809_v7 = vpack.c.bf16 %v7697_v62, %v7695_v53  ;;  %v7732_v32 = vcvt.s32.f32 %v7604_v42  ;;  %v7638_v18 = vunpack.c.2.s8 %v1039_v31 }
 0xd5c   : > { %7865 = vmatpush.bf16.msrb.mxu0 %v7794_v58  ;;  %v7640_v16 = vunpack.c.3.s8 %v1039_v31  ;;  %v7812_v57 = vpack.c.bf16 %v7704_v54, %v7702_v36  ;;  %v7759_v22 = vcvt.s32.f32 %v7631_v35  ;;  %v7761_v3 = vcvt.s32.f32 %v7633_v29 }
 0xd5d   : > { %7892 = vmatpush.bf16.msrb.mxu2 %v7828_v41  ;;  %7905 = vmatpush.bf16.msrb.mxu3 %v7846_v23  ;;  %v7563_v44 = vunpack.c.0.s8 %v1022_v4  ;;  %v7826_v33 = vpack.c.bf16 %v7732_v32, %v7730_v30  ;;  %v7766_v45 = vcvt.s32.f32 %v7638_v18  ;;  %v7565_v27 = vunpack.c.1.s8 %v1022_v4  ;;  %v1046_v4 = vld [vmem:[%s10758_s27 + $0x4f8] sm:$0xff]  ;;  %v12772_v23 = vld [vmem:[%s11429_s12 + $0x21] ss:$2 sm:$0xf] }
 0xd5e   : > { %v7768_v28 = vcvt.s32.f32 %v7640_v16  ;;  %7878 = vmatpush.bf16.msrb.mxu1 %v7812_v57  ;;  %v7841_v1 = vpack.c.bf16 %v7761_v3, %v7759_v22  ;;  %v7570_v19 = vunpack.c.0.s8 %v1023_v46  ;;  %v7572_v63 = vunpack.c.1.s8 %v1023_v46  ;;  %v1028_v16 = vld [vmem:[%s10758_s27 + $0x468] sm:$0xff] }
 0xd5f   : > { %v7691_v37 = vcvt.s32.f32 %v7563_v44  ;;  %v7599_v2 = vunpack.c.2.s8 %v1030_v6  ;;  %v7693_v0 = vcvt.s32.f32 %v7565_v27  ;;  %v7601_v39 = vunpack.c.3.s8 %v1030_v6 }
 0xd60   : > { %7914 = vmatpush.bf16.msra.mxu0 %v7809_v7  ;;  %v7844_v26 = vpack.c.bf16 %v7768_v28, %v7766_v45  ;;  %v7698_v43 = vcvt.s32.f32 %v7570_v19  ;;  %v7627_v5 = vunpack.c.0.s8 %v1038_v14  ;;  %v7700_v50 = vcvt.s32.f32 %v7572_v63 }
 0xd61   : > { %7893 = vmatpush.bf16.msrb.mxu2 %v7826_v33  ;;  %v7727_v13 = vcvt.s32.f32 %v7599_v2  ;;  %v7629_v52 = vunpack.c.1.s8 %v1038_v14  ;;  %v7634_v48 = vunpack.c.0.s8 %v1039_v31  ;;  %v7807_v9 = vpack.c.bf16 %v7693_v0, %v7691_v37 }
 0xd62   : > { %7906 = vmatpush.bf16.msrb.mxu3 %v7844_v26  ;;  %v7729_v34 = vcvt.s32.f32 %v7601_v39  ;;  %v7755_v10 = vcvt.s32.f32 %v7627_v5  ;;  %v7636_v11 = vunpack.c.1.s8 %v1039_v31  ;;  %v7810_v46 = vpack.c.bf16 %v7700_v50, %v7698_v43  ;;  %v1044_v39 = vld [vmem:[%s10758_s27 + $0x4e8] sm:$0xff]  ;;  %v12779_v5 = vld [vmem:[%s11429_s12 + $0x20] ss:$2 sm:$0xf] }
 0xd63   : > { %v7757_v25 = vcvt.s32.f32 %v7629_v52  ;;  %v7762_v41 = vcvt.s32.f32 %v7634_v48  ;;  %v7559_v60 = vunpack.c.2.s8 %v1020_v17  ;;  %v7561_v51 = vunpack.c.3.s8 %v1020_v17 }
 0xd64   : > { %7915 = vmatpush.bf16.msra.mxu0 %v7807_v9  ;;  %v7825_v21 = vpack.c.bf16 %v7729_v34, %v7727_v13  ;;  %v7764_v58 = vcvt.s32.f32 %v7636_v11  ;;  %v7663_v61 = vunpack.c.2.s8 %v1046_v4  ;;  %7879 = vmatpush.bf16.msrb.mxu1 %v7810_v46  ;;  %v7665_v56 = vunpack.c.3.s8 %v1046_v4 }
 0xd65   : > { %7942 = vmatpush.bf16.msra.mxu2 %v7841_v1  ;;  %v7839_v14 = vpack.c.bf16 %v7757_v25, %v7755_v10  ;;  %v7687_v53 = vcvt.s32.f32 %v7559_v60  ;;  %v7595_v47 = vunpack.c.0.s8 %v1030_v6  ;;  %v7689_v62 = vcvt.s32.f32 %v7561_v51  ;;  %v1018_v1 = vld [vmem:[%s10758_s27 + $0x418] sm:$0xff] }
 0xd66   : > { %v7842_v31 = vpack.c.bf16 %v7764_v58, %v7762_v41  ;;  %v7791_v36 = vcvt.s32.f32 %v7663_v61  ;;  %v7597_v42 = vunpack.c.1.s8 %v1030_v6  ;;  %v7793_v54 = vcvt.s32.f32 %v7665_v56  ;;  %v1034_v41 = vld [vmem:[%s10758_s27 + $0x498] sm:$0xff] }
 0xd67   : > { %v7723_v30 = vcvt.s32.f32 %v7595_v47  ;;  %v7623_v35 = vunpack.c.2.s8 %v1036_v38  ;;  %v7625_v29 = vunpack.c.3.s8 %v1036_v38  ;;  %v7805_v7 = vpack.c.bf16 %v7689_v62, %v7687_v53 }
 0xd68   : > { %7928 = vmatpush.bf16.msra.mxu1 %v7825_v21  ;;  %7907 = vmatpush.bf16.msrb.mxu3 %v7842_v31  ;;  %v7725_v32 = vcvt.s32.f32 %v7597_v42  ;;  %v7555_v18 = vunpack.c.0.s8 %v1020_v17  ;;  %v7493_v57 = vperm.slane %v12772_v23, 0  ;;  %v7857_v22 = vpack.c.bf16 %v7793_v54, %v7791_v36 }
 0xd69   : > { %7943 = vmatpush.bf16.msra.mxu2 %v7839_v14  ;;  %v7751_v3 = vcvt.s32.f32 %v7623_v35  ;;  %v7753_v44 = vcvt.s32.f32 %v7625_v29  ;;  %7916 = vmatpush.bf16.msra.mxu0 %v7805_v7  ;;  %v7557_v6 = vunpack.c.1.s8 %v1020_v17  ;;  %v7659_v28 = vunpack.c.0.s8 %v1046_v4  ;;  %v1026_v35 = vld [vmem:[%s10758_s27 + $0x458] sm:$0xff] }
 0xd6a   : > { %v7823_v33 = vpack.c.bf16 %v7725_v32, %v7723_v30  ;;  %v7683_v45 = vcvt.s32.f32 %v7555_v18  ;;  %v7661_v37 = vunpack.c.1.s8 %v1046_v4  ;;  %v7591_v19 = vunpack.c.2.s8 %v1028_v16 }
 0xd6b   : > { %v7837_v27 = vpack.c.bf16 %v7753_v44, %v7751_v3  ;;  %v7593_v26 = vunpack.c.3.s8 %v1028_v16  ;;  %v7685_v63 = vcvt.s32.f32 %v7557_v6  ;;  %v7787_v2 = vcvt.s32.f32 %v7659_v28 }
 0xd6c   : > { %7956 = vmatpush.bf16.msra.mxu3 %v7857_v22  ;;  %7929 = vmatpush.bf16.msra.mxu1 %v7823_v33  ;;  %v7619_v0 = vunpack.c.0.s8 %v1036_v38  ;;  %v7621_v43 = vunpack.c.1.s8 %v1036_v38  ;;  %v7789_v50 = vcvt.s32.f32 %v7661_v37  ;;  %v7719_v17 = vcvt.s32.f32 %v7591_v19 }
 0xd6d   : > { %7944 = vmatpush.bf16.msra.mxu2 %v7837_v27  ;;  %v7721_v13 = vcvt.s32.f32 %v7593_v26  ;;  %v7551_v52 = vunpack.c.2.s8 %v1018_v1  ;;  %v7803_v48 = vpack.c.bf16 %v7685_v63, %v7683_v45  ;;  %v7553_v4 = vunpack.c.3.s8 %v1018_v1  ;;  %v12786_v45 = vld [vmem:[%s10758_s27 + $0x408] sm:$0xff] }
 0xd6e   : > { %v7747_v9 = vcvt.s32.f32 %v7619_v0  ;;  %v7749_v34 = vcvt.s32.f32 %v7621_v43  ;;  %v7855_v10 = vpack.c.bf16 %v7789_v50, %v7787_v2  ;;  %v7655_v25 = vunpack.c.2.s8 %v1044_v39  ;;  %v12789_v0 = vld [vmem:[%s10758_s27 + $0x4d8] sm:$0xff] }
 0xd6f   : > { %v7821_v11 = vpack.c.bf16 %v7721_v13, %v7719_v17  ;;  %v7679_v46 = vcvt.s32.f32 %v7551_v52  ;;  %v7510_v60 = vperm.slane %v12779_v5, 0  ;;  %7917 = vmatpush.bf16.msra.mxu0 %v7803_v48  ;;  %v7681_v58 = vcvt.s32.f32 %v7553_v4 }
 0xd70   : > { %v7835_v21 = vpack.c.bf16 %v7749_v34, %v7747_v9  ;;  %v7657_v51 = vunpack.c.3.s8 %v1044_v39  ;;  %v7494_v61 = vperm.slane %v12772_v23, 1  ;;  %7957 = vmatpush.bf16.msra.mxu3 %v7855_v10  ;;  %v7783_v38 = vcvt.s32.f32 %v7655_v25 }
 0xd71   : > { %7930 = vmatpush.bf16.msra.mxu1 %v7821_v11  ;;  %v7587_v14 = vunpack.c.0.s8 %v1028_v16  ;;  %v7589_v53 = vunpack.c.1.s8 %v1028_v16  ;;  %v7801_v56 = vpack.c.bf16 %v7681_v58, %v7679_v46  ;;  %v7615_v31 = vunpack.c.2.s8 %v1034_v41  ;;  %v12799_v58 = vld [vmem:[%s10758_s27 + $0x488] sm:$0xff] }
 0xd72   : > { %7945 = vmatpush.bf16.msra.mxu2 %v7835_v21  ;;  %v7785_v47 = vcvt.s32.f32 %v7657_v51  ;;  %v7617_v62 = vunpack.c.3.s8 %v1034_v41  ;;  %v7547_v54 = vunpack.c.0.s8 %v1018_v1  ;;  %v7549_v30 = vunpack.c.1.s8 %v1018_v1 }
 0xd73   : > { %v7715_v36 = vcvt.s32.f32 %v7587_v14  ;;  %v7717_v42 = vcvt.s32.f32 %v7589_v53  ;;  %7918 = vmatpush.bf16.msra.mxu0 %v7801_v56  ;;  %v7743_v7 = vcvt.s32.f32 %v7615_v31  ;;  %v7651_v18 = vunpack.c.0.s8 %v1044_v39 }
 0xd74   : > { %v7853_v29 = vpack.c.bf16 %v7785_v47, %v7783_v38  ;;  %v7745_v32 = vcvt.s32.f32 %v7617_v62  ;;  %v7675_v44 = vcvt.s32.f32 %v7547_v54  ;;  %v7677_v33 = vcvt.s32.f32 %v7549_v30 }
 0xd75   : > { %v7819_v16 = vpack.c.bf16 %v7717_v42, %v7715_v36  ;;  %v7653_v6 = vunpack.c.1.s8 %v1044_v39  ;;  %v7779_v37 = vcvt.s32.f32 %v7651_v18  ;;  %v7583_v1 = vunpack.c.2.s8 %v1026_v35 }
 0xd76   : > { %7958 = vmatpush.bf16.msra.mxu3 %v7853_v29  ;;  %v7833_v27 = vpack.c.bf16 %v7745_v32, %v7743_v7  ;;  %v7799_v19 = vpack.c.bf16 %v7677_v33, %v7675_v44  ;;  %v7585_v63 = vunpack.c.3.s8 %v1026_v35  ;;  %v7611_v2 = vunpack.c.0.s8 %v1034_v41  ;;  %v1024_v44 = vld [vmem:[%s10758_s27 + $0x448] sm:$0xff] }
 0xd77   : > { %7931 = vmatpush.bf16.msra.mxu1 %v7819_v16  ;;  %v7781_v26 = vcvt.s32.f32 %v7653_v6  ;;  %v7511_v43 = vperm.slane %v12779_v5, 1  ;;  %v7711_v50 = vcvt.s32.f32 %v7583_v1  ;;  %v7613_v17 = vunpack.c.1.s8 %v1034_v41 }
 0xd78   : > { %7946 = vmatpush.bf16.msra.mxu2 %v7833_v27  ;;  %v7543_v39 = vunpack.c.2.s8 %v12786_v45  ;;  %7919 = vmatpush.bf16.msra.mxu0 %v7799_v19  ;;  %v7713_v52 = vcvt.s32.f32 %v7585_v63  ;;  %v7739_v48 = vcvt.s32.f32 %v7611_v2  ;;  %v7545_v9 = vunpack.c.3.s8 %v12786_v45 }
 0xd79   : > { %v7851_v13 = vpack.c.bf16 %v7781_v26, %v7779_v37  ;;  %v7741_v4 = vcvt.s32.f32 %v7613_v17  ;;  %v7647_v11 = vunpack.c.2.s8 %v12789_v0  ;;  %v7649_v41 = vunpack.c.3.s8 %v12789_v0 }
 0xd7a   : > { %v7671_v10 = vcvt.s32.f32 %v7543_v39  ;;  %v7817_v46 = vpack.c.bf16 %v7713_v52, %v7711_v50  ;;  %v7673_v25 = vcvt.s32.f32 %v7545_v9  ;;  %v7579_v21 = vunpack.c.0.s8 %v1026_v35 }
 0xd7b   : > { %7959 = vmatpush.bf16.msra.mxu3 %v7851_v13  ;;  %v7495_v14 = vperm.slane %v12772_v23, 2  ;;  %v7831_v53 = vpack.c.bf16 %v7741_v4, %v7739_v48  ;;  %v7775_v56 = vcvt.s32.f32 %v7647_v11  ;;  %v7581_v47 = vunpack.c.1.s8 %v1026_v35 }
 0xd7c   : > { %7932 = vmatpush.bf16.msra.mxu1 %v7817_v46  ;;  %v7797_v42 = vpack.c.bf16 %v7673_v25, %v7671_v10  ;;  %v7777_v54 = vcvt.s32.f32 %v7649_v41  ;;  %v7707_v30 = vcvt.s32.f32 %v7579_v21  ;;  %v7607_v32 = vunpack.c.2.s8 %v12799_v58 }
 0xd7d   : > { %7947 = vmatpush.bf16.msra.mxu2 %v7831_v53  ;;  %v7709_v7 = vcvt.s32.f32 %v7581_v47  ;;  %v7609_v18 = vunpack.c.3.s8 %v12799_v58  ;;  %v7541_v16 = vunpack.c.1.s8 %v12786_v45  ;;  %v7643_v26 = vunpack.c.0.s8 %v12789_v0 }
 0xd7e   : > { %7920 = vmatpush.bf16.msra.mxu0 %v7797_v42  ;;  %v7849_v35 = vpack.c.bf16 %v7777_v54, %v7775_v56  ;;  %v7645_v2 = vunpack.c.1.s8 %v12789_v0  ;;  %v7575_v50 = vunpack.c.2.s8 %v1024_v44  ;;  %v7577_v52 = vunpack.c.3.s8 %v1024_v44 }
 0xd7f   : > { %v7815_v6 = vpack.c.bf16 %v7709_v7, %v7707_v30  ;;  %v7737_v27 = vcvt.s32.f32 %v7609_v18  ;;  %v7669_v19 = vcvt.s32.f32 %v7541_v16  ;;  %v7771_v13 = vcvt.s32.f32 %v7643_v26 }
 0xd80   : > { %7960 = vmatpush.bf16.msra.mxu3 %v7849_v35  ;;  %v7773_v4 = vcvt.s32.f32 %v7645_v2  ;;  %v7703_v10 = vcvt.s32.f32 %v7575_v50  ;;  %v7603_v11 = vunpack.c.0.s8 %v12799_v58  ;;  %v7705_v41 = vcvt.s32.f32 %v7577_v52 }
 0xd81   : > { %7933 = vmatpush.bf16.msra.mxu1 %v7815_v6  ;;  %v7605_v0 = vunpack.c.1.s8 %v12799_v58  ;;  %v7571_v30 = vunpack.c.0.s8 %v1024_v44 }
 0xd82   : > { %v7847_v53 = vpack.c.bf16 %v7773_v4, %v7771_v13  ;;  %v7731_v56 = vcvt.s32.f32 %v7603_v11 }
 0xd84   : > { %7961 = vmatpush.bf16.msra.mxu3 %v7847_v53  ;;  %v10415_v53 = vld [vmem:[%s12836_s15 + $0x28] sm:$0xff] }
 0xdb7   : > { %v7389_v22 = vpop.f32.mrf.mxu0  ;;  %v7403_v3 = vpop.f32.mrf.mxu1 }
 0xdb8   : > { %v7404_v28 = vadd.f32 %v7403_v3, %v7389_v22  ;;  %v7539_v3 = vunpack.c.0.s8 %v12786_v45 }
 0xdba   : > { %v7501_v34 = vmul.f32 %v7493_v57, %v7404_v28  ;;  %v7735_v28 = vcvt.s32.f32 %v7607_v32  ;;  %v7667_v1 = vcvt.s32.f32 %v7539_v3 }
 0xdbc   : > { %v7518_v22 = vadd.f32 %v7510_v60, %v7501_v34  ;;  %v7829_v45 = vpack.c.bf16 %v7737_v27, %v7735_v28  ;;  %v7795_v39 = vpack.c.bf16 %v7669_v19, %v7667_v1 }
 0xdbe   : > { %v7417_v51 = vpop.f32.mrf.mxu2  ;;  %v7431_v38 = vpop.f32.mrf.mxu3  ;;  %v7526_v17 = vmax.f32 %v7518_v22, 0.0  ;;  %7948 = vmatpush.bf16.msra.mxu2 %v7829_v45  ;;  %7921 = vmatpush.bf16.msra.mxu0 %v7795_v39  ;;  %v7699_v22 = vcvt.s32.f32 %v7571_v30  ;;  %v10420_v30 = vld [vmem:[%s12836_s15 + $0x50] sm:$0xff] }
 0xdbf   : > { %v7432_v31 = vadd.f32 %v7431_v38, %v7417_v51  ;;  %v7391_v62 = vpop.f32.mrf.mxu0  ;;  %v7405_v36 = vpop.f32.mrf.mxu1 }
 0xdc0   : > { %v7406_v29 = vadd.f32 %v7405_v36, %v7391_v62  ;;  %v7733_v62 = vcvt.s32.f32 %v7605_v0 }
 0xdc1   : > { %v7502_v37 = vmul.f32 %v7494_v61, %v7432_v31  ;;  %v7813_v31 = vpack.c.bf16 %v7705_v41, %v7703_v10  ;;  %v10416_v41 = vld [vmem:[%s12836_s15 + $0x30] sm:$0xff] }
 0xdc2   : > { %v7505_v33 = vmul.f32 %v7493_v57, %v7406_v29  ;;  %v1040_v57 = vld [vmem:[%s10758_s27 + $0x4c8] sm:$0xff]  ;;  %v7573_v29 = vunpack.c.1.s8 %v1024_v44  ;;  %v7827_v7 = vpack.c.bf16 %v7733_v62, %v7731_v56  ;;  %v7512_v44 = vperm.slane %v12779_v5, 2  ;;  %v10424_v56 = vld [vmem:[%s12836_s15 + $0x70] sm:$0xff]  ;;  %v10422_v62 = vld [vmem:[%s12836_s15 + $0x60] sm:$0xff] }
 0xdc3   : > { %v7639_v21 = vunpack.c.2.s8 %v1040_v57  ;;  %v7519_v51 = vadd.f32 %v7511_v43, %v7502_v37  ;;  %v7641_v36 = vunpack.c.3.s8 %v1040_v57  ;;  %7934 = vmatpush.bf16.msra.mxu1 %v7813_v31  ;;  %v7635_v18 = vunpack.c.0.s8 %v1040_v57  ;;  %v10413_v31 = vld [vmem:[%s12836_s15 + $0x18] sm:$0xff] }
 0xdc4   : > { %v7522_v63 = vadd.f32 %v7510_v60, %v7505_v33  ;;  %v7701_v35 = vcvt.s32.f32 %v7573_v29  ;;  %v7637_v3 = vunpack.c.1.s8 %v1040_v57  ;;  %7949 = vmatpush.bf16.msra.mxu2 %v7827_v7  ;;  %v7496_v57 = vperm.slane %v12772_v23, 3  ;;  %v10410_v29 = vld [vmem:[%s12836_s15] sm:$0xff] }
 0xdc5   : > { %v7767_v54 = vcvt.s32.f32 %v7639_v21  ;;  %v7769_v32 = vcvt.s32.f32 %v7641_v36  ;;  %v7763_v6 = vcvt.s32.f32 %v7635_v18  ;;  %v10425_v21 = vld [vmem:[%s12836_s15 + $0x78] sm:$0xff]  ;;  %v10412_v36 = vld [vmem:[%s12836_s15 + $0x10] sm:$0xff]  ;;  %v8307_v7 = vpack.c.b16 %v12380_v49, %v12380_v49 }
 0xdc6   : > { %v7530_v48 = vmax.f32 %v7522_v63, 0.0  ;;  %v7419_v9 = vpop.f32.mrf.mxu2  ;;  %v7433_v34 = vpop.f32.mrf.mxu3  ;;  %v7811_v37 = vpack.c.bf16 %v7701_v35, %v7699_v22  ;;  %v7765_v1 = vcvt.s32.f32 %v7637_v3  ;;  %v8308_v18 = vpack.c.b16 %v12384_v15, %v12384_v15  ;;  %v10572_v15 = vld [vmem:[%s10998_s20 + $0x20] sm:$0xf0] }
 0xdc7   : > { %v7434_v46 = vadd.f32 %v7433_v34, %v7419_v9  ;;  %v7445_v60 = vpop.f32.mrf.mxu0  ;;  %v7459_v25 = vpop.f32.mrf.mxu1  ;;  %v7845_v33 = vpack.c.bf16 %v7769_v32, %v7767_v54  ;;  %v10411_v54 = vld [vmem:[%s12836_s15 + $0x8] sm:$0xff]  ;;  %v10418_v32 = vld [vmem:[%s12836_s15 + $0x40] sm:$0xff] }
 0xdc8   : > { %v7534_v38 = vpack.c.bf16 %v7530_v48, %v7526_v17  ;;  %v7460_v42 = vadd.f32 %v7459_v25, %v7445_v60  ;;  %7935 = vmatpush.bf16.msra.mxu1 %v7811_v37  ;;  %v7843_v2 = vpack.c.bf16 %v7765_v1, %v7763_v6  ;;  %v7513_v48 = vperm.slane %v12779_v5, 3 }
 0xdc9   : > { %v7506_v47 = vmul.f32 %v7494_v61, %v7434_v46  ;;  %v7527_v61 = vmax.f32 %v7519_v51, 0.0  ;;  %7962 = vmatpush.bf16.msra.mxu3 %v7845_v33 }
 0xdca   : > { %7866 = vmatmul.bf16.vlgmr.msrb.gmra.mxu0 %v7534_v38  ;;  %v7503_v28 = vmul.f32 %v7495_v14, %v7460_v42  ;;  %v10421_v42 = vld [vmem:[%s12836_s15 + $0x58] sm:$0xff] }
 0xdcb   : > { %v7523_v58 = vadd.f32 %v7511_v43, %v7506_v47  ;;  %v10423_v47 = vld [vmem:[%s12836_s15 + $0x68] sm:$0xff] }
 0xdcc   : > { %v7520_v17 = vadd.f32 %v7512_v44, %v7503_v28 }
 0xdcd   : > { %v7531_v16 = vmax.f32 %v7523_v58, 0.0  ;;  %7963 = vmatpush.bf16.msra.mxu3 %v7843_v2  ;;  %v10419_v58 = vld [vmem:[%s12836_s15 + $0x48] sm:$0xff] }
 0xdce   : > { %v7473_v27 = vpop.f32.mrf.mxu2  ;;  %v7487_v43 = vpop.f32.mrf.mxu3  ;;  %v7528_v9 = vmax.f32 %v7520_v17, 0.0  ;;  %v10574_v17 = vld [vmem:[%s10998_s20 + $0x28] sm:$0xf0] }
 0xdcf   : > { %v7535_v19 = vpack.c.bf16 %v7531_v16, %v7527_v61  ;;  %v7447_v26 = vpop.f32.mrf.mxu0  ;;  %v7461_v63 = vpop.f32.mrf.mxu1  ;;  %v7488_v50 = vadd.f32 %v7487_v43, %v7473_v27 }
 0xdd0   : > { %v7462_v45 = vadd.f32 %v7461_v63, %v7447_v26  ;;  %v12861_v63 = vld [vmem:[%s10998_s20 + $0x10] sm:$0xf0] }
 0xdd1   : > { %7880 = vmatmul.bf16.vlgmr.msrb.gmra.mxu1 %v7535_v19  ;;  %v7504_v52 = vmul.f32 %v7496_v57, %v7488_v50 }
 0xdd2   : > { %v7507_v39 = vmul.f32 %v7495_v14, %v7462_v45  ;;  %v10417_v14 = vld [vmem:[%s12836_s15 + $0x38] sm:$0xff]  ;;  %v7976_v45 = vperm.slane %v12861_v63, 5 }
 0xdd3   : > { %v7521_v46 = vadd.f32 %v7513_v48, %v7504_v52 }
 0xdd4   : > { %v7524_v13 = vadd.f32 %v7512_v44, %v7507_v39  ;;  %v7971_v39 = vperm.slane %v10574_v17, 5  ;;  %v10443_v17 = vld [vmem:[%s12836_s15 + $0x108] sm:$0xff] }
 0xdd5   : > { %v7529_v5 = vmax.f32 %v7521_v46, 0.0 }
 0xdd6   : > { %v7532_v34 = vmax.f32 %v7524_v13, 0.0  ;;  %v7475_v4 = vpop.f32.mrf.mxu2  ;;  %v7489_v10 = vpop.f32.mrf.mxu3 }
 0xdd7   : > { %v7490_v23 = vadd.f32 %v7489_v10, %v7475_v4 }
 0xdd8   : > { %v7536_v11 = vpack.c.bf16 %v7532_v34, %v7528_v9  ;;  %v12866_v9 = vld [vmem:[%s10998_s20 + $0x18] sm:$0xf0] }
 0xdd9   : > { %v7508_v60 = vmul.f32 %v7496_v57, %v7490_v23  ;;  %v7977_v34 = vperm.slane %v12866_v9, 5 }
 0xdda   : > { %7894 = vmatmul.bf16.vlgmr.msrb.gmra.mxu2 %v7536_v11  ;;  %7922 = vmatmul.bf16.vlgmr.msra.gmra.mxu0 %v7534_v38  ;;  %v10414_v38 = vld [vmem:[%s12836_s15 + $0x20] sm:$0xff] }
 0xddb   : > { %v7525_v25 = vadd.f32 %v7513_v48, %v7508_v60  ;;  %8407 = vmatpush.bf16.msrb.mxu2 %v10417_v14 }
 0xddd   : > { %v7533_v0 = vmax.f32 %v7525_v25, 0.0 }
 0xddf   : > { %v7537_v51 = vpack.c.bf16 %v7533_v0, %v7529_v5  ;;  %8408 = vmatpush.bf16.msrb.mxu2 %v10416_v41 }
 0xde1   : > { %7908 = vmatmul.bf16.vlgmr.msrb.gmra.mxu3 %v7537_v51  ;;  %7936 = vmatmul.bf16.vlgmr.msra.gmra.mxu1 %v7535_v19  ;;  %v7970_v19 = vperm.slane %v10572_v15, 5  ;;  %v10454_v15 = vld [vmem:[%s12836_s15 + $0x160] sm:$0xff] }
 0xde2   : > { %8420 = vmatpush.bf16.msrb.mxu3 %v10425_v21 }
 0xde3   : > { %8409 = vmatpush.bf16.msrb.mxu2 %v10415_v53 }
 0xde6   : > { %8421 = vmatpush.bf16.msrb.mxu3 %v10424_v56 }
 0xde7   : > { %8410 = vmatpush.bf16.msrb.mxu2 %v10414_v38 }
 0xdea   : > { %8422 = vmatpush.bf16.msrb.mxu3 %v10423_v47  ;;  %7950 = vmatmul.bf16.vlgmr.msra.gmra.mxu2 %v7536_v11 }
 0xdeb   : > { %8411 = vmatpush.bf16.msrb.mxu2 %v10413_v31 }
 0xdee   : > { %8423 = vmatpush.bf16.msrb.mxu3 %v10422_v62 }
 0xdef   : > { %8412 = vmatpush.bf16.msrb.mxu2 %v10412_v36 }
 0xdf1   : > { %7964 = vmatmul.bf16.vlgmr.msra.gmra.mxu3 %v7537_v51 }
 0xdf2   : > { %8424 = vmatpush.bf16.msrb.mxu3 %v10421_v42 }
 0xdf3   : > { %8413 = vmatpush.bf16.msrb.mxu2 %v10411_v54 }
 0xdf6   : > { %8425 = vmatpush.bf16.msrb.mxu3 %v10420_v30 }
 0xdf7   : > { %8414 = vmatpush.bf16.msrb.mxu2 %v10410_v29  ;;  %v10449_v29 = vld [vmem:[%s12836_s15 + $0x138] sm:$0xff] }
 0xdf8   : > { %8281 = vmatpush.bf16.msrb.mxu0 %v10449_v29  ;;  %v10428_v29 = vld [vmem:[%s12836_s15 + $0x90] sm:$0xff] }
 0xdfa   : > { %8426 = vmatpush.bf16.msrb.mxu3 %v10419_v58  ;;  %8415 = vmatmul.bf16.vlgmr.msrb.gmra.mxu2 %v8307_v7  ;;  %v10457_v58 = vld [vmem:[%s12836_s15 + $0x178] sm:$0xff]  ;;  %v10448_v7 = vld [vmem:[%s12836_s15 + $0x130] sm:$0xff] }
 0xdfb   : > { %8294 = vmatpush.bf16.msrb.mxu1 %v10457_v58  ;;  %v10436_v58 = vld [vmem:[%s12836_s15 + $0xd0] sm:$0xff] }
 0xdfc   : > { %8282 = vmatpush.bf16.msrb.mxu0 %v10448_v7  ;;  %v10458_v7 = vld [vmem:[%s12836_s15 + $0x180] sm:$0xff] }
 0xdfe   : > { %8427 = vmatpush.bf16.msrb.mxu3 %v10418_v32  ;;  %v10456_v32 = vld [vmem:[%s12836_s15 + $0x170] sm:$0xff] }
 0xdff   : > { %8295 = vmatpush.bf16.msrb.mxu1 %v10456_v32  ;;  %v10466_v32 = vld [vmem:[%s12836_s15 + $0x1c0] sm:$0xff] }
 0xe01   : > { %8428 = vmatmul.bf16.vlgmr.msrb.gmra.mxu3 %v8308_v18  ;;  %v10447_v18 = vld [vmem:[%s12836_s15 + $0x128] sm:$0xff] }
 0xe02   : > { %8283 = vmatpush.bf16.msrb.mxu0 %v10447_v18 }
 0xe47   : > { %v7867_v35 = vpop.f32.mrf.mxu0 }
 0xe4e   : > { %v7881_v22 = vpop.f32.mrf.mxu1 }
 0xe4f   : > { %v7869_v16 = vpop.f32.mrf.mxu0  ;;  %v7882_v28 = vadd.f32 %v7881_v22, %v7867_v35  ;;  %v10455_v22 = vld [vmem:[%s12836_s15 + $0x168] sm:$0xff] }
 0xe50   : > { %8296 = vmatpush.bf16.msrb.mxu1 %v10455_v22 }
 0xe54   : > { %8297 = vmatpush.bf16.msrb.mxu1 %v10454_v15 }
 0xe56   : > { %v7883_v61 = vpop.f32.mrf.mxu1 }
 0xe57   : > { %v7923_v37 = vpop.f32.mrf.mxu0  ;;  %v7884_v2 = vadd.f32 %v7883_v61, %v7869_v16 }
 0xe5d   : > { %v7895_v3 = vpop.f32.mrf.mxu2 }
 0xe5e   : > { %v7937_v49 = vpop.f32.mrf.mxu1  ;;  %v7896_v27 = vadd.f32 %v7895_v3, %v7882_v28 }
 0xe5f   : > { %v7938_v26 = vadd.f32 %v7937_v49, %v7923_v37  ;;  %v7925_v46 = vpop.f32.mrf.mxu0 }
 0xe64   : > { %v7909_v33 = vpop.f32.mrf.mxu3 }
 0xe65   : > { %v7897_v6 = vpop.f32.mrf.mxu2  ;;  %v7910_v1 = vadd.f32 %v7909_v33, %v7896_v27 }
 0xe66   : > { %v7898_v52 = vadd.f32 %v7897_v6, %v7884_v2  ;;  %v7939_v10 = vpop.f32.mrf.mxu1  ;;  %v10452_v2 = vld [vmem:[%s12836_s15 + $0x150] sm:$0xff] }
 0xe67   : > { %v7972_v50 = vmul.f32 %v7970_v19, %v7910_v1  ;;  %v7940_v60 = vadd.f32 %v7939_v10, %v7925_v46  ;;  %v10446_v1 = vld [vmem:[%s12836_s15 + $0x120] sm:$0xff]  ;;  %v10441_v10 = vld [vmem:[%s12836_s15 + $0xf8] sm:$0xff]  ;;  %v10440_v46 = vld [vmem:[%s12836_s15 + $0xf0] sm:$0xff] }
 0xe68   : > { %8284 = vmatpush.bf16.msrb.mxu0 %v10446_v1 }
 0xe69   : > { %v7978_v23 = vadd.f32 %v7976_v45, %v7972_v50  ;;  %v10465_v50 = vld [vmem:[%s12836_s15 + $0x1b8] sm:$0xff] }
 0xe6a   : > { %8662 = vmatpush.bf16.msra.mxu2 %v10465_v50 }
 0xe6b   : > { %v7982_v0 = vadd.f32 %v7978_v23, %v12695_v24  ;;  %v10463_v23 = vld [vmem:[%s12836_s15 + $0x1a8] sm:$0xff] }
 0xe6c   : > { %v7911_v44 = vpop.f32.mrf.mxu3 }
 0xe6d   : > { %v7951_v43 = vpop.f32.mrf.mxu2  ;;  %v7912_v14 = vadd.f32 %v7911_v44, %v7898_v52  ;;  %v10472_v52 = vld [vmem:[%s12836_s15 + $0x1f0] sm:$0xff] }
 0xe6e   : > { %v7952_v57 = vadd.f32 %v7951_v43, %v7938_v26  ;;  %v10453_v26 = vld [vmem:[%s12836_s15 + $0x158] sm:$0xff] }
 0xe6f   : > { %v7974_v41 = vmul.f32 %v7970_v19, %v7912_v14  ;;  %v10445_v19 = vld [vmem:[%s12836_s15 + $0x118] sm:$0xff]  ;;  %8298 = vmatpush.bf16.msrb.mxu1 %v10453_v26  ;;  %v10471_v14 = vld [vmem:[%s12836_s15 + $0x1e8] sm:$0xff] }
 0xe70   : > { %8285 = vmatpush.bf16.msrb.mxu0 %v10445_v19  ;;  %v10576_v19 = vld [vmem:[%s10998_s20] sm:$0xf0] }
 0xe71   : > { %v7980_v47 = vadd.f32 %v7976_v45, %v7974_v41  ;;  %v10444_v45 = vld [vmem:[%s12836_s15 + $0x110] sm:$0xff]  ;;  %v10431_v41 = vld [vmem:[%s12836_s15 + $0xa8] sm:$0xff]  ;;  %v8036_v26 = vperm.slane %v10576_v19, 7 }
 0xe73   : > { %v7984_v36 = vadd.f32 %v7980_v47, %v12725_v40  ;;  %8299 = vmatpush.bf16.msrb.mxu1 %v10452_v2  ;;  %v10468_v47 = vld [vmem:[%s12836_s15 + $0x1d0] sm:$0xff] }
 0xe74   : > { %v7965_v13 = vpop.f32.mrf.mxu3  ;;  %8286 = vmatpush.bf16.msrb.mxu0 %v10444_v45  ;;  %v10577_v45 = vld [vmem:[%s10998_s20 + $0x8] sm:$0xf0]  ;;  %s8856_s20 = sshll.u32 %s10766_s18, 3 }
 0xe75   : > { %v7966_v48 = vadd.f32 %v7965_v13, %v7952_v57  ;;  %v7953_v4 = vpop.f32.mrf.mxu2  ;;  %v10473_v57 = vld [vmem:[%s12836_s15 + $0x1f8] sm:$0xff]  ;;  %v10464_v13 = vld [vmem:[%s12836_s15 + $0x1b0] sm:$0xff]  ;;  %v8037_v2 = vperm.slane %v10577_v45, 7  ;;  %s465_s26 = scalar_lea.vmem %s12984_s8, %s8856_s20 }
 0xe76   : > { %v7954_v5 = vadd.f32 %v7953_v4, %v7940_v60  ;;  %8675 = vmatpush.bf16.msra.mxu3 %v10473_v57  ;;  %8663 = vmatpush.bf16.msra.mxu2 %v10464_v13  ;;  %v10433_v4 = vld [vmem:[%s12836_s15 + $0xb8] sm:$0xff]  ;;  %v10462_v60 = vld [vmem:[%s12836_s15 + $0x1a0] sm:$0xff] }
 0xe77   : > { %v7973_v11 = vmul.f32 %v7971_v39, %v7966_v48  ;;  %v10442_v48 = vld [vmem:[%s12836_s15 + $0x100] sm:$0xff] }
 0xe78   : > { %8287 = vmatpush.bf16.msrb.mxu0 %v10443_v17  ;;  %v8042_v17 = vperm.slane %v12861_v63, 7 }
 0xe79   : > { %v7979_v25 = vadd.f32 %v7977_v34, %v7973_v11  ;;  %v10432_v11 = vld [vmem:[%s12836_s15 + $0xb0] sm:$0xff] }
 0xe7a   : > { %8676 = vmatpush.bf16.msra.mxu3 %v10472_v52  ;;  %8664 = vmatpush.bf16.msra.mxu2 %v10463_v23 }
 0xe7b   : > { %v7983_v21 = vadd.f32 %v7979_v25, %v12699_v8  ;;  %v10470_v25 = vld [vmem:[%s12836_s15 + $0x1e0] sm:$0xff] }
 0xe7c   : > { %v7967_v51 = vpop.f32.mrf.mxu3  ;;  %8288 = vmatpush.bf16.msrb.mxu0 %v10442_v48 }
 0xe7d   : > { %v7968_v53 = vadd.f32 %v7967_v51, %v7954_v5  ;;  %v12871_v56 = vpop.f32.mrf.mxu2  ;;  %v7986_v38 = vadd.f32 %v7983_v21, %v7982_v0  ;;  %v10439_v5 = vld [vmem:[%s12836_s15 + $0xe8] sm:$0xff]  ;;  %v10430_v51 = vld [vmem:[%s12836_s15 + $0xa0] sm:$0xff] }
 0xe7e   : > { %8677 = vmatpush.bf16.msra.mxu3 %v10471_v14  ;;  %8665 = vmatpush.bf16.msra.mxu2 %v10462_v60 }
 0xe7f   : > { %v7975_v31 = vmul.f32 %v7971_v39, %v7968_v53  ;;  %7987 = vadd.xlane.f32.xlu2 %v7986_v38  ;;  %v10451_v39 = vld [vmem:[%s12836_s15 + $0x148] sm:$0xff]  ;;  %v10438_v53 = vld [vmem:[%s12836_s15 + $0xe0] sm:$0xff]  ;;  %v10460_v38 = vld [vmem:[%s12836_s15 + $0x190] sm:$0xff] }
 0xe80   : > { %8300 = vmatpush.bf16.msrb.mxu1 %v10451_v39  ;;  %8533 = vmatpush.bf16.msra.mxu0 %v10433_v4  ;;  %v8043_v39 = vperm.slane %v12866_v9, 7 }
 0xe81   : > { %v7981_v62 = vadd.f32 %v7977_v34, %v7975_v31  ;;  %v10450_v34 = vld [vmem:[%s12836_s15 + $0x140] sm:$0xff] }
 0xe82   : > { %8678 = vmatpush.bf16.msra.mxu3 %v10470_v25 }
 0xe83   : > { %v7985_v24 = vadd.f32 %v7981_v62, %v12729_v55 }
 0xe84   : > { %v12875_v8 = vpop.f32.mrf.mxu3  ;;  %8301 = vmatpush.bf16.msrb.mxu1 %v10450_v34  ;;  %8534 = vmatpush.bf16.msra.mxu0 %v10432_v11 }
 0xe85   : > { %v8418_v42 = vpop.f32.mrf.mxu2  ;;  %v7989_v54 = vadd.f32 %v7985_v24, %v7984_v36 }
 0xe86   : > { %v10459_v42 = vld [vmem:[%s12836_s15 + $0x188] sm:$0xff] }
 0xe87   : > { %7990 = vadd.xlane.f32.xlu0 %v7989_v54 }
 0xe88   : > { %8546 = vmatpush.bf16.msra.mxu1 %v10441_v10  ;;  %8535 = vmatpush.bf16.msra.mxu0 %v10431_v41 }
 0xe8c   : > { %v8431_v30 = vpop.f32.mrf.mxu3  ;;  %8547 = vmatpush.bf16.msra.mxu1 %v10440_v46  ;;  %8536 = vmatpush.bf16.msra.mxu0 %v10430_v51 }
 0xe8d   : > { %v10467_v30 = vld [vmem:[%s12836_s15 + $0x1c8] sm:$0xff] }
 0xe90   : > { %8548 = vmatpush.bf16.msra.mxu1 %v10439_v5 }
 0xe94   : > { %8549 = vmatpush.bf16.msra.mxu1 %v10438_v53 }
 0xef2   : > { %v7988_v40 = vpop.xlane.xlu2 %7987 }
 0xef3   : > { %v7992_v55 = vmul.f32 %v7988_v40, %v11135_v20  ;;  %v10427_v40 = vld [vmem:[%s12836_s15 + $0x88] sm:$0xff] }
 0xef5   : > { %v12884_v35 = vsub.f32 %v7982_v0, %v7992_v55  ;;  %v12886_v3 = vsub.f32 %v7983_v21, %v7992_v55  ;;  %v10461_v0 = vld [vmem:[%s12836_s15 + $0x198] sm:$0xff]  ;;  %v10435_v55 = vld [vmem:[%s12836_s15 + $0xc8] sm:$0xff] }
 0xef6   : > { %v10469_v21 = vld [vmem:[%s12836_s15 + $0x1d8] sm:$0xff]  ;;  %8666 = vmatpush.bf16.msra.mxu2 %v10461_v0 }
 0xef7   : > { %v7998_v61 = vmul.f32 %v12884_v35, %v12884_v35  ;;  %v7999_v16 = vmul.f32 %v12886_v3, %v12886_v3  ;;  %8679 = vmatpush.bf16.msra.mxu3 %v10469_v21 }
 0xef9   : > { %v8002_v33 = vadd.f32 %v7999_v16, %v7998_v61 }
 0xefa   : > { %v7991_v6 = vpop.xlane.xlu0 %7990  ;;  %8667 = vmatpush.bf16.msra.mxu2 %v10460_v38 }
 0xefb   : > { %v7993_v28 = vmul.f32 %v7991_v6, %v11135_v20  ;;  %8003 = vadd.xlane.f32.xlu1 %v8002_v33  ;;  %8680 = vmatpush.bf16.msra.mxu3 %v10468_v47  ;;  %v10426_v6 = vld [vmem:[%s12836_s15 + $0x80] sm:$0xff] }
 0xefd   : > { %v12893_v49 = vsub.f32 %v7984_v36, %v7993_v28  ;;  %v12895_v44 = vsub.f32 %v7985_v24, %v7993_v28  ;;  %v10429_v36 = vld [vmem:[%s12836_s15 + $0x98] sm:$0xff]  ;;  %v10434_v28 = vld [vmem:[%s12836_s15 + $0xc0] sm:$0xff] }
 0xefe   : > { %v10437_v24 = vld [vmem:[%s12836_s15 + $0xd8] sm:$0xff]  ;;  %8537 = vmatpush.bf16.msra.mxu0 %v10429_v36  ;;  %8668 = vmatpush.bf16.msra.mxu2 %v10459_v42 }
 0xeff   : > { %v8000_v27 = vmul.f32 %v12893_v49, %v12893_v49  ;;  %v8001_v43 = vmul.f32 %v12895_v44, %v12895_v44  ;;  %8550 = vmatpush.bf16.msra.mxu1 %v10437_v24  ;;  %8681 = vmatpush.bf16.msra.mxu3 %v10467_v30 }
 0xf01   : > { %v8005_v37 = vadd.f32 %v8001_v43, %v8000_v27 }
 0xf02   : > { %8538 = vmatpush.bf16.msra.mxu0 %v10428_v29  ;;  %8669 = vmatpush.bf16.msra.mxu2 %v10458_v7 }
 0xf03   : > { %8006 = vadd.xlane.f32.xlu2 %v8005_v37  ;;  %8551 = vmatpush.bf16.msra.mxu1 %v10436_v58 }
 0xf04   : > { %8682 = vmatpush.bf16.msra.mxu3 %v10466_v32 }
 0xf06   : > { %8539 = vmatpush.bf16.msra.mxu0 %v10427_v40 }
 0xf07   : > { %8552 = vmatpush.bf16.msra.mxu1 %v10435_v55 }
 0xf0a   : > { %8540 = vmatpush.bf16.msra.mxu0 %v10426_v6 }
 0xf0b   : > { %8553 = vmatpush.bf16.msra.mxu1 %v10434_v28 }
 0xf6e   : > { %v8004_v31 = vpop.xlane.xlu1 %8003 }
 0xf6f   : > { %v8008_v62 = vmul.f32 %v8004_v31, %v11135_v20 }
 0xf71   : > { %v8010_v54 = vadd.f32 1e-05, %v8008_v62 }
 0xf73   : > { %10552 = vrsqrt.f32 %v8010_v54  ;;  %vm8018_vm8 = vweird.f32 %v8010_v54 }
 0xf76   : > { %v8007_v18 = vpop.xlane.xlu2 %8006 }
 0xf77   : > { %v8009_v22 = vmul.f32 %v8007_v18, %v11135_v20 }
 0xf79   : > { %v10553_v61 = vpop.eup %10552  ;;  %v8011_v16 = vadd.f32 1e-05, %v8009_v22 }
 0xf7a   : > { %v8013_v33 = vmul.f32 %v10553_v61, %v8010_v54  ;;  %vm8019_vm7 = vweird.f32 %v10553_v61 }
 0xf7b   : > { %10554 = vrsqrt.f32 %v8011_v16  ;;  %vm8020_vm9 = vmor %vm8018_vm8, %vm8019_vm7  ;;  %vm8028_vm11 = vweird.f32 %v8011_v16 }
 0xf7c   : > { %v8014_v27 = vmul.f32 %v10553_v61, %v8013_v33 }
 0xf7e   : > { %v8015_v43 = vmul.f32 0.5, %v8014_v27 }
 0xf80   : > { %v8016_v37 = vsub.f32 1.5, %v8015_v43 }
 0xf81   : > { %v10555_v20 = vpop.eup %10554 }
 0xf82   : > { %v8017_v1 = vmul.f32 %v10553_v61, %v8016_v37  ;;  %v8023_v15 = vmul.f32 %v10555_v20, %v8011_v16  ;;  %vm8029_vm10 = vweird.f32 %v10555_v20 }
 0xf83   : > { %vm8030_vm12 = vmor %vm8028_vm11, %vm8029_vm10 }
 0xf84   : > { %v8021_v50 = vsel %vm8020_vm9, %v10553_v61, %v8017_v1  ;;  %v8024_v57 = vmul.f32 %v10555_v20, %v8023_v15 }
 0xf85   : > { %v8032_v13 = vmul.f32 %v8021_v50, %v12884_v35  ;;  %v8033_v52 = vmul.f32 %v8021_v50, %v12886_v3 }
 0xf86   : > { %v8025_v48 = vmul.f32 0.5, %v8024_v57 }
 0xf87   : > { %v8038_v34 = vmul.f32 %v8036_v26, %v8032_v13  ;;  %v8039_v4 = vmul.f32 %v8037_v2, %v8033_v52 }
 0xf88   : > { %v8026_v10 = vsub.f32 1.5, %v8025_v48 }
 0xf89   : > { %v8044_v23 = vadd.f32 %v8042_v17, %v8038_v34  ;;  %v8045_v14 = vadd.f32 %v8043_v39, %v8039_v4 }
 0xf8a   : > { %v8027_v11 = vmul.f32 %v10555_v20, %v8026_v10 }
 0xf8b   : > { %v8048_v46 = vpack.c.bf16 %v8045_v14, %v8044_v23 }
 0xf8c   : > { %v8031_v60 = vsel %vm8030_vm12, %v10555_v20, %v8027_v11 }
 0xf8d   : > { %v8034_v63 = vmul.f32 %v8031_v60, %v12893_v49  ;;  %v8035_v9 = vmul.f32 %v8031_v60, %v12895_v44  ;;  %v8179_v25 = vunpack.c.l.b16 %v8048_v46  ;;  %v8180_v35 = vunpack.c.h.b16 %v8048_v46 }
 0xf8e   : > { %v8433_v49 = vpack.c.b16 %v12382_v12, %v12382_v12  ;;  %v8434_v44 = vpack.c.b16 %v12386_v59, %v12386_v59 }
 0xf8f   : > { %v8040_v41 = vmul.f32 %v8036_v26, %v8034_v63  ;;  %v8041_v3 = vmul.f32 %v8037_v2, %v8035_v9  ;;  %v8181_v5 = vpack.c.b16 %v8179_v25, %v8179_v25  ;;  %v8182_v0 = vpack.c.b16 %v8180_v35, %v8180_v35 }
 0xf91   : > { %v8046_v21 = vadd.f32 %v8042_v17, %v8040_v41  ;;  %v8047_v51 = vadd.f32 %v8043_v39, %v8041_v3  ;;  %8289 = vmatmul.bf16.vlgmr.msrb.gmra.mxu0 %v8181_v5  ;;  %8302 = vmatmul.bf16.vlgmr.msrb.gmra.mxu1 %v8182_v0 }
 0xf93   : > { %v8049_v53 = vpack.c.bf16 %v8047_v51, %v8046_v21 }
 0xf95   : > { %v8560_v38 = vunpack.c.l.b16 %v8049_v53  ;;  %v8561_v47 = vunpack.c.h.b16 %v8049_v53 }
 0xf97   : > { %v8562_v31 = vpack.c.b16 %v8560_v38, %v8560_v38  ;;  %v8563_v62 = vpack.c.b16 %v8561_v47, %v8561_v47 }
 0xf99   : > { %8670 = vmatmul.bf16.vlgmr.msra.gmra.mxu2 %v8562_v31  ;;  %8683 = vmatmul.bf16.vlgmr.msra.gmra.mxu3 %v8563_v62 }
 0xfa1   : > { %8541 = vmatmul.bf16.vlgmr.msra.gmra.mxu0 %v8433_v49  ;;  %8554 = vmatmul.bf16.vlgmr.msra.gmra.mxu1 %v8434_v44 }
0x100e   : > { %v8290_v36 = vpop.f32.mrf.mxu0  ;;  %v8303_v24 = vpop.f32.mrf.mxu1 }
0x100f   : > { %v8304_v30 = vadd.f32 %v8303_v24, %v8290_v36 }
0x1011   : > { %v8417_v29 = vadd.f32 %v12871_v56, %v8304_v30 }
0x1013   : > { %v8430_v22 = vadd.f32 %v12875_v8, %v8417_v29 }
0x1016   : > { %v8292_v42 = vpop.f32.mrf.mxu0  ;;  %v8305_v54 = vpop.f32.mrf.mxu1 }
0x101c   : > { %v8671_v58 = vpop.f32.mrf.mxu2  ;;  %v8684_v7 = vpop.f32.mrf.mxu3 }
0x101d   : > { %v8685_v40 = vadd.f32 %v8684_v7, %v8671_v58 }
0x101e   : > { %v8542_v32 = vpop.f32.mrf.mxu0  ;;  %v8555_v18 = vpop.f32.mrf.mxu1 }
0x101f   : > { %v8556_v12 = vadd.f32 %v8555_v18, %v8542_v32 }
0x1021   : > { %v8688_v55 = vadd.f32 %v8556_v12, %v8430_v22 }
0x1023   : > { %v8689_v59 = vadd.f32 %v8688_v55, %v8685_v40 }
0x1024   : > { %v8673_v61 = vpop.f32.mrf.mxu2  ;;  %v8686_v16 = vpop.f32.mrf.mxu3 }
0x1025   : > { %8690 = vst [vmem:[%s465_s26] sm:$0xff] %v8689_v59 }
0x1026   : > { %v8544_v33 = vpop.f32.mrf.mxu0  ;;  %v8557_v56 = vpop.f32.mrf.mxu1 }
0x1027 PF: > { %p18_p5 = scmp.ge.s32.totalorder %s10714_s10, 4   ;;  %s12987_s27 = smov %s10634_s28 }
0x1028   : > { %s12988_s28 = smov %s10638_s29  ;;  %s12989_s29 = smov %s10724_s13 }
0x1029   : > { %s12990_s30 = smov %s10714_s10  ;;  %20 = sbr.rel (!%p18_p5) target bundleno = 3 (0x3), region = 118 }
0x102e   :  { %8710 = vsyncpa [#allocation3], 1 }
0x102f   :  { %8712 = vsyncpa [#allocation3 + $0x1], 1 }

</bundles_post_ra>
